<compile_context>
chip_gen: v7x
topology: tpu7x:2x2x1
jax: 0.10.0
libtpu: 0.0.40
codegen_flags: <defaults>
</compile_context>

<pallas_src>
import functools

import numpy as np
import jax
import jax.numpy as jnp
from jax.experimental import pallas as pl
from jax.experimental.pallas import tpu as pltpu


# ---------------------------------------------------------------------------
# Fused kernel
# ---------------------------------------------------------------------------
def _lenet_fused_kernel(x_ref, w1_ref, b1_ref, w2_ref, b2_ref,
                        wf1_ref, bf1_ref, wf2_ref, bf2_ref, wf3_ref, bf3_ref,
                        o_ref, *, batch):
    """Whole-network forward.

    x_ref  : (batch*32, 128) bf16, row = (h%4)*(batch*8) + n*8 + (h//4),
             lane = w*3 + c   (96 used, zero padded)
    w1_ref : (1280, 128) bf16, block k=dj*5+ki:  [w*3+c, pw*6+oc] = w1[oc,c,ki,kj]
             with kj = w - 2*pw - dj (block-Toeplitz over the W axis)
    w2_ref : (1280, 128) bf16, block k=dj*5+ki:  [pw*6+c1, qw*16+oc2]
    wf1_ref: (640, 128)  bf16, block qh:         [qw*16+oc2, j] = fc1_w[j, oc2*25+qh*5+qw]
    wf2_ref, wf3_ref: (128,128) bf16 pre-transposed, zero padded
    b*_ref : (1,128) f32 biases, tiled/padded to the matching lane layout
    o_ref  : (batch, 128) f32, lanes 0..9 = logits
    """
    f32, bf16 = jnp.float32, jnp.bfloat16

    b1 = b1_ref[...]
    b2 = b2_ref[...]
    bfc1 = bf1_ref[...]
    bfc2 = bf2_ref[...]
    bfc3 = bf3_ref[...]
    wfc2 = wf2_ref[...]
    wfc3 = wf3_ref[...]

    def w1_blk(dj, ki):
        k = dj * 5 + ki
        return w1_ref[k * 128:(k + 1) * 128, :]

    def w2_blk(dj, ki):
        k = dj * 5 + ki
        return w2_ref[k * 128:(k + 1) * 128, :]

    for n in range(batch):
        # ---- conv1 + ReLU + 2x2 maxpool (pool folded into 4 shifted accums) --
        # p1[pe][a, pw*6+oc] = pool1[n, oc, ph=2a+pe, pw],   a in 0..6
        p1 = []
        for pe in range(2):
            zmax = None
            for di in range(2):
                for dj in range(2):
                    acc = jnp.zeros((7, 128), f32)
                    for ki in range(5):
                        s = 2 * pe + di + ki            # input row h = 4a + s
                        row0 = (s % 4) * (batch * 8) + n * 8 + (s // 4)
                        lhs = x_ref[row0:row0 + 7, :]   # (7, 128) bf16
                        acc = acc + jnp.dot(lhs, w1_blk(dj, ki),
                                            preferred_element_type=f32)
                    zmax = acc if zmax is None else jnp.maximum(zmax, acc)
            p1.append(jnp.maximum(zmax + b1, 0.0).astype(bf16))   # (7, 128)

        # ---- conv2 + ReLU + 2x2 maxpool --------------------------------------
        # qact[qh, qw*16+oc2] = pool2[n, oc2, qh, qw]
        qmax = None
        for di in range(2):
            for dj in range(2):
                acc = jnp.zeros((5, 128), f32)
                for ki in range(5):
                    s = di + ki                         # source ph = 2*qh + s
                    lhs = p1[s % 2][(s // 2):(s // 2) + 5, :]   # (5, 128)
                    acc = acc + jnp.dot(lhs, w2_blk(dj, ki),
                                        preferred_element_type=f32)
                qmax = acc if qmax is None else jnp.maximum(qmax, acc)
        qact = jnp.maximum(qmax + b2, 0.0).astype(bf16)           # (5, 128)

        # ---- fc1 (+ReLU): contract over (qh rows) x (qw,oc2 lanes) -----------
        acc = jnp.zeros((1, 128), f32)
        for qh in range(5):
            acc = acc + jnp.dot(qact[qh:qh + 1, :],
                                wf1_ref[qh * 128:(qh + 1) * 128, :],
                                preferred_element_type=f32)
        r1 = jnp.maximum(acc + bfc1, 0.0).astype(bf16)            # (1, 128)

        # ---- fc2 (+ReLU), fc3 ------------------------------------------------
        r2 = jnp.maximum(jnp.dot(r1, wfc2, preferred_element_type=f32) + bfc2,
                         0.0).astype(bf16)
        r3 = jnp.dot(r2, wfc3, preferred_element_type=f32) + bfc3  # (1, 128)

        o_ref[n:n + 1, :] = r3


# ---------------------------------------------------------------------------
# One-time input layout: NCHW -> (h%4, n, h//4) rows x (w*3+c) lanes, bf16
# ---------------------------------------------------------------------------
def _prep_input(x):
    n = x.shape[0]
    xt = jnp.transpose(x, (0, 2, 3, 1))        # (N, 32, 32, 3)  NHWC
    xt = xt.reshape(n, 8, 4, 32 * 3)           # h = 4*u + q -> (N, u, q, 96)
    xt = jnp.transpose(xt, (2, 0, 1, 3))       # (q, N, u, 96)
    xt = xt.reshape(4 * n * 8, 32 * 3)         # row = q*(N*8) + n*8 + u
    xt = jnp.pad(xt, ((0, 0), (0, 128 - 96)))  # lane-pad 96 -> 128
    return xt.astype(jnp.bfloat16)


# ---------------------------------------------------------------------------
# Forward pass: one pallas_call
# ---------------------------------------------------------------------------
def _net_forward_impl(packed, x):
    batch = x.shape[0]
    xk = _prep_input(x)
    kernel = functools.partial(_lenet_fused_kernel, batch=batch)

    full2d = lambda i: (0, 0)
    out = pl.pallas_call(
        kernel,
        out_shape=jax.ShapeDtypeStruct((batch, 128), jnp.float32),
        grid=(1,),
        in_specs=[
            pl.BlockSpec((batch * 32, 128), full2d),   # x
            pl.BlockSpec((1280, 128), full2d),         # conv1 weights (Toeplitz)
            pl.BlockSpec((1, 128), full2d),            # conv1 bias row
            pl.BlockSpec((1280, 128), full2d),         # conv2 weights (Toeplitz)
            pl.BlockSpec((1, 128), full2d),            # conv2 bias row
            pl.BlockSpec((640, 128), full2d),          # fc1 weights (per qh)
            pl.BlockSpec((1, 128), full2d),            # fc1 bias
            pl.BlockSpec((128, 128), full2d),          # fc2 weights
            pl.BlockSpec((1, 128), full2d),            # fc2 bias
            pl.BlockSpec((128, 128), full2d),          # fc3 weights
            pl.BlockSpec((1, 128), full2d),            # fc3 bias
        ],
        out_specs=pl.BlockSpec((batch, 128), full2d),
        compiler_params=pltpu.CompilerParams(
            dimension_semantics=("arbitrary",)),
    )(xk, packed["w1"], packed["b1"], packed["w2"], packed["b2"],
      packed["wf1"], packed["bf1"], packed["wf2"], packed["bf2"],
      packed["wf3"], packed["bf3"])
    return out[:, :10]


net_forward = jax.jit(_net_forward_impl)


# ---------------------------------------------------------------------------
# Parameters: PyTorch-style init + one-time packing into kernel layouts
# ---------------------------------------------------------------------------
def init_params(seed=0):
    key = jax.random.PRNGKey(seed)
    ks = jax.random.split(key, 10)

    def u(k, shape, fan_in):
        bound = 1.0 / float(fan_in) ** 0.5
        return jax.random.uniform(k, shape, jnp.float32, -bound, bound)

    p = {}
    p["conv1_w"] = u(ks[0], (6, 3, 5, 5), 3 * 5 * 5)
    p["conv1_b"] = u(ks[1], (6,), 3 * 5 * 5)
    p["conv2_w"] = u(ks[2], (16, 6, 5, 5), 6 * 5 * 5)
    p["conv2_b"] = u(ks[3], (16,), 6 * 5 * 5)
    p["fc1_w"] = u(ks[4], (120, 400), 400)
    p["fc1_b"] = u(ks[5], (120,), 400)
    p["fc2_w"] = u(ks[6], (84, 120), 120)
    p["fc2_b"] = u(ks[7], (84,), 120)
    p["fc3_w"] = u(ks[8], (10, 84), 84)
    p["fc3_b"] = u(ks[9], (10,), 84)
    return p


def pack_params(p):
    """One-time host-side repack of the PyTorch-layout params into padded,
    pre-transposed, bf16 kernel layouts (hoisted out of the forward pass)."""
    w1 = np.asarray(p["conv1_w"], np.float32)
    b1 = np.asarray(p["conv1_b"], np.float32)
    w2 = np.asarray(p["conv2_w"], np.float32)
    b2 = np.asarray(p["conv2_b"], np.float32)
    f1w = np.asarray(p["fc1_w"], np.float32)
    f1b = np.asarray(p["fc1_b"], np.float32)
    f2w = np.asarray(p["fc2_w"], np.float32)
    f2b = np.asarray(p["fc2_b"], np.float32)
    f3w = np.asarray(p["fc3_w"], np.float32)
    f3b = np.asarray(p["fc3_b"], np.float32)

    # conv1 block-Toeplitz: W1T[dj, ki, w*3+c, pw*6+oc] = w1[oc,c,ki, w-2pw-dj]
    W1T = np.zeros((2, 5, 128, 128), np.float32)
    dj, ki, pw, oc, kj, c = np.meshgrid(
        np.arange(2), np.arange(5), np.arange(14), np.arange(6),
        np.arange(5), np.arange(3), indexing="ij")
    W1T[dj, ki, (2 * pw + dj + kj) * 3 + c, pw * 6 + oc] = w1[oc, c, ki, kj]
    W1T = W1T.reshape(10 * 128, 128)

    b1row = np.zeros((1, 128), np.float32)
    for pw_ in range(14):
        b1row[0, pw_ * 6:(pw_ + 1) * 6] = b1

    # conv2 block-Toeplitz: W2T[dj, ki, pw*6+c1, qw*16+oc2]
    W2T = np.zeros((2, 5, 128, 128), np.float32)
    dj, ki, qw, oc, kj, c = np.meshgrid(
        np.arange(2), np.arange(5), np.arange(5), np.arange(16),
        np.arange(5), np.arange(6), indexing="ij")
    W2T[dj, ki, (2 * qw + dj + kj) * 6 + c, qw * 16 + oc] = w2[oc, c, ki, kj]
    W2T = W2T.reshape(10 * 128, 128)

    b2row = np.zeros((1, 128), np.float32)
    for qw_ in range(5):
        b2row[0, qw_ * 16:(qw_ + 1) * 16] = b2

    # fc1: Wfc1[qh, qw*16+oc2, j] = fc1_w[j, oc2*25 + qh*5 + qw]
    # (also fixes up the NHWC vs PyTorch NCHW flatten ordering of the 400 dim)
    Wfc1 = np.zeros((5, 128, 128), np.float32)
    qh, qw, oc, j = np.meshgrid(np.arange(5), np.arange(5), np.arange(16),
                                np.arange(120), indexing="ij")
    Wfc1[qh, qw * 16 + oc, j] = f1w[j, oc * 25 + qh * 5 + qw]
    Wfc1 = Wfc1.reshape(5 * 128, 128)

    bfc1 = np.zeros((1, 128), np.float32); bfc1[0, :120] = f1b
    Wfc2 = np.zeros((128, 128), np.float32); Wfc2[:120, :84] = f2w.T
    bfc2 = np.zeros((1, 128), np.float32); bfc2[0, :84] = f2b
    Wfc3 = np.zeros((128, 128), np.float32); Wfc3[:84, :10] = f3w.T
    bfc3 = np.zeros((1, 128), np.float32); bfc3[0, :10] = f3b

    bf16 = jnp.bfloat16
    return {
        "w1": jnp.asarray(W1T, bf16), "b1": jnp.asarray(b1row),
        "w2": jnp.asarray(W2T, bf16), "b2": jnp.asarray(b2row),
        "wf1": jnp.asarray(Wfc1, bf16), "bf1": jnp.asarray(bfc1),
        "wf2": jnp.asarray(Wfc2, bf16), "bf2": jnp.asarray(bfc2),
        "wf3": jnp.asarray(Wfc3, bf16), "bf3": jnp.asarray(bfc3),
    }


# ---------------------------------------------------------------------------
# Pure-JAX reference (original param layout) for a correctness sanity check.
# ---------------------------------------------------------------------------
def net_forward_ref(p, x):
    def conv(x, w, b):
        y = jax.lax.conv_general_dilated(
            x, w, window_strides=(1, 1), padding="VALID",
            dimension_numbers=("NCHW", "OIHW", "NCHW"))
        return jax.nn.relu(y + b[None, :, None, None])

    def pool(x):
        return jax.lax.reduce_window(
            x, -jnp.inf, jax.lax.max, (1, 1, 2, 2), (1, 1, 2, 2), "VALID")

    x = pool(conv(x, p["conv1_w"], p["conv1_b"]))
    x = pool(conv(x, p["conv2_w"], p["conv2_b"]))
    x = x.reshape(-1, 400)
    x = jax.nn.relu(x @ p["fc1_w"].T + p["fc1_b"])
    x = jax.nn.relu(x @ p["fc2_w"].T + p["fc2_b"])
    return x @ p["fc3_w"].T + p["fc3_b"]


if __name__ == "__main__":
    params = init_params(0)
    packed = pack_params(params)
    x = jax.random.normal(jax.random.PRNGKey(0), (2, 3, 32, 32), jnp.float32)

    out = jax.block_until_ready(net_forward(packed, x))
    ref = jax.block_until_ready(net_forward_ref(params, x))

    assert out.shape == (2, 10), out.shape
    # bf16 MXU operands / f32 accumulation -> loose-ish tolerance.
    assert jnp.allclose(out, ref, atol=3e-2, rtol=3e-2), (out, ref)
    print("KERNEL_OK")
</pallas_src>

<mosaic_0001>
module attributes {stable_mosaic.version = 11 : i64} {
  func.func @_lenet_fused_kernel(%arg0: i32, %arg1: memref<64x128xbf16, #tpu.memory_space<vmem>>, %arg2: memref<1280x128xbf16, #tpu.memory_space<vmem>>, %arg3: memref<1x128xf32, #tpu.memory_space<vmem>>, %arg4: memref<1280x128xbf16, #tpu.memory_space<vmem>>, %arg5: memref<1x128xf32, #tpu.memory_space<vmem>>, %arg6: memref<640x128xbf16, #tpu.memory_space<vmem>>, %arg7: memref<1x128xf32, #tpu.memory_space<vmem>>, %arg8: memref<128x128xbf16, #tpu.memory_space<vmem>>, %arg9: memref<1x128xf32, #tpu.memory_space<vmem>>, %arg10: memref<128x128xbf16, #tpu.memory_space<vmem>>, %arg11: memref<1x128xf32, #tpu.memory_space<vmem>>, %arg12: memref<2x128xf32, #tpu.memory_space<vmem>>) attributes {dimension_semantics = [#tpu.dimension_semantics<arbitrary>], iteration_bounds = array<i64: 1>, scalar_prefetch = 0 : i64, scratch_operands = 0 : i64, tpu.core_type = #tpu.core_type<tc>, window_params = [{pipeline_mode = #tpu.pipeline_mode<synchronous>, transform_indices = @transform_0, window_bounds = array<i64: 64, 128>}, {pipeline_mode = #tpu.pipeline_mode<synchronous>, transform_indices = @transform_1, window_bounds = array<i64: 1280, 128>}, {pipeline_mode = #tpu.pipeline_mode<synchronous>, transform_indices = @transform_2, window_bounds = array<i64: 1, 128>}, {pipeline_mode = #tpu.pipeline_mode<synchronous>, transform_indices = @transform_3, window_bounds = array<i64: 1280, 128>}, {pipeline_mode = #tpu.pipeline_mode<synchronous>, transform_indices = @transform_4, window_bounds = array<i64: 1, 128>}, {pipeline_mode = #tpu.pipeline_mode<synchronous>, transform_indices = @transform_5, window_bounds = array<i64: 640, 128>}, {pipeline_mode = #tpu.pipeline_mode<synchronous>, transform_indices = @transform_6, window_bounds = array<i64: 1, 128>}, {pipeline_mode = #tpu.pipeline_mode<synchronous>, transform_indices = @transform_7, window_bounds = array<i64: 128, 128>}, {pipeline_mode = #tpu.pipeline_mode<synchronous>, transform_indices = @transform_8, window_bounds = array<i64: 1, 128>}, {pipeline_mode = #tpu.pipeline_mode<synchronous>, transform_indices = @transform_9, window_bounds = array<i64: 128, 128>}, {pipeline_mode = #tpu.pipeline_mode<synchronous>, transform_indices = @transform_10, window_bounds = array<i64: 1, 128>}, {pipeline_mode = #tpu.pipeline_mode<synchronous>, transform_indices = @transform_11, window_bounds = array<i64: 2, 128>}]} {
    %c0 = arith.constant 0 : index
    %c0_0 = arith.constant 0 : index
    %0 = vector.load %arg3[%c0, %c0_0] : memref<1x128xf32, #tpu.memory_space<vmem>>, vector<1x128xf32>
    %c0_1 = arith.constant 0 : index
    %c0_2 = arith.constant 0 : index
    %1 = vector.load %arg5[%c0_1, %c0_2] : memref<1x128xf32, #tpu.memory_space<vmem>>, vector<1x128xf32>
    %c0_3 = arith.constant 0 : index
    %c0_4 = arith.constant 0 : index
    %2 = vector.load %arg7[%c0_3, %c0_4] : memref<1x128xf32, #tpu.memory_space<vmem>>, vector<1x128xf32>
    %c0_5 = arith.constant 0 : index
    %c0_6 = arith.constant 0 : index
    %3 = vector.load %arg9[%c0_5, %c0_6] : memref<1x128xf32, #tpu.memory_space<vmem>>, vector<1x128xf32>
    %c0_7 = arith.constant 0 : index
    %c0_8 = arith.constant 0 : index
    %4 = vector.load %arg11[%c0_7, %c0_8] : memref<1x128xf32, #tpu.memory_space<vmem>>, vector<1x128xf32>
    %c0_9 = arith.constant 0 : index
    %c0_10 = arith.constant 0 : index
    %5 = vector.load %arg8[%c0_9, %c0_10] : memref<128x128xbf16, #tpu.memory_space<vmem>>, vector<128x128xbf16>
    %c0_11 = arith.constant 0 : index
    %c0_12 = arith.constant 0 : index
    %6 = vector.load %arg10[%c0_11, %c0_12] : memref<128x128xbf16, #tpu.memory_space<vmem>>, vector<128x128xbf16>
    %cst = arith.constant 0.000000e+00 : f32
    %7 = vector.broadcast %cst : f32 to vector<7x128xf32>
    %c0_13 = arith.constant 0 : index
    %c0_14 = arith.constant 0 : index
    %8 = vector.load %arg1[%c0_13, %c0_14] : memref<64x128xbf16, #tpu.memory_space<vmem>>, vector<7x128xbf16>
    %c0_15 = arith.constant 0 : index
    %c0_16 = arith.constant 0 : index
    %9 = vector.load %arg2[%c0_15, %c0_16] : memref<1280x128xbf16, #tpu.memory_space<vmem>>, vector<128x128xbf16>
    %cst_17 = arith.constant dense<0.000000e+00> : vector<7x128xf32>
    %10 = tpu.matmul %8, %9, %cst_17 {dimension_numbers = #tpu.dot_dimension_numbers<[1], [0], [0], [1], [0, 0, 1, 1], [], []>} : vector<7x128xbf16>, vector<128x128xbf16>, vector<7x128xf32> -> vector<7x128xf32>
    %11 = arith.addf %7, %10 : vector<7x128xf32>
    %c16 = arith.constant 16 : index
    %c0_18 = arith.constant 0 : index
    %12 = vector.load %arg1[%c16, %c0_18] : memref<64x128xbf16, #tpu.memory_space<vmem>>, vector<7x128xbf16>
    %c128 = arith.constant 128 : index
    %c0_19 = arith.constant 0 : index
    %13 = vector.load %arg2[%c128, %c0_19] : memref<1280x128xbf16, #tpu.memory_space<vmem>>, vector<128x128xbf16>
    %cst_20 = arith.constant dense<0.000000e+00> : vector<7x128xf32>
    %14 = tpu.matmul %12, %13, %cst_20 {dimension_numbers = #tpu.dot_dimension_numbers<[1], [0], [0], [1], [0, 0, 1, 1], [], []>} : vector<7x128xbf16>, vector<128x128xbf16>, vector<7x128xf32> -> vector<7x128xf32>
    %15 = arith.addf %11, %14 : vector<7x128xf32>
    %c32 = arith.constant 32 : index
    %c0_21 = arith.constant 0 : index
    %16 = vector.load %arg1[%c32, %c0_21] : memref<64x128xbf16, #tpu.memory_space<vmem>>, vector<7x128xbf16>
    %c256 = arith.constant 256 : index
    %c0_22 = arith.constant 0 : index
    %17 = vector.load %arg2[%c256, %c0_22] : memref<1280x128xbf16, #tpu.memory_space<vmem>>, vector<128x128xbf16>
    %cst_23 = arith.constant dense<0.000000e+00> : vector<7x128xf32>
    %18 = tpu.matmul %16, %17, %cst_23 {dimension_numbers = #tpu.dot_dimension_numbers<[1], [0], [0], [1], [0, 0, 1, 1], [], []>} : vector<7x128xbf16>, vector<128x128xbf16>, vector<7x128xf32> -> vector<7x128xf32>
    %19 = arith.addf %15, %18 : vector<7x128xf32>
    %c48 = arith.constant 48 : index
    %c0_24 = arith.constant 0 : index
    %20 = vector.load %arg1[%c48, %c0_24] : memref<64x128xbf16, #tpu.memory_space<vmem>>, vector<7x128xbf16>
    %c384 = arith.constant 384 : index
    %c0_25 = arith.constant 0 : index
    %21 = vector.load %arg2[%c384, %c0_25] : memref<1280x128xbf16, #tpu.memory_space<vmem>>, vector<128x128xbf16>
    %cst_26 = arith.constant dense<0.000000e+00> : vector<7x128xf32>
    %22 = tpu.matmul %20, %21, %cst_26 {dimension_numbers = #tpu.dot_dimension_numbers<[1], [0], [0], [1], [0, 0, 1, 1], [], []>} : vector<7x128xbf16>, vector<128x128xbf16>, vector<7x128xf32> -> vector<7x128xf32>
    %23 = arith.addf %19, %22 : vector<7x128xf32>
    %c1 = arith.constant 1 : index
    %c0_27 = arith.constant 0 : index
    %24 = vector.load %arg1[%c1, %c0_27] : memref<64x128xbf16, #tpu.memory_space<vmem>>, vector<7x128xbf16>
    %c512 = arith.constant 512 : index
    %c0_28 = arith.constant 0 : index
    %25 = vector.load %arg2[%c512, %c0_28] : memref<1280x128xbf16, #tpu.memory_space<vmem>>, vector<128x128xbf16>
    %cst_29 = arith.constant dense<0.000000e+00> : vector<7x128xf32>
    %26 = tpu.matmul %24, %25, %cst_29 {dimension_numbers = #tpu.dot_dimension_numbers<[1], [0], [0], [1], [0, 0, 1, 1], [], []>} : vector<7x128xbf16>, vector<128x128xbf16>, vector<7x128xf32> -> vector<7x128xf32>
    %27 = arith.addf %23, %26 : vector<7x128xf32>
    %cst_30 = arith.constant 0.000000e+00 : f32
    %28 = vector.broadcast %cst_30 : f32 to vector<7x128xf32>
    %c0_31 = arith.constant 0 : index
    %c0_32 = arith.constant 0 : index
    %29 = vector.load %arg1[%c0_31, %c0_32] : memref<64x128xbf16, #tpu.memory_space<vmem>>, vector<7x128xbf16>
    %c640 = arith.constant 640 : index
    %c0_33 = arith.constant 0 : index
    %30 = vector.load %arg2[%c640, %c0_33] : memref<1280x128xbf16, #tpu.memory_space<vmem>>, vector<128x128xbf16>
    %cst_34 = arith.constant dense<0.000000e+00> : vector<7x128xf32>
    %31 = tpu.matmul %29, %30, %cst_34 {dimension_numbers = #tpu.dot_dimension_numbers<[1], [0], [0], [1], [0, 0, 1, 1], [], []>} : vector<7x128xbf16>, vector<128x128xbf16>, vector<7x128xf32> -> vector<7x128xf32>
    %32 = arith.addf %28, %31 : vector<7x128xf32>
    %c16_35 = arith.constant 16 : index
    %c0_36 = arith.constant 0 : index
    %33 = vector.load %arg1[%c16_35, %c0_36] : memref<64x128xbf16, #tpu.memory_space<vmem>>, vector<7x128xbf16>
    %c768 = arith.constant 768 : index
    %c0_37 = arith.constant 0 : index
    %34 = vector.load %arg2[%c768, %c0_37] : memref<1280x128xbf16, #tpu.memory_space<vmem>>, vector<128x128xbf16>
    %cst_38 = arith.constant dense<0.000000e+00> : vector<7x128xf32>
    %35 = tpu.matmul %33, %34, %cst_38 {dimension_numbers = #tpu.dot_dimension_numbers<[1], [0], [0], [1], [0, 0, 1, 1], [], []>} : vector<7x128xbf16>, vector<128x128xbf16>, vector<7x128xf32> -> vector<7x128xf32>
    %36 = arith.addf %32, %35 : vector<7x128xf32>
    %c32_39 = arith.constant 32 : index
    %c0_40 = arith.constant 0 : index
    %37 = vector.load %arg1[%c32_39, %c0_40] : memref<64x128xbf16, #tpu.memory_space<vmem>>, vector<7x128xbf16>
    %c896 = arith.constant 896 : index
    %c0_41 = arith.constant 0 : index
    %38 = vector.load %arg2[%c896, %c0_41] : memref<1280x128xbf16, #tpu.memory_space<vmem>>, vector<128x128xbf16>
    %cst_42 = arith.constant dense<0.000000e+00> : vector<7x128xf32>
    %39 = tpu.matmul %37, %38, %cst_42 {dimension_numbers = #tpu.dot_dimension_numbers<[1], [0], [0], [1], [0, 0, 1, 1], [], []>} : vector<7x128xbf16>, vector<128x128xbf16>, vector<7x128xf32> -> vector<7x128xf32>
    %40 = arith.addf %36, %39 : vector<7x128xf32>
    %c48_43 = arith.constant 48 : index
    %c0_44 = arith.constant 0 : index
    %41 = vector.load %arg1[%c48_43, %c0_44] : memref<64x128xbf16, #tpu.memory_space<vmem>>, vector<7x128xbf16>
    %c1024 = arith.constant 1024 : index
    %c0_45 = arith.constant 0 : index
    %42 = vector.load %arg2[%c1024, %c0_45] : memref<1280x128xbf16, #tpu.memory_space<vmem>>, vector<128x128xbf16>
    %cst_46 = arith.constant dense<0.000000e+00> : vector<7x128xf32>
    %43 = tpu.matmul %41, %42, %cst_46 {dimension_numbers = #tpu.dot_dimension_numbers<[1], [0], [0], [1], [0, 0, 1, 1], [], []>} : vector<7x128xbf16>, vector<128x128xbf16>, vector<7x128xf32> -> vector<7x128xf32>
    %44 = arith.addf %40, %43 : vector<7x128xf32>
    %c1_47 = arith.constant 1 : index
    %c0_48 = arith.constant 0 : index
    %45 = vector.load %arg1[%c1_47, %c0_48] : memref<64x128xbf16, #tpu.memory_space<vmem>>, vector<7x128xbf16>
    %c1152 = arith.constant 1152 : index
    %c0_49 = arith.constant 0 : index
    %46 = vector.load %arg2[%c1152, %c0_49] : memref<1280x128xbf16, #tpu.memory_space<vmem>>, vector<128x128xbf16>
    %cst_50 = arith.constant dense<0.000000e+00> : vector<7x128xf32>
    %47 = tpu.matmul %45, %46, %cst_50 {dimension_numbers = #tpu.dot_dimension_numbers<[1], [0], [0], [1], [0, 0, 1, 1], [], []>} : vector<7x128xbf16>, vector<128x128xbf16>, vector<7x128xf32> -> vector<7x128xf32>
    %48 = arith.addf %44, %47 : vector<7x128xf32>
    %49 = arith.maximumf %27, %48 : vector<7x128xf32>
    %cst_51 = arith.constant 0.000000e+00 : f32
    %50 = vector.broadcast %cst_51 : f32 to vector<7x128xf32>
    %c16_52 = arith.constant 16 : index
    %c0_53 = arith.constant 0 : index
    %51 = vector.load %arg1[%c16_52, %c0_53] : memref<64x128xbf16, #tpu.memory_space<vmem>>, vector<7x128xbf16>
    %c0_54 = arith.constant 0 : index
    %c0_55 = arith.constant 0 : index
    %52 = vector.load %arg2[%c0_54, %c0_55] : memref<1280x128xbf16, #tpu.memory_space<vmem>>, vector<128x128xbf16>
    %cst_56 = arith.constant dense<0.000000e+00> : vector<7x128xf32>
    %53 = tpu.matmul %51, %52, %cst_56 {dimension_numbers = #tpu.dot_dimension_numbers<[1], [0], [0], [1], [0, 0, 1, 1], [], []>} : vector<7x128xbf16>, vector<128x128xbf16>, vector<7x128xf32> -> vector<7x128xf32>
    %54 = arith.addf %50, %53 : vector<7x128xf32>
    %c32_57 = arith.constant 32 : index
    %c0_58 = arith.constant 0 : index
    %55 = vector.load %arg1[%c32_57, %c0_58] : memref<64x128xbf16, #tpu.memory_space<vmem>>, vector<7x128xbf16>
    %c128_59 = arith.constant 128 : index
    %c0_60 = arith.constant 0 : index
    %56 = vector.load %arg2[%c128_59, %c0_60] : memref<1280x128xbf16, #tpu.memory_space<vmem>>, vector<128x128xbf16>
    %cst_61 = arith.constant dense<0.000000e+00> : vector<7x128xf32>
    %57 = tpu.matmul %55, %56, %cst_61 {dimension_numbers = #tpu.dot_dimension_numbers<[1], [0], [0], [1], [0, 0, 1, 1], [], []>} : vector<7x128xbf16>, vector<128x128xbf16>, vector<7x128xf32> -> vector<7x128xf32>
    %58 = arith.addf %54, %57 : vector<7x128xf32>
    %c48_62 = arith.constant 48 : index
    %c0_63 = arith.constant 0 : index
    %59 = vector.load %arg1[%c48_62, %c0_63] : memref<64x128xbf16, #tpu.memory_space<vmem>>, vector<7x128xbf16>
    %c256_64 = arith.constant 256 : index
    %c0_65 = arith.constant 0 : index
    %60 = vector.load %arg2[%c256_64, %c0_65] : memref<1280x128xbf16, #tpu.memory_space<vmem>>, vector<128x128xbf16>
    %cst_66 = arith.constant dense<0.000000e+00> : vector<7x128xf32>
    %61 = tpu.matmul %59, %60, %cst_66 {dimension_numbers = #tpu.dot_dimension_numbers<[1], [0], [0], [1], [0, 0, 1, 1], [], []>} : vector<7x128xbf16>, vector<128x128xbf16>, vector<7x128xf32> -> vector<7x128xf32>
    %62 = arith.addf %58, %61 : vector<7x128xf32>
    %c1_67 = arith.constant 1 : index
    %c0_68 = arith.constant 0 : index
    %63 = vector.load %arg1[%c1_67, %c0_68] : memref<64x128xbf16, #tpu.memory_space<vmem>>, vector<7x128xbf16>
    %c384_69 = arith.constant 384 : index
    %c0_70 = arith.constant 0 : index
    %64 = vector.load %arg2[%c384_69, %c0_70] : memref<1280x128xbf16, #tpu.memory_space<vmem>>, vector<128x128xbf16>
    %cst_71 = arith.constant dense<0.000000e+00> : vector<7x128xf32>
    %65 = tpu.matmul %63, %64, %cst_71 {dimension_numbers = #tpu.dot_dimension_numbers<[1], [0], [0], [1], [0, 0, 1, 1], [], []>} : vector<7x128xbf16>, vector<128x128xbf16>, vector<7x128xf32> -> vector<7x128xf32>
    %66 = arith.addf %62, %65 : vector<7x128xf32>
    %c17 = arith.constant 17 : index
    %c0_72 = arith.constant 0 : index
    %67 = vector.load %arg1[%c17, %c0_72] : memref<64x128xbf16, #tpu.memory_space<vmem>>, vector<7x128xbf16>
    %c512_73 = arith.constant 512 : index
    %c0_74 = arith.constant 0 : index
    %68 = vector.load %arg2[%c512_73, %c0_74] : memref<1280x128xbf16, #tpu.memory_space<vmem>>, vector<128x128xbf16>
    %cst_75 = arith.constant dense<0.000000e+00> : vector<7x128xf32>
    %69 = tpu.matmul %67, %68, %cst_75 {dimension_numbers = #tpu.dot_dimension_numbers<[1], [0], [0], [1], [0, 0, 1, 1], [], []>} : vector<7x128xbf16>, vector<128x128xbf16>, vector<7x128xf32> -> vector<7x128xf32>
    %70 = arith.addf %66, %69 : vector<7x128xf32>
    %71 = arith.maximumf %49, %70 : vector<7x128xf32>
    %cst_76 = arith.constant 0.000000e+00 : f32
    %72 = vector.broadcast %cst_76 : f32 to vector<7x128xf32>
    %c16_77 = arith.constant 16 : index
    %c0_78 = arith.constant 0 : index
    %73 = vector.load %arg1[%c16_77, %c0_78] : memref<64x128xbf16, #tpu.memory_space<vmem>>, vector<7x128xbf16>
    %c640_79 = arith.constant 640 : index
    %c0_80 = arith.constant 0 : index
    %74 = vector.load %arg2[%c640_79, %c0_80] : memref<1280x128xbf16, #tpu.memory_space<vmem>>, vector<128x128xbf16>
    %cst_81 = arith.constant dense<0.000000e+00> : vector<7x128xf32>
    %75 = tpu.matmul %73, %74, %cst_81 {dimension_numbers = #tpu.dot_dimension_numbers<[1], [0], [0], [1], [0, 0, 1, 1], [], []>} : vector<7x128xbf16>, vector<128x128xbf16>, vector<7x128xf32> -> vector<7x128xf32>
    %76 = arith.addf %72, %75 : vector<7x128xf32>
    %c32_82 = arith.constant 32 : index
    %c0_83 = arith.constant 0 : index
    %77 = vector.load %arg1[%c32_82, %c0_83] : memref<64x128xbf16, #tpu.memory_space<vmem>>, vector<7x128xbf16>
    %c768_84 = arith.constant 768 : index
    %c0_85 = arith.constant 0 : index
    %78 = vector.load %arg2[%c768_84, %c0_85] : memref<1280x128xbf16, #tpu.memory_space<vmem>>, vector<128x128xbf16>
    %cst_86 = arith.constant dense<0.000000e+00> : vector<7x128xf32>
    %79 = tpu.matmul %77, %78, %cst_86 {dimension_numbers = #tpu.dot_dimension_numbers<[1], [0], [0], [1], [0, 0, 1, 1], [], []>} : vector<7x128xbf16>, vector<128x128xbf16>, vector<7x128xf32> -> vector<7x128xf32>
    %80 = arith.addf %76, %79 : vector<7x128xf32>
    %c48_87 = arith.constant 48 : index
    %c0_88 = arith.constant 0 : index
    %81 = vector.load %arg1[%c48_87, %c0_88] : memref<64x128xbf16, #tpu.memory_space<vmem>>, vector<7x128xbf16>
    %c896_89 = arith.constant 896 : index
    %c0_90 = arith.constant 0 : index
    %82 = vector.load %arg2[%c896_89, %c0_90] : memref<1280x128xbf16, #tpu.memory_space<vmem>>, vector<128x128xbf16>
    %cst_91 = arith.constant dense<0.000000e+00> : vector<7x128xf32>
    %83 = tpu.matmul %81, %82, %cst_91 {dimension_numbers = #tpu.dot_dimension_numbers<[1], [0], [0], [1], [0, 0, 1, 1], [], []>} : vector<7x128xbf16>, vector<128x128xbf16>, vector<7x128xf32> -> vector<7x128xf32>
    %84 = arith.addf %80, %83 : vector<7x128xf32>
    %c1_92 = arith.constant 1 : index
    %c0_93 = arith.constant 0 : index
    %85 = vector.load %arg1[%c1_92, %c0_93] : memref<64x128xbf16, #tpu.memory_space<vmem>>, vector<7x128xbf16>
    %c1024_94 = arith.constant 1024 : index
    %c0_95 = arith.constant 0 : index
    %86 = vector.load %arg2[%c1024_94, %c0_95] : memref<1280x128xbf16, #tpu.memory_space<vmem>>, vector<128x128xbf16>
    %cst_96 = arith.constant dense<0.000000e+00> : vector<7x128xf32>
    %87 = tpu.matmul %85, %86, %cst_96 {dimension_numbers = #tpu.dot_dimension_numbers<[1], [0], [0], [1], [0, 0, 1, 1], [], []>} : vector<7x128xbf16>, vector<128x128xbf16>, vector<7x128xf32> -> vector<7x128xf32>
    %88 = arith.addf %84, %87 : vector<7x128xf32>
    %c17_97 = arith.constant 17 : index
    %c0_98 = arith.constant 0 : index
    %89 = vector.load %arg1[%c17_97, %c0_98] : memref<64x128xbf16, #tpu.memory_space<vmem>>, vector<7x128xbf16>
    %c1152_99 = arith.constant 1152 : index
    %c0_100 = arith.constant 0 : index
    %90 = vector.load %arg2[%c1152_99, %c0_100] : memref<1280x128xbf16, #tpu.memory_space<vmem>>, vector<128x128xbf16>
    %cst_101 = arith.constant dense<0.000000e+00> : vector<7x128xf32>
    %91 = tpu.matmul %89, %90, %cst_101 {dimension_numbers = #tpu.dot_dimension_numbers<[1], [0], [0], [1], [0, 0, 1, 1], [], []>} : vector<7x128xbf16>, vector<128x128xbf16>, vector<7x128xf32> -> vector<7x128xf32>
    %92 = arith.addf %88, %91 : vector<7x128xf32>
    %93 = arith.maximumf %71, %92 : vector<7x128xf32>
    %94 = vector.broadcast %0 : vector<1x128xf32> to vector<7x128xf32>
    %95 = arith.addf %93, %94 : vector<7x128xf32>
    %cst_102 = arith.constant 0.000000e+00 : f32
    %96 = vector.broadcast %cst_102 : f32 to vector<7x128xf32>
    %97 = arith.maximumf %95, %96 : vector<7x128xf32>
    %98 = arith.truncf %97 : vector<7x128xf32> to vector<7x128xbf16>
    %cst_103 = arith.constant 0.000000e+00 : f32
    %99 = vector.broadcast %cst_103 : f32 to vector<7x128xf32>
    %c32_104 = arith.constant 32 : index
    %c0_105 = arith.constant 0 : index
    %100 = vector.load %arg1[%c32_104, %c0_105] : memref<64x128xbf16, #tpu.memory_space<vmem>>, vector<7x128xbf16>
    %c0_106 = arith.constant 0 : index
    %c0_107 = arith.constant 0 : index
    %101 = vector.load %arg2[%c0_106, %c0_107] : memref<1280x128xbf16, #tpu.memory_space<vmem>>, vector<128x128xbf16>
    %cst_108 = arith.constant dense<0.000000e+00> : vector<7x128xf32>
    %102 = tpu.matmul %100, %101, %cst_108 {dimension_numbers = #tpu.dot_dimension_numbers<[1], [0], [0], [1], [0, 0, 1, 1], [], []>} : vector<7x128xbf16>, vector<128x128xbf16>, vector<7x128xf32> -> vector<7x128xf32>
    %103 = arith.addf %99, %102 : vector<7x128xf32>
    %c48_109 = arith.constant 48 : index
    %c0_110 = arith.constant 0 : index
    %104 = vector.load %arg1[%c48_109, %c0_110] : memref<64x128xbf16, #tpu.memory_space<vmem>>, vector<7x128xbf16>
    %c128_111 = arith.constant 128 : index
    %c0_112 = arith.constant 0 : index
    %105 = vector.load %arg2[%c128_111, %c0_112] : memref<1280x128xbf16, #tpu.memory_space<vmem>>, vector<128x128xbf16>
    %cst_113 = arith.constant dense<0.000000e+00> : vector<7x128xf32>
    %106 = tpu.matmul %104, %105, %cst_113 {dimension_numbers = #tpu.dot_dimension_numbers<[1], [0], [0], [1], [0, 0, 1, 1], [], []>} : vector<7x128xbf16>, vector<128x128xbf16>, vector<7x128xf32> -> vector<7x128xf32>
    %107 = arith.addf %103, %106 : vector<7x128xf32>
    %c1_114 = arith.constant 1 : index
    %c0_115 = arith.constant 0 : index
    %108 = vector.load %arg1[%c1_114, %c0_115] : memref<64x128xbf16, #tpu.memory_space<vmem>>, vector<7x128xbf16>
    %c256_116 = arith.constant 256 : index
    %c0_117 = arith.constant 0 : index
    %109 = vector.load %arg2[%c256_116, %c0_117] : memref<1280x128xbf16, #tpu.memory_space<vmem>>, vector<128x128xbf16>
    %cst_118 = arith.constant dense<0.000000e+00> : vector<7x128xf32>
    %110 = tpu.matmul %108, %109, %cst_118 {dimension_numbers = #tpu.dot_dimension_numbers<[1], [0], [0], [1], [0, 0, 1, 1], [], []>} : vector<7x128xbf16>, vector<128x128xbf16>, vector<7x128xf32> -> vector<7x128xf32>
    %111 = arith.addf %107, %110 : vector<7x128xf32>
    %c17_119 = arith.constant 17 : index
    %c0_120 = arith.constant 0 : index
    %112 = vector.load %arg1[%c17_119, %c0_120] : memref<64x128xbf16, #tpu.memory_space<vmem>>, vector<7x128xbf16>
    %c384_121 = arith.constant 384 : index
    %c0_122 = arith.constant 0 : index
    %113 = vector.load %arg2[%c384_121, %c0_122] : memref<1280x128xbf16, #tpu.memory_space<vmem>>, vector<128x128xbf16>
    %cst_123 = arith.constant dense<0.000000e+00> : vector<7x128xf32>
    %114 = tpu.matmul %112, %113, %cst_123 {dimension_numbers = #tpu.dot_dimension_numbers<[1], [0], [0], [1], [0, 0, 1, 1], [], []>} : vector<7x128xbf16>, vector<128x128xbf16>, vector<7x128xf32> -> vector<7x128xf32>
    %115 = arith.addf %111, %114 : vector<7x128xf32>
    %c33 = arith.constant 33 : index
    %c0_124 = arith.constant 0 : index
    %116 = vector.load %arg1[%c33, %c0_124] : memref<64x128xbf16, #tpu.memory_space<vmem>>, vector<7x128xbf16>
    %c512_125 = arith.constant 512 : index
    %c0_126 = arith.constant 0 : index
    %117 = vector.load %arg2[%c512_125, %c0_126] : memref<1280x128xbf16, #tpu.memory_space<vmem>>, vector<128x128xbf16>
    %cst_127 = arith.constant dense<0.000000e+00> : vector<7x128xf32>
    %118 = tpu.matmul %116, %117, %cst_127 {dimension_numbers = #tpu.dot_dimension_numbers<[1], [0], [0], [1], [0, 0, 1, 1], [], []>} : vector<7x128xbf16>, vector<128x128xbf16>, vector<7x128xf32> -> vector<7x128xf32>
    %119 = arith.addf %115, %118 : vector<7x128xf32>
    %cst_128 = arith.constant 0.000000e+00 : f32
    %120 = vector.broadcast %cst_128 : f32 to vector<7x128xf32>
    %c32_129 = arith.constant 32 : index
    %c0_130 = arith.constant 0 : index
    %121 = vector.load %arg1[%c32_129, %c0_130] : memref<64x128xbf16, #tpu.memory_space<vmem>>, vector<7x128xbf16>
    %c640_131 = arith.constant 640 : index
    %c0_132 = arith.constant 0 : index
    %122 = vector.load %arg2[%c640_131, %c0_132] : memref<1280x128xbf16, #tpu.memory_space<vmem>>, vector<128x128xbf16>
    %cst_133 = arith.constant dense<0.000000e+00> : vector<7x128xf32>
    %123 = tpu.matmul %121, %122, %cst_133 {dimension_numbers = #tpu.dot_dimension_numbers<[1], [0], [0], [1], [0, 0, 1, 1], [], []>} : vector<7x128xbf16>, vector<128x128xbf16>, vector<7x128xf32> -> vector<7x128xf32>
    %124 = arith.addf %120, %123 : vector<7x128xf32>
    %c48_134 = arith.constant 48 : index
    %c0_135 = arith.constant 0 : index
    %125 = vector.load %arg1[%c48_134, %c0_135] : memref<64x128xbf16, #tpu.memory_space<vmem>>, vector<7x128xbf16>
    %c768_136 = arith.constant 768 : index
    %c0_137 = arith.constant 0 : index
    %126 = vector.load %arg2[%c768_136, %c0_137] : memref<1280x128xbf16, #tpu.memory_space<vmem>>, vector<128x128xbf16>
    %cst_138 = arith.constant dense<0.000000e+00> : vector<7x128xf32>
    %127 = tpu.matmul %125, %126, %cst_138 {dimension_numbers = #tpu.dot_dimension_numbers<[1], [0], [0], [1], [0, 0, 1, 1], [], []>} : vector<7x128xbf16>, vector<128x128xbf16>, vector<7x128xf32> -> vector<7x128xf32>
    %128 = arith.addf %124, %127 : vector<7x128xf32>
    %c1_139 = arith.constant 1 : index
    %c0_140 = arith.constant 0 : index
    %129 = vector.load %arg1[%c1_139, %c0_140] : memref<64x128xbf16, #tpu.memory_space<vmem>>, vector<7x128xbf16>
    %c896_141 = arith.constant 896 : index
    %c0_142 = arith.constant 0 : index
    %130 = vector.load %arg2[%c896_141, %c0_142] : memref<1280x128xbf16, #tpu.memory_space<vmem>>, vector<128x128xbf16>
    %cst_143 = arith.constant dense<0.000000e+00> : vector<7x128xf32>
    %131 = tpu.matmul %129, %130, %cst_143 {dimension_numbers = #tpu.dot_dimension_numbers<[1], [0], [0], [1], [0, 0, 1, 1], [], []>} : vector<7x128xbf16>, vector<128x128xbf16>, vector<7x128xf32> -> vector<7x128xf32>
    %132 = arith.addf %128, %131 : vector<7x128xf32>
    %c17_144 = arith.constant 17 : index
    %c0_145 = arith.constant 0 : index
    %133 = vector.load %arg1[%c17_144, %c0_145] : memref<64x128xbf16, #tpu.memory_space<vmem>>, vector<7x128xbf16>
    %c1024_146 = arith.constant 1024 : index
    %c0_147 = arith.constant 0 : index
    %134 = vector.load %arg2[%c1024_146, %c0_147] : memref<1280x128xbf16, #tpu.memory_space<vmem>>, vector<128x128xbf16>
    %cst_148 = arith.constant dense<0.000000e+00> : vector<7x128xf32>
    %135 = tpu.matmul %133, %134, %cst_148 {dimension_numbers = #tpu.dot_dimension_numbers<[1], [0], [0], [1], [0, 0, 1, 1], [], []>} : vector<7x128xbf16>, vector<128x128xbf16>, vector<7x128xf32> -> vector<7x128xf32>
    %136 = arith.addf %132, %135 : vector<7x128xf32>
    %c33_149 = arith.constant 33 : index
    %c0_150 = arith.constant 0 : index
    %137 = vector.load %arg1[%c33_149, %c0_150] : memref<64x128xbf16, #tpu.memory_space<vmem>>, vector<7x128xbf16>
    %c1152_151 = arith.constant 1152 : index
    %c0_152 = arith.constant 0 : index
    %138 = vector.load %arg2[%c1152_151, %c0_152] : memref<1280x128xbf16, #tpu.memory_space<vmem>>, vector<128x128xbf16>
    %cst_153 = arith.constant dense<0.000000e+00> : vector<7x128xf32>
    %139 = tpu.matmul %137, %138, %cst_153 {dimension_numbers = #tpu.dot_dimension_numbers<[1], [0], [0], [1], [0, 0, 1, 1], [], []>} : vector<7x128xbf16>, vector<128x128xbf16>, vector<7x128xf32> -> vector<7x128xf32>
    %140 = arith.addf %136, %139 : vector<7x128xf32>
    %141 = arith.maximumf %119, %140 : vector<7x128xf32>
    %cst_154 = arith.constant 0.000000e+00 : f32
    %142 = vector.broadcast %cst_154 : f32 to vector<7x128xf32>
    %c48_155 = arith.constant 48 : index
    %c0_156 = arith.constant 0 : index
    %143 = vector.load %arg1[%c48_155, %c0_156] : memref<64x128xbf16, #tpu.memory_space<vmem>>, vector<7x128xbf16>
    %c0_157 = arith.constant 0 : index
    %c0_158 = arith.constant 0 : index
    %144 = vector.load %arg2[%c0_157, %c0_158] : memref<1280x128xbf16, #tpu.memory_space<vmem>>, vector<128x128xbf16>
    %cst_159 = arith.constant dense<0.000000e+00> : vector<7x128xf32>
    %145 = tpu.matmul %143, %144, %cst_159 {dimension_numbers = #tpu.dot_dimension_numbers<[1], [0], [0], [1], [0, 0, 1, 1], [], []>} : vector<7x128xbf16>, vector<128x128xbf16>, vector<7x128xf32> -> vector<7x128xf32>
    %146 = arith.addf %142, %145 : vector<7x128xf32>
    %c1_160 = arith.constant 1 : index
    %c0_161 = arith.constant 0 : index
    %147 = vector.load %arg1[%c1_160, %c0_161] : memref<64x128xbf16, #tpu.memory_space<vmem>>, vector<7x128xbf16>
    %c128_162 = arith.constant 128 : index
    %c0_163 = arith.constant 0 : index
    %148 = vector.load %arg2[%c128_162, %c0_163] : memref<1280x128xbf16, #tpu.memory_space<vmem>>, vector<128x128xbf16>
    %cst_164 = arith.constant dense<0.000000e+00> : vector<7x128xf32>
    %149 = tpu.matmul %147, %148, %cst_164 {dimension_numbers = #tpu.dot_dimension_numbers<[1], [0], [0], [1], [0, 0, 1, 1], [], []>} : vector<7x128xbf16>, vector<128x128xbf16>, vector<7x128xf32> -> vector<7x128xf32>
    %150 = arith.addf %146, %149 : vector<7x128xf32>
    %c17_165 = arith.constant 17 : index
    %c0_166 = arith.constant 0 : index
    %151 = vector.load %arg1[%c17_165, %c0_166] : memref<64x128xbf16, #tpu.memory_space<vmem>>, vector<7x128xbf16>
    %c256_167 = arith.constant 256 : index
    %c0_168 = arith.constant 0 : index
    %152 = vector.load %arg2[%c256_167, %c0_168] : memref<1280x128xbf16, #tpu.memory_space<vmem>>, vector<128x128xbf16>
    %cst_169 = arith.constant dense<0.000000e+00> : vector<7x128xf32>
    %153 = tpu.matmul %151, %152, %cst_169 {dimension_numbers = #tpu.dot_dimension_numbers<[1], [0], [0], [1], [0, 0, 1, 1], [], []>} : vector<7x128xbf16>, vector<128x128xbf16>, vector<7x128xf32> -> vector<7x128xf32>
    %154 = arith.addf %150, %153 : vector<7x128xf32>
    %c33_170 = arith.constant 33 : index
    %c0_171 = arith.constant 0 : index
    %155 = vector.load %arg1[%c33_170, %c0_171] : memref<64x128xbf16, #tpu.memory_space<vmem>>, vector<7x128xbf16>
    %c384_172 = arith.constant 384 : index
    %c0_173 = arith.constant 0 : index
    %156 = vector.load %arg2[%c384_172, %c0_173] : memref<1280x128xbf16, #tpu.memory_space<vmem>>, vector<128x128xbf16>
    %cst_174 = arith.constant dense<0.000000e+00> : vector<7x128xf32>
    %157 = tpu.matmul %155, %156, %cst_174 {dimension_numbers = #tpu.dot_dimension_numbers<[1], [0], [0], [1], [0, 0, 1, 1], [], []>} : vector<7x128xbf16>, vector<128x128xbf16>, vector<7x128xf32> -> vector<7x128xf32>
    %158 = arith.addf %154, %157 : vector<7x128xf32>
    %c49 = arith.constant 49 : index
    %c0_175 = arith.constant 0 : index
    %159 = vector.load %arg1[%c49, %c0_175] : memref<64x128xbf16, #tpu.memory_space<vmem>>, vector<7x128xbf16>
    %c512_176 = arith.constant 512 : index
    %c0_177 = arith.constant 0 : index
    %160 = vector.load %arg2[%c512_176, %c0_177] : memref<1280x128xbf16, #tpu.memory_space<vmem>>, vector<128x128xbf16>
    %cst_178 = arith.constant dense<0.000000e+00> : vector<7x128xf32>
    %161 = tpu.matmul %159, %160, %cst_178 {dimension_numbers = #tpu.dot_dimension_numbers<[1], [0], [0], [1], [0, 0, 1, 1], [], []>} : vector<7x128xbf16>, vector<128x128xbf16>, vector<7x128xf32> -> vector<7x128xf32>
    %162 = arith.addf %158, %161 : vector<7x128xf32>
    %163 = arith.maximumf %141, %162 : vector<7x128xf32>
    %cst_179 = arith.constant 0.000000e+00 : f32
    %164 = vector.broadcast %cst_179 : f32 to vector<7x128xf32>
    %c48_180 = arith.constant 48 : index
    %c0_181 = arith.constant 0 : index
    %165 = vector.load %arg1[%c48_180, %c0_181] : memref<64x128xbf16, #tpu.memory_space<vmem>>, vector<7x128xbf16>
    %c640_182 = arith.constant 640 : index
    %c0_183 = arith.constant 0 : index
    %166 = vector.load %arg2[%c640_182, %c0_183] : memref<1280x128xbf16, #tpu.memory_space<vmem>>, vector<128x128xbf16>
    %cst_184 = arith.constant dense<0.000000e+00> : vector<7x128xf32>
    %167 = tpu.matmul %165, %166, %cst_184 {dimension_numbers = #tpu.dot_dimension_numbers<[1], [0], [0], [1], [0, 0, 1, 1], [], []>} : vector<7x128xbf16>, vector<128x128xbf16>, vector<7x128xf32> -> vector<7x128xf32>
    %168 = arith.addf %164, %167 : vector<7x128xf32>
    %c1_185 = arith.constant 1 : index
    %c0_186 = arith.constant 0 : index
    %169 = vector.load %arg1[%c1_185, %c0_186] : memref<64x128xbf16, #tpu.memory_space<vmem>>, vector<7x128xbf16>
    %c768_187 = arith.constant 768 : index
    %c0_188 = arith.constant 0 : index
    %170 = vector.load %arg2[%c768_187, %c0_188] : memref<1280x128xbf16, #tpu.memory_space<vmem>>, vector<128x128xbf16>
    %cst_189 = arith.constant dense<0.000000e+00> : vector<7x128xf32>
    %171 = tpu.matmul %169, %170, %cst_189 {dimension_numbers = #tpu.dot_dimension_numbers<[1], [0], [0], [1], [0, 0, 1, 1], [], []>} : vector<7x128xbf16>, vector<128x128xbf16>, vector<7x128xf32> -> vector<7x128xf32>
    %172 = arith.addf %168, %171 : vector<7x128xf32>
    %c17_190 = arith.constant 17 : index
    %c0_191 = arith.constant 0 : index
    %173 = vector.load %arg1[%c17_190, %c0_191] : memref<64x128xbf16, #tpu.memory_space<vmem>>, vector<7x128xbf16>
    %c896_192 = arith.constant 896 : index
    %c0_193 = arith.constant 0 : index
    %174 = vector.load %arg2[%c896_192, %c0_193] : memref<1280x128xbf16, #tpu.memory_space<vmem>>, vector<128x128xbf16>
    %cst_194 = arith.constant dense<0.000000e+00> : vector<7x128xf32>
    %175 = tpu.matmul %173, %174, %cst_194 {dimension_numbers = #tpu.dot_dimension_numbers<[1], [0], [0], [1], [0, 0, 1, 1], [], []>} : vector<7x128xbf16>, vector<128x128xbf16>, vector<7x128xf32> -> vector<7x128xf32>
    %176 = arith.addf %172, %175 : vector<7x128xf32>
    %c33_195 = arith.constant 33 : index
    %c0_196 = arith.constant 0 : index
    %177 = vector.load %arg1[%c33_195, %c0_196] : memref<64x128xbf16, #tpu.memory_space<vmem>>, vector<7x128xbf16>
    %c1024_197 = arith.constant 1024 : index
    %c0_198 = arith.constant 0 : index
    %178 = vector.load %arg2[%c1024_197, %c0_198] : memref<1280x128xbf16, #tpu.memory_space<vmem>>, vector<128x128xbf16>
    %cst_199 = arith.constant dense<0.000000e+00> : vector<7x128xf32>
    %179 = tpu.matmul %177, %178, %cst_199 {dimension_numbers = #tpu.dot_dimension_numbers<[1], [0], [0], [1], [0, 0, 1, 1], [], []>} : vector<7x128xbf16>, vector<128x128xbf16>, vector<7x128xf32> -> vector<7x128xf32>
    %180 = arith.addf %176, %179 : vector<7x128xf32>
    %c49_200 = arith.constant 49 : index
    %c0_201 = arith.constant 0 : index
    %181 = vector.load %arg1[%c49_200, %c0_201] : memref<64x128xbf16, #tpu.memory_space<vmem>>, vector<7x128xbf16>
    %c1152_202 = arith.constant 1152 : index
    %c0_203 = arith.constant 0 : index
    %182 = vector.load %arg2[%c1152_202, %c0_203] : memref<1280x128xbf16, #tpu.memory_space<vmem>>, vector<128x128xbf16>
    %cst_204 = arith.constant dense<0.000000e+00> : vector<7x128xf32>
    %183 = tpu.matmul %181, %182, %cst_204 {dimension_numbers = #tpu.dot_dimension_numbers<[1], [0], [0], [1], [0, 0, 1, 1], [], []>} : vector<7x128xbf16>, vector<128x128xbf16>, vector<7x128xf32> -> vector<7x128xf32>
    %184 = arith.addf %180, %183 : vector<7x128xf32>
    %185 = arith.maximumf %163, %184 : vector<7x128xf32>
    %186 = vector.broadcast %0 : vector<1x128xf32> to vector<7x128xf32>
    %187 = arith.addf %185, %186 : vector<7x128xf32>
    %cst_205 = arith.constant 0.000000e+00 : f32
    %188 = vector.broadcast %cst_205 : f32 to vector<7x128xf32>
    %189 = arith.maximumf %187, %188 : vector<7x128xf32>
    %190 = arith.truncf %189 : vector<7x128xf32> to vector<7x128xbf16>
    %cst_206 = arith.constant 0.000000e+00 : f32
    %191 = vector.broadcast %cst_206 : f32 to vector<5x128xf32>
    %192 = vector.extract_strided_slice %98 {offsets = [0, 0], sizes = [5, 128], strides = [1, 1]} : vector<7x128xbf16> to vector<5x128xbf16>
    %c0_207 = arith.constant 0 : index
    %c0_208 = arith.constant 0 : index
    %193 = vector.load %arg4[%c0_207, %c0_208] : memref<1280x128xbf16, #tpu.memory_space<vmem>>, vector<128x128xbf16>
    %cst_209 = arith.constant dense<0.000000e+00> : vector<5x128xf32>
    %194 = tpu.matmul %192, %193, %cst_209 {dimension_numbers = #tpu.dot_dimension_numbers<[1], [0], [0], [1], [0, 0, 1, 1], [], []>} : vector<5x128xbf16>, vector<128x128xbf16>, vector<5x128xf32> -> vector<5x128xf32>
    %195 = arith.addf %191, %194 : vector<5x128xf32>
    %196 = vector.extract_strided_slice %190 {offsets = [0, 0], sizes = [5, 128], strides = [1, 1]} : vector<7x128xbf16> to vector<5x128xbf16>
    %c128_210 = arith.constant 128 : index
    %c0_211 = arith.constant 0 : index
    %197 = vector.load %arg4[%c128_210, %c0_211] : memref<1280x128xbf16, #tpu.memory_space<vmem>>, vector<128x128xbf16>
    %cst_212 = arith.constant dense<0.000000e+00> : vector<5x128xf32>
    %198 = tpu.matmul %196, %197, %cst_212 {dimension_numbers = #tpu.dot_dimension_numbers<[1], [0], [0], [1], [0, 0, 1, 1], [], []>} : vector<5x128xbf16>, vector<128x128xbf16>, vector<5x128xf32> -> vector<5x128xf32>
    %199 = arith.addf %195, %198 : vector<5x128xf32>
    %200 = vector.extract_strided_slice %98 {offsets = [1, 0], sizes = [5, 128], strides = [1, 1]} : vector<7x128xbf16> to vector<5x128xbf16>
    %c256_213 = arith.constant 256 : index
    %c0_214 = arith.constant 0 : index
    %201 = vector.load %arg4[%c256_213, %c0_214] : memref<1280x128xbf16, #tpu.memory_space<vmem>>, vector<128x128xbf16>
    %cst_215 = arith.constant dense<0.000000e+00> : vector<5x128xf32>
    %202 = tpu.matmul %200, %201, %cst_215 {dimension_numbers = #tpu.dot_dimension_numbers<[1], [0], [0], [1], [0, 0, 1, 1], [], []>} : vector<5x128xbf16>, vector<128x128xbf16>, vector<5x128xf32> -> vector<5x128xf32>
    %203 = arith.addf %199, %202 : vector<5x128xf32>
    %204 = vector.extract_strided_slice %190 {offsets = [1, 0], sizes = [5, 128], strides = [1, 1]} : vector<7x128xbf16> to vector<5x128xbf16>
    %c384_216 = arith.constant 384 : index
    %c0_217 = arith.constant 0 : index
    %205 = vector.load %arg4[%c384_216, %c0_217] : memref<1280x128xbf16, #tpu.memory_space<vmem>>, vector<128x128xbf16>
    %cst_218 = arith.constant dense<0.000000e+00> : vector<5x128xf32>
    %206 = tpu.matmul %204, %205, %cst_218 {dimension_numbers = #tpu.dot_dimension_numbers<[1], [0], [0], [1], [0, 0, 1, 1], [], []>} : vector<5x128xbf16>, vector<128x128xbf16>, vector<5x128xf32> -> vector<5x128xf32>
    %207 = arith.addf %203, %206 : vector<5x128xf32>
    %208 = vector.extract_strided_slice %98 {offsets = [2, 0], sizes = [5, 128], strides = [1, 1]} : vector<7x128xbf16> to vector<5x128xbf16>
    %c512_219 = arith.constant 512 : index
    %c0_220 = arith.constant 0 : index
    %209 = vector.load %arg4[%c512_219, %c0_220] : memref<1280x128xbf16, #tpu.memory_space<vmem>>, vector<128x128xbf16>
    %cst_221 = arith.constant dense<0.000000e+00> : vector<5x128xf32>
    %210 = tpu.matmul %208, %209, %cst_221 {dimension_numbers = #tpu.dot_dimension_numbers<[1], [0], [0], [1], [0, 0, 1, 1], [], []>} : vector<5x128xbf16>, vector<128x128xbf16>, vector<5x128xf32> -> vector<5x128xf32>
    %211 = arith.addf %207, %210 : vector<5x128xf32>
    %cst_222 = arith.constant 0.000000e+00 : f32
    %212 = vector.broadcast %cst_222 : f32 to vector<5x128xf32>
    %213 = vector.extract_strided_slice %98 {offsets = [0, 0], sizes = [5, 128], strides = [1, 1]} : vector<7x128xbf16> to vector<5x128xbf16>
    %c640_223 = arith.constant 640 : index
    %c0_224 = arith.constant 0 : index
    %214 = vector.load %arg4[%c640_223, %c0_224] : memref<1280x128xbf16, #tpu.memory_space<vmem>>, vector<128x128xbf16>
    %cst_225 = arith.constant dense<0.000000e+00> : vector<5x128xf32>
    %215 = tpu.matmul %213, %214, %cst_225 {dimension_numbers = #tpu.dot_dimension_numbers<[1], [0], [0], [1], [0, 0, 1, 1], [], []>} : vector<5x128xbf16>, vector<128x128xbf16>, vector<5x128xf32> -> vector<5x128xf32>
    %216 = arith.addf %212, %215 : vector<5x128xf32>
    %217 = vector.extract_strided_slice %190 {offsets = [0, 0], sizes = [5, 128], strides = [1, 1]} : vector<7x128xbf16> to vector<5x128xbf16>
    %c768_226 = arith.constant 768 : index
    %c0_227 = arith.constant 0 : index
    %218 = vector.load %arg4[%c768_226, %c0_227] : memref<1280x128xbf16, #tpu.memory_space<vmem>>, vector<128x128xbf16>
    %cst_228 = arith.constant dense<0.000000e+00> : vector<5x128xf32>
    %219 = tpu.matmul %217, %218, %cst_228 {dimension_numbers = #tpu.dot_dimension_numbers<[1], [0], [0], [1], [0, 0, 1, 1], [], []>} : vector<5x128xbf16>, vector<128x128xbf16>, vector<5x128xf32> -> vector<5x128xf32>
    %220 = arith.addf %216, %219 : vector<5x128xf32>
    %221 = vector.extract_strided_slice %98 {offsets = [1, 0], sizes = [5, 128], strides = [1, 1]} : vector<7x128xbf16> to vector<5x128xbf16>
    %c896_229 = arith.constant 896 : index
    %c0_230 = arith.constant 0 : index
    %222 = vector.load %arg4[%c896_229, %c0_230] : memref<1280x128xbf16, #tpu.memory_space<vmem>>, vector<128x128xbf16>
    %cst_231 = arith.constant dense<0.000000e+00> : vector<5x128xf32>
    %223 = tpu.matmul %221, %222, %cst_231 {dimension_numbers = #tpu.dot_dimension_numbers<[1], [0], [0], [1], [0, 0, 1, 1], [], []>} : vector<5x128xbf16>, vector<128x128xbf16>, vector<5x128xf32> -> vector<5x128xf32>
    %224 = arith.addf %220, %223 : vector<5x128xf32>
    %225 = vector.extract_strided_slice %190 {offsets = [1, 0], sizes = [5, 128], strides = [1, 1]} : vector<7x128xbf16> to vector<5x128xbf16>
    %c1024_232 = arith.constant 1024 : index
    %c0_233 = arith.constant 0 : index
    %226 = vector.load %arg4[%c1024_232, %c0_233] : memref<1280x128xbf16, #tpu.memory_space<vmem>>, vector<128x128xbf16>
    %cst_234 = arith.constant dense<0.000000e+00> : vector<5x128xf32>
    %227 = tpu.matmul %225, %226, %cst_234 {dimension_numbers = #tpu.dot_dimension_numbers<[1], [0], [0], [1], [0, 0, 1, 1], [], []>} : vector<5x128xbf16>, vector<128x128xbf16>, vector<5x128xf32> -> vector<5x128xf32>
    %228 = arith.addf %224, %227 : vector<5x128xf32>
    %229 = vector.extract_strided_slice %98 {offsets = [2, 0], sizes = [5, 128], strides = [1, 1]} : vector<7x128xbf16> to vector<5x128xbf16>
    %c1152_235 = arith.constant 1152 : index
    %c0_236 = arith.constant 0 : index
    %230 = vector.load %arg4[%c1152_235, %c0_236] : memref<1280x128xbf16, #tpu.memory_space<vmem>>, vector<128x128xbf16>
    %cst_237 = arith.constant dense<0.000000e+00> : vector<5x128xf32>
    %231 = tpu.matmul %229, %230, %cst_237 {dimension_numbers = #tpu.dot_dimension_numbers<[1], [0], [0], [1], [0, 0, 1, 1], [], []>} : vector<5x128xbf16>, vector<128x128xbf16>, vector<5x128xf32> -> vector<5x128xf32>
    %232 = arith.addf %228, %231 : vector<5x128xf32>
    %233 = arith.maximumf %211, %232 : vector<5x128xf32>
    %cst_238 = arith.constant 0.000000e+00 : f32
    %234 = vector.broadcast %cst_238 : f32 to vector<5x128xf32>
    %235 = vector.extract_strided_slice %190 {offsets = [0, 0], sizes = [5, 128], strides = [1, 1]} : vector<7x128xbf16> to vector<5x128xbf16>
    %c0_239 = arith.constant 0 : index
    %c0_240 = arith.constant 0 : index
    %236 = vector.load %arg4[%c0_239, %c0_240] : memref<1280x128xbf16, #tpu.memory_space<vmem>>, vector<128x128xbf16>
    %cst_241 = arith.constant dense<0.000000e+00> : vector<5x128xf32>
    %237 = tpu.matmul %235, %236, %cst_241 {dimension_numbers = #tpu.dot_dimension_numbers<[1], [0], [0], [1], [0, 0, 1, 1], [], []>} : vector<5x128xbf16>, vector<128x128xbf16>, vector<5x128xf32> -> vector<5x128xf32>
    %238 = arith.addf %234, %237 : vector<5x128xf32>
    %239 = vector.extract_strided_slice %98 {offsets = [1, 0], sizes = [5, 128], strides = [1, 1]} : vector<7x128xbf16> to vector<5x128xbf16>
    %c128_242 = arith.constant 128 : index
    %c0_243 = arith.constant 0 : index
    %240 = vector.load %arg4[%c128_242, %c0_243] : memref<1280x128xbf16, #tpu.memory_space<vmem>>, vector<128x128xbf16>
    %cst_244 = arith.constant dense<0.000000e+00> : vector<5x128xf32>
    %241 = tpu.matmul %239, %240, %cst_244 {dimension_numbers = #tpu.dot_dimension_numbers<[1], [0], [0], [1], [0, 0, 1, 1], [], []>} : vector<5x128xbf16>, vector<128x128xbf16>, vector<5x128xf32> -> vector<5x128xf32>
    %242 = arith.addf %238, %241 : vector<5x128xf32>
    %243 = vector.extract_strided_slice %190 {offsets = [1, 0], sizes = [5, 128], strides = [1, 1]} : vector<7x128xbf16> to vector<5x128xbf16>
    %c256_245 = arith.constant 256 : index
    %c0_246 = arith.constant 0 : index
    %244 = vector.load %arg4[%c256_245, %c0_246] : memref<1280x128xbf16, #tpu.memory_space<vmem>>, vector<128x128xbf16>
    %cst_247 = arith.constant dense<0.000000e+00> : vector<5x128xf32>
    %245 = tpu.matmul %243, %244, %cst_247 {dimension_numbers = #tpu.dot_dimension_numbers<[1], [0], [0], [1], [0, 0, 1, 1], [], []>} : vector<5x128xbf16>, vector<128x128xbf16>, vector<5x128xf32> -> vector<5x128xf32>
    %246 = arith.addf %242, %245 : vector<5x128xf32>
    %247 = vector.extract_strided_slice %98 {offsets = [2, 0], sizes = [5, 128], strides = [1, 1]} : vector<7x128xbf16> to vector<5x128xbf16>
    %c384_248 = arith.constant 384 : index
    %c0_249 = arith.constant 0 : index
    %248 = vector.load %arg4[%c384_248, %c0_249] : memref<1280x128xbf16, #tpu.memory_space<vmem>>, vector<128x128xbf16>
    %cst_250 = arith.constant dense<0.000000e+00> : vector<5x128xf32>
    %249 = tpu.matmul %247, %248, %cst_250 {dimension_numbers = #tpu.dot_dimension_numbers<[1], [0], [0], [1], [0, 0, 1, 1], [], []>} : vector<5x128xbf16>, vector<128x128xbf16>, vector<5x128xf32> -> vector<5x128xf32>
    %250 = arith.addf %246, %249 : vector<5x128xf32>
    %251 = vector.extract_strided_slice %190 {offsets = [2, 0], sizes = [5, 128], strides = [1, 1]} : vector<7x128xbf16> to vector<5x128xbf16>
    %c512_251 = arith.constant 512 : index
    %c0_252 = arith.constant 0 : index
    %252 = vector.load %arg4[%c512_251, %c0_252] : memref<1280x128xbf16, #tpu.memory_space<vmem>>, vector<128x128xbf16>
    %cst_253 = arith.constant dense<0.000000e+00> : vector<5x128xf32>
    %253 = tpu.matmul %251, %252, %cst_253 {dimension_numbers = #tpu.dot_dimension_numbers<[1], [0], [0], [1], [0, 0, 1, 1], [], []>} : vector<5x128xbf16>, vector<128x128xbf16>, vector<5x128xf32> -> vector<5x128xf32>
    %254 = arith.addf %250, %253 : vector<5x128xf32>
    %255 = arith.maximumf %233, %254 : vector<5x128xf32>
    %cst_254 = arith.constant 0.000000e+00 : f32
    %256 = vector.broadcast %cst_254 : f32 to vector<5x128xf32>
    %257 = vector.extract_strided_slice %190 {offsets = [0, 0], sizes = [5, 128], strides = [1, 1]} : vector<7x128xbf16> to vector<5x128xbf16>
    %c640_255 = arith.constant 640 : index
    %c0_256 = arith.constant 0 : index
    %258 = vector.load %arg4[%c640_255, %c0_256] : memref<1280x128xbf16, #tpu.memory_space<vmem>>, vector<128x128xbf16>
    %cst_257 = arith.constant dense<0.000000e+00> : vector<5x128xf32>
    %259 = tpu.matmul %257, %258, %cst_257 {dimension_numbers = #tpu.dot_dimension_numbers<[1], [0], [0], [1], [0, 0, 1, 1], [], []>} : vector<5x128xbf16>, vector<128x128xbf16>, vector<5x128xf32> -> vector<5x128xf32>
    %260 = arith.addf %256, %259 : vector<5x128xf32>
    %261 = vector.extract_strided_slice %98 {offsets = [1, 0], sizes = [5, 128], strides = [1, 1]} : vector<7x128xbf16> to vector<5x128xbf16>
    %c768_258 = arith.constant 768 : index
    %c0_259 = arith.constant 0 : index
    %262 = vector.load %arg4[%c768_258, %c0_259] : memref<1280x128xbf16, #tpu.memory_space<vmem>>, vector<128x128xbf16>
    %cst_260 = arith.constant dense<0.000000e+00> : vector<5x128xf32>
    %263 = tpu.matmul %261, %262, %cst_260 {dimension_numbers = #tpu.dot_dimension_numbers<[1], [0], [0], [1], [0, 0, 1, 1], [], []>} : vector<5x128xbf16>, vector<128x128xbf16>, vector<5x128xf32> -> vector<5x128xf32>
    %264 = arith.addf %260, %263 : vector<5x128xf32>
    %265 = vector.extract_strided_slice %190 {offsets = [1, 0], sizes = [5, 128], strides = [1, 1]} : vector<7x128xbf16> to vector<5x128xbf16>
    %c896_261 = arith.constant 896 : index
    %c0_262 = arith.constant 0 : index
    %266 = vector.load %arg4[%c896_261, %c0_262] : memref<1280x128xbf16, #tpu.memory_space<vmem>>, vector<128x128xbf16>
    %cst_263 = arith.constant dense<0.000000e+00> : vector<5x128xf32>
    %267 = tpu.matmul %265, %266, %cst_263 {dimension_numbers = #tpu.dot_dimension_numbers<[1], [0], [0], [1], [0, 0, 1, 1], [], []>} : vector<5x128xbf16>, vector<128x128xbf16>, vector<5x128xf32> -> vector<5x128xf32>
    %268 = arith.addf %264, %267 : vector<5x128xf32>
    %269 = vector.extract_strided_slice %98 {offsets = [2, 0], sizes = [5, 128], strides = [1, 1]} : vector<7x128xbf16> to vector<5x128xbf16>
    %c1024_264 = arith.constant 1024 : index
    %c0_265 = arith.constant 0 : index
    %270 = vector.load %arg4[%c1024_264, %c0_265] : memref<1280x128xbf16, #tpu.memory_space<vmem>>, vector<128x128xbf16>
    %cst_266 = arith.constant dense<0.000000e+00> : vector<5x128xf32>
    %271 = tpu.matmul %269, %270, %cst_266 {dimension_numbers = #tpu.dot_dimension_numbers<[1], [0], [0], [1], [0, 0, 1, 1], [], []>} : vector<5x128xbf16>, vector<128x128xbf16>, vector<5x128xf32> -> vector<5x128xf32>
    %272 = arith.addf %268, %271 : vector<5x128xf32>
    %273 = vector.extract_strided_slice %190 {offsets = [2, 0], sizes = [5, 128], strides = [1, 1]} : vector<7x128xbf16> to vector<5x128xbf16>
    %c1152_267 = arith.constant 1152 : index
    %c0_268 = arith.constant 0 : index
    %274 = vector.load %arg4[%c1152_267, %c0_268] : memref<1280x128xbf16, #tpu.memory_space<vmem>>, vector<128x128xbf16>
    %cst_269 = arith.constant dense<0.000000e+00> : vector<5x128xf32>
    %275 = tpu.matmul %273, %274, %cst_269 {dimension_numbers = #tpu.dot_dimension_numbers<[1], [0], [0], [1], [0, 0, 1, 1], [], []>} : vector<5x128xbf16>, vector<128x128xbf16>, vector<5x128xf32> -> vector<5x128xf32>
    %276 = arith.addf %272, %275 : vector<5x128xf32>
    %277 = arith.maximumf %255, %276 : vector<5x128xf32>
    %278 = vector.broadcast %1 : vector<1x128xf32> to vector<5x128xf32>
    %279 = arith.addf %277, %278 : vector<5x128xf32>
    %cst_270 = arith.constant 0.000000e+00 : f32
    %280 = vector.broadcast %cst_270 : f32 to vector<5x128xf32>
    %281 = arith.maximumf %279, %280 : vector<5x128xf32>
    %282 = arith.truncf %281 : vector<5x128xf32> to vector<5x128xbf16>
    %cst_271 = arith.constant 0.000000e+00 : f32
    %283 = vector.broadcast %cst_271 : f32 to vector<1x128xf32>
    %284 = vector.extract_strided_slice %282 {offsets = [0, 0], sizes = [1, 128], strides = [1, 1]} : vector<5x128xbf16> to vector<1x128xbf16>
    %c0_272 = arith.constant 0 : index
    %c0_273 = arith.constant 0 : index
    %285 = vector.load %arg6[%c0_272, %c0_273] : memref<640x128xbf16, #tpu.memory_space<vmem>>, vector<128x128xbf16>
    %cst_274 = arith.constant dense<0.000000e+00> : vector<1x128xf32>
    %286 = tpu.matmul %284, %285, %cst_274 {dimension_numbers = #tpu.dot_dimension_numbers<[1], [0], [0], [1], [0, 0, 1, 1], [], []>} : vector<1x128xbf16>, vector<128x128xbf16>, vector<1x128xf32> -> vector<1x128xf32>
    %287 = arith.addf %283, %286 : vector<1x128xf32>
    %288 = vector.extract_strided_slice %282 {offsets = [1, 0], sizes = [1, 128], strides = [1, 1]} : vector<5x128xbf16> to vector<1x128xbf16>
    %c128_275 = arith.constant 128 : index
    %c0_276 = arith.constant 0 : index
    %289 = vector.load %arg6[%c128_275, %c0_276] : memref<640x128xbf16, #tpu.memory_space<vmem>>, vector<128x128xbf16>
    %cst_277 = arith.constant dense<0.000000e+00> : vector<1x128xf32>
    %290 = tpu.matmul %288, %289, %cst_277 {dimension_numbers = #tpu.dot_dimension_numbers<[1], [0], [0], [1], [0, 0, 1, 1], [], []>} : vector<1x128xbf16>, vector<128x128xbf16>, vector<1x128xf32> -> vector<1x128xf32>
    %291 = arith.addf %287, %290 : vector<1x128xf32>
    %292 = vector.extract_strided_slice %282 {offsets = [2, 0], sizes = [1, 128], strides = [1, 1]} : vector<5x128xbf16> to vector<1x128xbf16>
    %c256_278 = arith.constant 256 : index
    %c0_279 = arith.constant 0 : index
    %293 = vector.load %arg6[%c256_278, %c0_279] : memref<640x128xbf16, #tpu.memory_space<vmem>>, vector<128x128xbf16>
    %cst_280 = arith.constant dense<0.000000e+00> : vector<1x128xf32>
    %294 = tpu.matmul %292, %293, %cst_280 {dimension_numbers = #tpu.dot_dimension_numbers<[1], [0], [0], [1], [0, 0, 1, 1], [], []>} : vector<1x128xbf16>, vector<128x128xbf16>, vector<1x128xf32> -> vector<1x128xf32>
    %295 = arith.addf %291, %294 : vector<1x128xf32>
    %296 = vector.extract_strided_slice %282 {offsets = [3, 0], sizes = [1, 128], strides = [1, 1]} : vector<5x128xbf16> to vector<1x128xbf16>
    %c384_281 = arith.constant 384 : index
    %c0_282 = arith.constant 0 : index
    %297 = vector.load %arg6[%c384_281, %c0_282] : memref<640x128xbf16, #tpu.memory_space<vmem>>, vector<128x128xbf16>
    %cst_283 = arith.constant dense<0.000000e+00> : vector<1x128xf32>
    %298 = tpu.matmul %296, %297, %cst_283 {dimension_numbers = #tpu.dot_dimension_numbers<[1], [0], [0], [1], [0, 0, 1, 1], [], []>} : vector<1x128xbf16>, vector<128x128xbf16>, vector<1x128xf32> -> vector<1x128xf32>
    %299 = arith.addf %295, %298 : vector<1x128xf32>
    %300 = vector.extract_strided_slice %282 {offsets = [4, 0], sizes = [1, 128], strides = [1, 1]} : vector<5x128xbf16> to vector<1x128xbf16>
    %c512_284 = arith.constant 512 : index
    %c0_285 = arith.constant 0 : index
    %301 = vector.load %arg6[%c512_284, %c0_285] : memref<640x128xbf16, #tpu.memory_space<vmem>>, vector<128x128xbf16>
    %cst_286 = arith.constant dense<0.000000e+00> : vector<1x128xf32>
    %302 = tpu.matmul %300, %301, %cst_286 {dimension_numbers = #tpu.dot_dimension_numbers<[1], [0], [0], [1], [0, 0, 1, 1], [], []>} : vector<1x128xbf16>, vector<128x128xbf16>, vector<1x128xf32> -> vector<1x128xf32>
    %303 = arith.addf %299, %302 : vector<1x128xf32>
    %304 = arith.addf %303, %2 : vector<1x128xf32>
    %cst_287 = arith.constant 0.000000e+00 : f32
    %305 = vector.broadcast %cst_287 : f32 to vector<1x128xf32>
    %306 = arith.maximumf %304, %305 : vector<1x128xf32>
    %307 = arith.truncf %306 : vector<1x128xf32> to vector<1x128xbf16>
    %cst_288 = arith.constant dense<0.000000e+00> : vector<1x128xf32>
    %308 = tpu.matmul %307, %5, %cst_288 {dimension_numbers = #tpu.dot_dimension_numbers<[1], [0], [0], [1], [0, 0, 1, 1], [], []>} : vector<1x128xbf16>, vector<128x128xbf16>, vector<1x128xf32> -> vector<1x128xf32>
    %309 = arith.addf %308, %3 : vector<1x128xf32>
    %cst_289 = arith.constant 0.000000e+00 : f32
    %310 = vector.broadcast %cst_289 : f32 to vector<1x128xf32>
    %311 = arith.maximumf %309, %310 : vector<1x128xf32>
    %312 = arith.truncf %311 : vector<1x128xf32> to vector<1x128xbf16>
    %cst_290 = arith.constant dense<0.000000e+00> : vector<1x128xf32>
    %313 = tpu.matmul %312, %6, %cst_290 {dimension_numbers = #tpu.dot_dimension_numbers<[1], [0], [0], [1], [0, 0, 1, 1], [], []>} : vector<1x128xbf16>, vector<128x128xbf16>, vector<1x128xf32> -> vector<1x128xf32>
    %314 = arith.addf %313, %4 : vector<1x128xf32>
    %c0_291 = arith.constant 0 : index
    %c0_292 = arith.constant 0 : index
    %315 = vector.load %arg12[%c0_291, %c0_292] : memref<2x128xf32, #tpu.memory_space<vmem>>, vector<1x128xf32>
    tpu.vector_store %arg12[%c0_291, %c0_292], %314 {strides = array<i32>} : memref<2x128xf32, #tpu.memory_space<vmem>>, vector<1x128xf32>,
    %cst_293 = arith.constant 0.000000e+00 : f32
    %316 = vector.broadcast %cst_293 : f32 to vector<7x128xf32>
    %c8 = arith.constant 8 : index
    %c0_294 = arith.constant 0 : index
    %317 = vector.load %arg1[%c8, %c0_294] : memref<64x128xbf16, #tpu.memory_space<vmem>>, vector<7x128xbf16>
    %c0_295 = arith.constant 0 : index
    %c0_296 = arith.constant 0 : index
    %318 = vector.load %arg2[%c0_295, %c0_296] : memref<1280x128xbf16, #tpu.memory_space<vmem>>, vector<128x128xbf16>
    %cst_297 = arith.constant dense<0.000000e+00> : vector<7x128xf32>
    %319 = tpu.matmul %317, %318, %cst_297 {dimension_numbers = #tpu.dot_dimension_numbers<[1], [0], [0], [1], [0, 0, 1, 1], [], []>} : vector<7x128xbf16>, vector<128x128xbf16>, vector<7x128xf32> -> vector<7x128xf32>
    %320 = arith.addf %316, %319 : vector<7x128xf32>
    %c24 = arith.constant 24 : index
    %c0_298 = arith.constant 0 : index
    %321 = vector.load %arg1[%c24, %c0_298] : memref<64x128xbf16, #tpu.memory_space<vmem>>, vector<7x128xbf16>
    %c128_299 = arith.constant 128 : index
    %c0_300 = arith.constant 0 : index
    %322 = vector.load %arg2[%c128_299, %c0_300] : memref<1280x128xbf16, #tpu.memory_space<vmem>>, vector<128x128xbf16>
    %cst_301 = arith.constant dense<0.000000e+00> : vector<7x128xf32>
    %323 = tpu.matmul %321, %322, %cst_301 {dimension_numbers = #tpu.dot_dimension_numbers<[1], [0], [0], [1], [0, 0, 1, 1], [], []>} : vector<7x128xbf16>, vector<128x128xbf16>, vector<7x128xf32> -> vector<7x128xf32>
    %324 = arith.addf %320, %323 : vector<7x128xf32>
    %c40 = arith.constant 40 : index
    %c0_302 = arith.constant 0 : index
    %325 = vector.load %arg1[%c40, %c0_302] : memref<64x128xbf16, #tpu.memory_space<vmem>>, vector<7x128xbf16>
    %c256_303 = arith.constant 256 : index
    %c0_304 = arith.constant 0 : index
    %326 = vector.load %arg2[%c256_303, %c0_304] : memref<1280x128xbf16, #tpu.memory_space<vmem>>, vector<128x128xbf16>
    %cst_305 = arith.constant dense<0.000000e+00> : vector<7x128xf32>
    %327 = tpu.matmul %325, %326, %cst_305 {dimension_numbers = #tpu.dot_dimension_numbers<[1], [0], [0], [1], [0, 0, 1, 1], [], []>} : vector<7x128xbf16>, vector<128x128xbf16>, vector<7x128xf32> -> vector<7x128xf32>
    %328 = arith.addf %324, %327 : vector<7x128xf32>
    %c56 = arith.constant 56 : index
    %c0_306 = arith.constant 0 : index
    %329 = vector.load %arg1[%c56, %c0_306] : memref<64x128xbf16, #tpu.memory_space<vmem>>, vector<7x128xbf16>
    %c384_307 = arith.constant 384 : index
    %c0_308 = arith.constant 0 : index
    %330 = vector.load %arg2[%c384_307, %c0_308] : memref<1280x128xbf16, #tpu.memory_space<vmem>>, vector<128x128xbf16>
    %cst_309 = arith.constant dense<0.000000e+00> : vector<7x128xf32>
    %331 = tpu.matmul %329, %330, %cst_309 {dimension_numbers = #tpu.dot_dimension_numbers<[1], [0], [0], [1], [0, 0, 1, 1], [], []>} : vector<7x128xbf16>, vector<128x128xbf16>, vector<7x128xf32> -> vector<7x128xf32>
    %332 = arith.addf %328, %331 : vector<7x128xf32>
    %c9 = arith.constant 9 : index
    %c0_310 = arith.constant 0 : index
    %333 = vector.load %arg1[%c9, %c0_310] : memref<64x128xbf16, #tpu.memory_space<vmem>>, vector<7x128xbf16>
    %c512_311 = arith.constant 512 : index
    %c0_312 = arith.constant 0 : index
    %334 = vector.load %arg2[%c512_311, %c0_312] : memref<1280x128xbf16, #tpu.memory_space<vmem>>, vector<128x128xbf16>
    %cst_313 = arith.constant dense<0.000000e+00> : vector<7x128xf32>
    %335 = tpu.matmul %333, %334, %cst_313 {dimension_numbers = #tpu.dot_dimension_numbers<[1], [0], [0], [1], [0, 0, 1, 1], [], []>} : vector<7x128xbf16>, vector<128x128xbf16>, vector<7x128xf32> -> vector<7x128xf32>
    %336 = arith.addf %332, %335 : vector<7x128xf32>
    %cst_314 = arith.constant 0.000000e+00 : f32
    %337 = vector.broadcast %cst_314 : f32 to vector<7x128xf32>
    %c8_315 = arith.constant 8 : index
    %c0_316 = arith.constant 0 : index
    %338 = vector.load %arg1[%c8_315, %c0_316] : memref<64x128xbf16, #tpu.memory_space<vmem>>, vector<7x128xbf16>
    %c640_317 = arith.constant 640 : index
    %c0_318 = arith.constant 0 : index
    %339 = vector.load %arg2[%c640_317, %c0_318] : memref<1280x128xbf16, #tpu.memory_space<vmem>>, vector<128x128xbf16>
    %cst_319 = arith.constant dense<0.000000e+00> : vector<7x128xf32>
    %340 = tpu.matmul %338, %339, %cst_319 {dimension_numbers = #tpu.dot_dimension_numbers<[1], [0], [0], [1], [0, 0, 1, 1], [], []>} : vector<7x128xbf16>, vector<128x128xbf16>, vector<7x128xf32> -> vector<7x128xf32>
    %341 = arith.addf %337, %340 : vector<7x128xf32>
    %c24_320 = arith.constant 24 : index
    %c0_321 = arith.constant 0 : index
    %342 = vector.load %arg1[%c24_320, %c0_321] : memref<64x128xbf16, #tpu.memory_space<vmem>>, vector<7x128xbf16>
    %c768_322 = arith.constant 768 : index
    %c0_323 = arith.constant 0 : index
    %343 = vector.load %arg2[%c768_322, %c0_323] : memref<1280x128xbf16, #tpu.memory_space<vmem>>, vector<128x128xbf16>
    %cst_324 = arith.constant dense<0.000000e+00> : vector<7x128xf32>
    %344 = tpu.matmul %342, %343, %cst_324 {dimension_numbers = #tpu.dot_dimension_numbers<[1], [0], [0], [1], [0, 0, 1, 1], [], []>} : vector<7x128xbf16>, vector<128x128xbf16>, vector<7x128xf32> -> vector<7x128xf32>
    %345 = arith.addf %341, %344 : vector<7x128xf32>
    %c40_325 = arith.constant 40 : index
    %c0_326 = arith.constant 0 : index
    %346 = vector.load %arg1[%c40_325, %c0_326] : memref<64x128xbf16, #tpu.memory_space<vmem>>, vector<7x128xbf16>
    %c896_327 = arith.constant 896 : index
    %c0_328 = arith.constant 0 : index
    %347 = vector.load %arg2[%c896_327, %c0_328] : memref<1280x128xbf16, #tpu.memory_space<vmem>>, vector<128x128xbf16>
    %cst_329 = arith.constant dense<0.000000e+00> : vector<7x128xf32>
    %348 = tpu.matmul %346, %347, %cst_329 {dimension_numbers = #tpu.dot_dimension_numbers<[1], [0], [0], [1], [0, 0, 1, 1], [], []>} : vector<7x128xbf16>, vector<128x128xbf16>, vector<7x128xf32> -> vector<7x128xf32>
    %349 = arith.addf %345, %348 : vector<7x128xf32>
    %c56_330 = arith.constant 56 : index
    %c0_331 = arith.constant 0 : index
    %350 = vector.load %arg1[%c56_330, %c0_331] : memref<64x128xbf16, #tpu.memory_space<vmem>>, vector<7x128xbf16>
    %c1024_332 = arith.constant 1024 : index
    %c0_333 = arith.constant 0 : index
    %351 = vector.load %arg2[%c1024_332, %c0_333] : memref<1280x128xbf16, #tpu.memory_space<vmem>>, vector<128x128xbf16>
    %cst_334 = arith.constant dense<0.000000e+00> : vector<7x128xf32>
    %352 = tpu.matmul %350, %351, %cst_334 {dimension_numbers = #tpu.dot_dimension_numbers<[1], [0], [0], [1], [0, 0, 1, 1], [], []>} : vector<7x128xbf16>, vector<128x128xbf16>, vector<7x128xf32> -> vector<7x128xf32>
    %353 = arith.addf %349, %352 : vector<7x128xf32>
    %c9_335 = arith.constant 9 : index
    %c0_336 = arith.constant 0 : index
    %354 = vector.load %arg1[%c9_335, %c0_336] : memref<64x128xbf16, #tpu.memory_space<vmem>>, vector<7x128xbf16>
    %c1152_337 = arith.constant 1152 : index
    %c0_338 = arith.constant 0 : index
    %355 = vector.load %arg2[%c1152_337, %c0_338] : memref<1280x128xbf16, #tpu.memory_space<vmem>>, vector<128x128xbf16>
    %cst_339 = arith.constant dense<0.000000e+00> : vector<7x128xf32>
    %356 = tpu.matmul %354, %355, %cst_339 {dimension_numbers = #tpu.dot_dimension_numbers<[1], [0], [0], [1], [0, 0, 1, 1], [], []>} : vector<7x128xbf16>, vector<128x128xbf16>, vector<7x128xf32> -> vector<7x128xf32>
    %357 = arith.addf %353, %356 : vector<7x128xf32>
    %358 = arith.maximumf %336, %357 : vector<7x128xf32>
    %cst_340 = arith.constant 0.000000e+00 : f32
    %359 = vector.broadcast %cst_340 : f32 to vector<7x128xf32>
    %c24_341 = arith.constant 24 : index
    %c0_342 = arith.constant 0 : index
    %360 = vector.load %arg1[%c24_341, %c0_342] : memref<64x128xbf16, #tpu.memory_space<vmem>>, vector<7x128xbf16>
    %c0_343 = arith.constant 0 : index
    %c0_344 = arith.constant 0 : index
    %361 = vector.load %arg2[%c0_343, %c0_344] : memref<1280x128xbf16, #tpu.memory_space<vmem>>, vector<128x128xbf16>
    %cst_345 = arith.constant dense<0.000000e+00> : vector<7x128xf32>
    %362 = tpu.matmul %360, %361, %cst_345 {dimension_numbers = #tpu.dot_dimension_numbers<[1], [0], [0], [1], [0, 0, 1, 1], [], []>} : vector<7x128xbf16>, vector<128x128xbf16>, vector<7x128xf32> -> vector<7x128xf32>
    %363 = arith.addf %359, %362 : vector<7x128xf32>
    %c40_346 = arith.constant 40 : index
    %c0_347 = arith.constant 0 : index
    %364 = vector.load %arg1[%c40_346, %c0_347] : memref<64x128xbf16, #tpu.memory_space<vmem>>, vector<7x128xbf16>
    %c128_348 = arith.constant 128 : index
    %c0_349 = arith.constant 0 : index
    %365 = vector.load %arg2[%c128_348, %c0_349] : memref<1280x128xbf16, #tpu.memory_space<vmem>>, vector<128x128xbf16>
    %cst_350 = arith.constant dense<0.000000e+00> : vector<7x128xf32>
    %366 = tpu.matmul %364, %365, %cst_350 {dimension_numbers = #tpu.dot_dimension_numbers<[1], [0], [0], [1], [0, 0, 1, 1], [], []>} : vector<7x128xbf16>, vector<128x128xbf16>, vector<7x128xf32> -> vector<7x128xf32>
    %367 = arith.addf %363, %366 : vector<7x128xf32>
    %c56_351 = arith.constant 56 : index
    %c0_352 = arith.constant 0 : index
    %368 = vector.load %arg1[%c56_351, %c0_352] : memref<64x128xbf16, #tpu.memory_space<vmem>>, vector<7x128xbf16>
    %c256_353 = arith.constant 256 : index
    %c0_354 = arith.constant 0 : index
    %369 = vector.load %arg2[%c256_353, %c0_354] : memref<1280x128xbf16, #tpu.memory_space<vmem>>, vector<128x128xbf16>
    %cst_355 = arith.constant dense<0.000000e+00> : vector<7x128xf32>
    %370 = tpu.matmul %368, %369, %cst_355 {dimension_numbers = #tpu.dot_dimension_numbers<[1], [0], [0], [1], [0, 0, 1, 1], [], []>} : vector<7x128xbf16>, vector<128x128xbf16>, vector<7x128xf32> -> vector<7x128xf32>
    %371 = arith.addf %367, %370 : vector<7x128xf32>
    %c9_356 = arith.constant 9 : index
    %c0_357 = arith.constant 0 : index
    %372 = vector.load %arg1[%c9_356, %c0_357] : memref<64x128xbf16, #tpu.memory_space<vmem>>, vector<7x128xbf16>
    %c384_358 = arith.constant 384 : index
    %c0_359 = arith.constant 0 : index
    %373 = vector.load %arg2[%c384_358, %c0_359] : memref<1280x128xbf16, #tpu.memory_space<vmem>>, vector<128x128xbf16>
    %cst_360 = arith.constant dense<0.000000e+00> : vector<7x128xf32>
    %374 = tpu.matmul %372, %373, %cst_360 {dimension_numbers = #tpu.dot_dimension_numbers<[1], [0], [0], [1], [0, 0, 1, 1], [], []>} : vector<7x128xbf16>, vector<128x128xbf16>, vector<7x128xf32> -> vector<7x128xf32>
    %375 = arith.addf %371, %374 : vector<7x128xf32>
    %c25 = arith.constant 25 : index
    %c0_361 = arith.constant 0 : index
    %376 = vector.load %arg1[%c25, %c0_361] : memref<64x128xbf16, #tpu.memory_space<vmem>>, vector<7x128xbf16>
    %c512_362 = arith.constant 512 : index
    %c0_363 = arith.constant 0 : index
    %377 = vector.load %arg2[%c512_362, %c0_363] : memref<1280x128xbf16, #tpu.memory_space<vmem>>, vector<128x128xbf16>
    %cst_364 = arith.constant dense<0.000000e+00> : vector<7x128xf32>
    %378 = tpu.matmul %376, %377, %cst_364 {dimension_numbers = #tpu.dot_dimension_numbers<[1], [0], [0], [1], [0, 0, 1, 1], [], []>} : vector<7x128xbf16>, vector<128x128xbf16>, vector<7x128xf32> -> vector<7x128xf32>
    %379 = arith.addf %375, %378 : vector<7x128xf32>
    %380 = arith.maximumf %358, %379 : vector<7x128xf32>
    %cst_365 = arith.constant 0.000000e+00 : f32
    %381 = vector.broadcast %cst_365 : f32 to vector<7x128xf32>
    %c24_366 = arith.constant 24 : index
    %c0_367 = arith.constant 0 : index
    %382 = vector.load %arg1[%c24_366, %c0_367] : memref<64x128xbf16, #tpu.memory_space<vmem>>, vector<7x128xbf16>
    %c640_368 = arith.constant 640 : index
    %c0_369 = arith.constant 0 : index
    %383 = vector.load %arg2[%c640_368, %c0_369] : memref<1280x128xbf16, #tpu.memory_space<vmem>>, vector<128x128xbf16>
    %cst_370 = arith.constant dense<0.000000e+00> : vector<7x128xf32>
    %384 = tpu.matmul %382, %383, %cst_370 {dimension_numbers = #tpu.dot_dimension_numbers<[1], [0], [0], [1], [0, 0, 1, 1], [], []>} : vector<7x128xbf16>, vector<128x128xbf16>, vector<7x128xf32> -> vector<7x128xf32>
    %385 = arith.addf %381, %384 : vector<7x128xf32>
    %c40_371 = arith.constant 40 : index
    %c0_372 = arith.constant 0 : index
    %386 = vector.load %arg1[%c40_371, %c0_372] : memref<64x128xbf16, #tpu.memory_space<vmem>>, vector<7x128xbf16>
    %c768_373 = arith.constant 768 : index
    %c0_374 = arith.constant 0 : index
    %387 = vector.load %arg2[%c768_373, %c0_374] : memref<1280x128xbf16, #tpu.memory_space<vmem>>, vector<128x128xbf16>
    %cst_375 = arith.constant dense<0.000000e+00> : vector<7x128xf32>
    %388 = tpu.matmul %386, %387, %cst_375 {dimension_numbers = #tpu.dot_dimension_numbers<[1], [0], [0], [1], [0, 0, 1, 1], [], []>} : vector<7x128xbf16>, vector<128x128xbf16>, vector<7x128xf32> -> vector<7x128xf32>
    %389 = arith.addf %385, %388 : vector<7x128xf32>
    %c56_376 = arith.constant 56 : index
    %c0_377 = arith.constant 0 : index
    %390 = vector.load %arg1[%c56_376, %c0_377] : memref<64x128xbf16, #tpu.memory_space<vmem>>, vector<7x128xbf16>
    %c896_378 = arith.constant 896 : index
    %c0_379 = arith.constant 0 : index
    %391 = vector.load %arg2[%c896_378, %c0_379] : memref<1280x128xbf16, #tpu.memory_space<vmem>>, vector<128x128xbf16>
    %cst_380 = arith.constant dense<0.000000e+00> : vector<7x128xf32>
    %392 = tpu.matmul %390, %391, %cst_380 {dimension_numbers = #tpu.dot_dimension_numbers<[1], [0], [0], [1], [0, 0, 1, 1], [], []>} : vector<7x128xbf16>, vector<128x128xbf16>, vector<7x128xf32> -> vector<7x128xf32>
    %393 = arith.addf %389, %392 : vector<7x128xf32>
    %c9_381 = arith.constant 9 : index
    %c0_382 = arith.constant 0 : index
    %394 = vector.load %arg1[%c9_381, %c0_382] : memref<64x128xbf16, #tpu.memory_space<vmem>>, vector<7x128xbf16>
    %c1024_383 = arith.constant 1024 : index
    %c0_384 = arith.constant 0 : index
    %395 = vector.load %arg2[%c1024_383, %c0_384] : memref<1280x128xbf16, #tpu.memory_space<vmem>>, vector<128x128xbf16>
    %cst_385 = arith.constant dense<0.000000e+00> : vector<7x128xf32>
    %396 = tpu.matmul %394, %395, %cst_385 {dimension_numbers = #tpu.dot_dimension_numbers<[1], [0], [0], [1], [0, 0, 1, 1], [], []>} : vector<7x128xbf16>, vector<128x128xbf16>, vector<7x128xf32> -> vector<7x128xf32>
    %397 = arith.addf %393, %396 : vector<7x128xf32>
    %c25_386 = arith.constant 25 : index
    %c0_387 = arith.constant 0 : index
    %398 = vector.load %arg1[%c25_386, %c0_387] : memref<64x128xbf16, #tpu.memory_space<vmem>>, vector<7x128xbf16>
    %c1152_388 = arith.constant 1152 : index
    %c0_389 = arith.constant 0 : index
    %399 = vector.load %arg2[%c1152_388, %c0_389] : memref<1280x128xbf16, #tpu.memory_space<vmem>>, vector<128x128xbf16>
    %cst_390 = arith.constant dense<0.000000e+00> : vector<7x128xf32>
    %400 = tpu.matmul %398, %399, %cst_390 {dimension_numbers = #tpu.dot_dimension_numbers<[1], [0], [0], [1], [0, 0, 1, 1], [], []>} : vector<7x128xbf16>, vector<128x128xbf16>, vector<7x128xf32> -> vector<7x128xf32>
    %401 = arith.addf %397, %400 : vector<7x128xf32>
    %402 = arith.maximumf %380, %401 : vector<7x128xf32>
    %403 = vector.broadcast %0 : vector<1x128xf32> to vector<7x128xf32>
    %404 = arith.addf %402, %403 : vector<7x128xf32>
    %cst_391 = arith.constant 0.000000e+00 : f32
    %405 = vector.broadcast %cst_391 : f32 to vector<7x128xf32>
    %406 = arith.maximumf %404, %405 : vector<7x128xf32>
    %407 = arith.truncf %406 : vector<7x128xf32> to vector<7x128xbf16>
    %cst_392 = arith.constant 0.000000e+00 : f32
    %408 = vector.broadcast %cst_392 : f32 to vector<7x128xf32>
    %c40_393 = arith.constant 40 : index
    %c0_394 = arith.constant 0 : index
    %409 = vector.load %arg1[%c40_393, %c0_394] : memref<64x128xbf16, #tpu.memory_space<vmem>>, vector<7x128xbf16>
    %c0_395 = arith.constant 0 : index
    %c0_396 = arith.constant 0 : index
    %410 = vector.load %arg2[%c0_395, %c0_396] : memref<1280x128xbf16, #tpu.memory_space<vmem>>, vector<128x128xbf16>
    %cst_397 = arith.constant dense<0.000000e+00> : vector<7x128xf32>
    %411 = tpu.matmul %409, %410, %cst_397 {dimension_numbers = #tpu.dot_dimension_numbers<[1], [0], [0], [1], [0, 0, 1, 1], [], []>} : vector<7x128xbf16>, vector<128x128xbf16>, vector<7x128xf32> -> vector<7x128xf32>
    %412 = arith.addf %408, %411 : vector<7x128xf32>
    %c56_398 = arith.constant 56 : index
    %c0_399 = arith.constant 0 : index
    %413 = vector.load %arg1[%c56_398, %c0_399] : memref<64x128xbf16, #tpu.memory_space<vmem>>, vector<7x128xbf16>
    %c128_400 = arith.constant 128 : index
    %c0_401 = arith.constant 0 : index
    %414 = vector.load %arg2[%c128_400, %c0_401] : memref<1280x128xbf16, #tpu.memory_space<vmem>>, vector<128x128xbf16>
    %cst_402 = arith.constant dense<0.000000e+00> : vector<7x128xf32>
    %415 = tpu.matmul %413, %414, %cst_402 {dimension_numbers = #tpu.dot_dimension_numbers<[1], [0], [0], [1], [0, 0, 1, 1], [], []>} : vector<7x128xbf16>, vector<128x128xbf16>, vector<7x128xf32> -> vector<7x128xf32>
    %416 = arith.addf %412, %415 : vector<7x128xf32>
    %c9_403 = arith.constant 9 : index
    %c0_404 = arith.constant 0 : index
    %417 = vector.load %arg1[%c9_403, %c0_404] : memref<64x128xbf16, #tpu.memory_space<vmem>>, vector<7x128xbf16>
    %c256_405 = arith.constant 256 : index
    %c0_406 = arith.constant 0 : index
    %418 = vector.load %arg2[%c256_405, %c0_406] : memref<1280x128xbf16, #tpu.memory_space<vmem>>, vector<128x128xbf16>
    %cst_407 = arith.constant dense<0.000000e+00> : vector<7x128xf32>
    %419 = tpu.matmul %417, %418, %cst_407 {dimension_numbers = #tpu.dot_dimension_numbers<[1], [0], [0], [1], [0, 0, 1, 1], [], []>} : vector<7x128xbf16>, vector<128x128xbf16>, vector<7x128xf32> -> vector<7x128xf32>
    %420 = arith.addf %416, %419 : vector<7x128xf32>
    %c25_408 = arith.constant 25 : index
    %c0_409 = arith.constant 0 : index
    %421 = vector.load %arg1[%c25_408, %c0_409] : memref<64x128xbf16, #tpu.memory_space<vmem>>, vector<7x128xbf16>
    %c384_410 = arith.constant 384 : index
    %c0_411 = arith.constant 0 : index
    %422 = vector.load %arg2[%c384_410, %c0_411] : memref<1280x128xbf16, #tpu.memory_space<vmem>>, vector<128x128xbf16>
    %cst_412 = arith.constant dense<0.000000e+00> : vector<7x128xf32>
    %423 = tpu.matmul %421, %422, %cst_412 {dimension_numbers = #tpu.dot_dimension_numbers<[1], [0], [0], [1], [0, 0, 1, 1], [], []>} : vector<7x128xbf16>, vector<128x128xbf16>, vector<7x128xf32> -> vector<7x128xf32>
    %424 = arith.addf %420, %423 : vector<7x128xf32>
    %c41 = arith.constant 41 : index
    %c0_413 = arith.constant 0 : index
    %425 = vector.load %arg1[%c41, %c0_413] : memref<64x128xbf16, #tpu.memory_space<vmem>>, vector<7x128xbf16>
    %c512_414 = arith.constant 512 : index
    %c0_415 = arith.constant 0 : index
    %426 = vector.load %arg2[%c512_414, %c0_415] : memref<1280x128xbf16, #tpu.memory_space<vmem>>, vector<128x128xbf16>
    %cst_416 = arith.constant dense<0.000000e+00> : vector<7x128xf32>
    %427 = tpu.matmul %425, %426, %cst_416 {dimension_numbers = #tpu.dot_dimension_numbers<[1], [0], [0], [1], [0, 0, 1, 1], [], []>} : vector<7x128xbf16>, vector<128x128xbf16>, vector<7x128xf32> -> vector<7x128xf32>
    %428 = arith.addf %424, %427 : vector<7x128xf32>
    %cst_417 = arith.constant 0.000000e+00 : f32
    %429 = vector.broadcast %cst_417 : f32 to vector<7x128xf32>
    %c40_418 = arith.constant 40 : index
    %c0_419 = arith.constant 0 : index
    %430 = vector.load %arg1[%c40_418, %c0_419] : memref<64x128xbf16, #tpu.memory_space<vmem>>, vector<7x128xbf16>
    %c640_420 = arith.constant 640 : index
    %c0_421 = arith.constant 0 : index
    %431 = vector.load %arg2[%c640_420, %c0_421] : memref<1280x128xbf16, #tpu.memory_space<vmem>>, vector<128x128xbf16>
    %cst_422 = arith.constant dense<0.000000e+00> : vector<7x128xf32>
    %432 = tpu.matmul %430, %431, %cst_422 {dimension_numbers = #tpu.dot_dimension_numbers<[1], [0], [0], [1], [0, 0, 1, 1], [], []>} : vector<7x128xbf16>, vector<128x128xbf16>, vector<7x128xf32> -> vector<7x128xf32>
    %433 = arith.addf %429, %432 : vector<7x128xf32>
    %c56_423 = arith.constant 56 : index
    %c0_424 = arith.constant 0 : index
    %434 = vector.load %arg1[%c56_423, %c0_424] : memref<64x128xbf16, #tpu.memory_space<vmem>>, vector<7x128xbf16>
    %c768_425 = arith.constant 768 : index
    %c0_426 = arith.constant 0 : index
    %435 = vector.load %arg2[%c768_425, %c0_426] : memref<1280x128xbf16, #tpu.memory_space<vmem>>, vector<128x128xbf16>
    %cst_427 = arith.constant dense<0.000000e+00> : vector<7x128xf32>
    %436 = tpu.matmul %434, %435, %cst_427 {dimension_numbers = #tpu.dot_dimension_numbers<[1], [0], [0], [1], [0, 0, 1, 1], [], []>} : vector<7x128xbf16>, vector<128x128xbf16>, vector<7x128xf32> -> vector<7x128xf32>
    %437 = arith.addf %433, %436 : vector<7x128xf32>
    %c9_428 = arith.constant 9 : index
    %c0_429 = arith.constant 0 : index
    %438 = vector.load %arg1[%c9_428, %c0_429] : memref<64x128xbf16, #tpu.memory_space<vmem>>, vector<7x128xbf16>
    %c896_430 = arith.constant 896 : index
    %c0_431 = arith.constant 0 : index
    %439 = vector.load %arg2[%c896_430, %c0_431] : memref<1280x128xbf16, #tpu.memory_space<vmem>>, vector<128x128xbf16>
    %cst_432 = arith.constant dense<0.000000e+00> : vector<7x128xf32>
    %440 = tpu.matmul %438, %439, %cst_432 {dimension_numbers = #tpu.dot_dimension_numbers<[1], [0], [0], [1], [0, 0, 1, 1], [], []>} : vector<7x128xbf16>, vector<128x128xbf16>, vector<7x128xf32> -> vector<7x128xf32>
    %441 = arith.addf %437, %440 : vector<7x128xf32>
    %c25_433 = arith.constant 25 : index
    %c0_434 = arith.constant 0 : index
    %442 = vector.load %arg1[%c25_433, %c0_434] : memref<64x128xbf16, #tpu.memory_space<vmem>>, vector<7x128xbf16>
    %c1024_435 = arith.constant 1024 : index
    %c0_436 = arith.constant 0 : index
    %443 = vector.load %arg2[%c1024_435, %c0_436] : memref<1280x128xbf16, #tpu.memory_space<vmem>>, vector<128x128xbf16>
    %cst_437 = arith.constant dense<0.000000e+00> : vector<7x128xf32>
    %444 = tpu.matmul %442, %443, %cst_437 {dimension_numbers = #tpu.dot_dimension_numbers<[1], [0], [0], [1], [0, 0, 1, 1], [], []>} : vector<7x128xbf16>, vector<128x128xbf16>, vector<7x128xf32> -> vector<7x128xf32>
    %445 = arith.addf %441, %444 : vector<7x128xf32>
    %c41_438 = arith.constant 41 : index
    %c0_439 = arith.constant 0 : index
    %446 = vector.load %arg1[%c41_438, %c0_439] : memref<64x128xbf16, #tpu.memory_space<vmem>>, vector<7x128xbf16>
    %c1152_440 = arith.constant 1152 : index
    %c0_441 = arith.constant 0 : index
    %447 = vector.load %arg2[%c1152_440, %c0_441] : memref<1280x128xbf16, #tpu.memory_space<vmem>>, vector<128x128xbf16>
    %cst_442 = arith.constant dense<0.000000e+00> : vector<7x128xf32>
    %448 = tpu.matmul %446, %447, %cst_442 {dimension_numbers = #tpu.dot_dimension_numbers<[1], [0], [0], [1], [0, 0, 1, 1], [], []>} : vector<7x128xbf16>, vector<128x128xbf16>, vector<7x128xf32> -> vector<7x128xf32>
    %449 = arith.addf %445, %448 : vector<7x128xf32>
    %450 = arith.maximumf %428, %449 : vector<7x128xf32>
    %cst_443 = arith.constant 0.000000e+00 : f32
    %451 = vector.broadcast %cst_443 : f32 to vector<7x128xf32>
    %c56_444 = arith.constant 56 : index
    %c0_445 = arith.constant 0 : index
    %452 = vector.load %arg1[%c56_444, %c0_445] : memref<64x128xbf16, #tpu.memory_space<vmem>>, vector<7x128xbf16>
    %c0_446 = arith.constant 0 : index
    %c0_447 = arith.constant 0 : index
    %453 = vector.load %arg2[%c0_446, %c0_447] : memref<1280x128xbf16, #tpu.memory_space<vmem>>, vector<128x128xbf16>
    %cst_448 = arith.constant dense<0.000000e+00> : vector<7x128xf32>
    %454 = tpu.matmul %452, %453, %cst_448 {dimension_numbers = #tpu.dot_dimension_numbers<[1], [0], [0], [1], [0, 0, 1, 1], [], []>} : vector<7x128xbf16>, vector<128x128xbf16>, vector<7x128xf32> -> vector<7x128xf32>
    %455 = arith.addf %451, %454 : vector<7x128xf32>
    %c9_449 = arith.constant 9 : index
    %c0_450 = arith.constant 0 : index
    %456 = vector.load %arg1[%c9_449, %c0_450] : memref<64x128xbf16, #tpu.memory_space<vmem>>, vector<7x128xbf16>
    %c128_451 = arith.constant 128 : index
    %c0_452 = arith.constant 0 : index
    %457 = vector.load %arg2[%c128_451, %c0_452] : memref<1280x128xbf16, #tpu.memory_space<vmem>>, vector<128x128xbf16>
    %cst_453 = arith.constant dense<0.000000e+00> : vector<7x128xf32>
    %458 = tpu.matmul %456, %457, %cst_453 {dimension_numbers = #tpu.dot_dimension_numbers<[1], [0], [0], [1], [0, 0, 1, 1], [], []>} : vector<7x128xbf16>, vector<128x128xbf16>, vector<7x128xf32> -> vector<7x128xf32>
    %459 = arith.addf %455, %458 : vector<7x128xf32>
    %c25_454 = arith.constant 25 : index
    %c0_455 = arith.constant 0 : index
    %460 = vector.load %arg1[%c25_454, %c0_455] : memref<64x128xbf16, #tpu.memory_space<vmem>>, vector<7x128xbf16>
    %c256_456 = arith.constant 256 : index
    %c0_457 = arith.constant 0 : index
    %461 = vector.load %arg2[%c256_456, %c0_457] : memref<1280x128xbf16, #tpu.memory_space<vmem>>, vector<128x128xbf16>
    %cst_458 = arith.constant dense<0.000000e+00> : vector<7x128xf32>
    %462 = tpu.matmul %460, %461, %cst_458 {dimension_numbers = #tpu.dot_dimension_numbers<[1], [0], [0], [1], [0, 0, 1, 1], [], []>} : vector<7x128xbf16>, vector<128x128xbf16>, vector<7x128xf32> -> vector<7x128xf32>
    %463 = arith.addf %459, %462 : vector<7x128xf32>
    %c41_459 = arith.constant 41 : index
    %c0_460 = arith.constant 0 : index
    %464 = vector.load %arg1[%c41_459, %c0_460] : memref<64x128xbf16, #tpu.memory_space<vmem>>, vector<7x128xbf16>
    %c384_461 = arith.constant 384 : index
    %c0_462 = arith.constant 0 : index
    %465 = vector.load %arg2[%c384_461, %c0_462] : memref<1280x128xbf16, #tpu.memory_space<vmem>>, vector<128x128xbf16>
    %cst_463 = arith.constant dense<0.000000e+00> : vector<7x128xf32>
    %466 = tpu.matmul %464, %465, %cst_463 {dimension_numbers = #tpu.dot_dimension_numbers<[1], [0], [0], [1], [0, 0, 1, 1], [], []>} : vector<7x128xbf16>, vector<128x128xbf16>, vector<7x128xf32> -> vector<7x128xf32>
    %467 = arith.addf %463, %466 : vector<7x128xf32>
    %c57 = arith.constant 57 : index
    %c0_464 = arith.constant 0 : index
    %468 = vector.load %arg1[%c57, %c0_464] : memref<64x128xbf16, #tpu.memory_space<vmem>>, vector<7x128xbf16>
    %c512_465 = arith.constant 512 : index
    %c0_466 = arith.constant 0 : index
    %469 = vector.load %arg2[%c512_465, %c0_466] : memref<1280x128xbf16, #tpu.memory_space<vmem>>, vector<128x128xbf16>
    %cst_467 = arith.constant dense<0.000000e+00> : vector<7x128xf32>
    %470 = tpu.matmul %468, %469, %cst_467 {dimension_numbers = #tpu.dot_dimension_numbers<[1], [0], [0], [1], [0, 0, 1, 1], [], []>} : vector<7x128xbf16>, vector<128x128xbf16>, vector<7x128xf32> -> vector<7x128xf32>
    %471 = arith.addf %467, %470 : vector<7x128xf32>
    %472 = arith.maximumf %450, %471 : vector<7x128xf32>
    %cst_468 = arith.constant 0.000000e+00 : f32
    %473 = vector.broadcast %cst_468 : f32 to vector<7x128xf32>
    %c56_469 = arith.constant 56 : index
    %c0_470 = arith.constant 0 : index
    %474 = vector.load %arg1[%c56_469, %c0_470] : memref<64x128xbf16, #tpu.memory_space<vmem>>, vector<7x128xbf16>
    %c640_471 = arith.constant 640 : index
    %c0_472 = arith.constant 0 : index
    %475 = vector.load %arg2[%c640_471, %c0_472] : memref<1280x128xbf16, #tpu.memory_space<vmem>>, vector<128x128xbf16>
    %cst_473 = arith.constant dense<0.000000e+00> : vector<7x128xf32>
    %476 = tpu.matmul %474, %475, %cst_473 {dimension_numbers = #tpu.dot_dimension_numbers<[1], [0], [0], [1], [0, 0, 1, 1], [], []>} : vector<7x128xbf16>, vector<128x128xbf16>, vector<7x128xf32> -> vector<7x128xf32>
    %477 = arith.addf %473, %476 : vector<7x128xf32>
    %c9_474 = arith.constant 9 : index
    %c0_475 = arith.constant 0 : index
    %478 = vector.load %arg1[%c9_474, %c0_475] : memref<64x128xbf16, #tpu.memory_space<vmem>>, vector<7x128xbf16>
    %c768_476 = arith.constant 768 : index
    %c0_477 = arith.constant 0 : index
    %479 = vector.load %arg2[%c768_476, %c0_477] : memref<1280x128xbf16, #tpu.memory_space<vmem>>, vector<128x128xbf16>
    %cst_478 = arith.constant dense<0.000000e+00> : vector<7x128xf32>
    %480 = tpu.matmul %478, %479, %cst_478 {dimension_numbers = #tpu.dot_dimension_numbers<[1], [0], [0], [1], [0, 0, 1, 1], [], []>} : vector<7x128xbf16>, vector<128x128xbf16>, vector<7x128xf32> -> vector<7x128xf32>
    %481 = arith.addf %477, %480 : vector<7x128xf32>
    %c25_479 = arith.constant 25 : index
    %c0_480 = arith.constant 0 : index
    %482 = vector.load %arg1[%c25_479, %c0_480] : memref<64x128xbf16, #tpu.memory_space<vmem>>, vector<7x128xbf16>
    %c896_481 = arith.constant 896 : index
    %c0_482 = arith.constant 0 : index
    %483 = vector.load %arg2[%c896_481, %c0_482] : memref<1280x128xbf16, #tpu.memory_space<vmem>>, vector<128x128xbf16>
    %cst_483 = arith.constant dense<0.000000e+00> : vector<7x128xf32>
    %484 = tpu.matmul %482, %483, %cst_483 {dimension_numbers = #tpu.dot_dimension_numbers<[1], [0], [0], [1], [0, 0, 1, 1], [], []>} : vector<7x128xbf16>, vector<128x128xbf16>, vector<7x128xf32> -> vector<7x128xf32>
    %485 = arith.addf %481, %484 : vector<7x128xf32>
    %c41_484 = arith.constant 41 : index
    %c0_485 = arith.constant 0 : index
    %486 = vector.load %arg1[%c41_484, %c0_485] : memref<64x128xbf16, #tpu.memory_space<vmem>>, vector<7x128xbf16>
    %c1024_486 = arith.constant 1024 : index
    %c0_487 = arith.constant 0 : index
    %487 = vector.load %arg2[%c1024_486, %c0_487] : memref<1280x128xbf16, #tpu.memory_space<vmem>>, vector<128x128xbf16>
    %cst_488 = arith.constant dense<0.000000e+00> : vector<7x128xf32>
    %488 = tpu.matmul %486, %487, %cst_488 {dimension_numbers = #tpu.dot_dimension_numbers<[1], [0], [0], [1], [0, 0, 1, 1], [], []>} : vector<7x128xbf16>, vector<128x128xbf16>, vector<7x128xf32> -> vector<7x128xf32>
    %489 = arith.addf %485, %488 : vector<7x128xf32>
    %c57_489 = arith.constant 57 : index
    %c0_490 = arith.constant 0 : index
    %490 = vector.load %arg1[%c57_489, %c0_490] : memref<64x128xbf16, #tpu.memory_space<vmem>>, vector<7x128xbf16>
    %c1152_491 = arith.constant 1152 : index
    %c0_492 = arith.constant 0 : index
    %491 = vector.load %arg2[%c1152_491, %c0_492] : memref<1280x128xbf16, #tpu.memory_space<vmem>>, vector<128x128xbf16>
    %cst_493 = arith.constant dense<0.000000e+00> : vector<7x128xf32>
    %492 = tpu.matmul %490, %491, %cst_493 {dimension_numbers = #tpu.dot_dimension_numbers<[1], [0], [0], [1], [0, 0, 1, 1], [], []>} : vector<7x128xbf16>, vector<128x128xbf16>, vector<7x128xf32> -> vector<7x128xf32>
    %493 = arith.addf %489, %492 : vector<7x128xf32>
    %494 = arith.maximumf %472, %493 : vector<7x128xf32>
    %495 = vector.broadcast %0 : vector<1x128xf32> to vector<7x128xf32>
    %496 = arith.addf %494, %495 : vector<7x128xf32>
    %cst_494 = arith.constant 0.000000e+00 : f32
    %497 = vector.broadcast %cst_494 : f32 to vector<7x128xf32>
    %498 = arith.maximumf %496, %497 : vector<7x128xf32>
    %499 = arith.truncf %498 : vector<7x128xf32> to vector<7x128xbf16>
    %cst_495 = arith.constant 0.000000e+00 : f32
    %500 = vector.broadcast %cst_495 : f32 to vector<5x128xf32>
    %501 = vector.extract_strided_slice %407 {offsets = [0, 0], sizes = [5, 128], strides = [1, 1]} : vector<7x128xbf16> to vector<5x128xbf16>
    %c0_496 = arith.constant 0 : index
    %c0_497 = arith.constant 0 : index
    %502 = vector.load %arg4[%c0_496, %c0_497] : memref<1280x128xbf16, #tpu.memory_space<vmem>>, vector<128x128xbf16>
    %cst_498 = arith.constant dense<0.000000e+00> : vector<5x128xf32>
    %503 = tpu.matmul %501, %502, %cst_498 {dimension_numbers = #tpu.dot_dimension_numbers<[1], [0], [0], [1], [0, 0, 1, 1], [], []>} : vector<5x128xbf16>, vector<128x128xbf16>, vector<5x128xf32> -> vector<5x128xf32>
    %504 = arith.addf %500, %503 : vector<5x128xf32>
    %505 = vector.extract_strided_slice %499 {offsets = [0, 0], sizes = [5, 128], strides = [1, 1]} : vector<7x128xbf16> to vector<5x128xbf16>
    %c128_499 = arith.constant 128 : index
    %c0_500 = arith.constant 0 : index
    %506 = vector.load %arg4[%c128_499, %c0_500] : memref<1280x128xbf16, #tpu.memory_space<vmem>>, vector<128x128xbf16>
    %cst_501 = arith.constant dense<0.000000e+00> : vector<5x128xf32>
    %507 = tpu.matmul %505, %506, %cst_501 {dimension_numbers = #tpu.dot_dimension_numbers<[1], [0], [0], [1], [0, 0, 1, 1], [], []>} : vector<5x128xbf16>, vector<128x128xbf16>, vector<5x128xf32> -> vector<5x128xf32>
    %508 = arith.addf %504, %507 : vector<5x128xf32>
    %509 = vector.extract_strided_slice %407 {offsets = [1, 0], sizes = [5, 128], strides = [1, 1]} : vector<7x128xbf16> to vector<5x128xbf16>
    %c256_502 = arith.constant 256 : index
    %c0_503 = arith.constant 0 : index
    %510 = vector.load %arg4[%c256_502, %c0_503] : memref<1280x128xbf16, #tpu.memory_space<vmem>>, vector<128x128xbf16>
    %cst_504 = arith.constant dense<0.000000e+00> : vector<5x128xf32>
    %511 = tpu.matmul %509, %510, %cst_504 {dimension_numbers = #tpu.dot_dimension_numbers<[1], [0], [0], [1], [0, 0, 1, 1], [], []>} : vector<5x128xbf16>, vector<128x128xbf16>, vector<5x128xf32> -> vector<5x128xf32>
    %512 = arith.addf %508, %511 : vector<5x128xf32>
    %513 = vector.extract_strided_slice %499 {offsets = [1, 0], sizes = [5, 128], strides = [1, 1]} : vector<7x128xbf16> to vector<5x128xbf16>
    %c384_505 = arith.constant 384 : index
    %c0_506 = arith.constant 0 : index
    %514 = vector.load %arg4[%c384_505, %c0_506] : memref<1280x128xbf16, #tpu.memory_space<vmem>>, vector<128x128xbf16>
    %cst_507 = arith.constant dense<0.000000e+00> : vector<5x128xf32>
    %515 = tpu.matmul %513, %514, %cst_507 {dimension_numbers = #tpu.dot_dimension_numbers<[1], [0], [0], [1], [0, 0, 1, 1], [], []>} : vector<5x128xbf16>, vector<128x128xbf16>, vector<5x128xf32> -> vector<5x128xf32>
    %516 = arith.addf %512, %515 : vector<5x128xf32>
    %517 = vector.extract_strided_slice %407 {offsets = [2, 0], sizes = [5, 128], strides = [1, 1]} : vector<7x128xbf16> to vector<5x128xbf16>
    %c512_508 = arith.constant 512 : index
    %c0_509 = arith.constant 0 : index
    %518 = vector.load %arg4[%c512_508, %c0_509] : memref<1280x128xbf16, #tpu.memory_space<vmem>>, vector<128x128xbf16>
    %cst_510 = arith.constant dense<0.000000e+00> : vector<5x128xf32>
    %519 = tpu.matmul %517, %518, %cst_510 {dimension_numbers = #tpu.dot_dimension_numbers<[1], [0], [0], [1], [0, 0, 1, 1], [], []>} : vector<5x128xbf16>, vector<128x128xbf16>, vector<5x128xf32> -> vector<5x128xf32>
    %520 = arith.addf %516, %519 : vector<5x128xf32>
    %cst_511 = arith.constant 0.000000e+00 : f32
    %521 = vector.broadcast %cst_511 : f32 to vector<5x128xf32>
    %522 = vector.extract_strided_slice %407 {offsets = [0, 0], sizes = [5, 128], strides = [1, 1]} : vector<7x128xbf16> to vector<5x128xbf16>
    %c640_512 = arith.constant 640 : index
    %c0_513 = arith.constant 0 : index
    %523 = vector.load %arg4[%c640_512, %c0_513] : memref<1280x128xbf16, #tpu.memory_space<vmem>>, vector<128x128xbf16>
    %cst_514 = arith.constant dense<0.000000e+00> : vector<5x128xf32>
    %524 = tpu.matmul %522, %523, %cst_514 {dimension_numbers = #tpu.dot_dimension_numbers<[1], [0], [0], [1], [0, 0, 1, 1], [], []>} : vector<5x128xbf16>, vector<128x128xbf16>, vector<5x128xf32> -> vector<5x128xf32>
    %525 = arith.addf %521, %524 : vector<5x128xf32>
    %526 = vector.extract_strided_slice %499 {offsets = [0, 0], sizes = [5, 128], strides = [1, 1]} : vector<7x128xbf16> to vector<5x128xbf16>
    %c768_515 = arith.constant 768 : index
    %c0_516 = arith.constant 0 : index
    %527 = vector.load %arg4[%c768_515, %c0_516] : memref<1280x128xbf16, #tpu.memory_space<vmem>>, vector<128x128xbf16>
    %cst_517 = arith.constant dense<0.000000e+00> : vector<5x128xf32>
    %528 = tpu.matmul %526, %527, %cst_517 {dimension_numbers = #tpu.dot_dimension_numbers<[1], [0], [0], [1], [0, 0, 1, 1], [], []>} : vector<5x128xbf16>, vector<128x128xbf16>, vector<5x128xf32> -> vector<5x128xf32>
    %529 = arith.addf %525, %528 : vector<5x128xf32>
    %530 = vector.extract_strided_slice %407 {offsets = [1, 0], sizes = [5, 128], strides = [1, 1]} : vector<7x128xbf16> to vector<5x128xbf16>
    %c896_518 = arith.constant 896 : index
    %c0_519 = arith.constant 0 : index
    %531 = vector.load %arg4[%c896_518, %c0_519] : memref<1280x128xbf16, #tpu.memory_space<vmem>>, vector<128x128xbf16>
    %cst_520 = arith.constant dense<0.000000e+00> : vector<5x128xf32>
    %532 = tpu.matmul %530, %531, %cst_520 {dimension_numbers = #tpu.dot_dimension_numbers<[1], [0], [0], [1], [0, 0, 1, 1], [], []>} : vector<5x128xbf16>, vector<128x128xbf16>, vector<5x128xf32> -> vector<5x128xf32>
    %533 = arith.addf %529, %532 : vector<5x128xf32>
    %534 = vector.extract_strided_slice %499 {offsets = [1, 0], sizes = [5, 128], strides = [1, 1]} : vector<7x128xbf16> to vector<5x128xbf16>
    %c1024_521 = arith.constant 1024 : index
    %c0_522 = arith.constant 0 : index
    %535 = vector.load %arg4[%c1024_521, %c0_522] : memref<1280x128xbf16, #tpu.memory_space<vmem>>, vector<128x128xbf16>
    %cst_523 = arith.constant dense<0.000000e+00> : vector<5x128xf32>
    %536 = tpu.matmul %534, %535, %cst_523 {dimension_numbers = #tpu.dot_dimension_numbers<[1], [0], [0], [1], [0, 0, 1, 1], [], []>} : vector<5x128xbf16>, vector<128x128xbf16>, vector<5x128xf32> -> vector<5x128xf32>
    %537 = arith.addf %533, %536 : vector<5x128xf32>
    %538 = vector.extract_strided_slice %407 {offsets = [2, 0], sizes = [5, 128], strides = [1, 1]} : vector<7x128xbf16> to vector<5x128xbf16>
    %c1152_524 = arith.constant 1152 : index
    %c0_525 = arith.constant 0 : index
    %539 = vector.load %arg4[%c1152_524, %c0_525] : memref<1280x128xbf16, #tpu.memory_space<vmem>>, vector<128x128xbf16>
    %cst_526 = arith.constant dense<0.000000e+00> : vector<5x128xf32>
    %540 = tpu.matmul %538, %539, %cst_526 {dimension_numbers = #tpu.dot_dimension_numbers<[1], [0], [0], [1], [0, 0, 1, 1], [], []>} : vector<5x128xbf16>, vector<128x128xbf16>, vector<5x128xf32> -> vector<5x128xf32>
    %541 = arith.addf %537, %540 : vector<5x128xf32>
    %542 = arith.maximumf %520, %541 : vector<5x128xf32>
    %cst_527 = arith.constant 0.000000e+00 : f32
    %543 = vector.broadcast %cst_527 : f32 to vector<5x128xf32>
    %544 = vector.extract_strided_slice %499 {offsets = [0, 0], sizes = [5, 128], strides = [1, 1]} : vector<7x128xbf16> to vector<5x128xbf16>
    %c0_528 = arith.constant 0 : index
    %c0_529 = arith.constant 0 : index
    %545 = vector.load %arg4[%c0_528, %c0_529] : memref<1280x128xbf16, #tpu.memory_space<vmem>>, vector<128x128xbf16>
    %cst_530 = arith.constant dense<0.000000e+00> : vector<5x128xf32>
    %546 = tpu.matmul %544, %545, %cst_530 {dimension_numbers = #tpu.dot_dimension_numbers<[1], [0], [0], [1], [0, 0, 1, 1], [], []>} : vector<5x128xbf16>, vector<128x128xbf16>, vector<5x128xf32> -> vector<5x128xf32>
    %547 = arith.addf %543, %546 : vector<5x128xf32>
    %548 = vector.extract_strided_slice %407 {offsets = [1, 0], sizes = [5, 128], strides = [1, 1]} : vector<7x128xbf16> to vector<5x128xbf16>
    %c128_531 = arith.constant 128 : index
    %c0_532 = arith.constant 0 : index
    %549 = vector.load %arg4[%c128_531, %c0_532] : memref<1280x128xbf16, #tpu.memory_space<vmem>>, vector<128x128xbf16>
    %cst_533 = arith.constant dense<0.000000e+00> : vector<5x128xf32>
    %550 = tpu.matmul %548, %549, %cst_533 {dimension_numbers = #tpu.dot_dimension_numbers<[1], [0], [0], [1], [0, 0, 1, 1], [], []>} : vector<5x128xbf16>, vector<128x128xbf16>, vector<5x128xf32> -> vector<5x128xf32>
    %551 = arith.addf %547, %550 : vector<5x128xf32>
    %552 = vector.extract_strided_slice %499 {offsets = [1, 0], sizes = [5, 128], strides = [1, 1]} : vector<7x128xbf16> to vector<5x128xbf16>
    %c256_534 = arith.constant 256 : index
    %c0_535 = arith.constant 0 : index
    %553 = vector.load %arg4[%c256_534, %c0_535] : memref<1280x128xbf16, #tpu.memory_space<vmem>>, vector<128x128xbf16>
    %cst_536 = arith.constant dense<0.000000e+00> : vector<5x128xf32>
    %554 = tpu.matmul %552, %553, %cst_536 {dimension_numbers = #tpu.dot_dimension_numbers<[1], [0], [0], [1], [0, 0, 1, 1], [], []>} : vector<5x128xbf16>, vector<128x128xbf16>, vector<5x128xf32> -> vector<5x128xf32>
    %555 = arith.addf %551, %554 : vector<5x128xf32>
    %556 = vector.extract_strided_slice %407 {offsets = [2, 0], sizes = [5, 128], strides = [1, 1]} : vector<7x128xbf16> to vector<5x128xbf16>
    %c384_537 = arith.constant 384 : index
    %c0_538 = arith.constant 0 : index
    %557 = vector.load %arg4[%c384_537, %c0_538] : memref<1280x128xbf16, #tpu.memory_space<vmem>>, vector<128x128xbf16>
    %cst_539 = arith.constant dense<0.000000e+00> : vector<5x128xf32>
    %558 = tpu.matmul %556, %557, %cst_539 {dimension_numbers = #tpu.dot_dimension_numbers<[1], [0], [0], [1], [0, 0, 1, 1], [], []>} : vector<5x128xbf16>, vector<128x128xbf16>, vector<5x128xf32> -> vector<5x128xf32>
    %559 = arith.addf %555, %558 : vector<5x128xf32>
    %560 = vector.extract_strided_slice %499 {offsets = [2, 0], sizes = [5, 128], strides = [1, 1]} : vector<7x128xbf16> to vector<5x128xbf16>
    %c512_540 = arith.constant 512 : index
    %c0_541 = arith.constant 0 : index
    %561 = vector.load %arg4[%c512_540, %c0_541] : memref<1280x128xbf16, #tpu.memory_space<vmem>>, vector<128x128xbf16>
    %cst_542 = arith.constant dense<0.000000e+00> : vector<5x128xf32>
    %562 = tpu.matmul %560, %561, %cst_542 {dimension_numbers = #tpu.dot_dimension_numbers<[1], [0], [0], [1], [0, 0, 1, 1], [], []>} : vector<5x128xbf16>, vector<128x128xbf16>, vector<5x128xf32> -> vector<5x128xf32>
    %563 = arith.addf %559, %562 : vector<5x128xf32>
    %564 = arith.maximumf %542, %563 : vector<5x128xf32>
    %cst_543 = arith.constant 0.000000e+00 : f32
    %565 = vector.broadcast %cst_543 : f32 to vector<5x128xf32>
    %566 = vector.extract_strided_slice %499 {offsets = [0, 0], sizes = [5, 128], strides = [1, 1]} : vector<7x128xbf16> to vector<5x128xbf16>
    %c640_544 = arith.constant 640 : index
    %c0_545 = arith.constant 0 : index
    %567 = vector.load %arg4[%c640_544, %c0_545] : memref<1280x128xbf16, #tpu.memory_space<vmem>>, vector<128x128xbf16>
    %cst_546 = arith.constant dense<0.000000e+00> : vector<5x128xf32>
    %568 = tpu.matmul %566, %567, %cst_546 {dimension_numbers = #tpu.dot_dimension_numbers<[1], [0], [0], [1], [0, 0, 1, 1], [], []>} : vector<5x128xbf16>, vector<128x128xbf16>, vector<5x128xf32> -> vector<5x128xf32>
    %569 = arith.addf %565, %568 : vector<5x128xf32>
    %570 = vector.extract_strided_slice %407 {offsets = [1, 0], sizes = [5, 128], strides = [1, 1]} : vector<7x128xbf16> to vector<5x128xbf16>
    %c768_547 = arith.constant 768 : index
    %c0_548 = arith.constant 0 : index
    %571 = vector.load %arg4[%c768_547, %c0_548] : memref<1280x128xbf16, #tpu.memory_space<vmem>>, vector<128x128xbf16>
    %cst_549 = arith.constant dense<0.000000e+00> : vector<5x128xf32>
    %572 = tpu.matmul %570, %571, %cst_549 {dimension_numbers = #tpu.dot_dimension_numbers<[1], [0], [0], [1], [0, 0, 1, 1], [], []>} : vector<5x128xbf16>, vector<128x128xbf16>, vector<5x128xf32> -> vector<5x128xf32>
    %573 = arith.addf %569, %572 : vector<5x128xf32>
    %574 = vector.extract_strided_slice %499 {offsets = [1, 0], sizes = [5, 128], strides = [1, 1]} : vector<7x128xbf16> to vector<5x128xbf16>
    %c896_550 = arith.constant 896 : index
    %c0_551 = arith.constant 0 : index
    %575 = vector.load %arg4[%c896_550, %c0_551] : memref<1280x128xbf16, #tpu.memory_space<vmem>>, vector<128x128xbf16>
    %cst_552 = arith.constant dense<0.000000e+00> : vector<5x128xf32>
    %576 = tpu.matmul %574, %575, %cst_552 {dimension_numbers = #tpu.dot_dimension_numbers<[1], [0], [0], [1], [0, 0, 1, 1], [], []>} : vector<5x128xbf16>, vector<128x128xbf16>, vector<5x128xf32> -> vector<5x128xf32>
    %577 = arith.addf %573, %576 : vector<5x128xf32>
    %578 = vector.extract_strided_slice %407 {offsets = [2, 0], sizes = [5, 128], strides = [1, 1]} : vector<7x128xbf16> to vector<5x128xbf16>
    %c1024_553 = arith.constant 1024 : index
    %c0_554 = arith.constant 0 : index
    %579 = vector.load %arg4[%c1024_553, %c0_554] : memref<1280x128xbf16, #tpu.memory_space<vmem>>, vector<128x128xbf16>
    %cst_555 = arith.constant dense<0.000000e+00> : vector<5x128xf32>
    %580 = tpu.matmul %578, %579, %cst_555 {dimension_numbers = #tpu.dot_dimension_numbers<[1], [0], [0], [1], [0, 0, 1, 1], [], []>} : vector<5x128xbf16>, vector<128x128xbf16>, vector<5x128xf32> -> vector<5x128xf32>
    %581 = arith.addf %577, %580 : vector<5x128xf32>
    %582 = vector.extract_strided_slice %499 {offsets = [2, 0], sizes = [5, 128], strides = [1, 1]} : vector<7x128xbf16> to vector<5x128xbf16>
    %c1152_556 = arith.constant 1152 : index
    %c0_557 = arith.constant 0 : index
    %583 = vector.load %arg4[%c1152_556, %c0_557] : memref<1280x128xbf16, #tpu.memory_space<vmem>>, vector<128x128xbf16>
    %cst_558 = arith.constant dense<0.000000e+00> : vector<5x128xf32>
    %584 = tpu.matmul %582, %583, %cst_558 {dimension_numbers = #tpu.dot_dimension_numbers<[1], [0], [0], [1], [0, 0, 1, 1], [], []>} : vector<5x128xbf16>, vector<128x128xbf16>, vector<5x128xf32> -> vector<5x128xf32>
    %585 = arith.addf %581, %584 : vector<5x128xf32>
    %586 = arith.maximumf %564, %585 : vector<5x128xf32>
    %587 = vector.broadcast %1 : vector<1x128xf32> to vector<5x128xf32>
    %588 = arith.addf %586, %587 : vector<5x128xf32>
    %cst_559 = arith.constant 0.000000e+00 : f32
    %589 = vector.broadcast %cst_559 : f32 to vector<5x128xf32>
    %590 = arith.maximumf %588, %589 : vector<5x128xf32>
    %591 = arith.truncf %590 : vector<5x128xf32> to vector<5x128xbf16>
    %cst_560 = arith.constant 0.000000e+00 : f32
    %592 = vector.broadcast %cst_560 : f32 to vector<1x128xf32>
    %593 = vector.extract_strided_slice %591 {offsets = [0, 0], sizes = [1, 128], strides = [1, 1]} : vector<5x128xbf16> to vector<1x128xbf16>
    %c0_561 = arith.constant 0 : index
    %c0_562 = arith.constant 0 : index
    %594 = vector.load %arg6[%c0_561, %c0_562] : memref<640x128xbf16, #tpu.memory_space<vmem>>, vector<128x128xbf16>
    %cst_563 = arith.constant dense<0.000000e+00> : vector<1x128xf32>
    %595 = tpu.matmul %593, %594, %cst_563 {dimension_numbers = #tpu.dot_dimension_numbers<[1], [0], [0], [1], [0, 0, 1, 1], [], []>} : vector<1x128xbf16>, vector<128x128xbf16>, vector<1x128xf32> -> vector<1x128xf32>
    %596 = arith.addf %592, %595 : vector<1x128xf32>
    %597 = vector.extract_strided_slice %591 {offsets = [1, 0], sizes = [1, 128], strides = [1, 1]} : vector<5x128xbf16> to vector<1x128xbf16>
    %c128_564 = arith.constant 128 : index
    %c0_565 = arith.constant 0 : index
    %598 = vector.load %arg6[%c128_564, %c0_565] : memref<640x128xbf16, #tpu.memory_space<vmem>>, vector<128x128xbf16>
    %cst_566 = arith.constant dense<0.000000e+00> : vector<1x128xf32>
    %599 = tpu.matmul %597, %598, %cst_566 {dimension_numbers = #tpu.dot_dimension_numbers<[1], [0], [0], [1], [0, 0, 1, 1], [], []>} : vector<1x128xbf16>, vector<128x128xbf16>, vector<1x128xf32> -> vector<1x128xf32>
    %600 = arith.addf %596, %599 : vector<1x128xf32>
    %601 = vector.extract_strided_slice %591 {offsets = [2, 0], sizes = [1, 128], strides = [1, 1]} : vector<5x128xbf16> to vector<1x128xbf16>
    %c256_567 = arith.constant 256 : index
    %c0_568 = arith.constant 0 : index
    %602 = vector.load %arg6[%c256_567, %c0_568] : memref<640x128xbf16, #tpu.memory_space<vmem>>, vector<128x128xbf16>
    %cst_569 = arith.constant dense<0.000000e+00> : vector<1x128xf32>
    %603 = tpu.matmul %601, %602, %cst_569 {dimension_numbers = #tpu.dot_dimension_numbers<[1], [0], [0], [1], [0, 0, 1, 1], [], []>} : vector<1x128xbf16>, vector<128x128xbf16>, vector<1x128xf32> -> vector<1x128xf32>
    %604 = arith.addf %600, %603 : vector<1x128xf32>
    %605 = vector.extract_strided_slice %591 {offsets = [3, 0], sizes = [1, 128], strides = [1, 1]} : vector<5x128xbf16> to vector<1x128xbf16>
    %c384_570 = arith.constant 384 : index
    %c0_571 = arith.constant 0 : index
    %606 = vector.load %arg6[%c384_570, %c0_571] : memref<640x128xbf16, #tpu.memory_space<vmem>>, vector<128x128xbf16>
    %cst_572 = arith.constant dense<0.000000e+00> : vector<1x128xf32>
    %607 = tpu.matmul %605, %606, %cst_572 {dimension_numbers = #tpu.dot_dimension_numbers<[1], [0], [0], [1], [0, 0, 1, 1], [], []>} : vector<1x128xbf16>, vector<128x128xbf16>, vector<1x128xf32> -> vector<1x128xf32>
    %608 = arith.addf %604, %607 : vector<1x128xf32>
    %609 = vector.extract_strided_slice %591 {offsets = [4, 0], sizes = [1, 128], strides = [1, 1]} : vector<5x128xbf16> to vector<1x128xbf16>
    %c512_573 = arith.constant 512 : index
    %c0_574 = arith.constant 0 : index
    %610 = vector.load %arg6[%c512_573, %c0_574] : memref<640x128xbf16, #tpu.memory_space<vmem>>, vector<128x128xbf16>
    %cst_575 = arith.constant dense<0.000000e+00> : vector<1x128xf32>
    %611 = tpu.matmul %609, %610, %cst_575 {dimension_numbers = #tpu.dot_dimension_numbers<[1], [0], [0], [1], [0, 0, 1, 1], [], []>} : vector<1x128xbf16>, vector<128x128xbf16>, vector<1x128xf32> -> vector<1x128xf32>
    %612 = arith.addf %608, %611 : vector<1x128xf32>
    %613 = arith.addf %612, %2 : vector<1x128xf32>
    %cst_576 = arith.constant 0.000000e+00 : f32
    %614 = vector.broadcast %cst_576 : f32 to vector<1x128xf32>
    %615 = arith.maximumf %613, %614 : vector<1x128xf32>
    %616 = arith.truncf %615 : vector<1x128xf32> to vector<1x128xbf16>
    %cst_577 = arith.constant dense<0.000000e+00> : vector<1x128xf32>
    %617 = tpu.matmul %616, %5, %cst_577 {dimension_numbers = #tpu.dot_dimension_numbers<[1], [0], [0], [1], [0, 0, 1, 1], [], []>} : vector<1x128xbf16>, vector<128x128xbf16>, vector<1x128xf32> -> vector<1x128xf32>
    %618 = arith.addf %617, %3 : vector<1x128xf32>
    %cst_578 = arith.constant 0.000000e+00 : f32
    %619 = vector.broadcast %cst_578 : f32 to vector<1x128xf32>
    %620 = arith.maximumf %618, %619 : vector<1x128xf32>
    %621 = arith.truncf %620 : vector<1x128xf32> to vector<1x128xbf16>
    %cst_579 = arith.constant dense<0.000000e+00> : vector<1x128xf32>
    %622 = tpu.matmul %621, %6, %cst_579 {dimension_numbers = #tpu.dot_dimension_numbers<[1], [0], [0], [1], [0, 0, 1, 1], [], []>} : vector<1x128xbf16>, vector<128x128xbf16>, vector<1x128xf32> -> vector<1x128xf32>
    %623 = arith.addf %622, %4 : vector<1x128xf32>
    %c1_580 = arith.constant 1 : index
    %c0_581 = arith.constant 0 : index
    %624 = vector.load %arg12[%c1_580, %c0_581] : memref<2x128xf32, #tpu.memory_space<vmem>>, vector<1x128xf32>
    tpu.vector_store %arg12[%c1_580, %c0_581], %623 {strides = array<i32>} : memref<2x128xf32, #tpu.memory_space<vmem>>, vector<1x128xf32>,
    return
  }
  func.func @transform_0(%arg0: i32) -> (i32, i32) {
    %c0_i32 = arith.constant 0 : i32
    %c0_i32_0 = arith.constant 0 : i32
    %c0_i32_1 = arith.constant 0 : i32
    return %c0_i32, %c0_i32_0 : i32, i32
  }
  func.func @transform_1(%arg0: i32) -> (i32, i32) {
    %c0_i32 = arith.constant 0 : i32
    %c0_i32_0 = arith.constant 0 : i32
    %c0_i32_1 = arith.constant 0 : i32
    return %c0_i32, %c0_i32_0 : i32, i32
  }
  func.func @transform_2(%arg0: i32) -> (i32, i32) {
    %c0_i32 = arith.constant 0 : i32
    %c0_i32_0 = arith.constant 0 : i32
    %c0_i32_1 = arith.constant 0 : i32
    return %c0_i32, %c0_i32_0 : i32, i32
  }
  func.func @transform_3(%arg0: i32) -> (i32, i32) {
    %c0_i32 = arith.constant 0 : i32
    %c0_i32_0 = arith.constant 0 : i32
    %c0_i32_1 = arith.constant 0 : i32
    return %c0_i32, %c0_i32_0 : i32, i32
  }
  func.func @transform_4(%arg0: i32) -> (i32, i32) {
    %c0_i32 = arith.constant 0 : i32
    %c0_i32_0 = arith.constant 0 : i32
    %c0_i32_1 = arith.constant 0 : i32
    return %c0_i32, %c0_i32_0 : i32, i32
  }
  func.func @transform_5(%arg0: i32) -> (i32, i32) {
    %c0_i32 = arith.constant 0 : i32
    %c0_i32_0 = arith.constant 0 : i32
    %c0_i32_1 = arith.constant 0 : i32
    return %c0_i32, %c0_i32_0 : i32, i32
  }
  func.func @transform_6(%arg0: i32) -> (i32, i32) {
    %c0_i32 = arith.constant 0 : i32
    %c0_i32_0 = arith.constant 0 : i32
    %c0_i32_1 = arith.constant 0 : i32
    return %c0_i32, %c0_i32_0 : i32, i32
  }
  func.func @transform_7(%arg0: i32) -> (i32, i32) {
    %c0_i32 = arith.constant 0 : i32
    %c0_i32_0 = arith.constant 0 : i32
    %c0_i32_1 = arith.constant 0 : i32
    return %c0_i32, %c0_i32_0 : i32, i32
  }
  func.func @transform_8(%arg0: i32) -> (i32, i32) {
    %c0_i32 = arith.constant 0 : i32
    %c0_i32_0 = arith.constant 0 : i32
    %c0_i32_1 = arith.constant 0 : i32
    return %c0_i32, %c0_i32_0 : i32, i32
  }
  func.func @transform_9(%arg0: i32) -> (i32, i32) {
    %c0_i32 = arith.constant 0 : i32
    %c0_i32_0 = arith.constant 0 : i32
    %c0_i32_1 = arith.constant 0 : i32
    return %c0_i32, %c0_i32_0 : i32, i32
  }
  func.func @transform_10(%arg0: i32) -> (i32, i32) {
    %c0_i32 = arith.constant 0 : i32
    %c0_i32_0 = arith.constant 0 : i32
    %c0_i32_1 = arith.constant 0 : i32
    return %c0_i32, %c0_i32_0 : i32, i32
  }
  func.func @transform_11(%arg0: i32) -> (i32, i32) {
    %c0_i32 = arith.constant 0 : i32
    %c0_i32_0 = arith.constant 0 : i32
    %c0_i32_1 = arith.constant 0 : i32
    return %c0_i32, %c0_i32_0 : i32, i32
  }
}

</mosaic_0001>

<bundles_post_ra>
// kernel: _net_forward_impl.1
= control target key start
LH: loop header
LB: loop body
LE: loop exit
PB: predicated region body
PF: predicated region fallthrough
CT: control target
= control target key end

     0   :  { %v14423_v1 = vmov 0.0   ;;  %vm14424_vm0 = vmmov 0   ;;  %s19450_s0 = inlined_call_operand.vmem [shape: bf16[64,128], index: 0, kind: input, shape index: {}]   ;;  %s19451_s1 = inlined_call_operand.vmem [shape: bf16[1280,128], index: 1, kind: input, shape index: {}]   ;;  %s19452_s2 = inlined_call_operand.vmem [shape: f32[1,128], index: 2, kind: input, shape index: {}]   ;;  %s19453_s3 = inlined_call_operand.vmem [shape: bf16[1280,128], index: 3, kind: input, shape index: {}]   ;;  %s19454_s4 = inlined_call_operand.vmem [shape: f32[1,128], index: 4, kind: input, shape index: {}]   ;;  %s19455_s5 = inlined_call_operand.vmem [shape: bf16[640,128], index: 5, kind: input, shape index: {}]   ;;  %s19456_s6 = inlined_call_operand.vmem [shape: f32[1,128], index: 6, kind: input, shape index: {}]   ;;  %s19457_s7 = inlined_call_operand.vmem [shape: bf16[128,128], index: 7, kind: input, shape index: {}]   ;;  %s19458_s8 = inlined_call_operand.vmem [shape: f32[1,128], index: 8, kind: input, shape index: {}]   ;;  %s19459_s9 = inlined_call_operand.vmem [shape: bf16[128,128], index: 9, kind: input, shape index: {}]   ;;  %s19460_s10 = inlined_call_operand.vmem [shape: f32[1,128], index: 10, kind: input, shape index: {}]   ;;  %s19461_s11 = inlined_call_operand.hbm [shape: f32[2,128], index: 11, kind: output, shape index: {}]  }
   0x1   :  { %v13746_v0 = vld [vmem:[%s19451_s1 + $0x40] sm:$0xff]   ;;  %10679 = vmatprep.subr.bf16.mxu0 %v14423_v1  ;;  %10779 = vmatprep.subr.bf16.mxu1 %v14423_v1  ;;  %v13748_v3 = vld [vmem:[%s19451_s1 + $0x48] sm:$0xff]   ;;  %v13750_v5 = vld [vmem:[%s19451_s1 + $0x50] sm:$0xff]  }
   0x2   :  { %v13747_v2 = vld [vmem:[%s19451_s1 + $0x180] sm:$0xff]   ;;  %10680 = vmatpush3.bf16.msra.mxu0 %v13746_v0  ;;  %10695 = vmatprep.mubr.msk.bf16.mxu0 %vm14424_vm0, %v14423_v1  ;;  %v13749_v4 = vld [vmem:[%s19451_s1 + $0x188] sm:$0xff]   ;;  %v13751_v6 = vld [vmem:[%s19451_s1 + $0x190] sm:$0xff]  }
   0x3   :  { %10780 = vmatpush3.bf16.msra.mxu1 %v13747_v2  ;;  %10681 = vmatprep.subr.bf16.mxu0 %v14423_v1  ;;  %v13752_v7 = vld [vmem:[%s19451_s1 + $0x58] sm:$0xff]   ;;  %v13754_v9 = vld [vmem:[%s19451_s1 + $0x60] sm:$0xff]   ;;  %v13756_v11 = vld [vmem:[%s19451_s1 + $0x68] sm:$0xff]  }
   0x4   :  { %10781 = vmatprep.subr.bf16.mxu1 %v14423_v1  ;;  %10795 = vmatprep.mubr.msk.bf16.mxu1 %vm14424_vm0, %v14423_v1  ;;  %v13753_v8 = vld [vmem:[%s19451_s1 + $0x198] sm:$0xff]   ;;  %v13755_v10 = vld [vmem:[%s19451_s1 + $0x1a0] sm:$0xff]   ;;  %v13757_v12 = vld [vmem:[%s19451_s1 + $0x1a8] sm:$0xff]  }
   0x5   :  { %v13758_v13 = vld [vmem:[%s19451_s1 + $0x70] sm:$0xff]   ;;  %v13760_v15 = vld [vmem:[%s19451_s1 + $0x78] sm:$0xff]   ;;  %v94_v17 = vld [vmem:[%s19450_s0 + $0x8] sm:$0xf] }
   0x6   :  { %10682 = vmatpush3.bf16.msra.mxu0 %v13748_v3  ;;  %v13759_v14 = vld [vmem:[%s19451_s1 + $0x1b0] sm:$0xff]   ;;  %v13761_v16 = vld [vmem:[%s19451_s1 + $0x1b8] sm:$0xff]   ;;  %v13763_v18 = vld [vmem:[%s19451_s1] sm:$0xff]  }
   0x7   :  { %10782 = vmatpush3.bf16.msra.mxu1 %v13749_v4  ;;  %10683 = vmatprep.subr.bf16.mxu0 %v14423_v1  ;;  %v13764_v19 = vld [vmem:[%s19451_s1 + $0x140] sm:$0xff]   ;;  %v13765_v20 = vld [vmem:[%s19451_s1 + $0x8] sm:$0xff]   ;;  %v13767_v22 = vld [vmem:[%s19451_s1 + $0x10] sm:$0xff]  }
   0x8   :  { %10783 = vmatprep.subr.bf16.mxu1 %v14423_v1  ;;  %v13766_v21 = vld [vmem:[%s19451_s1 + $0x148] sm:$0xff]   ;;  %v13768_v23 = vld [vmem:[%s19451_s1 + $0x150] sm:$0xff]   ;;  %v13769_v24 = vld [vmem:[%s19451_s1 + $0x18] sm:$0xff]  }
   0x9   :  { %v13770_v25 = vld [vmem:[%s19451_s1 + $0x158] sm:$0xff]   ;;  %v13771_v26 = vld [vmem:[%s19451_s1 + $0x20] sm:$0xff]   ;;  %v13773_v28 = vld [vmem:[%s19451_s1 + $0x28] sm:$0xff]  }
   0xa   :  { %10684 = vmatpush3.bf16.msra.mxu0 %v13750_v5  ;;  %v13772_v27 = vld [vmem:[%s19451_s1 + $0x160] sm:$0xff]   ;;  %v13774_v29 = vld [vmem:[%s19451_s1 + $0x168] sm:$0xff]   ;;  %v13775_v30 = vld [vmem:[%s19451_s1 + $0x30] sm:$0xff]  }
   0xb   :  { %10784 = vmatpush3.bf16.msra.mxu1 %v13751_v6  ;;  %10685 = vmatprep.subr.bf16.mxu0 %v14423_v1  ;;  %v13776_v31 = vld [vmem:[%s19451_s1 + $0x170] sm:$0xff]   ;;  %v13777_v32 = vld [vmem:[%s19451_s1 + $0x38] sm:$0xff]   ;;  %v77_v34 = vld [vmem:[%s19450_s0] sm:$0xf] }
   0xc   :  { %10785 = vmatprep.subr.bf16.mxu1 %v14423_v1  ;;  %v13778_v33 = vld [vmem:[%s19451_s1 + $0x178] sm:$0xff]   ;;  %v13780_v35 = vld [vmem:[%s19451_s1 + $0x80] sm:$0xff]   ;;  %v13782_v37 = vld [vmem:[%s19451_s1 + $0x88] sm:$0xff]   ;;  %v14656_v41 = vcombine.low %v77_v34, %v77_v34 }
   0xd   :  { %v13781_v36 = vld [vmem:[%s19451_s1 + $0x1c0] sm:$0xff]   ;;  %v13783_v38 = vld [vmem:[%s19451_s1 + $0x1c8] sm:$0xff]   ;;  %v13784_v39 = vld [vmem:[%s19451_s1 + $0x90] sm:$0xff]  }
   0xe   :  { %10686 = vmatpush3.bf16.msra.mxu0 %v13752_v7  ;;  %v13785_v40 = vld [vmem:[%s19451_s1 + $0x1d0] sm:$0xff]   ;;  %v13786_v42 = vld [vmem:[%s19451_s1 + $0x98] sm:$0xff]   ;;  %v521_v44 = vshll.u32 %v14656_v41, 16  ;;  %v13788_v45 = vld [vmem:[%s19451_s1 + $0xa0] sm:$0xff]   ;;  %v519_v47 = vshrl.u32 %v14656_v41, 16 }
   0xf   :  { %10786 = vmatpush3.bf16.msra.mxu1 %v13753_v8  ;;  %10687 = vmatprep.subr.bf16.mxu0 %v14423_v1  ;;  %v13787_v43 = vld [vmem:[%s19451_s1 + $0x1d8] sm:$0xff]   ;;  %v13789_v46 = vld [vmem:[%s19451_s1 + $0x1e0] sm:$0xff]   ;;  %v13790_v48 = vld [vmem:[%s19451_s1 + $0xa8] sm:$0xff]  }
  0x10   :  { %10787 = vmatprep.subr.bf16.mxu1 %v14423_v1  ;;  %v14679_v49 = vrot.slane %v521_v44, 1  ;;  %v13791_v50 = vld [vmem:[%s19451_s1 + $0x1e8] sm:$0xff]   ;;  %v13792_v51 = vld [vmem:[%s19451_s1 + $0xb0] sm:$0xff]   ;;  %v13794_v53 = vld [vmem:[%s19451_s1 + $0xb8] sm:$0xff]  }
  0x11   :  { %v13793_v52 = vld [vmem:[%s19451_s1 + $0x1f0] sm:$0xff]   ;;  %v13795_v54 = vld [vmem:[%s19451_s1 + $0x1f8] sm:$0xff]   ;;  %v13796_v56 = vld [vmem:[%s19451_s1 + $0xc0] sm:$0xff]  }
  0x12   :  { %10688 = vmatpush3.bf16.msra.mxu0 %v13754_v9  ;;  %v14705_v55 = vld [vmem:[%s19450_s0 + $0x10] sm:$0xf]  ;;  %v13797_v57 = vld [vmem:[%s19451_s1 + $0x200] sm:$0xff]   ;;  %v13798_v58 = vld [vmem:[%s19451_s1 + $0xc8] sm:$0xff]  }
  0x13   :  { %10788 = vmatpush3.bf16.msra.mxu1 %v13755_v10  ;;  %10689 = vmatprep.subr.bf16.mxu0 %v14423_v1  ;;  %v13799_v59 = vld [vmem:[%s19451_s1 + $0x208] sm:$0xff]   ;;  %v13800_v60 = vld [vmem:[%s19451_s1 + $0xd0] sm:$0xff]   ;;  %v13802_v62 = vld [vmem:[%s19451_s1 + $0xd8] sm:$0xff]  }
  0x14   :  { %10789 = vmatprep.subr.bf16.mxu1 %v14423_v1  ;;  %v13801_v61 = vld [vmem:[%s19451_s1 + $0x210] sm:$0xff]   ;;  %v13803_v63 = vld [vmem:[%s19451_s1 + $0x218] sm:$0xff]   ;;  %v13804_v0 = vld [vmem:[%s19451_s1 + $0xe0] sm:$0xff]  }
  0x15   :  { %v13805_v2 = vld [vmem:[%s19451_s1 + $0x220] sm:$0xff]   ;;  %v13806_v3 = vld [vmem:[%s19451_s1 + $0xe8] sm:$0xff]   ;;  %v13808_v5 = vld [vmem:[%s19451_s1 + $0xf0] sm:$0xff]  }
  0x16   :  { %10690 = vmatpush3.bf16.msra.mxu0 %v13756_v11  ;;  %v13807_v4 = vld [vmem:[%s19451_s1 + $0x228] sm:$0xff]   ;;  %v13809_v6 = vld [vmem:[%s19451_s1 + $0x230] sm:$0xff]   ;;  %v13810_v7 = vld [vmem:[%s19451_s1 + $0xf8] sm:$0xff]  }
  0x17   :  { %10790 = vmatpush3.bf16.msra.mxu1 %v13757_v12  ;;  %10691 = vmatprep.subr.bf16.mxu0 %v14423_v1  ;;  %v13811_v8 = vld [vmem:[%s19451_s1 + $0x238] sm:$0xff]   ;;  %v13812_v10 = vld [vmem:[%s19451_s1 + $0x100] sm:$0xff]   ;;  %v13814_v12 = vld [vmem:[%s19451_s1 + $0x108] sm:$0xff]  }
  0x18   :  { %10791 = vmatprep.subr.bf16.mxu1 %v14423_v1  ;;  %v393_v9 = vld [vmem:[%s19450_s0 + $0x18] sm:$0xf]  ;;  %v13813_v11 = vld [vmem:[%s19451_s1 + $0x240] sm:$0xff]  }
  0x19   :  { %v14184_v41 = vld [vmem:[%s19451_s1 + $0x78] sm:$0xff]   ;;  %v14187_v44 = vld [vmem:[%s19451_s1 + $0x140] sm:$0xff]  }
  0x1a   :  { %10692 = vmatpush3.bf16.msra.mxu0 %v13758_v13  ;;  %v13815_v13 = vld [vmem:[%s19451_s1 + $0x248] sm:$0xff]  }
  0x1b   :  { %10792 = vmatpush3.bf16.msra.mxu1 %v13759_v14  ;;  %10693 = vmatprep.subr.bf16.mxu0 %v14423_v1  ;;  %v13816_v14 = vld [vmem:[%s19451_s1 + $0x110] sm:$0xff]  }
  0x1c   :  { %10793 = vmatprep.subr.bf16.mxu1 %v14423_v1 }
  0x1e   :  { %10694 = vmatpush3.bf16.msra.mxu0 %v13760_v15  ;;  %v13817_v15 = vld [vmem:[%s19451_s1 + $0x250] sm:$0xff]  }
  0x1f   :  { %10794 = vmatpush3.bf16.msra.mxu1 %v13761_v16  ;;  %10699 = vmatprep.subr.bf16.mxu0 %v14423_v1  ;;  %v13818_v16 = vld [vmem:[%s19451_s1 + $0x118] sm:$0xff]  }
  0x20   :  { %10799 = vmatprep.subr.bf16.mxu1 %v14423_v1 }
  0x21   :  { %10696 = vmatmul.mubr.bf16.vlgmr.msra.gmra.mrb[0].mxu0 %v94_v17 }
  0x22   :  { %10700 = vmatpush3.bf16.msra.mxu0 %v13763_v18  ;;  %10796 = vmatmul.mubr.bf16.vlgmr.msra.gmra.mrb[0].mxu1 %v94_v17  ;;  %v13819_v17 = vld [vmem:[%s19451_s1 + $0x258] sm:$0xff]   ;;  %v13820_v18 = vld [vmem:[%s19451_s1 + $0x120] sm:$0xff]  }
  0x23   :  { %10800 = vmatpush3.bf16.msra.mxu1 %v13764_v19  ;;  %10701 = vmatprep.subr.bf16.mxu0 %v14423_v1  ;;  %v13821_v19 = vld [vmem:[%s19451_s1 + $0x260] sm:$0xff]  }
  0x24   :  { %10801 = vmatprep.subr.bf16.mxu1 %v14423_v1  ;;  %10715 = vmatprep.mubr.msk.bf16.mxu0 %vm14424_vm0, %v14423_v1 }
  0x25   :  { %10815 = vmatprep.mubr.msk.bf16.mxu1 %vm14424_vm0, %v14423_v1 }
  0x26   :  { %10702 = vmatpush3.bf16.msra.mxu0 %v13765_v20  ;;  %v13822_v20 = vld [vmem:[%s19451_s1 + $0x128] sm:$0xff]  }
  0x27   :  { %10802 = vmatpush3.bf16.msra.mxu1 %v13766_v21  ;;  %10703 = vmatprep.subr.bf16.mxu0 %v14423_v1  ;;  %v13823_v21 = vld [vmem:[%s19451_s1 + $0x268] sm:$0xff]  }
  0x28   :  { %10803 = vmatprep.subr.bf16.mxu1 %v14423_v1 }
  0x2a   :  { %10704 = vmatpush3.bf16.msra.mxu0 %v13767_v22  ;;  %v13824_v22 = vld [vmem:[%s19451_s1 + $0x130] sm:$0xff]  }
  0x2b   :  { %10804 = vmatpush3.bf16.msra.mxu1 %v13768_v23  ;;  %10705 = vmatprep.subr.bf16.mxu0 %v14423_v1  ;;  %v13825_v23 = vld [vmem:[%s19451_s1 + $0x270] sm:$0xff]  }
  0x2c   :  { %10805 = vmatprep.subr.bf16.mxu1 %v14423_v1 }
  0x2e   :  { %10706 = vmatpush3.bf16.msra.mxu0 %v13769_v24  ;;  %v13826_v24 = vld [vmem:[%s19451_s1 + $0x138] sm:$0xff]  }
  0x2f   :  { %10806 = vmatpush3.bf16.msra.mxu1 %v13770_v25  ;;  %10707 = vmatprep.subr.bf16.mxu0 %v14423_v1  ;;  %v13827_v25 = vld [vmem:[%s19451_s1 + $0x278] sm:$0xff]  }
  0x30   :  { %10807 = vmatprep.subr.bf16.mxu1 %v14423_v1 }
  0x32   :  { %10708 = vmatpush3.bf16.msra.mxu0 %v13771_v26  ;;  %v14851_v26 = vor.u32 %v14679_v49, %v519_v47  ;;  %v14956_v47 = vld [vmem:[%s19451_s1 + $0x10] sm:$0xff]   ;;  %v14970_v49 = vld [vmem:[%s19451_s1 + $0x18] sm:$0xff]  }
  0x33   :  { %10808 = vmatpush3.bf16.msra.mxu1 %v13772_v27  ;;  %10709 = vmatprep.subr.bf16.mxu0 %v14423_v1  ;;  %v14170_v27 = vld [vmem:[%s19451_s1 + $0x40] sm:$0xff]  }
  0x34   :  { %10809 = vmatprep.subr.bf16.mxu1 %v14423_v1 }
  0x36   :  { %10710 = vmatpush3.bf16.msra.mxu0 %v13773_v28  ;;  %v14171_v28 = vld [vmem:[%s19451_s1 + $0x180] sm:$0xff]  }
  0x37   :  { %10810 = vmatpush3.bf16.msra.mxu1 %v13774_v29  ;;  %10711 = vmatprep.subr.bf16.mxu0 %v14423_v1  ;;  %v14172_v29 = vld [vmem:[%s19451_s1 + $0x48] sm:$0xff]  }
  0x38   :  { %10811 = vmatprep.subr.bf16.mxu1 %v14423_v1 }
  0x3a   :  { %10712 = vmatpush3.bf16.msra.mxu0 %v13775_v30  ;;  %v14173_v30 = vld [vmem:[%s19451_s1 + $0x188] sm:$0xff]  }
  0x3b   :  { %10812 = vmatpush3.bf16.msra.mxu1 %v13776_v31  ;;  %10713 = vmatprep.subr.bf16.mxu0 %v14423_v1  ;;  %v14174_v31 = vld [vmem:[%s19451_s1 + $0x50] sm:$0xff]  }
  0x3c   :  { %10813 = vmatprep.subr.bf16.mxu1 %v14423_v1 }
  0x3e   :  { %10714 = vmatpush3.bf16.msra.mxu0 %v13777_v32  ;;  %v14175_v32 = vld [vmem:[%s19451_s1 + $0x190] sm:$0xff]  }
  0x3f   :  { %10814 = vmatpush3.bf16.msra.mxu1 %v13778_v33  ;;  %10719 = vmatprep.subr.bf16.mxu0 %v14423_v1  ;;  %v14176_v33 = vld [vmem:[%s19451_s1 + $0x58] sm:$0xff]  }
  0x40   :  { %10819 = vmatprep.subr.bf16.mxu1 %v14423_v1 }
  0x41   :  { %10716 = vmatmul.mubr.bf16.vlgmr.msra.gmra.mrb[0].mxu0 %v77_v34 }
  0x42   :  { %10720 = vmatpush3.bf16.msra.mxu0 %v13780_v35  ;;  %10816 = vmatmul.mubr.bf16.vlgmr.msra.gmra.mrb[0].mxu1 %v77_v34  ;;  %v14177_v34 = vld [vmem:[%s19451_s1 + $0x198] sm:$0xff]   ;;  %v14178_v35 = vld [vmem:[%s19451_s1 + $0x60] sm:$0xff]  }
  0x43   :  { %10820 = vmatpush3.bf16.msra.mxu1 %v13781_v36  ;;  %10721 = vmatprep.subr.bf16.mxu0 %v14423_v1  ;;  %v14179_v36 = vld [vmem:[%s19451_s1 + $0x1a0] sm:$0xff]  }
  0x44   :  { %10821 = vmatprep.subr.bf16.mxu1 %v14423_v1  ;;  %10735 = vmatprep.mubr.msk.bf16.mxu0 %vm14424_vm0, %v14423_v1 }
  0x45   :  { %10835 = vmatprep.mubr.msk.bf16.mxu1 %vm14424_vm0, %v14423_v1 }
  0x46   :  { %10722 = vmatpush3.bf16.msra.mxu0 %v13782_v37  ;;  %v14180_v37 = vld [vmem:[%s19451_s1 + $0x68] sm:$0xff]  }
  0x47   :  { %10822 = vmatpush3.bf16.msra.mxu1 %v13783_v38  ;;  %10723 = vmatprep.subr.bf16.mxu0 %v14423_v1  ;;  %v14181_v38 = vld [vmem:[%s19451_s1 + $0x1a8] sm:$0xff]  }
  0x48   :  { %10823 = vmatprep.subr.bf16.mxu1 %v14423_v1 }
  0x4a   :  { %10724 = vmatpush3.bf16.msra.mxu0 %v13784_v39  ;;  %v14182_v39 = vld [vmem:[%s19451_s1 + $0x70] sm:$0xff]  }
  0x4b   :  { %10824 = vmatpush3.bf16.msra.mxu1 %v13785_v40  ;;  %10725 = vmatprep.subr.bf16.mxu0 %v14423_v1  ;;  %v14183_v40 = vld [vmem:[%s19451_s1 + $0x1b0] sm:$0xff]  }
  0x4c   :  { %10825 = vmatprep.subr.bf16.mxu1 %v14423_v1 }
  0x4e   :  { %10726 = vmatpush3.bf16.msra.mxu0 %v13786_v42  ;;  %v14185_v42 = vld [vmem:[%s19451_s1 + $0x1b8] sm:$0xff]  }
  0x4f   :  { %10826 = vmatpush3.bf16.msra.mxu1 %v13787_v43  ;;  %10727 = vmatprep.subr.bf16.mxu0 %v14423_v1  ;;  %v14186_v43 = vld [vmem:[%s19451_s1] sm:$0xff]  }
  0x50   :  { %10827 = vmatprep.subr.bf16.mxu1 %v14423_v1 }
  0x52   :  { %10728 = vmatpush3.bf16.msra.mxu0 %v13788_v45  ;;  %v14942_v45 = vld [vmem:[%s19451_s1 + $0x8] sm:$0xff]  }
  0x53   :  { %10828 = vmatpush3.bf16.msra.mxu1 %v13789_v46  ;;  %10729 = vmatprep.subr.bf16.mxu0 %v14423_v1  ;;  %v14948_v46 = vld [vmem:[%s19451_s1 + $0x148] sm:$0xff]  }
  0x54   :  { %10829 = vmatprep.subr.bf16.mxu1 %v14423_v1 }
  0x56   :  { %10730 = vmatpush3.bf16.msra.mxu0 %v13790_v48  ;;  %v14962_v48 = vld [vmem:[%s19451_s1 + $0x150] sm:$0xff]  }
  0x57   :  { %10830 = vmatpush3.bf16.msra.mxu1 %v13791_v50  ;;  %10731 = vmatprep.subr.bf16.mxu0 %v14423_v1  ;;  %v14976_v50 = vld [vmem:[%s19451_s1 + $0x158] sm:$0xff]  }
  0x58   :  { %10831 = vmatprep.subr.bf16.mxu1 %v14423_v1 }
  0x5a   :  { %10732 = vmatpush3.bf16.msra.mxu0 %v13792_v51  ;;  %v14984_v51 = vld [vmem:[%s19451_s1 + $0x20] sm:$0xff]  }
  0x5b   :  { %10832 = vmatpush3.bf16.msra.mxu1 %v13793_v52  ;;  %10733 = vmatprep.subr.bf16.mxu0 %v14423_v1  ;;  %v14990_v52 = vld [vmem:[%s19451_s1 + $0x160] sm:$0xff]  }
  0x5c   :  { %10833 = vmatprep.subr.bf16.mxu1 %v14423_v1 }
  0x5e   :  { %10734 = vmatpush3.bf16.msra.mxu0 %v13794_v53  ;;  %v14998_v53 = vld [vmem:[%s19451_s1 + $0x28] sm:$0xff]  }
  0x5f   :  { %10834 = vmatpush3.bf16.msra.mxu1 %v13795_v54  ;;  %10739 = vmatprep.subr.bf16.mxu0 %v14423_v1  ;;  %v15004_v54 = vld [vmem:[%s19451_s1 + $0x168] sm:$0xff]  }
  0x60   :  { %10839 = vmatprep.subr.bf16.mxu1 %v14423_v1 }
  0x61   :  { %10736 = vmatmul.mubr.bf16.vlgmr.msra.gmra.mrb[0].mxu0 %v14705_v55 }
  0x62   :  { %10740 = vmatpush3.bf16.msra.mxu0 %v13796_v56  ;;  %10836 = vmatmul.mubr.bf16.vlgmr.msra.gmra.mrb[0].mxu1 %v14705_v55  ;;  %v15018_v56 = vld [vmem:[%s19451_s1 + $0x170] sm:$0xff]  }
  0x63   :  { %10840 = vmatpush3.bf16.msra.mxu1 %v13797_v57  ;;  %10741 = vmatprep.subr.bf16.mxu0 %v14423_v1  ;;  %v15026_v57 = vld [vmem:[%s19451_s1 + $0x38] sm:$0xff]  }
  0x64   :  { %10841 = vmatprep.subr.bf16.mxu1 %v14423_v1  ;;  %10755 = vmatprep.mubr.msk.bf16.mxu0 %vm14424_vm0, %v14423_v1 }
  0x65   :  { %10855 = vmatprep.mubr.msk.bf16.mxu1 %vm14424_vm0, %v14423_v1 }
  0x66   :  { %10742 = vmatpush3.bf16.msra.mxu0 %v13798_v58  ;;  %v15032_v58 = vld [vmem:[%s19451_s1 + $0x178] sm:$0xff]  }
  0x67   :  { %10842 = vmatpush3.bf16.msra.mxu1 %v13799_v59  ;;  %10743 = vmatprep.subr.bf16.mxu0 %v14423_v1  ;;  %v15040_v59 = vld [vmem:[%s19450_s0 + $0x8] sm:$0xf] }
  0x68   :  { %10843 = vmatprep.subr.bf16.mxu1 %v14423_v1 }
  0x6a   :  { %10744 = vmatpush3.bf16.msra.mxu0 %v13800_v60  ;;  %v15046_v60 = vld [vmem:[%s19451_s1 + $0x80] sm:$0xff]  }
  0x6b   :  { %10844 = vmatpush3.bf16.msra.mxu1 %v13801_v61  ;;  %10745 = vmatprep.subr.bf16.mxu0 %v14423_v1  ;;  %v15053_v61 = vld [vmem:[%s19451_s1 + $0x1c0] sm:$0xff]  }
  0x6c   :  { %10845 = vmatprep.subr.bf16.mxu1 %v14423_v1 }
  0x6e   :  { %10746 = vmatpush3.bf16.msra.mxu0 %v13802_v62  ;;  %v15065_v62 = vld [vmem:[%s19451_s1 + $0x88] sm:$0xff]  }
  0x6f   :  { %10846 = vmatpush3.bf16.msra.mxu1 %v13803_v63  ;;  %10747 = vmatprep.subr.bf16.mxu0 %v14423_v1  ;;  %v15071_v63 = vld [vmem:[%s19451_s1 + $0x1c8] sm:$0xff]  }
  0x70   :  { %10847 = vmatprep.subr.bf16.mxu1 %v14423_v1 }
  0x72   :  { %10748 = vmatpush3.bf16.msra.mxu0 %v13804_v0  ;;  %v15079_v0 = vld [vmem:[%s19451_s1 + $0x90] sm:$0xff]  }
  0x73   :  { %10848 = vmatpush3.bf16.msra.mxu1 %v13805_v2  ;;  %10749 = vmatprep.subr.bf16.mxu0 %v14423_v1  ;;  %v15085_v2 = vld [vmem:[%s19451_s1 + $0x1d0] sm:$0xff]  }
  0x74   :  { %10849 = vmatprep.subr.bf16.mxu1 %v14423_v1 }
  0x76   :  { %10750 = vmatpush3.bf16.msra.mxu0 %v13806_v3  ;;  %v15093_v3 = vld [vmem:[%s19451_s1 + $0x98] sm:$0xff]  }
  0x77   :  { %10850 = vmatpush3.bf16.msra.mxu1 %v13807_v4  ;;  %10751 = vmatprep.subr.bf16.mxu0 %v14423_v1  ;;  %v15099_v4 = vld [vmem:[%s19451_s1 + $0x1d8] sm:$0xff]  }
  0x78   :  { %10851 = vmatprep.subr.bf16.mxu1 %v14423_v1 }
  0x7a   :  { %10752 = vmatpush3.bf16.msra.mxu0 %v13808_v5  ;;  %v15107_v5 = vld [vmem:[%s19451_s1 + $0xa0] sm:$0xff]  }
  0x7b   :  { %10852 = vmatpush3.bf16.msra.mxu1 %v13809_v6  ;;  %10753 = vmatprep.subr.bf16.mxu0 %v14423_v1  ;;  %v15113_v6 = vld [vmem:[%s19451_s1 + $0x1e0] sm:$0xff]  }
  0x7c   :  { %10853 = vmatprep.subr.bf16.mxu1 %v14423_v1 }
  0x7e   :  { %10754 = vmatpush3.bf16.msra.mxu0 %v13810_v7  ;;  %v15121_v7 = vld [vmem:[%s19451_s1 + $0xa8] sm:$0xff]  }
  0x7f   :  { %10854 = vmatpush3.bf16.msra.mxu1 %v13811_v8  ;;  %10759 = vmatprep.subr.bf16.mxu0 %v14423_v1  ;;  %v15127_v8 = vld [vmem:[%s19451_s1 + $0x1e8] sm:$0xff]  }
  0x80   :  { %10859 = vmatprep.subr.bf16.mxu1 %v14423_v1 }
  0x81   :  { %10756 = vmatmul.mubr.bf16.vlgmr.msra.gmra.mrb[0].mxu0 %v393_v9 }
  0x82   :  { %10760 = vmatpush3.bf16.msra.mxu0 %v13812_v10  ;;  %10856 = vmatmul.mubr.bf16.vlgmr.msra.gmra.mrb[0].mxu1 %v393_v9  ;;  %v15135_v9 = vld [vmem:[%s19451_s1 + $0xb0] sm:$0xff]  }
  0x83   :  { %10860 = vmatpush3.bf16.msra.mxu1 %v13813_v11  ;;  %10761 = vmatprep.subr.bf16.mxu0 %v14423_v1  ;;  %v15141_v10 = vld [vmem:[%s19451_s1 + $0x1f0] sm:$0xff]   ;;  %v15149_v11 = vld [vmem:[%s19451_s1 + $0xb8] sm:$0xff]  }
  0x84   :  { %10861 = vmatprep.subr.bf16.mxu1 %v14423_v1  ;;  %10775 = vmatprep.mubr.msk.bf16.mxu0 %vm14424_vm0, %v14423_v1 }
  0x85   :  { %10875 = vmatprep.mubr.msk.bf16.mxu1 %vm14424_vm0, %v14423_v1 }
  0x86   :  { %10762 = vmatpush3.bf16.msra.mxu0 %v13814_v12  ;;  %v15155_v12 = vld [vmem:[%s19451_s1 + $0x1f8] sm:$0xff]  }
  0x87   :  { %10862 = vmatpush3.bf16.msra.mxu1 %v13815_v13  ;;  %10763 = vmatprep.subr.bf16.mxu0 %v14423_v1  ;;  %v15163_v13 = vld [vmem:[%s19450_s0 + $0x18] sm:$0xf] }
  0x88   :  { %10863 = vmatprep.subr.bf16.mxu1 %v14423_v1  ;;  %19554 = vst [vmem:[#allocation5_spill] sm:$0xff] %v15163_v13 }
  0x8a   :  { %10764 = vmatpush3.bf16.msra.mxu0 %v13816_v14  ;;  %v15169_v14 = vld [vmem:[%s19451_s1 + $0xc0] sm:$0xff]  }
  0x8b   :  { %10864 = vmatpush3.bf16.msra.mxu1 %v13817_v15  ;;  %10765 = vmatprep.subr.bf16.mxu0 %v14423_v1  ;;  %v15176_v15 = vld [vmem:[%s19451_s1 + $0x200] sm:$0xff]  }
  0x8c   :  { %10865 = vmatprep.subr.bf16.mxu1 %v14423_v1 }
  0x8e   :  { %10766 = vmatpush3.bf16.msra.mxu0 %v13818_v16  ;;  %v15188_v16 = vld [vmem:[%s19451_s1 + $0xc8] sm:$0xff]  }
  0x8f   :  { %10866 = vmatpush3.bf16.msra.mxu1 %v13819_v17  ;;  %10767 = vmatprep.subr.bf16.mxu0 %v14423_v1  ;;  %v15194_v17 = vld [vmem:[%s19451_s1 + $0x208] sm:$0xff]  }
  0x90   :  { %10867 = vmatprep.subr.bf16.mxu1 %v14423_v1 }
  0x92   :  { %10768 = vmatpush3.bf16.msra.mxu0 %v13820_v18  ;;  %v15202_v18 = vld [vmem:[%s19451_s1 + $0xd0] sm:$0xff]  }
  0x93   :  { %10868 = vmatpush3.bf16.msra.mxu1 %v13821_v19  ;;  %10769 = vmatprep.subr.bf16.mxu0 %v14423_v1  ;;  %v15208_v19 = vld [vmem:[%s19451_s1 + $0x210] sm:$0xff]  }
  0x94   :  { %10869 = vmatprep.subr.bf16.mxu1 %v14423_v1 }
  0x96   :  { %10770 = vmatpush3.bf16.msra.mxu0 %v13822_v20  ;;  %v15216_v20 = vld [vmem:[%s19451_s1 + $0xd8] sm:$0xff]  }
  0x97   :  { %10870 = vmatpush3.bf16.msra.mxu1 %v13823_v21  ;;  %10771 = vmatprep.subr.bf16.mxu0 %v14423_v1  ;;  %v15222_v21 = vld [vmem:[%s19451_s1 + $0x218] sm:$0xff]  }
  0x98   :  { %10871 = vmatprep.subr.bf16.mxu1 %v14423_v1 }
  0x9a   :  { %10772 = vmatpush3.bf16.msra.mxu0 %v13824_v22  ;;  %v15230_v22 = vld [vmem:[%s19451_s1 + $0xe0] sm:$0xff]  }
  0x9b   :  { %10872 = vmatpush3.bf16.msra.mxu1 %v13825_v23  ;;  %10773 = vmatprep.subr.bf16.mxu0 %v14423_v1  ;;  %v15236_v23 = vld [vmem:[%s19451_s1 + $0x220] sm:$0xff]  }
  0x9c   :  { %10873 = vmatprep.subr.bf16.mxu1 %v14423_v1 }
  0x9e   :  { %10774 = vmatpush3.bf16.msra.mxu0 %v13826_v24  ;;  %v15244_v24 = vld [vmem:[%s19451_s1 + $0xe8] sm:$0xff]  }
  0x9f   :  { %10874 = vmatpush3.bf16.msra.mxu1 %v13827_v25  ;;  %10879 = vmatprep.subr.bf16.mxu0 %v14423_v1  ;;  %v15250_v25 = vld [vmem:[%s19451_s1 + $0x228] sm:$0xff]  }
  0xa0   :  { %10979 = vmatprep.subr.bf16.mxu1 %v14423_v1 }
  0xa1   :  { %10776 = vmatmul.mubr.bf16.vlgmr.msra.gmra.mrb[0].mxu0 %v14851_v26 }
  0xa2   :  { %10876 = vmatmul.mubr.bf16.vlgmr.msra.gmra.mrb[0].mxu1 %v14851_v26  ;;  %10880 = vmatpush3.bf16.msra.mxu0 %v14170_v27  ;;  %v15258_v27 = vld [vmem:[%s19451_s1 + $0xf0] sm:$0xff]  }
  0xa3   :  { %10980 = vmatpush3.bf16.msra.mxu1 %v14171_v28  ;;  %10881 = vmatprep.subr.bf16.mxu0 %v14423_v1  ;;  %v15264_v28 = vld [vmem:[%s19451_s1 + $0x230] sm:$0xff]  }
  0xa4   :  { %10981 = vmatprep.subr.bf16.mxu1 %v14423_v1  ;;  %10895 = vmatprep.mubr.msk.bf16.mxu0 %vm14424_vm0, %v14423_v1 }
  0xa5   :  { %10995 = vmatprep.mubr.msk.bf16.mxu1 %vm14424_vm0, %v14423_v1 }
  0xa6   :  { %10882 = vmatpush3.bf16.msra.mxu0 %v14172_v29  ;;  %v15272_v29 = vld [vmem:[%s19451_s1 + $0xf8] sm:$0xff]  }
  0xa7   :  { %10982 = vmatpush3.bf16.msra.mxu1 %v14173_v30  ;;  %10883 = vmatprep.subr.bf16.mxu0 %v14423_v1  ;;  %v15278_v30 = vld [vmem:[%s19451_s1 + $0x238] sm:$0xff]  }
  0xa8   :  { %10983 = vmatprep.subr.bf16.mxu1 %v14423_v1 }
  0xaa   :  { %10884 = vmatpush3.bf16.msra.mxu0 %v14174_v31  ;;  %v15287_v31 = vld [vmem:[%s19451_s1 + $0x100] sm:$0xff]  }
  0xab   :  { %10984 = vmatpush3.bf16.msra.mxu1 %v14175_v32  ;;  %10885 = vmatprep.subr.bf16.mxu0 %v14423_v1  ;;  %v15294_v32 = vld [vmem:[%s19451_s1 + $0x240] sm:$0xff]  }
  0xac   :  { %10985 = vmatprep.subr.bf16.mxu1 %v14423_v1 }
  0xae   :  { %10886 = vmatpush3.bf16.msra.mxu0 %v14176_v33  ;;  %v15306_v33 = vld [vmem:[%s19451_s1 + $0x108] sm:$0xff]  }
  0xaf   :  { %10986 = vmatpush3.bf16.msra.mxu1 %v14177_v34  ;;  %10887 = vmatprep.subr.bf16.mxu0 %v14423_v1  ;;  %v15312_v34 = vld [vmem:[%s19451_s1 + $0x248] sm:$0xff]  }
  0xb0   :  { %10987 = vmatprep.subr.bf16.mxu1 %v14423_v1 }
  0xb2   :  { %10888 = vmatpush3.bf16.msra.mxu0 %v14178_v35  ;;  %v15320_v35 = vld [vmem:[%s19451_s1 + $0x110] sm:$0xff]  }
  0xb3   :  { %10988 = vmatpush3.bf16.msra.mxu1 %v14179_v36  ;;  %10889 = vmatprep.subr.bf16.mxu0 %v14423_v1  ;;  %v15326_v36 = vld [vmem:[%s19451_s1 + $0x250] sm:$0xff]  }
  0xb4   :  { %10989 = vmatprep.subr.bf16.mxu1 %v14423_v1 }
  0xb6   :  { %10890 = vmatpush3.bf16.msra.mxu0 %v14180_v37  ;;  %v15334_v37 = vld [vmem:[%s19451_s1 + $0x118] sm:$0xff]  }
  0xb7   :  { %10990 = vmatpush3.bf16.msra.mxu1 %v14181_v38  ;;  %10891 = vmatprep.subr.bf16.mxu0 %v14423_v1  ;;  %v15340_v38 = vld [vmem:[%s19451_s1 + $0x258] sm:$0xff]  }
  0xb8   :  { %10991 = vmatprep.subr.bf16.mxu1 %v14423_v1 }
  0xba   :  { %10892 = vmatpush3.bf16.msra.mxu0 %v14182_v39  ;;  %v9128_v39 = vcombine.low %v15040_v59, %v15040_v59 }
  0xbb   :  { %10992 = vmatpush3.bf16.msra.mxu1 %v14183_v40  ;;  %10893 = vmatprep.subr.bf16.mxu0 %v14423_v1 }
  0xbc   :  { %10993 = vmatprep.subr.bf16.mxu1 %v14423_v1 }
  0xbe   :  { %10894 = vmatpush3.bf16.msra.mxu0 %v14184_v41 }
  0xbf   :  { %10994 = vmatpush3.bf16.msra.mxu1 %v14185_v42  ;;  %10899 = vmatprep.subr.bf16.mxu0 %v14423_v1 }
  0xc0   :  { %10999 = vmatprep.subr.bf16.mxu1 %v14423_v1 }
  0xc1   :  { %10896 = vmatmul.mubr.bf16.vlgmr.msra.gmra.mrb[4].mxu0 %v14705_v55 }
  0xc2   :  { %10900 = vmatpush3.bf16.msra.mxu0 %v14186_v43  ;;  %10996 = vmatmul.mubr.bf16.vlgmr.msra.gmra.mrb[4].mxu1 %v14705_v55  ;;  %v15012_v55 = vld [vmem:[%s19451_s1 + $0x30] sm:$0xff]  }
  0xc3   :  { %11000 = vmatpush3.bf16.msra.mxu1 %v14187_v44  ;;  %10901 = vmatprep.subr.bf16.mxu0 %v14423_v1 }
  0xc4   :  { %11001 = vmatprep.subr.bf16.mxu1 %v14423_v1  ;;  %10915 = vmatprep.mubr.msk.bf16.mxu0 %vm14424_vm0, %v14423_v1 }
  0xc5   :  { %11015 = vmatprep.mubr.msk.bf16.mxu1 %vm14424_vm0, %v14423_v1 }
  0xc6   :  { %10902 = vmatpush3.bf16.msra.mxu0 %v14942_v45 }
  0xc7   :  { %11002 = vmatpush3.bf16.msra.mxu1 %v14948_v46  ;;  %10903 = vmatprep.subr.bf16.mxu0 %v14423_v1 }
  0xc8   :  { %11003 = vmatprep.subr.bf16.mxu1 %v14423_v1 }
  0xca   :  { %10904 = vmatpush3.bf16.msra.mxu0 %v14956_v47 }
  0xcb   :  { %11004 = vmatpush3.bf16.msra.mxu1 %v14962_v48  ;;  %10905 = vmatprep.subr.bf16.mxu0 %v14423_v1 }
  0xcc   :  { %11005 = vmatprep.subr.bf16.mxu1 %v14423_v1 }
  0xce   :  { %10906 = vmatpush3.bf16.msra.mxu0 %v14970_v49 }
  0xcf   :  { %11006 = vmatpush3.bf16.msra.mxu1 %v14976_v50  ;;  %10907 = vmatprep.subr.bf16.mxu0 %v14423_v1 }
  0xd0   :  { %11007 = vmatprep.subr.bf16.mxu1 %v14423_v1 }
  0xd2   :  { %10908 = vmatpush3.bf16.msra.mxu0 %v14984_v51 }
  0xd3   :  { %11008 = vmatpush3.bf16.msra.mxu1 %v14990_v52  ;;  %10909 = vmatprep.subr.bf16.mxu0 %v14423_v1 }
  0xd4   :  { %11009 = vmatprep.subr.bf16.mxu1 %v14423_v1 }
  0xd6   :  { %10910 = vmatpush3.bf16.msra.mxu0 %v14998_v53 }
  0xd7   :  { %11010 = vmatpush3.bf16.msra.mxu1 %v15004_v54  ;;  %10911 = vmatprep.subr.bf16.mxu0 %v14423_v1 }
  0xd8   :  { %11011 = vmatprep.subr.bf16.mxu1 %v14423_v1 }
  0xda   :  { %10912 = vmatpush3.bf16.msra.mxu0 %v15012_v55 }
  0xdb   :  { %11012 = vmatpush3.bf16.msra.mxu1 %v15018_v56  ;;  %10913 = vmatprep.subr.bf16.mxu0 %v14423_v1 }
  0xdc   :  { %11013 = vmatprep.subr.bf16.mxu1 %v14423_v1 }
  0xde   :  { %10914 = vmatpush3.bf16.msra.mxu0 %v15026_v57 }
  0xdf   :  { %11014 = vmatpush3.bf16.msra.mxu1 %v15032_v58  ;;  %10919 = vmatprep.subr.bf16.mxu0 %v14423_v1 }
  0xe0   :  { %11019 = vmatprep.subr.bf16.mxu1 %v14423_v1 }
  0xe1   :  { %10916 = vmatmul.mubr.bf16.vlgmr.msra.gmra.mrb[4].mxu0 %v15040_v59 }
  0xe2   :  { %10920 = vmatpush3.bf16.msra.mxu0 %v15046_v60  ;;  %11016 = vmatmul.mubr.bf16.vlgmr.msra.gmra.mrb[4].mxu1 %v15040_v59 }
  0xe3   :  { %11020 = vmatpush3.bf16.msra.mxu1 %v15053_v61  ;;  %10921 = vmatprep.subr.bf16.mxu0 %v14423_v1 }
  0xe4   :  { %11021 = vmatprep.subr.bf16.mxu1 %v14423_v1  ;;  %10935 = vmatprep.mubr.msk.bf16.mxu0 %vm14424_vm0, %v14423_v1 }
  0xe5   :  { %11035 = vmatprep.mubr.msk.bf16.mxu1 %vm14424_vm0, %v14423_v1 }
  0xe6   :  { %10922 = vmatpush3.bf16.msra.mxu0 %v15065_v62 }
  0xe7   :  { %11022 = vmatpush3.bf16.msra.mxu1 %v15071_v63  ;;  %10923 = vmatprep.subr.bf16.mxu0 %v14423_v1 }
  0xe8   :  { %11023 = vmatprep.subr.bf16.mxu1 %v14423_v1 }
  0xea   :  { %10924 = vmatpush3.bf16.msra.mxu0 %v15079_v0 }
  0xeb   :  { %11024 = vmatpush3.bf16.msra.mxu1 %v15085_v2  ;;  %10925 = vmatprep.subr.bf16.mxu0 %v14423_v1 }
  0xec   :  { %11025 = vmatprep.subr.bf16.mxu1 %v14423_v1 }
  0xee   :  { %10926 = vmatpush3.bf16.msra.mxu0 %v15093_v3 }
  0xef   :  { %11026 = vmatpush3.bf16.msra.mxu1 %v15099_v4  ;;  %10927 = vmatprep.subr.bf16.mxu0 %v14423_v1 }
  0xf0   :  { %11027 = vmatprep.subr.bf16.mxu1 %v14423_v1 }
  0xf2   :  { %10928 = vmatpush3.bf16.msra.mxu0 %v15107_v5 }
  0xf3   :  { %11028 = vmatpush3.bf16.msra.mxu1 %v15113_v6  ;;  %10929 = vmatprep.subr.bf16.mxu0 %v14423_v1 }
  0xf4   :  { %11029 = vmatprep.subr.bf16.mxu1 %v14423_v1 }
  0xf6   :  { %10930 = vmatpush3.bf16.msra.mxu0 %v15121_v7 }
  0xf7   :  { %11030 = vmatpush3.bf16.msra.mxu1 %v15127_v8  ;;  %10931 = vmatprep.subr.bf16.mxu0 %v14423_v1 }
  0xf8   :  { %11031 = vmatprep.subr.bf16.mxu1 %v14423_v1 }
  0xfa   :  { %10932 = vmatpush3.bf16.msra.mxu0 %v15135_v9 }
  0xfb   :  { %11032 = vmatpush3.bf16.msra.mxu1 %v15141_v10  ;;  %10933 = vmatprep.subr.bf16.mxu0 %v14423_v1 }
  0xfc   :  { %11033 = vmatprep.subr.bf16.mxu1 %v14423_v1 }
  0xfe   :  { %10934 = vmatpush3.bf16.msra.mxu0 %v15149_v11 }
  0xff   :  { %11034 = vmatpush3.bf16.msra.mxu1 %v15155_v12  ;;  %10939 = vmatprep.subr.bf16.mxu0 %v14423_v1 }
 0x100   :  { %11039 = vmatprep.subr.bf16.mxu1 %v14423_v1 }
 0x101   :  { %10936 = vmatmul.mubr.bf16.vlgmr.msra.gmra.mrb[4].mxu0 %v15163_v13 }
 0x102   :  { %10940 = vmatpush3.bf16.msra.mxu0 %v15169_v14  ;;  %11036 = vmatmul.mubr.bf16.vlgmr.msra.gmra.mrb[4].mxu1 %v15163_v13 }
 0x103   :  { %11040 = vmatpush3.bf16.msra.mxu1 %v15176_v15  ;;  %10941 = vmatprep.subr.bf16.mxu0 %v14423_v1 }
 0x104   :  { %11041 = vmatprep.subr.bf16.mxu1 %v14423_v1  ;;  %10955 = vmatprep.mubr.msk.bf16.mxu0 %vm14424_vm0, %v14423_v1 }
 0x105   :  { %11055 = vmatprep.mubr.msk.bf16.mxu1 %vm14424_vm0, %v14423_v1 }
 0x106   :  { %10942 = vmatpush3.bf16.msra.mxu0 %v15188_v16 }
 0x107   :  { %11042 = vmatpush3.bf16.msra.mxu1 %v15194_v17  ;;  %10943 = vmatprep.subr.bf16.mxu0 %v14423_v1 }
 0x108   :  { %11043 = vmatprep.subr.bf16.mxu1 %v14423_v1 }
 0x10a   :  { %10944 = vmatpush3.bf16.msra.mxu0 %v15202_v18 }
 0x10b   :  { %11044 = vmatpush3.bf16.msra.mxu1 %v15208_v19  ;;  %10945 = vmatprep.subr.bf16.mxu0 %v14423_v1 }
 0x10c   :  { %11045 = vmatprep.subr.bf16.mxu1 %v14423_v1 }
 0x10e   :  { %10946 = vmatpush3.bf16.msra.mxu0 %v15216_v20 }
 0x10f   :  { %11046 = vmatpush3.bf16.msra.mxu1 %v15222_v21  ;;  %10947 = vmatprep.subr.bf16.mxu0 %v14423_v1 }
 0x110   :  { %11047 = vmatprep.subr.bf16.mxu1 %v14423_v1 }
 0x112   :  { %10948 = vmatpush3.bf16.msra.mxu0 %v15230_v22 }
 0x113   :  { %11048 = vmatpush3.bf16.msra.mxu1 %v15236_v23  ;;  %10949 = vmatprep.subr.bf16.mxu0 %v14423_v1 }
 0x114   :  { %11049 = vmatprep.subr.bf16.mxu1 %v14423_v1 }
 0x116   :  { %10950 = vmatpush3.bf16.msra.mxu0 %v15244_v24 }
 0x117   :  { %11050 = vmatpush3.bf16.msra.mxu1 %v15250_v25  ;;  %10951 = vmatprep.subr.bf16.mxu0 %v14423_v1 }
 0x118   :  { %11051 = vmatprep.subr.bf16.mxu1 %v14423_v1 }
 0x11a   :  { %10952 = vmatpush3.bf16.msra.mxu0 %v15258_v27 }
 0x11b   :  { %11052 = vmatpush3.bf16.msra.mxu1 %v15264_v28  ;;  %10953 = vmatprep.subr.bf16.mxu0 %v14423_v1 }
 0x11c   :  { %11053 = vmatprep.subr.bf16.mxu1 %v14423_v1 }
 0x11e   :  { %10954 = vmatpush3.bf16.msra.mxu0 %v15272_v29 }
 0x11f   :  { %11054 = vmatpush3.bf16.msra.mxu1 %v15278_v30  ;;  %10959 = vmatprep.subr.bf16.mxu0 %v14423_v1 }
 0x120   :  { %11059 = vmatprep.subr.bf16.mxu1 %v14423_v1 }
 0x121   :  { %10956 = vmatmul.mubr.bf16.vlgmr.msra.gmra.mrb[4].mxu0 %v14851_v26 }
 0x122   :  { %10960 = vmatpush3.bf16.msra.mxu0 %v15287_v31  ;;  %11056 = vmatmul.mubr.bf16.vlgmr.msra.gmra.mrb[4].mxu1 %v14851_v26 }
 0x123   :  { %11060 = vmatpush3.bf16.msra.mxu1 %v15294_v32  ;;  %10961 = vmatprep.subr.bf16.mxu0 %v14423_v1 }
 0x124   :  { %11061 = vmatprep.subr.bf16.mxu1 %v14423_v1  ;;  %10975 = vmatprep.mubr.msk.bf16.mxu0 %vm14424_vm0, %v14423_v1 }
 0x125   :  { %11075 = vmatprep.mubr.msk.bf16.mxu1 %vm14424_vm0, %v14423_v1 }
 0x126   :  { %10962 = vmatpush3.bf16.msra.mxu0 %v15306_v33 }
 0x127   :  { %11062 = vmatpush3.bf16.msra.mxu1 %v15312_v34  ;;  %10963 = vmatprep.subr.bf16.mxu0 %v14423_v1 }
 0x128   :  { %11063 = vmatprep.subr.bf16.mxu1 %v14423_v1 }
 0x12a   :  { %10964 = vmatpush3.bf16.msra.mxu0 %v15320_v35 }
 0x12b   :  { %11064 = vmatpush3.bf16.msra.mxu1 %v15326_v36  ;;  %10965 = vmatprep.subr.bf16.mxu0 %v14423_v1 }
 0x12c   :  { %11065 = vmatprep.subr.bf16.mxu1 %v14423_v1 }
 0x12e   :  { %10966 = vmatpush3.bf16.msra.mxu0 %v15334_v37 }
 0x12f   :  { %11066 = vmatpush3.bf16.msra.mxu1 %v15340_v38  ;;  %10967 = vmatprep.subr.bf16.mxu0 %v14423_v1 }
 0x130   :  { %11067 = vmatprep.subr.bf16.mxu1 %v14423_v1 }
 0x131   :  { %16 = vsyncpa [#allocation3], 0  ;;  %v15350_v40 = vld [vmem:[%s19451_s1 + $0x120] sm:$0xff]   ;;  %v1307_v42 = vshll.u32 %v9128_v39, 16  ;;  %v15364_v43 = vld [vmem:[%s19451_s1 + $0x128] sm:$0xff]   ;;  %v1305_v59 = vshrl.u32 %v9128_v39, 16 }
 0x132   :  { %19555 = vst [vmem:[#allocation6_spill] sm:$0xff] %v15350_v40  ;;  %10968 = vmatpush3.bf16.msra.mxu0 %v15350_v40  ;;  %v15356_v41 = vld [vmem:[%s19451_s1 + $0x260] sm:$0xff]   ;;  %19557 = vst [vmem:[#allocation8_spill] sm:$0xff] %v15364_v43  ;;  %v15370_v44 = vld [vmem:[%s19451_s1 + $0x268] sm:$0xff]   ;;  %s14425_s25 = smov [#allocation2]  }
 0x133   :  { %19556 = vst [vmem:[#allocation7_spill] sm:$0xff] %v15356_v41  ;;  %11068 = vmatpush3.bf16.msra.mxu1 %v15356_v41  ;;  %10969 = vmatprep.subr.bf16.mxu0 %v14423_v1  ;;  %v1309_v41 = vrot.slane %v1307_v42, 1  ;;  %v15378_v40 = vld [vmem:[%s19451_s1 + $0x130] sm:$0xff]   ;;  %v15394_v42 = vld [vmem:[%s19451_s1 + $0x138] sm:$0xff]   ;;  %s9039_s26 = sshll.u32 %s14425_s25, 4  ;;  %s9040_s26 = int_to_ptr.vmem [resolvable:$true] %s9039_s26 }
 0x134   :  { %11069 = vmatprep.subr.bf16.mxu1 %v14423_v1  ;;  %19558 = vst [vmem:[#allocation9_spill] sm:$0xff] %v15378_v40  ;;  %p14404_p1 = scmp.lt.s32.totalorder %s9040_s26, %s9040_s26 }
 0x135   :  { %v15389_v39 = vor.u32 %v1309_v41, %v1305_v59  ;;  %v15410_v41 = vld [vmem:[%s19451_s1 + $0x40] sm:$0xff]  }
 0x136   :  { %10970 = vmatpush3.bf16.msra.mxu0 %v15364_v43  ;;  %v15384_v43 = vld [vmem:[%s19451_s1 + $0x270] sm:$0xff]   ;;  %19560 = vst [vmem:[#allocation11_spill] sm:$0xff] %v15410_v41  ;;  %v15416_v59 = vld [vmem:[%s19451_s1 + $0x180] sm:$0xff]  }
 0x137   :  { %11070 = vmatpush3.bf16.msra.mxu1 %v15370_v44  ;;  %10971 = vmatprep.subr.bf16.mxu0 %v14423_v1  ;;  %19561 = vst [vmem:[#allocation12_spill] sm:$0xff] %v15416_v59 }
 0x138   :  { %11071 = vmatprep.subr.bf16.mxu1 %v14423_v1 }
 0x13a   :  { %10972 = vmatpush3.bf16.msra.mxu0 %v15378_v40  ;;  %v15400_v40 = vld [vmem:[%s19451_s1 + $0x278] sm:$0xff]  }
 0x13b   :  { %11072 = vmatpush3.bf16.msra.mxu1 %v15384_v43  ;;  %10973 = vmatprep.subr.bf16.mxu0 %v14423_v1  ;;  %19559 = vst [vmem:[#allocation10_spill] sm:$0xff] %v15400_v40 }
 0x13c   :  { %11073 = vmatprep.subr.bf16.mxu1 %v14423_v1 }
 0x13e   :  { %10974 = vmatpush3.bf16.msra.mxu0 %v15394_v42 }
 0x13f   :  { %11074 = vmatpush3.bf16.msra.mxu1 %v15400_v40  ;;  %11079 = vmatprep.subr.bf16.mxu0 %v14423_v1  ;;  %v15442_v40 = vld [vmem:[%s19451_s1 + $0x50] sm:$0xff]  }
 0x140   :  { %11179 = vmatprep.subr.bf16.mxu1 %v14423_v1  ;;  %19564 = vst [vmem:[#allocation15_spill] sm:$0xff] %v15442_v40 }
 0x141   :  { %10976 = vmatmul.mubr.bf16.vlgmr.msra.gmra.mrb[4].mxu0 %v15389_v39 }
 0x142   :  { %11076 = vmatmul.mubr.bf16.vlgmr.msra.gmra.mrb[4].mxu1 %v15389_v39  ;;  %11080 = vmatpush3.bf16.msra.mxu0 %v15410_v41  ;;  %v15428_v41 = vld [vmem:[%s19451_s1 + $0x48] sm:$0xff]  }
 0x143   :  { %11180 = vmatpush3.bf16.msra.mxu1 %v15416_v59  ;;  %11081 = vmatprep.subr.bf16.mxu0 %v14423_v1  ;;  %19562 = vst [vmem:[#allocation13_spill] sm:$0xff] %v15428_v41  ;;  %v15434_v59 = vld [vmem:[%s19451_s1 + $0x188] sm:$0xff]  }
 0x144   :  { %11181 = vmatprep.subr.bf16.mxu1 %v14423_v1  ;;  %11095 = vmatprep.mubr.msk.bf16.mxu0 %vm14424_vm0, %v14423_v1  ;;  %19563 = vst [vmem:[#allocation14_spill] sm:$0xff] %v15434_v59 }
 0x145   :  { %11195 = vmatprep.mubr.msk.bf16.mxu1 %vm14424_vm0, %v14423_v1 }
 0x146   :  { %11082 = vmatpush3.bf16.msra.mxu0 %v15428_v41  ;;  %v15448_v41 = vld [vmem:[%s19451_s1 + $0x190] sm:$0xff]  }
 0x147   :  { %11182 = vmatpush3.bf16.msra.mxu1 %v15434_v59  ;;  %11083 = vmatprep.subr.bf16.mxu0 %v14423_v1  ;;  %19565 = vst [vmem:[#allocation16_spill] sm:$0xff] %v15448_v41  ;;  %v15456_v59 = vld [vmem:[%s19451_s1 + $0x58] sm:$0xff]  }
 0x148   :  { %11183 = vmatprep.subr.bf16.mxu1 %v14423_v1  ;;  %19566 = vst [vmem:[#allocation17_spill] sm:$0xff] %v15456_v59 }
 0x14a   :  { %11084 = vmatpush3.bf16.msra.mxu0 %v15442_v40  ;;  %v15462_v40 = vld [vmem:[%s19451_s1 + $0x198] sm:$0xff]  }
 0x14b   :  { %11184 = vmatpush3.bf16.msra.mxu1 %v15448_v41  ;;  %11085 = vmatprep.subr.bf16.mxu0 %v14423_v1  ;;  %19567 = vst [vmem:[#allocation18_spill] sm:$0xff] %v15462_v40  ;;  %v15470_v41 = vld [vmem:[%s19451_s1 + $0x60] sm:$0xff]  }
 0x14c   :  { %11185 = vmatprep.subr.bf16.mxu1 %v14423_v1  ;;  %19568 = vst [vmem:[#allocation19_spill] sm:$0xff] %v15470_v41 }
 0x14e   :  { %11086 = vmatpush3.bf16.msra.mxu0 %v15456_v59  ;;  %v15476_v59 = vld [vmem:[%s19451_s1 + $0x1a0] sm:$0xff]  }
 0x14f   :  { %11186 = vmatpush3.bf16.msra.mxu1 %v15462_v40  ;;  %11087 = vmatprep.subr.bf16.mxu0 %v14423_v1  ;;  %19569 = vst [vmem:[#allocation20_spill] sm:$0xff] %v15476_v59  ;;  %v15484_v40 = vld [vmem:[%s19451_s1 + $0x68] sm:$0xff]  }
 0x150   :  { %11187 = vmatprep.subr.bf16.mxu1 %v14423_v1  ;;  %19570 = vst [vmem:[#allocation21_spill] sm:$0xff] %v15484_v40 }
 0x152   :  { %11088 = vmatpush3.bf16.msra.mxu0 %v15470_v41  ;;  %v15490_v41 = vld [vmem:[%s19451_s1 + $0x1a8] sm:$0xff]  }
 0x153   :  { %11188 = vmatpush3.bf16.msra.mxu1 %v15476_v59  ;;  %11089 = vmatprep.subr.bf16.mxu0 %v14423_v1  ;;  %19571 = vst [vmem:[#allocation22_spill] sm:$0xff] %v15490_v41  ;;  %v15498_v59 = vld [vmem:[%s19451_s1 + $0x70] sm:$0xff]  }
 0x154   :  { %11189 = vmatprep.subr.bf16.mxu1 %v14423_v1  ;;  %19572 = vst [vmem:[#allocation23_spill] sm:$0xff] %v15498_v59 }
 0x156   :  { %11090 = vmatpush3.bf16.msra.mxu0 %v15484_v40  ;;  %v15504_v40 = vld [vmem:[%s19451_s1 + $0x1b0] sm:$0xff]  }
 0x157   :  { %11190 = vmatpush3.bf16.msra.mxu1 %v15490_v41  ;;  %11091 = vmatprep.subr.bf16.mxu0 %v14423_v1  ;;  %19573 = vst [vmem:[#allocation24_spill] sm:$0xff] %v15504_v40  ;;  %v15512_v41 = vld [vmem:[%s19451_s1 + $0x78] sm:$0xff]  }
 0x158   :  { %11191 = vmatprep.subr.bf16.mxu1 %v14423_v1  ;;  %19574 = vst [vmem:[#allocation25_spill] sm:$0xff] %v15512_v41 }
 0x15a   :  { %11092 = vmatpush3.bf16.msra.mxu0 %v15498_v59  ;;  %v15518_v59 = vld [vmem:[%s19451_s1 + $0x1b8] sm:$0xff]  }
 0x15b   :  { %11192 = vmatpush3.bf16.msra.mxu1 %v15504_v40  ;;  %11093 = vmatprep.subr.bf16.mxu0 %v14423_v1  ;;  %v15527_v40 = vld [vmem:[%s19451_s1] sm:$0xff]  }
 0x15c   :  { %11193 = vmatprep.subr.bf16.mxu1 %v14423_v1 }
 0x15e   :  { %11094 = vmatpush3.bf16.msra.mxu0 %v15512_v41  ;;  %v15534_v41 = vld [vmem:[%s19451_s1 + $0x140] sm:$0xff]  }
 0x15f   :  { %11194 = vmatpush3.bf16.msra.mxu1 %v15518_v59  ;;  %11099 = vmatprep.subr.bf16.mxu0 %v14423_v1 }
 0x160   :  { %11199 = vmatprep.subr.bf16.mxu1 %v14423_v1 }
 0x161   :  { %11096 = vmatmul.mubr.bf16.vlgmr.msra.gmra.mrb[8].mxu0 %v15163_v13 }
 0x162   :  { %11100 = vmatpush3.bf16.msra.mxu0 %v15527_v40  ;;  %11196 = vmatmul.mubr.bf16.vlgmr.msra.gmra.mrb[8].mxu1 %v15163_v13 }
 0x163   :  { %11200 = vmatpush3.bf16.msra.mxu1 %v15534_v41  ;;  %11101 = vmatprep.subr.bf16.mxu0 %v14423_v1 }
 0x164   :  { %11201 = vmatprep.subr.bf16.mxu1 %v14423_v1  ;;  %11115 = vmatprep.mubr.msk.bf16.mxu0 %vm14424_vm0, %v14423_v1 }
 0x165   :  { %11215 = vmatprep.mubr.msk.bf16.mxu1 %vm14424_vm0, %v14423_v1 }
 0x166   :  { %11102 = vmatpush3.bf16.msra.mxu0 %v14942_v45 }
 0x167   :  { %11202 = vmatpush3.bf16.msra.mxu1 %v14948_v46  ;;  %11103 = vmatprep.subr.bf16.mxu0 %v14423_v1 }
 0x168   :  { %11203 = vmatprep.subr.bf16.mxu1 %v14423_v1 }
 0x16a   :  { %11104 = vmatpush3.bf16.msra.mxu0 %v14956_v47 }
 0x16b   :  { %11204 = vmatpush3.bf16.msra.mxu1 %v14962_v48  ;;  %11105 = vmatprep.subr.bf16.mxu0 %v14423_v1 }
 0x16c   :  { %11205 = vmatprep.subr.bf16.mxu1 %v14423_v1 }
 0x16e   :  { %11106 = vmatpush3.bf16.msra.mxu0 %v14970_v49 }
 0x16f   :  { %11206 = vmatpush3.bf16.msra.mxu1 %v14976_v50  ;;  %11107 = vmatprep.subr.bf16.mxu0 %v14423_v1 }
 0x170   :  { %11207 = vmatprep.subr.bf16.mxu1 %v14423_v1 }
 0x172   :  { %11108 = vmatpush3.bf16.msra.mxu0 %v14984_v51 }
 0x173   :  { %11208 = vmatpush3.bf16.msra.mxu1 %v14990_v52  ;;  %11109 = vmatprep.subr.bf16.mxu0 %v14423_v1 }
 0x174   :  { %v15558_v45 = vpop.f32.mrb[0].mxu0  ;;  %11209 = vmatprep.subr.bf16.mxu1 %v14423_v1 }
 0x175   :  { %v15561_v46 = vpop.f32.mrb[0].mxu1  ;;  %v10777_v47 = vpop.f32.mrb[1].mxu0 }
 0x176   :  { %v1138_v48 = vmax.f32 %v15558_v45, %v15561_v46  ;;  %v10877_v49 = vpop.f32.mrb[1].mxu1  ;;  %v611_v50 = vpop.f32.mrb[2].mxu0  ;;  %11110 = vmatpush3.bf16.msra.mxu0 %v14998_v53  ;;  %v15580_v53 = vld [vmem:[%s19450_s0 + $0x10] sm:$0xf]  ;;  %v14276_v47 = vld [vmem:[%s19451_s1 + $0x158] sm:$0xff]   ;;  %v14280_v45 = vld [vmem:[%s19451_s1 + $0x168] sm:$0xff]  }
 0x177   :  { %v1134_v13 = vpop.f32.mrb[2].mxu1  ;;  %11210 = vmatpush3.bf16.msra.mxu1 %v15004_v54  ;;  %v10778_v51 = vpop.f32.mrb[3].mxu0  ;;  %11111 = vmatprep.subr.bf16.mxu0 %v14423_v1  ;;  %v9130_v54 = vcombine.low %v15580_v53, %v15580_v53  ;;  %v14277_v49 = vld [vmem:[%s19451_s1 + $0x20] sm:$0xff]  }
 0x178   :  { %v10878_v52 = vpop.f32.mrb[3].mxu1  ;;  %11211 = vmatprep.subr.bf16.mxu1 %v14423_v1  ;;  %v19591_v13 = vld [vmem:[#allocation22_spill] sm:$0xff]  ;;  %v14278_v50 = vld [vmem:[%s19451_s1 + $0x160] sm:$0xff]  }
 0x17a   :  { %11112 = vmatpush3.bf16.msra.mxu0 %v15012_v55  ;;  %v19575_v55 = vld [vmem:[#allocation6_spill] sm:$0xff] }
 0x17b   :  { %11212 = vmatpush3.bf16.msra.mxu1 %v15018_v56  ;;  %11113 = vmatprep.subr.bf16.mxu0 %v14423_v1  ;;  %v19576_v56 = vld [vmem:[#allocation7_spill] sm:$0xff] }
 0x17c   :  { %11213 = vmatprep.subr.bf16.mxu1 %v14423_v1 }
 0x17e   :  { %11114 = vmatpush3.bf16.msra.mxu0 %v15026_v57  ;;  %v1735_v57 = vshll.u32 %v9130_v54, 16 }
 0x17f   :  { %11214 = vmatpush3.bf16.msra.mxu1 %v15032_v58  ;;  %11119 = vmatprep.subr.bf16.mxu0 %v14423_v1  ;;  %v19577_v58 = vld [vmem:[#allocation8_spill] sm:$0xff] }
 0x180   :  { %11219 = vmatprep.subr.bf16.mxu1 %v14423_v1 }
 0x181   :  { %11116 = vmatmul.mubr.bf16.vlgmr.msra.gmra.mrb[8].mxu0 %v15580_v53 }
 0x182   :  { %11120 = vmatpush3.bf16.msra.mxu0 %v15046_v60  ;;  %11216 = vmatmul.mubr.bf16.vlgmr.msra.gmra.mrb[8].mxu1 %v15580_v53  ;;  %v1733_v60 = vshrl.u32 %v9130_v54, 16 }
 0x183   :  { %11220 = vmatpush3.bf16.msra.mxu1 %v15053_v61  ;;  %11121 = vmatprep.subr.bf16.mxu0 %v14423_v1  ;;  %v1737_v61 = vrot.slane %v1735_v57, 1 }
 0x184   :  { %11221 = vmatprep.subr.bf16.mxu1 %v14423_v1  ;;  %11135 = vmatprep.mubr.msk.bf16.mxu0 %vm14424_vm0, %v14423_v1 }
 0x185   :  { %11235 = vmatprep.mubr.msk.bf16.mxu1 %vm14424_vm0, %v14423_v1 }
 0x186   :  { %11122 = vmatpush3.bf16.msra.mxu0 %v15065_v62  ;;  %v19578_v62 = vld [vmem:[#allocation9_spill] sm:$0xff] }
 0x187   :  { %11222 = vmatpush3.bf16.msra.mxu1 %v15071_v63  ;;  %11123 = vmatprep.subr.bf16.mxu0 %v14423_v1  ;;  %v15694_v63 = vor.u32 %v1737_v61, %v1733_v60  ;;  %v14279_v61 = vld [vmem:[%s19451_s1 + $0x28] sm:$0xff]  }
 0x188   :  { %11223 = vmatprep.subr.bf16.mxu1 %v14423_v1 }
 0x18a   :  { %11124 = vmatpush3.bf16.msra.mxu0 %v15079_v0  ;;  %v19579_v0 = vld [vmem:[#allocation10_spill] sm:$0xff] }
 0x18b   :  { %11224 = vmatpush3.bf16.msra.mxu1 %v15085_v2  ;;  %11125 = vmatprep.subr.bf16.mxu0 %v14423_v1  ;;  %v19580_v2 = vld [vmem:[#allocation11_spill] sm:$0xff] }
 0x18c   :  { %11225 = vmatprep.subr.bf16.mxu1 %v14423_v1 }
 0x18e   :  { %11126 = vmatpush3.bf16.msra.mxu0 %v15093_v3  ;;  %v19581_v3 = vld [vmem:[#allocation12_spill] sm:$0xff] }
 0x18f   :  { %11226 = vmatpush3.bf16.msra.mxu1 %v15099_v4  ;;  %11127 = vmatprep.subr.bf16.mxu0 %v14423_v1  ;;  %v19582_v4 = vld [vmem:[#allocation13_spill] sm:$0xff] }
 0x190   :  { %11227 = vmatprep.subr.bf16.mxu1 %v14423_v1 }
 0x192   :  { %11128 = vmatpush3.bf16.msra.mxu0 %v15107_v5  ;;  %v19583_v5 = vld [vmem:[#allocation14_spill] sm:$0xff] }
 0x193   :  { %11228 = vmatpush3.bf16.msra.mxu1 %v15113_v6  ;;  %11129 = vmatprep.subr.bf16.mxu0 %v14423_v1  ;;  %v19584_v6 = vld [vmem:[#allocation15_spill] sm:$0xff] }
 0x194   :  { %11229 = vmatprep.subr.bf16.mxu1 %v14423_v1 }
 0x196   :  { %11130 = vmatpush3.bf16.msra.mxu0 %v15121_v7  ;;  %v19585_v7 = vld [vmem:[#allocation16_spill] sm:$0xff] }
 0x197   :  { %11230 = vmatpush3.bf16.msra.mxu1 %v15127_v8  ;;  %11131 = vmatprep.subr.bf16.mxu0 %v14423_v1  ;;  %v19586_v8 = vld [vmem:[#allocation17_spill] sm:$0xff] }
 0x198   :  { %11231 = vmatprep.subr.bf16.mxu1 %v14423_v1 }
 0x19a   :  { %11132 = vmatpush3.bf16.msra.mxu0 %v15135_v9  ;;  %v19587_v9 = vld [vmem:[#allocation18_spill] sm:$0xff] }
 0x19b   :  { %11232 = vmatpush3.bf16.msra.mxu1 %v15141_v10  ;;  %11133 = vmatprep.subr.bf16.mxu0 %v14423_v1  ;;  %v19588_v10 = vld [vmem:[#allocation19_spill] sm:$0xff] }
 0x19c   :  { %11233 = vmatprep.subr.bf16.mxu1 %v14423_v1 }
 0x19e   :  { %11134 = vmatpush3.bf16.msra.mxu0 %v15149_v11  ;;  %v19589_v11 = vld [vmem:[#allocation20_spill] sm:$0xff] }
 0x19f   :  { %11234 = vmatpush3.bf16.msra.mxu1 %v15155_v12  ;;  %11139 = vmatprep.subr.bf16.mxu0 %v14423_v1  ;;  %v19590_v12 = vld [vmem:[#allocation21_spill] sm:$0xff] }
 0x1a0   :  { %11239 = vmatprep.subr.bf16.mxu1 %v14423_v1 }
 0x1a1   :  { %11136 = vmatmul.mubr.bf16.vlgmr.msra.gmra.mrb[8].mxu0 %v14851_v26 }
 0x1a2   :  { %11140 = vmatpush3.bf16.msra.mxu0 %v15169_v14  ;;  %11236 = vmatmul.mubr.bf16.vlgmr.msra.gmra.mrb[8].mxu1 %v14851_v26  ;;  %v19592_v14 = vld [vmem:[#allocation23_spill] sm:$0xff] }
 0x1a3   :  { %11240 = vmatpush3.bf16.msra.mxu1 %v15176_v15  ;;  %11141 = vmatprep.subr.bf16.mxu0 %v14423_v1  ;;  %v19593_v15 = vld [vmem:[#allocation24_spill] sm:$0xff] }
 0x1a4   :  { %11241 = vmatprep.subr.bf16.mxu1 %v14423_v1  ;;  %11155 = vmatprep.mubr.msk.bf16.mxu0 %vm14424_vm0, %v14423_v1 }
 0x1a5   :  { %11255 = vmatprep.mubr.msk.bf16.mxu1 %vm14424_vm0, %v14423_v1 }
 0x1a6   :  { %11142 = vmatpush3.bf16.msra.mxu0 %v15188_v16  ;;  %v19594_v16 = vld [vmem:[#allocation25_spill] sm:$0xff] }
 0x1a7   :  { %11242 = vmatpush3.bf16.msra.mxu1 %v15194_v17  ;;  %11143 = vmatprep.subr.bf16.mxu0 %v14423_v1  ;;  %v14271_v17 = vld [vmem:[%s19451_s1 + $0x8] sm:$0xff]  }
 0x1a8   :  { %11243 = vmatprep.subr.bf16.mxu1 %v14423_v1 }
 0x1aa   :  { %11144 = vmatpush3.bf16.msra.mxu0 %v15202_v18 }
 0x1ab   :  { %11244 = vmatpush3.bf16.msra.mxu1 %v15208_v19  ;;  %11145 = vmatprep.subr.bf16.mxu0 %v14423_v1 }
 0x1ac   :  { %11245 = vmatprep.subr.bf16.mxu1 %v14423_v1 }
 0x1ae   :  { %11146 = vmatpush3.bf16.msra.mxu0 %v15216_v20 }
 0x1af   :  { %11246 = vmatpush3.bf16.msra.mxu1 %v15222_v21  ;;  %11147 = vmatprep.subr.bf16.mxu0 %v14423_v1 }
 0x1b0   :  { %11247 = vmatprep.subr.bf16.mxu1 %v14423_v1 }
 0x1b2   :  { %11148 = vmatpush3.bf16.msra.mxu0 %v15230_v22 }
 0x1b3   :  { %11248 = vmatpush3.bf16.msra.mxu1 %v15236_v23  ;;  %11149 = vmatprep.subr.bf16.mxu0 %v14423_v1 }
 0x1b4   :  { %11249 = vmatprep.subr.bf16.mxu1 %v14423_v1 }
 0x1b6   :  { %11150 = vmatpush3.bf16.msra.mxu0 %v15244_v24 }
 0x1b7   :  { %11250 = vmatpush3.bf16.msra.mxu1 %v15250_v25  ;;  %11151 = vmatprep.subr.bf16.mxu0 %v14423_v1 }
 0x1b8   :  { %11251 = vmatprep.subr.bf16.mxu1 %v14423_v1 }
 0x1ba   :  { %11152 = vmatpush3.bf16.msra.mxu0 %v15258_v27 }
 0x1bb   :  { %11252 = vmatpush3.bf16.msra.mxu1 %v15264_v28  ;;  %11153 = vmatprep.subr.bf16.mxu0 %v14423_v1 }
 0x1bc   :  { %11253 = vmatprep.subr.bf16.mxu1 %v14423_v1 }
 0x1be   :  { %11154 = vmatpush3.bf16.msra.mxu0 %v15272_v29 }
 0x1bf   :  { %11254 = vmatpush3.bf16.msra.mxu1 %v15278_v30  ;;  %11159 = vmatprep.subr.bf16.mxu0 %v14423_v1 }
 0x1c0   :  { %11259 = vmatprep.subr.bf16.mxu1 %v14423_v1 }
 0x1c1   :  { %11156 = vmatmul.mubr.bf16.vlgmr.msra.gmra.mrb[8].mxu0 %v15389_v39 }
 0x1c2   :  { %11160 = vmatpush3.bf16.msra.mxu0 %v15287_v31  ;;  %11256 = vmatmul.mubr.bf16.vlgmr.msra.gmra.mrb[8].mxu1 %v15389_v39 }
 0x1c3   :  { %11260 = vmatpush3.bf16.msra.mxu1 %v15294_v32  ;;  %11161 = vmatprep.subr.bf16.mxu0 %v14423_v1 }
 0x1c4   :  { %11261 = vmatprep.subr.bf16.mxu1 %v14423_v1  ;;  %11175 = vmatprep.mubr.msk.bf16.mxu0 %vm14424_vm0, %v14423_v1 }
 0x1c5   :  { %11275 = vmatprep.mubr.msk.bf16.mxu1 %vm14424_vm0, %v14423_v1 }
 0x1c6   :  { %11162 = vmatpush3.bf16.msra.mxu0 %v15306_v33 }
 0x1c7   :  { %11262 = vmatpush3.bf16.msra.mxu1 %v15312_v34  ;;  %11163 = vmatprep.subr.bf16.mxu0 %v14423_v1 }
 0x1c8   :  { %11263 = vmatprep.subr.bf16.mxu1 %v14423_v1 }
 0x1ca   :  { %11164 = vmatpush3.bf16.msra.mxu0 %v15320_v35 }
 0x1cb   :  { %11264 = vmatpush3.bf16.msra.mxu1 %v15326_v36  ;;  %11165 = vmatprep.subr.bf16.mxu0 %v14423_v1 }
 0x1cc   :  { %11265 = vmatprep.subr.bf16.mxu1 %v14423_v1 }
 0x1ce   :  { %11166 = vmatpush3.bf16.msra.mxu0 %v15334_v37 }
 0x1cf   :  { %11266 = vmatpush3.bf16.msra.mxu1 %v15340_v38  ;;  %11167 = vmatprep.subr.bf16.mxu0 %v14423_v1 }
 0x1d0   :  { %11267 = vmatprep.subr.bf16.mxu1 %v14423_v1 }
 0x1d2   :  { %11168 = vmatpush3.bf16.msra.mxu0 %v19575_v55 }
 0x1d3   :  { %11268 = vmatpush3.bf16.msra.mxu1 %v19576_v56  ;;  %11169 = vmatprep.subr.bf16.mxu0 %v14423_v1 }
 0x1d4   :  { %11269 = vmatprep.subr.bf16.mxu1 %v14423_v1 }
 0x1d6   :  { %11170 = vmatpush3.bf16.msra.mxu0 %v19577_v58 }
 0x1d7   :  { %11270 = vmatpush3.bf16.msra.mxu1 %v15370_v44  ;;  %11171 = vmatprep.subr.bf16.mxu0 %v14423_v1 }
 0x1d8   :  { %11271 = vmatprep.subr.bf16.mxu1 %v14423_v1 }
 0x1da   :  { %11172 = vmatpush3.bf16.msra.mxu0 %v19578_v62 }
 0x1db   :  { %11272 = vmatpush3.bf16.msra.mxu1 %v15384_v43  ;;  %11173 = vmatprep.subr.bf16.mxu0 %v14423_v1 }
 0x1dc   :  { %11273 = vmatprep.subr.bf16.mxu1 %v14423_v1 }
 0x1de   :  { %11174 = vmatpush3.bf16.msra.mxu0 %v15394_v42 }
 0x1df   :  { %11274 = vmatpush3.bf16.msra.mxu1 %v19579_v0  ;;  %11279 = vmatprep.subr.bf16.mxu0 %v14423_v1 }
 0x1e0   :  { %11379 = vmatprep.subr.bf16.mxu1 %v14423_v1 }
 0x1e1   :  { %11176 = vmatmul.mubr.bf16.vlgmr.msra.gmra.mrb[8].mxu0 %v15694_v63 }
 0x1e2   :  { %11276 = vmatmul.mubr.bf16.vlgmr.msra.gmra.mrb[8].mxu1 %v15694_v63  ;;  %11280 = vmatpush3.bf16.msra.mxu0 %v19580_v2 }
 0x1e3   :  { %11380 = vmatpush3.bf16.msra.mxu1 %v19581_v3  ;;  %11281 = vmatprep.subr.bf16.mxu0 %v14423_v1 }
 0x1e4   :  { %11381 = vmatprep.subr.bf16.mxu1 %v14423_v1  ;;  %11295 = vmatprep.mubr.msk.bf16.mxu0 %vm14424_vm0, %v14423_v1 }
 0x1e5   :  { %11395 = vmatprep.mubr.msk.bf16.mxu1 %vm14424_vm0, %v14423_v1 }
 0x1e6   :  { %11282 = vmatpush3.bf16.msra.mxu0 %v19582_v4  ;;  %v14281_v4 = vld [vmem:[%s19451_s1 + $0x30] sm:$0xff]  }
 0x1e7   :  { %11382 = vmatpush3.bf16.msra.mxu1 %v19583_v5  ;;  %11283 = vmatprep.subr.bf16.mxu0 %v14423_v1  ;;  %v14282_v5 = vld [vmem:[%s19451_s1 + $0x170] sm:$0xff]  }
 0x1e8   :  { %11383 = vmatprep.subr.bf16.mxu1 %v14423_v1 }
 0x1ea   :  { %11284 = vmatpush3.bf16.msra.mxu0 %v19584_v6  ;;  %v14283_v6 = vld [vmem:[%s19451_s1 + $0x38] sm:$0xff]  }
 0x1eb   :  { %11384 = vmatpush3.bf16.msra.mxu1 %v19585_v7  ;;  %11285 = vmatprep.subr.bf16.mxu0 %v14423_v1  ;;  %v14284_v7 = vld [vmem:[%s19451_s1 + $0x178] sm:$0xff]  }
 0x1ec   :  { %11385 = vmatprep.subr.bf16.mxu1 %v14423_v1 }
 0x1ee   :  { %11286 = vmatpush3.bf16.msra.mxu0 %v19586_v8  ;;  %v19595_v8 = vld [vmem:[#allocation5_spill] sm:$0xff] }
 0x1ef   :  { %11386 = vmatpush3.bf16.msra.mxu1 %v19587_v9  ;;  %11287 = vmatprep.subr.bf16.mxu0 %v14423_v1  ;;  %v14285_v9 = vld [vmem:[%s19451_s1 + $0x80] sm:$0xff]  }
 0x1f0   :  { %11387 = vmatprep.subr.bf16.mxu1 %v14423_v1 }
 0x1f2   :  { %11288 = vmatpush3.bf16.msra.mxu0 %v19588_v10  ;;  %v14286_v10 = vld [vmem:[%s19451_s1 + $0x1c0] sm:$0xff]  }
 0x1f3   :  { %11388 = vmatpush3.bf16.msra.mxu1 %v19589_v11  ;;  %11289 = vmatprep.subr.bf16.mxu0 %v14423_v1  ;;  %v14287_v11 = vld [vmem:[%s19451_s1 + $0x88] sm:$0xff]  }
 0x1f4   :  { %11389 = vmatprep.subr.bf16.mxu1 %v14423_v1 }
 0x1f6   :  { %11290 = vmatpush3.bf16.msra.mxu0 %v19590_v12  ;;  %v14288_v12 = vld [vmem:[%s19451_s1 + $0x1c8] sm:$0xff]  }
 0x1f7   :  { %11390 = vmatpush3.bf16.msra.mxu1 %v19591_v13  ;;  %11291 = vmatprep.subr.bf16.mxu0 %v14423_v1  ;;  %v14289_v13 = vld [vmem:[%s19451_s1 + $0x90] sm:$0xff]  }
 0x1f8   :  { %11391 = vmatprep.subr.bf16.mxu1 %v14423_v1 }
 0x1fa   :  { %11292 = vmatpush3.bf16.msra.mxu0 %v19592_v14  ;;  %v14290_v14 = vld [vmem:[%s19451_s1 + $0x1d0] sm:$0xff]  }
 0x1fb   :  { %11392 = vmatpush3.bf16.msra.mxu1 %v19593_v15  ;;  %11293 = vmatprep.subr.bf16.mxu0 %v14423_v1  ;;  %v14291_v15 = vld [vmem:[%s19451_s1 + $0x98] sm:$0xff]  }
 0x1fc   :  { %11393 = vmatprep.subr.bf16.mxu1 %v14423_v1 }
 0x1fe   :  { %11294 = vmatpush3.bf16.msra.mxu0 %v19594_v16  ;;  %v14292_v16 = vld [vmem:[%s19451_s1 + $0x1d8] sm:$0xff]  }
 0x1ff   :  { %11394 = vmatpush3.bf16.msra.mxu1 %v15518_v59  ;;  %11299 = vmatprep.subr.bf16.mxu0 %v14423_v1  ;;  %v14275_v59 = vld [vmem:[%s19451_s1 + $0x18] sm:$0xff]  }
 0x200   :  { %11399 = vmatprep.subr.bf16.mxu1 %v14423_v1 }
 0x201   :  { %11296 = vmatmul.mubr.bf16.vlgmr.msra.gmra.mrb[12].mxu0 %v14851_v26 }
 0x202   :  { %11300 = vmatpush3.bf16.msra.mxu0 %v15527_v40  ;;  %11396 = vmatmul.mubr.bf16.vlgmr.msra.gmra.mrb[12].mxu1 %v14851_v26  ;;  %v14272_v26 = vld [vmem:[%s19451_s1 + $0x148] sm:$0xff]   ;;  %v14273_v40 = vld [vmem:[%s19451_s1 + $0x10] sm:$0xff]  }
 0x203   :  { %11400 = vmatpush3.bf16.msra.mxu1 %v15534_v41  ;;  %11301 = vmatprep.subr.bf16.mxu0 %v14423_v1  ;;  %v14274_v41 = vld [vmem:[%s19451_s1 + $0x150] sm:$0xff]  }
 0x204   :  { %11401 = vmatprep.subr.bf16.mxu1 %v14423_v1  ;;  %11315 = vmatprep.mubr.msk.bf16.mxu0 %vm14424_vm0, %v14423_v1 }
 0x205   :  { %11415 = vmatprep.mubr.msk.bf16.mxu1 %vm14424_vm0, %v14423_v1 }
 0x206   :  { %11302 = vmatpush3.bf16.msra.mxu0 %v14271_v17  ;;  %v14293_v17 = vld [vmem:[%s19451_s1 + $0xa0] sm:$0xff]  }
 0x207   :  { %11402 = vmatpush3.bf16.msra.mxu1 %v14272_v26  ;;  %11303 = vmatprep.subr.bf16.mxu0 %v14423_v1  ;;  %v14294_v26 = vld [vmem:[%s19451_s1 + $0x1e0] sm:$0xff]  }
 0x208   :  { %11403 = vmatprep.subr.bf16.mxu1 %v14423_v1 }
 0x20a   :  { %11304 = vmatpush3.bf16.msra.mxu0 %v14273_v40  ;;  %v14295_v40 = vld [vmem:[%s19451_s1 + $0xa8] sm:$0xff]  }
 0x20b   :  { %11404 = vmatpush3.bf16.msra.mxu1 %v14274_v41  ;;  %11305 = vmatprep.subr.bf16.mxu0 %v14423_v1  ;;  %v14296_v41 = vld [vmem:[%s19451_s1 + $0x1e8] sm:$0xff]  }
 0x20c   :  { %11405 = vmatprep.subr.bf16.mxu1 %v14423_v1 }
 0x20e   :  { %11306 = vmatpush3.bf16.msra.mxu0 %v14275_v59  ;;  %v14297_v59 = vld [vmem:[%s19451_s1 + $0xb0] sm:$0xff]  }
 0x20f   :  { %11406 = vmatpush3.bf16.msra.mxu1 %v14276_v47  ;;  %11307 = vmatprep.subr.bf16.mxu0 %v14423_v1  ;;  %v14298_v47 = vld [vmem:[%s19451_s1 + $0x1f0] sm:$0xff]  }
 0x210   :  { %11407 = vmatprep.subr.bf16.mxu1 %v14423_v1 }
 0x212   :  { %11308 = vmatpush3.bf16.msra.mxu0 %v14277_v49  ;;  %v14299_v49 = vld [vmem:[%s19451_s1 + $0xb8] sm:$0xff]  }
 0x213   :  { %11408 = vmatpush3.bf16.msra.mxu1 %v14278_v50  ;;  %11309 = vmatprep.subr.bf16.mxu0 %v14423_v1  ;;  %v14300_v50 = vld [vmem:[%s19451_s1 + $0x1f8] sm:$0xff]  }
 0x214   :  { %v1346_v51 = vpop.f32.mrb[4].mxu0  ;;  %11409 = vmatprep.subr.bf16.mxu1 %v14423_v1 }
 0x215   :  { %v15783_v52 = vmax.f32 %v1138_v48, %v1346_v51  ;;  %v15785_v53 = vpop.f32.mrb[4].mxu1  ;;  %v10977_v54 = vpop.f32.mrb[5].mxu0  ;;  %v14301_v51 = vld [vmem:[%s19451_s1 + $0xc0] sm:$0xff]  }
 0x216   :  { %v11077_v57 = vpop.f32.mrb[5].mxu1  ;;  %v1349_v60 = vpop.f32.mrb[6].mxu0  ;;  %11310 = vmatpush3.bf16.msra.mxu0 %v14279_v61  ;;  %v14302_v54 = vld [vmem:[%s19451_s1 + $0x200] sm:$0xff]   ;;  %v16080_v61 = vld [vmem:[%s19453_s3 + $0x1b8] sm:$0xff]  }
 0x217   :  { %v1557_v2 = vmax.f32 %v15783_v52, %v15785_v53  ;;  %v1553_v3 = vpop.f32.mrb[6].mxu1  ;;  %11410 = vmatpush3.bf16.msra.mxu1 %v14280_v45  ;;  %v10978_v46 = vpop.f32.mrb[7].mxu0  ;;  %11311 = vmatprep.subr.bf16.mxu0 %v14423_v1  ;;  %v14303_v57 = vld [vmem:[%s19451_s1 + $0xc8] sm:$0xff]   ;;  %v16075_v60 = vld [vmem:[%s19453_s3 + $0x78] sm:$0xff]   ;;  %v16213_v53 = vld [vmem:[%s19453_s3 + $0x80] sm:$0xff]  }
 0x218   :  { %v11078_v48 = vpop.f32.mrb[7].mxu1  ;;  %11411 = vmatprep.subr.bf16.mxu1 %v14423_v1 }
 0x21a   :  { %11312 = vmatpush3.bf16.msra.mxu0 %v14281_v4 }
 0x21b   :  { %11412 = vmatpush3.bf16.msra.mxu1 %v14282_v5  ;;  %11313 = vmatprep.subr.bf16.mxu0 %v14423_v1 }
 0x21c   :  { %11413 = vmatprep.subr.bf16.mxu1 %v14423_v1 }
 0x21e   :  { %11314 = vmatpush3.bf16.msra.mxu0 %v14283_v6 }
 0x21f   :  { %11414 = vmatpush3.bf16.msra.mxu1 %v14284_v7  ;;  %11319 = vmatprep.subr.bf16.mxu0 %v14423_v1 }
 0x220   :  { %11419 = vmatprep.subr.bf16.mxu1 %v14423_v1 }
 0x221   :  { %11316 = vmatmul.mubr.bf16.vlgmr.msra.gmra.mrb[12].mxu0 %v19595_v8 }
 0x222   :  { %11320 = vmatpush3.bf16.msra.mxu0 %v14285_v9  ;;  %11416 = vmatmul.mubr.bf16.vlgmr.msra.gmra.mrb[12].mxu1 %v19595_v8  ;;  %v9129_v9 = vld [vmem:[%s19452_s2] ss:$0 sm:$0xff] }
 0x223   :  { %11420 = vmatpush3.bf16.msra.mxu1 %v14286_v10  ;;  %11321 = vmatprep.subr.bf16.mxu0 %v14423_v1 }
 0x224   :  { %11421 = vmatprep.subr.bf16.mxu1 %v14423_v1  ;;  %11335 = vmatprep.mubr.msk.bf16.mxu0 %vm14424_vm0, %v14423_v1 }
 0x225   :  { %11435 = vmatprep.mubr.msk.bf16.mxu1 %vm14424_vm0, %v14423_v1 }
 0x226   :  { %11322 = vmatpush3.bf16.msra.mxu0 %v14287_v11 }
 0x227   :  { %11422 = vmatpush3.bf16.msra.mxu1 %v14288_v12  ;;  %11323 = vmatprep.subr.bf16.mxu0 %v14423_v1 }
 0x228   :  { %11423 = vmatprep.subr.bf16.mxu1 %v14423_v1 }
 0x22a   :  { %11324 = vmatpush3.bf16.msra.mxu0 %v14289_v13  ;;  %v16092_v13 = vld [vmem:[%s19453_s3] sm:$0xff]  }
 0x22b   :  { %11424 = vmatpush3.bf16.msra.mxu1 %v14290_v14  ;;  %11325 = vmatprep.subr.bf16.mxu0 %v14423_v1  ;;  %v16097_v14 = vld [vmem:[%s19453_s3 + $0x140] sm:$0xff]  }
 0x22c   :  { %11425 = vmatprep.subr.bf16.mxu1 %v14423_v1 }
 0x22e   :  { %11326 = vmatpush3.bf16.msra.mxu0 %v14291_v15 }
 0x22f   :  { %11426 = vmatpush3.bf16.msra.mxu1 %v14292_v16  ;;  %11327 = vmatprep.subr.bf16.mxu0 %v14423_v1  ;;  %v16108_v16 = vld [vmem:[%s19453_s3 + $0x8] sm:$0xff]  }
 0x230   :  { %11427 = vmatprep.subr.bf16.mxu1 %v14423_v1 }
 0x232   :  { %11328 = vmatpush3.bf16.msra.mxu0 %v14293_v17  ;;  %v16113_v17 = vld [vmem:[%s19453_s3 + $0x148] sm:$0xff]  }
 0x233   :  { %11428 = vmatpush3.bf16.msra.mxu1 %v14294_v26  ;;  %11329 = vmatprep.subr.bf16.mxu0 %v14423_v1  ;;  %v16126_v26 = vld [vmem:[%s19453_s3 + $0x10] sm:$0xff]  }
 0x234   :  { %11429 = vmatprep.subr.bf16.mxu1 %v14423_v1 }
 0x236   :  { %11330 = vmatpush3.bf16.msra.mxu0 %v14295_v40  ;;  %v16131_v40 = vld [vmem:[%s19453_s3 + $0x150] sm:$0xff]  }
 0x237   :  { %11430 = vmatpush3.bf16.msra.mxu1 %v14296_v41  ;;  %11331 = vmatprep.subr.bf16.mxu0 %v14423_v1  ;;  %v16140_v41 = vld [vmem:[%s19453_s3 + $0x18] sm:$0xff]  }
 0x238   :  { %11431 = vmatprep.subr.bf16.mxu1 %v14423_v1 }
 0x23a   :  { %11332 = vmatpush3.bf16.msra.mxu0 %v14297_v59  ;;  %v16145_v59 = vld [vmem:[%s19453_s3 + $0x158] sm:$0xff]  }
 0x23b   :  { %11432 = vmatpush3.bf16.msra.mxu1 %v14298_v47  ;;  %11333 = vmatprep.subr.bf16.mxu0 %v14423_v1  ;;  %v16154_v47 = vld [vmem:[%s19453_s3 + $0x20] sm:$0xff]  }
 0x23c   :  { %11433 = vmatprep.subr.bf16.mxu1 %v14423_v1 }
 0x23e   :  { %11334 = vmatpush3.bf16.msra.mxu0 %v14299_v49  ;;  %v16159_v49 = vld [vmem:[%s19453_s3 + $0x160] sm:$0xff]  }
 0x23f   :  { %11434 = vmatpush3.bf16.msra.mxu1 %v14300_v50  ;;  %11339 = vmatprep.subr.bf16.mxu0 %v14423_v1  ;;  %v16168_v50 = vld [vmem:[%s19453_s3 + $0x28] sm:$0xff]  }
 0x240   :  { %11439 = vmatprep.subr.bf16.mxu1 %v14423_v1 }
 0x241   :  { %11336 = vmatmul.mubr.bf16.vlgmr.msra.gmra.mrb[12].mxu0 %v15389_v39 }
 0x242   :  { %11340 = vmatpush3.bf16.msra.mxu0 %v14301_v51  ;;  %11436 = vmatmul.mubr.bf16.vlgmr.msra.gmra.mrb[12].mxu1 %v15389_v39  ;;  %v14304_v39 = vld [vmem:[%s19451_s1 + $0x208] sm:$0xff]  }
 0x243   :  { %11440 = vmatpush3.bf16.msra.mxu1 %v14302_v54  ;;  %11341 = vmatprep.subr.bf16.mxu0 %v14423_v1  ;;  %v16173_v51 = vld [vmem:[%s19453_s3 + $0x168] sm:$0xff]   ;;  %v16182_v54 = vld [vmem:[%s19453_s3 + $0x30] sm:$0xff]  }
 0x244   :  { %11441 = vmatprep.subr.bf16.mxu1 %v14423_v1  ;;  %11355 = vmatprep.mubr.msk.bf16.mxu0 %vm14424_vm0, %v14423_v1 }
 0x245   :  { %11455 = vmatprep.mubr.msk.bf16.mxu1 %vm14424_vm0, %v14423_v1 }
 0x246   :  { %11342 = vmatpush3.bf16.msra.mxu0 %v14303_v57  ;;  %v16187_v57 = vld [vmem:[%s19453_s3 + $0x170] sm:$0xff]  }
 0x247   :  { %11442 = vmatpush3.bf16.msra.mxu1 %v14304_v39  ;;  %11343 = vmatprep.subr.bf16.mxu0 %v14423_v1  ;;  %v1564_v39 = vadd.f32 %v9129_v9, %v1557_v2  ;;  %v16218_v2 = vld [vmem:[%s19453_s3 + $0x1c0] sm:$0xff]  }
 0x248   :  { %11443 = vmatprep.subr.bf16.mxu1 %v14423_v1 }
 0x249   :  { %v1565_v52 = vmax.f32 %v1564_v39, 0.0  ;;  %v16390_v39 = vld [vmem:[%s19453_s3 + $0x218] sm:$0xff]  }
 0x24a   :  { %11344 = vmatpush3.bf16.msra.mxu0 %v15202_v18  ;;  %v14305_v18 = vld [vmem:[%s19450_s0 + $0x18] sm:$0xf]  ;;  %19599 = vst [vmem:[#allocation9_spill] sm:$0xff] %v16390_v39 }
 0x24b   :  { %11444 = vmatpush3.bf16.msra.mxu1 %v15208_v19  ;;  %11345 = vmatprep.subr.bf16.mxu0 %v14423_v1  ;;  %v9131_v19 = vcombine.low %v14305_v18, %v14305_v18  ;;  %v16199_v18 = vld [vmem:[%s19453_s3 + $0x38] sm:$0xff]  }
 0x24c   :  { %11445 = vmatprep.subr.bf16.mxu1 %v14423_v1 }
 0x24e   :  { %11346 = vmatpush3.bf16.msra.mxu0 %v15216_v20  ;;  %v2153_v20 = vshll.u32 %v9131_v19, 16 }
 0x24f   :  { %11446 = vmatpush3.bf16.msra.mxu1 %v15222_v21  ;;  %11347 = vmatprep.subr.bf16.mxu0 %v14423_v1  ;;  %v2151_v21 = vshrl.u32 %v9131_v19, 16  ;;  %v16204_v19 = vld [vmem:[%s19453_s3 + $0x178] sm:$0xff]  }
 0x250   :  { %11447 = vmatprep.subr.bf16.mxu1 %v14423_v1 }
 0x252   :  { %11348 = vmatpush3.bf16.msra.mxu0 %v15230_v22  ;;  %v2155_v22 = vrot.slane %v2153_v20, 1  ;;  %v16220_v20 = vpack.c.bf16 %v1565_v52, %v1565_v52  ;;  %v16399_v52 = vld [vmem:[%s19453_s3 + $0xe0] sm:$0xff]  }
 0x253   :  { %11448 = vmatpush3.bf16.msra.mxu1 %v15236_v23  ;;  %11349 = vmatprep.subr.bf16.mxu0 %v14423_v1  ;;  %19600 = vst [vmem:[#allocation10_spill] sm:$0xff] %v16399_v52 }
 0x254   :  { %11449 = vmatprep.subr.bf16.mxu1 %v14423_v1  ;;  %v2156_v23 = vor.u32 %v2155_v22, %v2151_v21  ;;  %v16231_v21 = vld [vmem:[%s19453_s3 + $0x88] sm:$0xff]  }
 0x255   :  { %v16236_v22 = vld [vmem:[%s19453_s3 + $0x1c8] sm:$0xff]  }
 0x256   :  { %11350 = vmatpush3.bf16.msra.mxu0 %v15244_v24  ;;  %v15970_v24 = vld [vmem:[%s19453_s3 + $0x40] sm:$0xff]  }
 0x257   :  { %11450 = vmatpush3.bf16.msra.mxu1 %v15250_v25  ;;  %11351 = vmatprep.subr.bf16.mxu0 %v14423_v1  ;;  %v15977_v25 = vld [vmem:[%s19453_s3 + $0x180] sm:$0xff]  }
 0x258   :  { %11451 = vmatprep.subr.bf16.mxu1 %v14423_v1 }
 0x25a   :  { %11352 = vmatpush3.bf16.msra.mxu0 %v15258_v27  ;;  %v15984_v27 = vld [vmem:[%s19453_s3 + $0x48] sm:$0xff]  }
 0x25b   :  { %11452 = vmatpush3.bf16.msra.mxu1 %v15264_v28  ;;  %11353 = vmatprep.subr.bf16.mxu0 %v14423_v1  ;;  %v15991_v28 = vld [vmem:[%s19453_s3 + $0x188] sm:$0xff]  }
 0x25c   :  { %11453 = vmatprep.subr.bf16.mxu1 %v14423_v1 }
 0x25e   :  { %11354 = vmatpush3.bf16.msra.mxu0 %v15272_v29  ;;  %v16002_v29 = vld [vmem:[%s19453_s3 + $0x50] sm:$0xff]  }
 0x25f   :  { %11454 = vmatpush3.bf16.msra.mxu1 %v15278_v30  ;;  %11359 = vmatprep.subr.bf16.mxu0 %v14423_v1  ;;  %v16009_v30 = vld [vmem:[%s19453_s3 + $0x190] sm:$0xff]  }
 0x260   :  { %11459 = vmatprep.subr.bf16.mxu1 %v14423_v1 }
 0x261   :  { %11356 = vmatmul.mubr.bf16.vlgmr.msra.gmra.mrb[12].mxu0 %v15694_v63 }
 0x262   :  { %11360 = vmatpush3.bf16.msra.mxu0 %v15287_v31  ;;  %11456 = vmatmul.mubr.bf16.vlgmr.msra.gmra.mrb[12].mxu1 %v15694_v63  ;;  %v16016_v31 = vld [vmem:[%s19453_s3 + $0x58] sm:$0xff]   ;;  %v16061_v63 = vld [vmem:[%s19453_s3 + $0x70] sm:$0xff]  }
 0x263   :  { %11460 = vmatpush3.bf16.msra.mxu1 %v15294_v32  ;;  %11361 = vmatprep.subr.bf16.mxu0 %v14423_v1  ;;  %v16023_v32 = vld [vmem:[%s19453_s3 + $0x198] sm:$0xff]  }
 0x264   :  { %11461 = vmatprep.subr.bf16.mxu1 %v14423_v1  ;;  %11375 = vmatprep.mubr.msk.bf16.mxu0 %vm14424_vm0, %v14423_v1 }
 0x265   :  { %11475 = vmatprep.mubr.msk.bf16.mxu1 %vm14424_vm0, %v14423_v1 }
 0x266   :  { %11362 = vmatpush3.bf16.msra.mxu0 %v15306_v33  ;;  %v16030_v33 = vld [vmem:[%s19453_s3 + $0x60] sm:$0xff]  }
 0x267   :  { %11462 = vmatpush3.bf16.msra.mxu1 %v15312_v34  ;;  %11363 = vmatprep.subr.bf16.mxu0 %v14423_v1  ;;  %v16037_v34 = vld [vmem:[%s19453_s3 + $0x1a0] sm:$0xff]  }
 0x268   :  { %11463 = vmatprep.subr.bf16.mxu1 %v14423_v1 }
 0x26a   :  { %11364 = vmatpush3.bf16.msra.mxu0 %v15320_v35  ;;  %v16044_v35 = vld [vmem:[%s19453_s3 + $0x68] sm:$0xff]  }
 0x26b   :  { %11464 = vmatpush3.bf16.msra.mxu1 %v15326_v36  ;;  %11365 = vmatprep.subr.bf16.mxu0 %v14423_v1  ;;  %v16051_v36 = vld [vmem:[%s19453_s3 + $0x1a8] sm:$0xff]  }
 0x26c   :  { %11465 = vmatprep.subr.bf16.mxu1 %v14423_v1 }
 0x26e   :  { %11366 = vmatpush3.bf16.msra.mxu0 %v15334_v37 }
 0x26f   :  { %11466 = vmatpush3.bf16.msra.mxu1 %v15340_v38  ;;  %11367 = vmatprep.subr.bf16.mxu0 %v14423_v1 }
 0x270   :  { %11467 = vmatprep.subr.bf16.mxu1 %v14423_v1 }
 0x272   :  { %11368 = vmatpush3.bf16.msra.mxu0 %v19575_v55 }
 0x273   :  { %11468 = vmatpush3.bf16.msra.mxu1 %v19576_v56  ;;  %11369 = vmatprep.subr.bf16.mxu0 %v14423_v1 }
 0x274   :  { %11469 = vmatprep.subr.bf16.mxu1 %v14423_v1 }
 0x276   :  { %11370 = vmatpush3.bf16.msra.mxu0 %v19577_v58 }
 0x277   :  { %11470 = vmatpush3.bf16.msra.mxu1 %v15370_v44  ;;  %11371 = vmatprep.subr.bf16.mxu0 %v14423_v1 }
 0x278   :  { %11471 = vmatprep.subr.bf16.mxu1 %v14423_v1 }
 0x27a   :  { %11372 = vmatpush3.bf16.msra.mxu0 %v19578_v62 }
 0x27b   :  { %11472 = vmatpush3.bf16.msra.mxu1 %v15384_v43  ;;  %11373 = vmatprep.subr.bf16.mxu0 %v14423_v1 }
 0x27c   :  { %11473 = vmatprep.subr.bf16.mxu1 %v14423_v1 }
 0x27e   :  { %11374 = vmatpush3.bf16.msra.mxu0 %v15394_v42 }
 0x27f   :  { %11474 = vmatpush3.bf16.msra.mxu1 %v19579_v0  ;;  %11479 = vmatprep.subr.bf16.mxu0 %v14423_v1  ;;  %v16066_v0 = vld [vmem:[%s19453_s3 + $0x1b0] sm:$0xff]  }
 0x280   :  { %11579 = vmatprep.subr.bf16.mxu1 %v14423_v1 }
 0x281   :  { %11376 = vmatmul.mubr.bf16.vlgmr.msra.gmra.mrb[12].mxu0 %v2156_v23 }
 0x282   :  { %11476 = vmatmul.mubr.bf16.vlgmr.msra.gmra.mrb[12].mxu1 %v2156_v23  ;;  %11480 = vmatpush3.bf16.msra.mxu0 %v15970_v24  ;;  %v16249_v23 = vld [vmem:[%s19453_s3 + $0x90] sm:$0xff]  }
 0x283   :  { %11580 = vmatpush3.bf16.msra.mxu1 %v15977_v25  ;;  %11481 = vmatprep.subr.bf16.mxu0 %v14423_v1 }
 0x284   :  { %11581 = vmatprep.subr.bf16.mxu1 %v14423_v1  ;;  %11495 = vmatprep.mubr.msk.bf16.mxu0 %vm14424_vm0, %v14423_v1 }
 0x285   :  { %11595 = vmatprep.mubr.msk.bf16.mxu1 %vm14424_vm0, %v14423_v1 }
 0x286   :  { %11482 = vmatpush3.bf16.msra.mxu0 %v15984_v27 }
 0x287   :  { %11582 = vmatpush3.bf16.msra.mxu1 %v15991_v28  ;;  %11483 = vmatprep.subr.bf16.mxu0 %v14423_v1 }
 0x288   :  { %11583 = vmatprep.subr.bf16.mxu1 %v14423_v1 }
 0x28a   :  { %11484 = vmatpush3.bf16.msra.mxu0 %v16002_v29 }
 0x28b   :  { %11584 = vmatpush3.bf16.msra.mxu1 %v16009_v30  ;;  %11485 = vmatprep.subr.bf16.mxu0 %v14423_v1 }
 0x28c   :  { %11585 = vmatprep.subr.bf16.mxu1 %v14423_v1 }
 0x28e   :  { %11486 = vmatpush3.bf16.msra.mxu0 %v16016_v31 }
 0x28f   :  { %11586 = vmatpush3.bf16.msra.mxu1 %v16023_v32  ;;  %11487 = vmatprep.subr.bf16.mxu0 %v14423_v1 }
 0x290   :  { %11587 = vmatprep.subr.bf16.mxu1 %v14423_v1 }
 0x292   :  { %11488 = vmatpush3.bf16.msra.mxu0 %v16030_v33 }
 0x293   :  { %11588 = vmatpush3.bf16.msra.mxu1 %v16037_v34  ;;  %11489 = vmatprep.subr.bf16.mxu0 %v14423_v1 }
 0x294   :  { %11589 = vmatprep.subr.bf16.mxu1 %v14423_v1 }
 0x296   :  { %11490 = vmatpush3.bf16.msra.mxu0 %v16044_v35 }
 0x297   :  { %11590 = vmatpush3.bf16.msra.mxu1 %v16051_v36  ;;  %11491 = vmatprep.subr.bf16.mxu0 %v14423_v1 }
 0x298   :  { %11591 = vmatprep.subr.bf16.mxu1 %v14423_v1 }
 0x29a   :  { %11492 = vmatpush3.bf16.msra.mxu0 %v16061_v63 }
 0x29b   :  { %11592 = vmatpush3.bf16.msra.mxu1 %v16066_v0  ;;  %11493 = vmatprep.subr.bf16.mxu0 %v14423_v1 }
 0x29c   :  { %11593 = vmatprep.subr.bf16.mxu1 %v14423_v1 }
 0x29e   :  { %11494 = vmatpush3.bf16.msra.mxu0 %v16075_v60 }
 0x29f   :  { %11594 = vmatpush3.bf16.msra.mxu1 %v16080_v61  ;;  %11499 = vmatprep.subr.bf16.mxu0 %v14423_v1 }
 0x2a0   :  { %11599 = vmatprep.subr.bf16.mxu1 %v14423_v1 }
 0x2b4   :  { %v1774_v37 = vpop.f32.mrb[8].mxu0 }
 0x2b5   :  { %v1977_v38 = vpop.f32.mrb[8].mxu1  ;;  %v11177_v43 = vpop.f32.mrb[9].mxu0 }
 0x2b6   :  { %v1984_v44 = vmax.f32 %v1774_v37, %v1977_v38  ;;  %v11277_v42 = vpop.f32.mrb[9].mxu1  ;;  %v1777_v55 = vpop.f32.mrb[10].mxu0  ;;  %v16254_v37 = vld [vmem:[%s19453_s3 + $0x1d0] sm:$0xff]   ;;  %v16263_v38 = vld [vmem:[%s19453_s3 + $0x98] sm:$0xff]  }
 0x2b7   :  { %v1980_v56 = vpop.f32.mrb[10].mxu1  ;;  %v11178_v58 = vpop.f32.mrb[11].mxu0  ;;  %v16268_v43 = vld [vmem:[%s19453_s3 + $0x1d8] sm:$0xff]   ;;  %v16282_v42 = vld [vmem:[%s19453_s3 + $0x1e0] sm:$0xff]   ;;  %v16291_v55 = vld [vmem:[%s19453_s3 + $0xa8] sm:$0xff]  }
 0x2b8   :  { %v11278_v62 = vpop.f32.mrb[11].mxu1  ;;  %v16296_v56 = vld [vmem:[%s19453_s3 + $0x1e8] sm:$0xff]   ;;  %v16305_v58 = vld [vmem:[%s19453_s3 + $0xb0] sm:$0xff]  }
 0x2b9   :  { %v16310_v62 = vld [vmem:[%s19453_s3 + $0x1f0] sm:$0xff]  }
 0x354   :  { %v2192_v3 = vpop.f32.mrb[12].mxu0 }
 0x355   :  { %v2199_v45 = vmax.f32 %v1984_v44, %v2192_v3  ;;  %v2396_v46 = vpop.f32.mrb[12].mxu1  ;;  %v11377_v48 = vpop.f32.mrb[13].mxu0  ;;  %v16277_v44 = vld [vmem:[%s19453_s3 + $0xa0] sm:$0xff]   ;;  %v2634_v3 = vshll.u32 %v16220_v20, 16 }
 0x356   :  { %v11477_v4 = vpop.f32.mrb[13].mxu1  ;;  %v2195_v5 = vpop.f32.mrb[14].mxu0 }
 0x357   :  { %v2403_v6 = vmax.f32 %v2199_v45, %v2396_v46  ;;  %v2399_v7 = vpop.f32.mrb[14].mxu1  ;;  %v11378_v8 = vpop.f32.mrb[15].mxu0  ;;  %v16320_v45 = vld [vmem:[%s19453_s3 + $0xb8] sm:$0xff]   ;;  %v2636_v48 = vrot.slane %v2634_v3, 1  ;;  %v2632_v4 = vshrl.u32 %v16220_v20, 16  ;;  %v16335_v5 = vld [vmem:[%s19453_s3 + $0xc0] sm:$0xff]  }
 0x358   :  { %v11478_v10 = vpop.f32.mrb[15].mxu1  ;;  %v16325_v46 = vld [vmem:[%s19453_s3 + $0x1f8] sm:$0xff]   ;;  %v16353_v8 = vld [vmem:[%s19453_s3 + $0xc8] sm:$0xff]   ;;  %v16404_v3 = vld [vmem:[%s19453_s3 + $0x220] sm:$0xff]  }
 0x359   :  { %v2404_v11 = vadd.f32 %v9129_v9, %v2403_v6  ;;  %v16340_v6 = vld [vmem:[%s19453_s3 + $0x200] sm:$0xff]   ;;  %v16342_v7 = vor.u32 %v2636_v48, %v2632_v4  ;;  %v16358_v9 = vld [vmem:[%s19453_s3 + $0x208] sm:$0xff]   ;;  %v16371_v10 = vld [vmem:[%s19453_s3 + $0xd0] sm:$0xff]   ;;  %19601 = vst [vmem:[#allocation11_spill] sm:$0xff] %v16404_v3 }
 0x35a   :  { %19596 = vst [vmem:[#allocation6_spill] sm:$0xff] %v16371_v10  ;;  %v16413_v48 = vld [vmem:[%s19453_s3 + $0xe8] sm:$0xff]  }
 0x35b   :  { %v2405_v12 = vmax.f32 %v2404_v11, 0.0  ;;  %v16376_v11 = vld [vmem:[%s19453_s3 + $0x210] sm:$0xff]   ;;  %19602 = vst [vmem:[#allocation12_spill] sm:$0xff] %v16413_v48  ;;  %v16418_v4 = vld [vmem:[%s19453_s3 + $0x228] sm:$0xff]  }
 0x35c   :  { %19597 = vst [vmem:[#allocation7_spill] sm:$0xff] %v16376_v11  ;;  %19603 = vst [vmem:[#allocation13_spill] sm:$0xff] %v16418_v4 }
 0x35d   :  { %v16099_v15 = vpack.c.bf16 %v2405_v12, %v2405_v12  ;;  %v16385_v12 = vld [vmem:[%s19453_s3 + $0xd8] sm:$0xff]  }
 0x35e   :  { %19598 = vst [vmem:[#allocation8_spill] sm:$0xff] %v16385_v12 }
 0x35f   :  { %11496 = vmatmul.mubr.bf16.vlgmr.msra.gmra.mrb[16].mxu0 %v16099_v15  ;;  %11596 = vmatmul.mubr.bf16.vlgmr.msra.gmra.mrb[16].mxu1 %v16099_v15 }
 0x360   :  { %11500 = vmatpush3.bf16.msra.mxu0 %v16092_v13  ;;  %11600 = vmatpush3.bf16.msra.mxu1 %v16097_v14 }
 0x361   :  { %11501 = vmatprep.subr.bf16.mxu0 %v14423_v1  ;;  %11601 = vmatprep.subr.bf16.mxu1 %v14423_v1 }
 0x362   :  { %11515 = vmatprep.mubr.msk.bf16.mxu0 %vm14424_vm0, %v14423_v1  ;;  %11615 = vmatprep.mubr.msk.bf16.mxu1 %vm14424_vm0, %v14423_v1 }
 0x364   :  { %11502 = vmatpush3.bf16.msra.mxu0 %v16108_v16  ;;  %11602 = vmatpush3.bf16.msra.mxu1 %v16113_v17 }
 0x365   :  { %11503 = vmatprep.subr.bf16.mxu0 %v14423_v1  ;;  %11603 = vmatprep.subr.bf16.mxu1 %v14423_v1 }
 0x368   :  { %11504 = vmatpush3.bf16.msra.mxu0 %v16126_v26  ;;  %11604 = vmatpush3.bf16.msra.mxu1 %v16131_v40 }
 0x369   :  { %11505 = vmatprep.subr.bf16.mxu0 %v14423_v1  ;;  %11605 = vmatprep.subr.bf16.mxu1 %v14423_v1 }
 0x36c   :  { %11506 = vmatpush3.bf16.msra.mxu0 %v16140_v41  ;;  %11606 = vmatpush3.bf16.msra.mxu1 %v16145_v59 }
 0x36d   :  { %11507 = vmatprep.subr.bf16.mxu0 %v14423_v1  ;;  %11607 = vmatprep.subr.bf16.mxu1 %v14423_v1 }
 0x370   :  { %11508 = vmatpush3.bf16.msra.mxu0 %v16154_v47  ;;  %11608 = vmatpush3.bf16.msra.mxu1 %v16159_v49 }
 0x371   :  { %11509 = vmatprep.subr.bf16.mxu0 %v14423_v1  ;;  %11609 = vmatprep.subr.bf16.mxu1 %v14423_v1 }
 0x374   :  { %11510 = vmatpush3.bf16.msra.mxu0 %v16168_v50  ;;  %11610 = vmatpush3.bf16.msra.mxu1 %v16173_v51 }
 0x375   :  { %11511 = vmatprep.subr.bf16.mxu0 %v14423_v1  ;;  %11611 = vmatprep.subr.bf16.mxu1 %v14423_v1 }
 0x378   :  { %11512 = vmatpush3.bf16.msra.mxu0 %v16182_v54  ;;  %11612 = vmatpush3.bf16.msra.mxu1 %v16187_v57 }
 0x379   :  { %11513 = vmatprep.subr.bf16.mxu0 %v14423_v1  ;;  %11613 = vmatprep.subr.bf16.mxu1 %v14423_v1 }
 0x37c   :  { %11514 = vmatpush3.bf16.msra.mxu0 %v16199_v18  ;;  %11614 = vmatpush3.bf16.msra.mxu1 %v16204_v19 }
 0x37d   :  { %11519 = vmatprep.subr.bf16.mxu0 %v14423_v1  ;;  %11619 = vmatprep.subr.bf16.mxu1 %v14423_v1 }
 0x37f   :  { %11516 = vmatmul.mubr.bf16.vlgmr.msra.gmra.mrb[16].mxu0 %v16220_v20  ;;  %11616 = vmatmul.mubr.bf16.vlgmr.msra.gmra.mrb[16].mxu1 %v16220_v20 }
 0x380   :  { %11520 = vmatpush3.bf16.msra.mxu0 %v16213_v53  ;;  %11620 = vmatpush3.bf16.msra.mxu1 %v16218_v2 }
 0x381   :  { %11521 = vmatprep.subr.bf16.mxu0 %v14423_v1  ;;  %11621 = vmatprep.subr.bf16.mxu1 %v14423_v1 }
 0x382   :  { %11535 = vmatprep.mubr.msk.bf16.mxu0 %vm14424_vm0, %v14423_v1  ;;  %11635 = vmatprep.mubr.msk.bf16.mxu1 %vm14424_vm0, %v14423_v1 }
 0x384   :  { %11522 = vmatpush3.bf16.msra.mxu0 %v16231_v21  ;;  %11622 = vmatpush3.bf16.msra.mxu1 %v16236_v22 }
 0x385   :  { %11523 = vmatprep.subr.bf16.mxu0 %v14423_v1  ;;  %11623 = vmatprep.subr.bf16.mxu1 %v14423_v1 }
 0x388   :  { %11524 = vmatpush3.bf16.msra.mxu0 %v16249_v23  ;;  %11624 = vmatpush3.bf16.msra.mxu1 %v16254_v37 }
 0x389   :  { %11525 = vmatprep.subr.bf16.mxu0 %v14423_v1  ;;  %11625 = vmatprep.subr.bf16.mxu1 %v14423_v1 }
 0x38c   :  { %11526 = vmatpush3.bf16.msra.mxu0 %v16263_v38  ;;  %11626 = vmatpush3.bf16.msra.mxu1 %v16268_v43 }
 0x38d   :  { %11527 = vmatprep.subr.bf16.mxu0 %v14423_v1  ;;  %11627 = vmatprep.subr.bf16.mxu1 %v14423_v1 }
 0x390   :  { %11528 = vmatpush3.bf16.msra.mxu0 %v16277_v44  ;;  %11628 = vmatpush3.bf16.msra.mxu1 %v16282_v42 }
 0x391   :  { %11529 = vmatprep.subr.bf16.mxu0 %v14423_v1  ;;  %11629 = vmatprep.subr.bf16.mxu1 %v14423_v1 }
 0x394   :  { %11530 = vmatpush3.bf16.msra.mxu0 %v16291_v55  ;;  %11630 = vmatpush3.bf16.msra.mxu1 %v16296_v56 }
 0x395   :  { %11531 = vmatprep.subr.bf16.mxu0 %v14423_v1  ;;  %11631 = vmatprep.subr.bf16.mxu1 %v14423_v1 }
 0x398   :  { %11532 = vmatpush3.bf16.msra.mxu0 %v16305_v58  ;;  %11632 = vmatpush3.bf16.msra.mxu1 %v16310_v62 }
 0x399   :  { %11533 = vmatprep.subr.bf16.mxu0 %v14423_v1  ;;  %11633 = vmatprep.subr.bf16.mxu1 %v14423_v1 }
 0x39c   :  { %11534 = vmatpush3.bf16.msra.mxu0 %v16320_v45  ;;  %11634 = vmatpush3.bf16.msra.mxu1 %v16325_v46 }
 0x39d   :  { %11539 = vmatprep.subr.bf16.mxu0 %v14423_v1  ;;  %11639 = vmatprep.subr.bf16.mxu1 %v14423_v1 }
 0x39f   :  { %11536 = vmatmul.mubr.bf16.vlgmr.msra.gmra.mrb[16].mxu0 %v16342_v7  ;;  %11636 = vmatmul.mubr.bf16.vlgmr.msra.gmra.mrb[16].mxu1 %v16342_v7 }
 0x3a0   :  { %11540 = vmatpush3.bf16.msra.mxu0 %v16335_v5  ;;  %11640 = vmatpush3.bf16.msra.mxu1 %v16340_v6 }
 0x3a1   :  { %11541 = vmatprep.subr.bf16.mxu0 %v14423_v1  ;;  %11641 = vmatprep.subr.bf16.mxu1 %v14423_v1 }
 0x3a2   :  { %11555 = vmatprep.mubr.msk.bf16.mxu0 %vm14424_vm0, %v14423_v1  ;;  %11655 = vmatprep.mubr.msk.bf16.mxu1 %vm14424_vm0, %v14423_v1 }
 0x3a4   :  { %11542 = vmatpush3.bf16.msra.mxu0 %v16353_v8  ;;  %11642 = vmatpush3.bf16.msra.mxu1 %v16358_v9 }
 0x3a5   :  { %11543 = vmatprep.subr.bf16.mxu0 %v14423_v1  ;;  %11643 = vmatprep.subr.bf16.mxu1 %v14423_v1 }
 0x3a8   :  { %11544 = vmatpush3.bf16.msra.mxu0 %v16371_v10  ;;  %11644 = vmatpush3.bf16.msra.mxu1 %v16376_v11  ;;  %v2745_v11 = vshrl.u32 %v16099_v15, 16 }
 0x3a9   :  { %11545 = vmatprep.subr.bf16.mxu0 %v14423_v1  ;;  %11645 = vmatprep.subr.bf16.mxu1 %v14423_v1 }
 0x3ac   :  { %11546 = vmatpush3.bf16.msra.mxu0 %v16385_v12  ;;  %11646 = vmatpush3.bf16.msra.mxu1 %v16390_v39  ;;  %v2747_v39 = vshll.u32 %v16099_v15, 16 }
 0x3ad   :  { %11547 = vmatprep.subr.bf16.mxu0 %v14423_v1  ;;  %11647 = vmatprep.subr.bf16.mxu1 %v14423_v1 }
 0x3ae   :  { %v2749_v12 = vrot.slane %v2747_v39, 1  ;;  %v16475_v39 = vld [vmem:[%s19453_s3 + $0x108] sm:$0xff]  }
 0x3af   :  { %19607 = vst [vmem:[#allocation17_spill] sm:$0xff] %v16475_v39 }
 0x3b0   :  { %11548 = vmatpush3.bf16.msra.mxu0 %v16399_v52  ;;  %11648 = vmatpush3.bf16.msra.mxu1 %v16404_v3  ;;  %v16427_v3 = vld [vmem:[%s19453_s3 + $0xf0] sm:$0xff]   ;;  %v16464_v10 = vor.u32 %v2749_v12, %v2745_v11  ;;  %v16480_v11 = vld [vmem:[%s19453_s3 + $0x248] sm:$0xff]  }
 0x3b1   :  { %11549 = vmatprep.subr.bf16.mxu0 %v14423_v1  ;;  %11649 = vmatprep.subr.bf16.mxu1 %v14423_v1  ;;  %19604 = vst [vmem:[#allocation14_spill] sm:$0xff] %v16427_v3  ;;  %v16432_v52 = vld [vmem:[%s19453_s3 + $0x230] sm:$0xff]   ;;  %19608 = vst [vmem:[#allocation18_spill] sm:$0xff] %v16480_v11 }
 0x3b2   :  { %19605 = vst [vmem:[#allocation15_spill] sm:$0xff] %v16432_v52  ;;  %v16493_v12 = vld [vmem:[%s19453_s3 + $0x110] sm:$0xff]  }
 0x3b3   :  { %19609 = vst [vmem:[#allocation19_spill] sm:$0xff] %v16493_v12 }
 0x3b4   :  { %11550 = vmatpush3.bf16.msra.mxu0 %v16413_v48  ;;  %11650 = vmatpush3.bf16.msra.mxu1 %v16418_v4  ;;  %v16442_v4 = vld [vmem:[%s19453_s3 + $0xf8] sm:$0xff]  }
 0x3b5   :  { %11551 = vmatprep.subr.bf16.mxu0 %v14423_v1  ;;  %11651 = vmatprep.subr.bf16.mxu1 %v14423_v1  ;;  %v16447_v48 = vld [vmem:[%s19453_s3 + $0x238] sm:$0xff]  }
 0x3b8   :  { %11552 = vmatpush3.bf16.msra.mxu0 %v16427_v3  ;;  %11652 = vmatpush3.bf16.msra.mxu1 %v16432_v52  ;;  %v16457_v52 = vld [vmem:[%s19453_s3 + $0x100] sm:$0xff]  }
 0x3b9   :  { %11553 = vmatprep.subr.bf16.mxu0 %v14423_v1  ;;  %11653 = vmatprep.subr.bf16.mxu1 %v14423_v1  ;;  %v16462_v3 = vld [vmem:[%s19453_s3 + $0x240] sm:$0xff]  }
 0x3ba   :  { %19606 = vst [vmem:[#allocation16_spill] sm:$0xff] %v16462_v3 }
 0x3bc   :  { %11554 = vmatpush3.bf16.msra.mxu0 %v16442_v4  ;;  %11654 = vmatpush3.bf16.msra.mxu1 %v16447_v48 }
 0x3bd   :  { %11559 = vmatprep.subr.bf16.mxu0 %v14423_v1  ;;  %11659 = vmatprep.subr.bf16.mxu1 %v14423_v1 }
 0x3bf   :  { %11556 = vmatmul.mubr.bf16.vlgmr.msra.gmra.mrb[16].mxu0 %v16464_v10  ;;  %11656 = vmatmul.mubr.bf16.vlgmr.msra.gmra.mrb[16].mxu1 %v16464_v10 }
 0x3c0   :  { %11560 = vmatpush3.bf16.msra.mxu0 %v16457_v52  ;;  %11660 = vmatpush3.bf16.msra.mxu1 %v16462_v3  ;;  %v16498_v3 = vld [vmem:[%s19453_s3 + $0x250] sm:$0xff]  }
 0x3c1   :  { %11561 = vmatprep.subr.bf16.mxu0 %v14423_v1  ;;  %11661 = vmatprep.subr.bf16.mxu1 %v14423_v1  ;;  %19610 = vst [vmem:[#allocation20_spill] sm:$0xff] %v16498_v3 }
 0x3c2   :  { %11575 = vmatprep.mubr.msk.bf16.mxu0 %vm14424_vm0, %v14423_v1  ;;  %11675 = vmatprep.mubr.msk.bf16.mxu1 %vm14424_vm0, %v14423_v1 }
 0x3c4   :  { %11562 = vmatpush3.bf16.msra.mxu0 %v16475_v39  ;;  %11662 = vmatpush3.bf16.msra.mxu1 %v16480_v11  ;;  %v16507_v11 = vld [vmem:[%s19453_s3 + $0x118] sm:$0xff]  }
 0x3c5   :  { %11563 = vmatprep.subr.bf16.mxu0 %v14423_v1  ;;  %11663 = vmatprep.subr.bf16.mxu1 %v14423_v1  ;;  %19611 = vst [vmem:[#allocation21_spill] sm:$0xff] %v16507_v11  ;;  %v16512_v39 = vld [vmem:[%s19453_s3 + $0x258] sm:$0xff]  }
 0x3c6   :  { %19612 = vst [vmem:[#allocation22_spill] sm:$0xff] %v16512_v39 }
 0x3c8   :  { %11564 = vmatpush3.bf16.msra.mxu0 %v16493_v12  ;;  %11664 = vmatpush3.bf16.msra.mxu1 %v16498_v3  ;;  %v16521_v3 = vld [vmem:[%s19453_s3 + $0x120] sm:$0xff]  }
 0x3c9   :  { %11565 = vmatprep.subr.bf16.mxu0 %v14423_v1  ;;  %11665 = vmatprep.subr.bf16.mxu1 %v14423_v1  ;;  %19613 = vst [vmem:[#allocation23_spill] sm:$0xff] %v16521_v3  ;;  %v16526_v12 = vld [vmem:[%s19453_s3 + $0x260] sm:$0xff]  }
 0x3ca   :  { %19614 = vst [vmem:[#allocation24_spill] sm:$0xff] %v16526_v12 }
 0x3cc   :  { %11566 = vmatpush3.bf16.msra.mxu0 %v16507_v11  ;;  %11666 = vmatpush3.bf16.msra.mxu1 %v16512_v39  ;;  %v16535_v39 = vld [vmem:[%s19453_s3 + $0x128] sm:$0xff]  }
 0x3cd   :  { %11567 = vmatprep.subr.bf16.mxu0 %v14423_v1  ;;  %11667 = vmatprep.subr.bf16.mxu1 %v14423_v1  ;;  %19615 = vst [vmem:[#allocation25_spill] sm:$0xff] %v16535_v39  ;;  %v16540_v11 = vld [vmem:[%s19453_s3 + $0x268] sm:$0xff]  }
 0x3ce   :  { %19616 = vst [vmem:[#allocation5_spill] sm:$0xff] %v16540_v11 }
 0x3d0   :  { %11568 = vmatpush3.bf16.msra.mxu0 %v16521_v3  ;;  %11668 = vmatpush3.bf16.msra.mxu1 %v16526_v12  ;;  %v16549_v12 = vld [vmem:[%s19453_s3 + $0x130] sm:$0xff]  }
 0x3d1   :  { %11569 = vmatprep.subr.bf16.mxu0 %v14423_v1  ;;  %11669 = vmatprep.subr.bf16.mxu1 %v14423_v1  ;;  %v16554_v3 = vld [vmem:[%s19453_s3 + $0x270] sm:$0xff]  }
 0x3d2   :  { %19617 = vst [vmem:[#allocation26_spill] sm:$0xff] %v16554_v3 }
 0x3d4   :  { %11570 = vmatpush3.bf16.msra.mxu0 %v16535_v39  ;;  %11670 = vmatpush3.bf16.msra.mxu1 %v16540_v11  ;;  %v16563_v11 = vld [vmem:[%s19453_s3 + $0x138] sm:$0xff]  }
 0x3d5   :  { %11571 = vmatprep.subr.bf16.mxu0 %v14423_v1  ;;  %11671 = vmatprep.subr.bf16.mxu1 %v14423_v1  ;;  %v16568_v39 = vld [vmem:[%s19453_s3 + $0x278] sm:$0xff]  }
 0x3d8   :  { %11572 = vmatpush3.bf16.msra.mxu0 %v16549_v12  ;;  %11672 = vmatpush3.bf16.msra.mxu1 %v16554_v3  ;;  %v16575_v3 = vrot.slane %v16220_v20, 1 }
 0x3d9   :  { %11573 = vmatprep.subr.bf16.mxu0 %v14423_v1  ;;  %11673 = vmatprep.subr.bf16.mxu1 %v14423_v1 }
 0x3dc   :  { %11574 = vmatpush3.bf16.msra.mxu0 %v16563_v11  ;;  %11674 = vmatpush3.bf16.msra.mxu1 %v16568_v39 }
 0x3dd   :  { %11679 = vmatprep.subr.bf16.mxu0 %v14423_v1  ;;  %11779 = vmatprep.subr.bf16.mxu1 %v14423_v1 }
 0x3df   :  { %11576 = vmatmul.mubr.bf16.vlgmr.msra.gmra.mrb[16].mxu0 %v16575_v3  ;;  %11676 = vmatmul.mubr.bf16.vlgmr.msra.gmra.mrb[16].mxu1 %v16575_v3 }
 0x3e0   :  { %11680 = vmatpush3.bf16.msra.mxu0 %v15970_v24  ;;  %11780 = vmatpush3.bf16.msra.mxu1 %v15977_v25  ;;  %v19618_v24 = vld [vmem:[#allocation6_spill] sm:$0xff]  ;;  %v19619_v25 = vld [vmem:[#allocation7_spill] sm:$0xff] }
 0x3e1   :  { %11681 = vmatprep.subr.bf16.mxu0 %v14423_v1  ;;  %11781 = vmatprep.subr.bf16.mxu1 %v14423_v1 }
 0x3e2   :  { %11695 = vmatprep.mubr.msk.bf16.mxu0 %vm14424_vm0, %v14423_v1  ;;  %11795 = vmatprep.mubr.msk.bf16.mxu1 %vm14424_vm0, %v14423_v1 }
 0x3e4   :  { %11682 = vmatpush3.bf16.msra.mxu0 %v15984_v27  ;;  %11782 = vmatpush3.bf16.msra.mxu1 %v15991_v28  ;;  %v19620_v27 = vld [vmem:[#allocation8_spill] sm:$0xff]  ;;  %v19621_v28 = vld [vmem:[#allocation9_spill] sm:$0xff] }
 0x3e5   :  { %11683 = vmatprep.subr.bf16.mxu0 %v14423_v1  ;;  %11783 = vmatprep.subr.bf16.mxu1 %v14423_v1 }
 0x3e8   :  { %11684 = vmatpush3.bf16.msra.mxu0 %v16002_v29  ;;  %11784 = vmatpush3.bf16.msra.mxu1 %v16009_v30  ;;  %v19622_v29 = vld [vmem:[#allocation10_spill] sm:$0xff]  ;;  %v19623_v30 = vld [vmem:[#allocation11_spill] sm:$0xff] }
 0x3e9   :  { %11685 = vmatprep.subr.bf16.mxu0 %v14423_v1  ;;  %11785 = vmatprep.subr.bf16.mxu1 %v14423_v1 }
 0x3ec   :  { %11686 = vmatpush3.bf16.msra.mxu0 %v16016_v31  ;;  %11786 = vmatpush3.bf16.msra.mxu1 %v16023_v32  ;;  %v19624_v31 = vld [vmem:[#allocation12_spill] sm:$0xff]  ;;  %v19625_v32 = vld [vmem:[#allocation13_spill] sm:$0xff] }
 0x3ed   :  { %11687 = vmatprep.subr.bf16.mxu0 %v14423_v1  ;;  %11787 = vmatprep.subr.bf16.mxu1 %v14423_v1 }
 0x3f0   :  { %11688 = vmatpush3.bf16.msra.mxu0 %v16030_v33  ;;  %11788 = vmatpush3.bf16.msra.mxu1 %v16037_v34  ;;  %v19626_v33 = vld [vmem:[#allocation14_spill] sm:$0xff]  ;;  %v19627_v34 = vld [vmem:[#allocation15_spill] sm:$0xff] }
 0x3f1   :  { %11689 = vmatprep.subr.bf16.mxu0 %v14423_v1  ;;  %11789 = vmatprep.subr.bf16.mxu1 %v14423_v1 }
 0x3f4   :  { %11690 = vmatpush3.bf16.msra.mxu0 %v16044_v35  ;;  %11790 = vmatpush3.bf16.msra.mxu1 %v16051_v36  ;;  %v19628_v35 = vld [vmem:[#allocation16_spill] sm:$0xff]  ;;  %v19629_v36 = vld [vmem:[#allocation17_spill] sm:$0xff] }
 0x3f5   :  { %11691 = vmatprep.subr.bf16.mxu0 %v14423_v1  ;;  %11791 = vmatprep.subr.bf16.mxu1 %v14423_v1 }
 0x3f8   :  { %11692 = vmatpush3.bf16.msra.mxu0 %v16061_v63  ;;  %11792 = vmatpush3.bf16.msra.mxu1 %v16066_v0  ;;  %v19630_v63 = vld [vmem:[#allocation18_spill] sm:$0xff]  ;;  %v19631_v0 = vld [vmem:[#allocation19_spill] sm:$0xff] }
 0x3f9   :  { %11693 = vmatprep.subr.bf16.mxu0 %v14423_v1  ;;  %11793 = vmatprep.subr.bf16.mxu1 %v14423_v1 }
 0x3fc   :  { %11694 = vmatpush3.bf16.msra.mxu0 %v16075_v60  ;;  %11794 = vmatpush3.bf16.msra.mxu1 %v16080_v61  ;;  %v19632_v60 = vld [vmem:[#allocation20_spill] sm:$0xff]  ;;  %v19633_v61 = vld [vmem:[#allocation21_spill] sm:$0xff] }
 0x3fd   :  { %11699 = vmatprep.subr.bf16.mxu0 %v14423_v1  ;;  %11799 = vmatprep.subr.bf16.mxu1 %v14423_v1 }
 0x3ff   :  { %11696 = vmatmul.mubr.bf16.vlgmr.msra.gmra.mrb[20].mxu0 %v16342_v7  ;;  %11796 = vmatmul.mubr.bf16.vlgmr.msra.gmra.mrb[20].mxu1 %v16342_v7 }
 0x400   :  { %11700 = vmatpush3.bf16.msra.mxu0 %v16092_v13  ;;  %11800 = vmatpush3.bf16.msra.mxu1 %v16097_v14  ;;  %v19634_v13 = vld [vmem:[#allocation22_spill] sm:$0xff]  ;;  %v19635_v14 = vld [vmem:[#allocation23_spill] sm:$0xff] }
 0x401   :  { %11701 = vmatprep.subr.bf16.mxu0 %v14423_v1  ;;  %11801 = vmatprep.subr.bf16.mxu1 %v14423_v1 }
 0x402   :  { %11715 = vmatprep.mubr.msk.bf16.mxu0 %vm14424_vm0, %v14423_v1  ;;  %11815 = vmatprep.mubr.msk.bf16.mxu1 %vm14424_vm0, %v14423_v1 }
 0x404   :  { %11702 = vmatpush3.bf16.msra.mxu0 %v16108_v16  ;;  %11802 = vmatpush3.bf16.msra.mxu1 %v16113_v17  ;;  %v19636_v16 = vld [vmem:[#allocation24_spill] sm:$0xff]  ;;  %v19637_v17 = vld [vmem:[#allocation25_spill] sm:$0xff] }
 0x405   :  { %11703 = vmatprep.subr.bf16.mxu0 %v14423_v1  ;;  %11803 = vmatprep.subr.bf16.mxu1 %v14423_v1 }
 0x408   :  { %11704 = vmatpush3.bf16.msra.mxu0 %v16126_v26  ;;  %11804 = vmatpush3.bf16.msra.mxu1 %v16131_v40  ;;  %v19638_v26 = vld [vmem:[#allocation5_spill] sm:$0xff]  ;;  %v19639_v40 = vld [vmem:[#allocation26_spill] sm:$0xff] }
 0x409   :  { %11705 = vmatprep.subr.bf16.mxu0 %v14423_v1  ;;  %11805 = vmatprep.subr.bf16.mxu1 %v14423_v1 }
 0x40c   :  { %11706 = vmatpush3.bf16.msra.mxu0 %v16140_v41  ;;  %11806 = vmatpush3.bf16.msra.mxu1 %v16145_v59  ;;  %v13910_v41 = vld [vmem:[%s19455_s5] sm:$0xff]  }
 0x40d   :  { %11707 = vmatprep.subr.bf16.mxu0 %v14423_v1  ;;  %11807 = vmatprep.subr.bf16.mxu1 %v14423_v1  ;;  %v13911_v59 = vld [vmem:[%s19455_s5 + $0x40] sm:$0xff]  }
 0x410   :  { %11708 = vmatpush3.bf16.msra.mxu0 %v16154_v47  ;;  %11808 = vmatpush3.bf16.msra.mxu1 %v16159_v49  ;;  %v3636_v47 = vrot.slane %v16099_v15, 1  ;;  %v13912_v49 = vld [vmem:[%s19455_s5 + $0x8] sm:$0xff]  }
 0x411   :  { %11709 = vmatprep.subr.bf16.mxu0 %v14423_v1  ;;  %11809 = vmatprep.subr.bf16.mxu1 %v14423_v1 }
 0x414   :  { %11710 = vmatpush3.bf16.msra.mxu0 %v16168_v50  ;;  %11810 = vmatpush3.bf16.msra.mxu1 %v16173_v51  ;;  %v13913_v50 = vld [vmem:[%s19455_s5 + $0x48] sm:$0xff]   ;;  %v13915_v51 = vld [vmem:[%s19455_s5 + $0x50] sm:$0xff]  }
 0x415   :  { %11711 = vmatprep.subr.bf16.mxu0 %v14423_v1  ;;  %11811 = vmatprep.subr.bf16.mxu1 %v14423_v1 }
 0x418   :  { %11712 = vmatpush3.bf16.msra.mxu0 %v16182_v54  ;;  %11812 = vmatpush3.bf16.msra.mxu1 %v16187_v57  ;;  %v13916_v54 = vld [vmem:[%s19455_s5 + $0x18] sm:$0xff]  }
 0x419   :  { %11713 = vmatprep.subr.bf16.mxu0 %v14423_v1  ;;  %11813 = vmatprep.subr.bf16.mxu1 %v14423_v1  ;;  %v13917_v57 = vld [vmem:[%s19455_s5 + $0x58] sm:$0xff]  }
 0x41c   :  { %11714 = vmatpush3.bf16.msra.mxu0 %v16199_v18  ;;  %11814 = vmatpush3.bf16.msra.mxu1 %v16204_v19  ;;  %v13918_v18 = vld [vmem:[%s19455_s5 + $0x20] sm:$0xff]  }
 0x41d   :  { %11719 = vmatprep.subr.bf16.mxu0 %v14423_v1  ;;  %11819 = vmatprep.subr.bf16.mxu1 %v14423_v1  ;;  %v13919_v19 = vld [vmem:[%s19455_s5 + $0x60] sm:$0xff]  }
 0x41f   :  { %11716 = vmatmul.mubr.bf16.vlgmr.msra.gmra.mrb[20].mxu0 %v16099_v15  ;;  %11816 = vmatmul.mubr.bf16.vlgmr.msra.gmra.mrb[20].mxu1 %v16099_v15  ;;  %v13914_v15 = vld [vmem:[%s19455_s5 + $0x10] sm:$0xff]  }
 0x420   :  { %11720 = vmatpush3.bf16.msra.mxu0 %v16213_v53  ;;  %11820 = vmatpush3.bf16.msra.mxu1 %v16218_v2  ;;  %v13920_v53 = vld [vmem:[%s19455_s5 + $0x28] sm:$0xff]  }
 0x421   :  { %11721 = vmatprep.subr.bf16.mxu0 %v14423_v1  ;;  %11821 = vmatprep.subr.bf16.mxu1 %v14423_v1 }
 0x422   :  { %11735 = vmatprep.mubr.msk.bf16.mxu0 %vm14424_vm0, %v14423_v1  ;;  %11835 = vmatprep.mubr.msk.bf16.mxu1 %vm14424_vm0, %v14423_v1 }
 0x424   :  { %11722 = vmatpush3.bf16.msra.mxu0 %v16231_v21  ;;  %11822 = vmatpush3.bf16.msra.mxu1 %v16236_v22 }
 0x425   :  { %11723 = vmatprep.subr.bf16.mxu0 %v14423_v1  ;;  %11823 = vmatprep.subr.bf16.mxu1 %v14423_v1 }
 0x428   :  { %11724 = vmatpush3.bf16.msra.mxu0 %v16249_v23  ;;  %11824 = vmatpush3.bf16.msra.mxu1 %v16254_v37 }
 0x429   :  { %11725 = vmatprep.subr.bf16.mxu0 %v14423_v1  ;;  %11825 = vmatprep.subr.bf16.mxu1 %v14423_v1 }
 0x42c   :  { %11726 = vmatpush3.bf16.msra.mxu0 %v16263_v38  ;;  %11826 = vmatpush3.bf16.msra.mxu1 %v16268_v43 }
 0x42d   :  { %11727 = vmatprep.subr.bf16.mxu0 %v14423_v1  ;;  %11827 = vmatprep.subr.bf16.mxu1 %v14423_v1 }
 0x430   :  { %11728 = vmatpush3.bf16.msra.mxu0 %v16277_v44  ;;  %11828 = vmatpush3.bf16.msra.mxu1 %v16282_v42  ;;  %v13921_v42 = vld [vmem:[%s19455_s5 + $0x68] sm:$0xff]  }
 0x431   :  { %11729 = vmatprep.subr.bf16.mxu0 %v14423_v1  ;;  %11829 = vmatprep.subr.bf16.mxu1 %v14423_v1 }
 0x434   :  { %11730 = vmatpush3.bf16.msra.mxu0 %v16291_v55  ;;  %11830 = vmatpush3.bf16.msra.mxu1 %v16296_v56  ;;  %v13922_v55 = vld [vmem:[%s19455_s5 + $0x30] sm:$0xff]  }
 0x435   :  { %11731 = vmatprep.subr.bf16.mxu0 %v14423_v1  ;;  %11831 = vmatprep.subr.bf16.mxu1 %v14423_v1  ;;  %v13923_v56 = vld [vmem:[%s19455_s5 + $0x70] sm:$0xff]  }
 0x438   :  { %11732 = vmatpush3.bf16.msra.mxu0 %v16305_v58  ;;  %11832 = vmatpush3.bf16.msra.mxu1 %v16310_v62  ;;  %v13924_v58 = vld [vmem:[%s19455_s5 + $0x38] sm:$0xff]  }
 0x439   :  { %11733 = vmatprep.subr.bf16.mxu0 %v14423_v1  ;;  %11833 = vmatprep.subr.bf16.mxu1 %v14423_v1  ;;  %v13925_v62 = vld [vmem:[%s19455_s5 + $0x78] sm:$0xff]  }
 0x43c   :  { %11734 = vmatpush3.bf16.msra.mxu0 %v16320_v45  ;;  %11834 = vmatpush3.bf16.msra.mxu1 %v16325_v46 }
 0x43d   :  { %11739 = vmatprep.subr.bf16.mxu0 %v14423_v1  ;;  %11839 = vmatprep.subr.bf16.mxu1 %v14423_v1 }
 0x43f   :  { %11736 = vmatmul.mubr.bf16.vlgmr.msra.gmra.mrb[20].mxu0 %v16464_v10  ;;  %11836 = vmatmul.mubr.bf16.vlgmr.msra.gmra.mrb[20].mxu1 %v16464_v10 }
 0x440   :  { %11740 = vmatpush3.bf16.msra.mxu0 %v16335_v5  ;;  %11840 = vmatpush3.bf16.msra.mxu1 %v16340_v6 }
 0x441   :  { %11741 = vmatprep.subr.bf16.mxu0 %v14423_v1  ;;  %11841 = vmatprep.subr.bf16.mxu1 %v14423_v1 }
 0x442   :  { %11755 = vmatprep.mubr.msk.bf16.mxu0 %vm14424_vm0, %v14423_v1  ;;  %11855 = vmatprep.mubr.msk.bf16.mxu1 %vm14424_vm0, %v14423_v1 }
 0x444   :  { %11742 = vmatpush3.bf16.msra.mxu0 %v16353_v8  ;;  %11842 = vmatpush3.bf16.msra.mxu1 %v16358_v9  ;;  %v9212_v8 = vld [vmem:[%s19454_s4] ss:$0 sm:$0xff] }
 0x445   :  { %11743 = vmatprep.subr.bf16.mxu0 %v14423_v1  ;;  %11843 = vmatprep.subr.bf16.mxu1 %v14423_v1 }
 0x448   :  { %11744 = vmatpush3.bf16.msra.mxu0 %v19618_v24  ;;  %11844 = vmatpush3.bf16.msra.mxu1 %v19619_v25  ;;  %v13927_v24 = vld [vmem:[%s19455_s5 + $0x80] sm:$0xff]  }
 0x449   :  { %11745 = vmatprep.subr.bf16.mxu0 %v14423_v1  ;;  %11845 = vmatprep.subr.bf16.mxu1 %v14423_v1 }
 0x44c   :  { %11746 = vmatpush3.bf16.msra.mxu0 %v19620_v27  ;;  %11846 = vmatpush3.bf16.msra.mxu1 %v19621_v28  ;;  %v13928_v27 = vld [vmem:[%s19455_s5 + $0xc8] sm:$0xff]  }
 0x44d   :  { %11747 = vmatprep.subr.bf16.mxu0 %v14423_v1  ;;  %11847 = vmatprep.subr.bf16.mxu1 %v14423_v1  ;;  %v13929_v28 = vld [vmem:[%s19455_s5 + $0x88] sm:$0xff]  }
 0x450   :  { %11748 = vmatpush3.bf16.msra.mxu0 %v19622_v29  ;;  %11848 = vmatpush3.bf16.msra.mxu1 %v19623_v30  ;;  %v13930_v29 = vld [vmem:[%s19455_s5 + $0xd0] sm:$0xff]  }
 0x451   :  { %11749 = vmatprep.subr.bf16.mxu0 %v14423_v1  ;;  %11849 = vmatprep.subr.bf16.mxu1 %v14423_v1  ;;  %v13931_v30 = vld [vmem:[%s19455_s5 + $0x90] sm:$0xff]  }
 0x454   :  { %11750 = vmatpush3.bf16.msra.mxu0 %v19624_v31  ;;  %11850 = vmatpush3.bf16.msra.mxu1 %v19625_v32  ;;  %v13932_v31 = vld [vmem:[%s19455_s5 + $0xd8] sm:$0xff]  }
 0x455   :  { %11751 = vmatprep.subr.bf16.mxu0 %v14423_v1  ;;  %11851 = vmatprep.subr.bf16.mxu1 %v14423_v1  ;;  %v13933_v32 = vld [vmem:[%s19455_s5 + $0x98] sm:$0xff]  }
 0x458   :  { %11752 = vmatpush3.bf16.msra.mxu0 %v19626_v33  ;;  %11852 = vmatpush3.bf16.msra.mxu1 %v19627_v34  ;;  %v13934_v33 = vld [vmem:[%s19455_s5 + $0xe0] sm:$0xff]  }
 0x459   :  { %11753 = vmatprep.subr.bf16.mxu0 %v14423_v1  ;;  %11853 = vmatprep.subr.bf16.mxu1 %v14423_v1  ;;  %v13935_v34 = vld [vmem:[%s19455_s5 + $0xa0] sm:$0xff]  }
 0x45c   :  { %11754 = vmatpush3.bf16.msra.mxu0 %v16442_v4  ;;  %11854 = vmatpush3.bf16.msra.mxu1 %v16447_v48 }
 0x45d   :  { %11759 = vmatprep.subr.bf16.mxu0 %v14423_v1  ;;  %11859 = vmatprep.subr.bf16.mxu1 %v14423_v1 }
 0x45f   :  { %11756 = vmatmul.mubr.bf16.vlgmr.msra.gmra.mrb[20].mxu0 %v16575_v3  ;;  %11856 = vmatmul.mubr.bf16.vlgmr.msra.gmra.mrb[20].mxu1 %v16575_v3 }
 0x460   :  { %11760 = vmatpush3.bf16.msra.mxu0 %v16457_v52  ;;  %11860 = vmatpush3.bf16.msra.mxu1 %v19628_v35  ;;  %v13936_v35 = vld [vmem:[%s19455_s5 + $0xe8] sm:$0xff]  }
 0x461   :  { %11761 = vmatprep.subr.bf16.mxu0 %v14423_v1  ;;  %11861 = vmatprep.subr.bf16.mxu1 %v14423_v1 }
 0x462   :  { %11775 = vmatprep.mubr.msk.bf16.mxu0 %vm14424_vm0, %v14423_v1  ;;  %11875 = vmatprep.mubr.msk.bf16.mxu1 %vm14424_vm0, %v14423_v1 }
 0x464   :  { %11762 = vmatpush3.bf16.msra.mxu0 %v19629_v36  ;;  %11862 = vmatpush3.bf16.msra.mxu1 %v19630_v63  ;;  %v13937_v36 = vld [vmem:[%s19455_s5 + $0xa8] sm:$0xff]   ;;  %v13938_v63 = vld [vmem:[%s19455_s5 + $0xf0] sm:$0xff]  }
 0x465   :  { %11763 = vmatprep.subr.bf16.mxu0 %v14423_v1  ;;  %11863 = vmatprep.subr.bf16.mxu1 %v14423_v1 }
 0x468   :  { %11764 = vmatpush3.bf16.msra.mxu0 %v19631_v0  ;;  %11864 = vmatpush3.bf16.msra.mxu1 %v19632_v60  ;;  %v13939_v0 = vld [vmem:[%s19455_s5 + $0xb0] sm:$0xff]   ;;  %v13940_v60 = vld [vmem:[%s19455_s5 + $0xf8] sm:$0xff]  }
 0x469   :  { %11765 = vmatprep.subr.bf16.mxu0 %v14423_v1  ;;  %11865 = vmatprep.subr.bf16.mxu1 %v14423_v1 }
 0x46c   :  { %11766 = vmatpush3.bf16.msra.mxu0 %v19633_v61  ;;  %11866 = vmatpush3.bf16.msra.mxu1 %v19634_v13  ;;  %v13941_v61 = vld [vmem:[%s19455_s5 + $0xb8] sm:$0xff]  }
 0x46d   :  { %11767 = vmatprep.subr.bf16.mxu0 %v14423_v1  ;;  %11867 = vmatprep.subr.bf16.mxu1 %v14423_v1 }
 0x470   :  { %11768 = vmatpush3.bf16.msra.mxu0 %v19635_v14  ;;  %11868 = vmatpush3.bf16.msra.mxu1 %v19636_v16  ;;  %v13942_v14 = vld [vmem:[%s19455_s5 + $0x100] sm:$0xff]  }
 0x471   :  { %11769 = vmatprep.subr.bf16.mxu0 %v14423_v1  ;;  %11869 = vmatprep.subr.bf16.mxu1 %v14423_v1 }
 0x474   :  { %11770 = vmatpush3.bf16.msra.mxu0 %v19637_v17  ;;  %11870 = vmatpush3.bf16.msra.mxu1 %v19638_v26  ;;  %v13943_v17 = vld [vmem:[%s19455_s5 + $0x108] sm:$0xff]   ;;  %v13944_v26 = vld [vmem:[%s19455_s5 + $0x110] sm:$0xff]  }
 0x475   :  { %11771 = vmatprep.subr.bf16.mxu0 %v14423_v1  ;;  %11871 = vmatprep.subr.bf16.mxu1 %v14423_v1 }
 0x478   :  { %11772 = vmatpush3.bf16.msra.mxu0 %v16549_v12  ;;  %11872 = vmatpush3.bf16.msra.mxu1 %v19639_v40  ;;  %v13945_v40 = vld [vmem:[%s19455_s5 + $0x118] sm:$0xff]  }
 0x479   :  { %11773 = vmatprep.subr.bf16.mxu0 %v14423_v1  ;;  %11873 = vmatprep.subr.bf16.mxu1 %v14423_v1 }
 0x47c   :  { %11774 = vmatpush3.bf16.msra.mxu0 %v16563_v11  ;;  %11874 = vmatpush3.bf16.msra.mxu1 %v16568_v39  ;;  %v13926_v11 = vld [vmem:[%s19455_s5 + $0xc0] sm:$0xff]  }
 0x47d   :  { %11899 = vmatprep.subr.bf16.mxu1 %v14423_v1  ;;  %11879 = vmatprep.subr.bf16.mxu0 %v14423_v1 }
 0x47f   :  { %11776 = vmatmul.mubr.bf16.vlgmr.msra.gmra.mrb[20].mxu0 %v3636_v47  ;;  %11876 = vmatmul.mubr.bf16.vlgmr.msra.gmra.mrb[20].mxu1 %v3636_v47  ;;  %v13948_v47 = vld [vmem:[%s19455_s5 + $0x130] sm:$0xff]  }
 0x480   :  { %11900 = vmatpush3.bf16.msra.mxu1 %v13910_v41  ;;  %11880 = vmatpush3.bf16.msra.mxu0 %v13911_v59  ;;  %v13946_v41 = vld [vmem:[%s19455_s5 + $0x120] sm:$0xff]   ;;  %v13947_v59 = vld [vmem:[%s19455_s5 + $0x128] sm:$0xff]  }
 0x481   :  { %11901 = vmatprep.subr.bf16.mxu1 %v14423_v1  ;;  %11881 = vmatprep.subr.bf16.mxu0 %v14423_v1 }
 0x482   :  { %11915 = vmatprep.mubr.msk.bf16.mxu1 %vm14424_vm0, %v14423_v1  ;;  %11895 = vmatprep.mubr.msk.bf16.mxu0 %vm14424_vm0, %v14423_v1 }
 0x484   :  { %11902 = vmatpush3.bf16.msra.mxu1 %v13912_v49  ;;  %11882 = vmatpush3.bf16.msra.mxu0 %v13913_v50  ;;  %v13949_v49 = vld [vmem:[%s19455_s5 + $0x138] sm:$0xff]  }
 0x485   :  { %11903 = vmatprep.subr.bf16.mxu1 %v14423_v1  ;;  %11883 = vmatprep.subr.bf16.mxu0 %v14423_v1 }
 0x488   :  { %11904 = vmatpush3.bf16.msra.mxu1 %v13914_v15  ;;  %11884 = vmatpush3.bf16.msra.mxu0 %v13915_v51  ;;  %v13950_v15 = vld [vmem:[%s19457_s7] sm:$0xff]   ;;  %v13951_v51 = vld [vmem:[%s19457_s7 + $0x8] sm:$0xff]  }
 0x489   :  { %11905 = vmatprep.subr.bf16.mxu1 %v14423_v1  ;;  %11885 = vmatprep.subr.bf16.mxu0 %v14423_v1 }
 0x48c   :  { %11906 = vmatpush3.bf16.msra.mxu1 %v13916_v54  ;;  %11886 = vmatpush3.bf16.msra.mxu0 %v13917_v57  ;;  %v13952_v54 = vld [vmem:[%s19457_s7 + $0x10] sm:$0xff]   ;;  %v13953_v57 = vld [vmem:[%s19457_s7 + $0x18] sm:$0xff]  }
 0x48d   :  { %11907 = vmatprep.subr.bf16.mxu1 %v14423_v1  ;;  %11887 = vmatprep.subr.bf16.mxu0 %v14423_v1 }
 0x490   :  { %11908 = vmatpush3.bf16.msra.mxu1 %v13918_v18  ;;  %11888 = vmatpush3.bf16.msra.mxu0 %v13919_v19  ;;  %v13954_v18 = vld [vmem:[%s19457_s7 + $0x20] sm:$0xff]   ;;  %v13955_v19 = vld [vmem:[%s19457_s7 + $0x28] sm:$0xff]  }
 0x491   :  { %11909 = vmatprep.subr.bf16.mxu1 %v14423_v1  ;;  %11889 = vmatprep.subr.bf16.mxu0 %v14423_v1 }
 0x494   :  { %11910 = vmatpush3.bf16.msra.mxu1 %v13920_v53  ;;  %11890 = vmatpush3.bf16.msra.mxu0 %v13921_v42  ;;  %v13956_v53 = vld [vmem:[%s19457_s7 + $0x30] sm:$0xff]  }
 0x495   :  { %11911 = vmatprep.subr.bf16.mxu1 %v14423_v1  ;;  %11891 = vmatprep.subr.bf16.mxu0 %v14423_v1 }
 0x498   :  { %11912 = vmatpush3.bf16.msra.mxu1 %v13922_v55  ;;  %11892 = vmatpush3.bf16.msra.mxu0 %v13923_v56 }
 0x499   :  { %11913 = vmatprep.subr.bf16.mxu1 %v14423_v1  ;;  %11893 = vmatprep.subr.bf16.mxu0 %v14423_v1 }
 0x49c   :  { %11914 = vmatpush3.bf16.msra.mxu1 %v13924_v58  ;;  %11894 = vmatpush3.bf16.msra.mxu0 %v13925_v62 }
 0x49d   :  { %11939 = vmatprep.subr.bf16.mxu1 %v14423_v1  ;;  %11919 = vmatprep.subr.bf16.mxu0 %v14423_v1 }
 0x4b2   :  { %v2942_v2 = vpop.f32.mrb[16].mxu0  ;;  %v3465_v20 = vpop.f32.mrb[16].mxu1 }
 0x4b3   :  { %v3472_v21 = vmax.f32 %v2942_v2, %v3465_v20  ;;  %v11577_v22 = vpop.f32.mrb[17].mxu0  ;;  %v11677_v23 = vpop.f32.mrb[17].mxu1  ;;  %v13957_v2 = vld [vmem:[%s19457_s7 + $0x38] sm:$0xff]  }
 0x4b4   :  { %v2945_v37 = vpop.f32.mrb[18].mxu0  ;;  %v3468_v38 = vpop.f32.mrb[18].mxu1 }
 0x4b5   :  { %v11578_v43 = vpop.f32.mrb[19].mxu0  ;;  %v11678_v44 = vpop.f32.mrb[19].mxu1 }
 0x552   :  { %v3672_v45 = vpop.f32.mrb[20].mxu0  ;;  %v3876_v46 = vpop.f32.mrb[20].mxu1 }
 0x553   :  { %v3679_v5 = vmax.f32 %v3472_v21, %v3672_v45  ;;  %v11777_v6 = vpop.f32.mrb[21].mxu0  ;;  %v11877_v7 = vpop.f32.mrb[21].mxu1 }
 0x554   :  { %v3675_v9 = vpop.f32.mrb[22].mxu0  ;;  %v3879_v10 = vpop.f32.mrb[22].mxu1 }
 0x555   :  { %v3883_v52 = vmax.f32 %v3679_v5, %v3876_v46  ;;  %v11778_v3 = vpop.f32.mrb[23].mxu0  ;;  %v11878_v48 = vpop.f32.mrb[23].mxu1  ;;  %v42_v9 = vld [vmem:[%s19456_s6] sm:$0x1] }
 0x557   :  { %v3890_v4 = vadd.f32 %v9212_v8, %v3883_v52 }
 0x559   :  { %v3891_v39 = vmax.f32 %v3890_v4, 0.0 }
 0x55b   :  { %v16844_v12 = vpack.c.bf16 %v3891_v39, %v3891_v39 }
 0x55d   :  { %11916 = vmatmul.mubr.bf16.vlgmr.msra.gmra.mrb[24].mxu1 %v16844_v12  ;;  %v3926_v25 = vshrl.u32 %v16844_v12, 16  ;;  %v4122_v16 = vrot.slane %v16844_v12, 1  ;;  %v4336_v50 = vrot.slane %v16844_v12, 2  ;;  %v16991_v12 = vld [vmem:[%s19451_s1 + $0x40] sm:$0xff]  }
 0x55e   :  { %11940 = vmatpush3.bf16.msra.mxu1 %v13926_v11  ;;  %11955 = vmatprep.mubr.msk.bf16.mxu1 %vm14424_vm0, %v14423_v1 }
 0x55f   :  { %11896 = vmatmul.mubr.bf16.vlgmr.msra.gmra.mrb[24].mxu0 %v3926_v25  ;;  %11941 = vmatprep.subr.bf16.mxu1 %v14423_v1  ;;  %v4229_v13 = vrot.slane %v3926_v25, 1 }
 0x560   :  { %11920 = vmatpush3.bf16.msra.mxu0 %v13927_v24  ;;  %11935 = vmatprep.mubr.msk.bf16.mxu0 %vm14424_vm0, %v14423_v1  ;;  %v13992_v24 = vld [vmem:[%s19459_s9] sm:$0xff]  }
 0x561   :  { %11921 = vmatprep.subr.bf16.mxu0 %v14423_v1 }
 0x562   :  { %11942 = vmatpush3.bf16.msra.mxu1 %v13928_v27  ;;  %v17001_v27 = vld [vmem:[%s19451_s1 + $0x48] sm:$0xff]  }
 0x563   :  { %11943 = vmatprep.subr.bf16.mxu1 %v14423_v1 }
 0x564   :  { %11922 = vmatpush3.bf16.msra.mxu0 %v13929_v28  ;;  %v13994_v28 = vld [vmem:[%s19459_s9 + $0x8] sm:$0xff]  }
 0x565   :  { %11923 = vmatprep.subr.bf16.mxu0 %v14423_v1 }
 0x566   :  { %11944 = vmatpush3.bf16.msra.mxu1 %v13930_v29  ;;  %v17014_v29 = vld [vmem:[%s19451_s1 + $0x50] sm:$0xff]  }
 0x567   :  { %11945 = vmatprep.subr.bf16.mxu1 %v14423_v1 }
 0x568   :  { %11924 = vmatpush3.bf16.msra.mxu0 %v13931_v30  ;;  %v13996_v30 = vld [vmem:[%s19459_s9 + $0x10] sm:$0xff]  }
 0x569   :  { %11925 = vmatprep.subr.bf16.mxu0 %v14423_v1 }
 0x56a   :  { %11946 = vmatpush3.bf16.msra.mxu1 %v13932_v31  ;;  %v17025_v31 = vld [vmem:[%s19451_s1 + $0x58] sm:$0xff]  }
 0x56b   :  { %11947 = vmatprep.subr.bf16.mxu1 %v14423_v1 }
 0x56c   :  { %11926 = vmatpush3.bf16.msra.mxu0 %v13933_v32  ;;  %v13998_v32 = vld [vmem:[%s19459_s9 + $0x18] sm:$0xff]  }
 0x56d   :  { %11927 = vmatprep.subr.bf16.mxu0 %v14423_v1 }
 0x56e   :  { %11948 = vmatpush3.bf16.msra.mxu1 %v13934_v33  ;;  %v17036_v33 = vld [vmem:[%s19451_s1 + $0x60] sm:$0xff]  }
 0x56f   :  { %11949 = vmatprep.subr.bf16.mxu1 %v14423_v1 }
 0x570   :  { %11928 = vmatpush3.bf16.msra.mxu0 %v13935_v34  ;;  %v14000_v34 = vld [vmem:[%s19459_s9 + $0x20] sm:$0xff]  }
 0x571   :  { %11929 = vmatprep.subr.bf16.mxu0 %v14423_v1 }
 0x572   :  { %11950 = vmatpush3.bf16.msra.mxu1 %v13936_v35  ;;  %v17047_v35 = vld [vmem:[%s19451_s1 + $0x68] sm:$0xff]  }
 0x573   :  { %11951 = vmatprep.subr.bf16.mxu1 %v14423_v1 }
 0x574   :  { %11930 = vmatpush3.bf16.msra.mxu0 %v13937_v36  ;;  %v14002_v36 = vld [vmem:[%s19459_s9 + $0x28] sm:$0xff]  }
 0x575   :  { %11931 = vmatprep.subr.bf16.mxu0 %v14423_v1 }
 0x576   :  { %11952 = vmatpush3.bf16.msra.mxu1 %v13938_v63  ;;  %v17058_v63 = vld [vmem:[%s19451_s1 + $0x70] sm:$0xff]  }
 0x577   :  { %11953 = vmatprep.subr.bf16.mxu1 %v14423_v1 }
 0x578   :  { %11932 = vmatpush3.bf16.msra.mxu0 %v13939_v0  ;;  %v14004_v0 = vld [vmem:[%s19459_s9 + $0x30] sm:$0xff]  }
 0x579   :  { %11933 = vmatprep.subr.bf16.mxu0 %v14423_v1 }
 0x57a   :  { %11954 = vmatpush3.bf16.msra.mxu1 %v13940_v60  ;;  %v17069_v60 = vld [vmem:[%s19451_s1 + $0x78] sm:$0xff]  }
 0x57b   :  { %11979 = vmatprep.subr.bf16.mxu1 %v14423_v1 }
 0x57c   :  { %11934 = vmatpush3.bf16.msra.mxu0 %v13941_v61  ;;  %v17076_v61 = vld [vmem:[%s19450_s0 + $0xc] sm:$0xf] }
 0x57d   :  { %11956 = vmatmul.mubr.bf16.vlgmr.msra.gmra.mrb[28].mxu1 %v4229_v13  ;;  %11959 = vmatprep.subr.bf16.mxu0 %v14423_v1  ;;  %v17081_v13 = vld [vmem:[%s19451_s1] sm:$0xff]  }
 0x57e   :  { %11995 = vmatprep.mubr.msk.bf16.mxu1 %vm14424_vm0, %v14423_v1  ;;  %11980 = vmatpush3.bf16.msra.mxu1 %v13950_v15  ;;  %v17162_v15 = vld [vmem:[%s19451_s1 + $0x90] sm:$0xff]  }
 0x57f   :  { %11936 = vmatmul.mubr.bf16.vlgmr.msra.gmra.mrb[28].mxu0 %v4122_v16  ;;  %11981 = vmatprep.subr.bf16.mxu1 %v14423_v1  ;;  %v17098_v16 = vld [vmem:[%s19451_s1 + $0x10] sm:$0xff]  }
 0x580   :  { %11960 = vmatpush3.bf16.msra.mxu0 %v13942_v14  ;;  %11975 = vmatprep.mubr.msk.bf16.mxu0 %vm14424_vm0, %v14423_v1  ;;  %v17089_v14 = vld [vmem:[%s19451_s1 + $0x8] sm:$0xff]  }
 0x581   :  { %11961 = vmatprep.subr.bf16.mxu0 %v14423_v1 }
 0x582   :  { %11982 = vmatpush3.bf16.msra.mxu1 %v13951_v51  ;;  %v17169_v51 = vld [vmem:[%s19451_s1 + $0x98] sm:$0xff]  }
 0x583   :  { %11983 = vmatprep.subr.bf16.mxu1 %v14423_v1 }
 0x584   :  { %11962 = vmatpush3.bf16.msra.mxu0 %v13943_v17  ;;  %v17105_v17 = vld [vmem:[%s19451_s1 + $0x18] sm:$0xff]  }
 0x585   :  { %11963 = vmatprep.subr.bf16.mxu0 %v14423_v1 }
 0x586   :  { %11984 = vmatpush3.bf16.msra.mxu1 %v13952_v54  ;;  %v17176_v54 = vld [vmem:[%s19451_s1 + $0xa0] sm:$0xff]  }
 0x587   :  { %11985 = vmatprep.subr.bf16.mxu1 %v14423_v1 }
 0x588   :  { %11964 = vmatpush3.bf16.msra.mxu0 %v13944_v26  ;;  %v17112_v26 = vld [vmem:[%s19451_s1 + $0x20] sm:$0xff]  }
 0x589   :  { %11965 = vmatprep.subr.bf16.mxu0 %v14423_v1 }
 0x58a   :  { %11986 = vmatpush3.bf16.msra.mxu1 %v13953_v57  ;;  %v17183_v57 = vld [vmem:[%s19451_s1 + $0xa8] sm:$0xff]  }
 0x58b   :  { %11987 = vmatprep.subr.bf16.mxu1 %v14423_v1 }
 0x58c   :  { %11966 = vmatpush3.bf16.msra.mxu0 %v13945_v40  ;;  %v17119_v40 = vld [vmem:[%s19451_s1 + $0x28] sm:$0xff]  }
 0x58d   :  { %11967 = vmatprep.subr.bf16.mxu0 %v14423_v1 }
 0x58e   :  { %11988 = vmatpush3.bf16.msra.mxu1 %v13954_v18  ;;  %v14006_v18 = vld [vmem:[%s19459_s9 + $0x38] sm:$0xff]  }
 0x58f   :  { %11989 = vmatprep.subr.bf16.mxu1 %v14423_v1 }
 0x590   :  { %11968 = vmatpush3.bf16.msra.mxu0 %v13946_v41  ;;  %v17126_v41 = vld [vmem:[%s19451_s1 + $0x30] sm:$0xff]  }
 0x591   :  { %11969 = vmatprep.subr.bf16.mxu0 %v14423_v1 }
 0x592   :  { %11990 = vmatpush3.bf16.msra.mxu1 %v13955_v19  ;;  %v17193_v19 = vld [vmem:[%s19451_s1 + $0xb0] sm:$0xff]  }
 0x593   :  { %11991 = vmatprep.subr.bf16.mxu1 %v14423_v1 }
 0x594   :  { %11970 = vmatpush3.bf16.msra.mxu0 %v13947_v59  ;;  %v17133_v59 = vld [vmem:[%s19451_s1 + $0x38] sm:$0xff]  }
 0x595   :  { %11971 = vmatprep.subr.bf16.mxu0 %v14423_v1 }
 0x596   :  { %11992 = vmatpush3.bf16.msra.mxu1 %v13956_v53  ;;  %v17201_v53 = vld [vmem:[%s19451_s1 + $0xb8] sm:$0xff]  }
 0x597   :  { %11993 = vmatprep.subr.bf16.mxu1 %v14423_v1 }
 0x598   :  { %11972 = vmatpush3.bf16.msra.mxu0 %v13948_v47  ;;  %v17140_v47 = vld [vmem:[%s19450_s0 + $0x4] sm:$0xf] }
 0x599   :  { %11973 = vmatprep.subr.bf16.mxu0 %v14423_v1 }
 0x59a   :  { %11994 = vmatpush3.bf16.msra.mxu1 %v13957_v2  ;;  %v17208_v2 = vld [vmem:[%s19450_s0 + $0x14] sm:$0xf] }
 0x59b   :  { %12019 = vmatprep.subr.bf16.mxu1 %v14423_v1 }
 0x59c   :  { %11974 = vmatpush3.bf16.msra.mxu0 %v13949_v49  ;;  %v17145_v49 = vld [vmem:[%s19451_s1 + $0x80] sm:$0xff]  }
 0x59d   :  { %11999 = vmatprep.subr.bf16.mxu0 %v14423_v1 }
 0x59f   :  { %11976 = vmatmul.mubr.bf16.vlgmr.msra.gmra.mrb[32].mxu0 %v4336_v50  ;;  %v17153_v50 = vld [vmem:[%s19451_s1 + $0x88] sm:$0xff]  }
 0x5a0   :  { %12015 = vmatprep.mubr.msk.bf16.mxu0 %vm14424_vm0, %v14423_v1  ;;  %12000 = vmatpush3.bf16.msra.mxu0 %v13992_v24 }
 0x5a1   :  { %12001 = vmatprep.subr.bf16.mxu0 %v14423_v1 }
 0x5a4   :  { %12002 = vmatpush3.bf16.msra.mxu0 %v13994_v28  ;;  %v17378_v28 = vld [vmem:[%s19451_s1 + $0x180] sm:$0xff]  }
 0x5a5   :  { %12003 = vmatprep.subr.bf16.mxu0 %v14423_v1 }
 0x5a8   :  { %12004 = vmatpush3.bf16.msra.mxu0 %v13996_v30 }
 0x5a9   :  { %12005 = vmatprep.subr.bf16.mxu0 %v14423_v1 }
 0x5ac   :  { %12006 = vmatpush3.bf16.msra.mxu0 %v13998_v32  ;;  %v17386_v32 = vld [vmem:[%s19451_s1 + $0x188] sm:$0xff]  }
 0x5ad   :  { %12007 = vmatprep.subr.bf16.mxu0 %v14423_v1 }
 0x5b0   :  { %12008 = vmatpush3.bf16.msra.mxu0 %v14000_v34  ;;  %v17397_v34 = vld [vmem:[%s19451_s1 + $0x190] sm:$0xff]  }
 0x5b1   :  { %12009 = vmatprep.subr.bf16.mxu0 %v14423_v1 }
 0x5b4   :  { %12010 = vmatpush3.bf16.msra.mxu0 %v14002_v36  ;;  %v17409_v36 = vld [vmem:[%s19451_s1 + $0x198] sm:$0xff]  }
 0x5b5   :  { %12011 = vmatprep.subr.bf16.mxu0 %v14423_v1 }
 0x5b8   :  { %12012 = vmatpush3.bf16.msra.mxu0 %v14004_v0  ;;  %v17418_v0 = vld [vmem:[%s19451_s1 + $0x1a0] sm:$0xff]  }
 0x5b9   :  { %12013 = vmatprep.subr.bf16.mxu0 %v14423_v1 }
 0x5bc   :  { %12014 = vmatpush3.bf16.msra.mxu0 %v14006_v18  ;;  %v17427_v18 = vld [vmem:[%s19451_s1 + $0x1a8] sm:$0xff]  }
 0x5bd   :  { %12119 = vmatprep.subr.bf16.mxu0 %v14423_v1 }
 0x630   :  { %v4099_v20 = vpop.f32.mrb[24].mxu1 }
 0x631   :  { %v11917_v21 = vpop.f32.mrb[25].mxu1 }
 0x632   :  { %v4011_v22 = vpop.f32.mrb[24].mxu0  ;;  %v4102_v23 = vpop.f32.mrb[26].mxu1  ;;  %v17221_v21 = vld [vmem:[%s19451_s1 + $0xc8] sm:$0xff]  }
 0x633   :  { %v4100_v37 = vadd.f32 %v4099_v20, %v4011_v22  ;;  %v11897_v38 = vpop.f32.mrb[25].mxu0  ;;  %v11918_v43 = vpop.f32.mrb[27].mxu1  ;;  %v17213_v20 = vld [vmem:[%s19451_s1 + $0xc0] sm:$0xff]   ;;  %v17230_v22 = vld [vmem:[%s19451_s1 + $0xd0] sm:$0xff]   ;;  %v17237_v23 = vld [vmem:[%s19451_s1 + $0xd8] sm:$0xff]  }
 0x634   :  { %v4014_v44 = vpop.f32.mrb[26].mxu0  ;;  %v17251_v38 = vld [vmem:[%s19451_s1 + $0xe8] sm:$0xff]   ;;  %v17258_v43 = vld [vmem:[%s19451_s1 + $0xf0] sm:$0xff]  }
 0x635   :  { %v11898_v42 = vpop.f32.mrb[27].mxu0  ;;  %v17265_v44 = vld [vmem:[%s19451_s1 + $0xf8] sm:$0xff]  }
 0x636   :  { %v17272_v42 = vld [vmem:[%s19450_s0 + $0x1c] sm:$0xf] }
 0x650   :  { %v4313_v55 = vpop.f32.mrb[28].mxu1 }
 0x651   :  { %v11957_v56 = vpop.f32.mrb[29].mxu1 }
 0x652   :  { %v4206_v58 = vpop.f32.mrb[28].mxu0  ;;  %v4316_v62 = vpop.f32.mrb[30].mxu1  ;;  %v17285_v56 = vld [vmem:[%s19451_s1 + $0x108] sm:$0xff]  }
 0x653   :  { %v4212_v45 = vadd.f32 %v4206_v58, %v4100_v37  ;;  %v11937_v46 = vpop.f32.mrb[29].mxu0  ;;  %v11958_v5 = vpop.f32.mrb[31].mxu1  ;;  %v17244_v37 = vld [vmem:[%s19451_s1 + $0xe0] sm:$0xff]   ;;  %19641 = vst [vmem:[#allocation7_spill] sm:$0xff] %v17285_v56  ;;  %v17294_v58 = vld [vmem:[%s19451_s1 + $0x110] sm:$0xff]   ;;  %v17301_v62 = vld [vmem:[%s19451_s1 + $0x118] sm:$0xff]  }
 0x654   :  { %v4209_v6 = vpop.f32.mrb[30].mxu0  ;;  %19642 = vst [vmem:[#allocation8_spill] sm:$0xff] %v17294_v58  ;;  %19643 = vst [vmem:[#allocation9_spill] sm:$0xff] %v17301_v62  ;;  %v9301_v46 = vcombine.low %v17140_v47, %v17140_v47  ;;  %v17317_v5 = vld [vmem:[%s19451_s1 + $0x128] sm:$0xff]  }
 0x655   :  { %v11938_v7 = vpop.f32.mrb[31].mxu0  ;;  %v4319_v8 = vadd.f32 %v4313_v55, %v4212_v45  ;;  %v17277_v55 = vld [vmem:[%s19451_s1 + $0x100] sm:$0xff]  }
 0x656   :  { %19640 = vst [vmem:[#allocation6_spill] sm:$0xff] %v17277_v55  ;;  %v17308_v45 = vld [vmem:[%s19451_s1 + $0x120] sm:$0xff]   ;;  %v5053_v6 = vshll.u32 %v9301_v46, 16  ;;  %v17324_v7 = vld [vmem:[%s19451_s1 + $0x130] sm:$0xff]  }
 0x657   :  { %19644 = vst [vmem:[#allocation10_spill] sm:$0xff] %v17308_v45 }
 0x672   :  { %v4420_v10 = vpop.f32.mrb[32].mxu0 }
 0x673   :  { %v4426_v52 = vadd.f32 %v4420_v10, %v4319_v8  ;;  %v11977_v3 = vpop.f32.mrb[33].mxu0  ;;  %v5051_v8 = vshrl.u32 %v9301_v46, 16  ;;  %v17331_v10 = vld [vmem:[%s19451_s1 + $0x138] sm:$0xff]   ;;  %v17436_v46 = vld [vmem:[%s19451_s1 + $0x1b0] sm:$0xff]  }
 0x674   :  { %v4423_v48 = vpop.f32.mrb[34].mxu0  ;;  %v43_v3 = vld [vmem:[%s19458_s8] sm:$0x1] }
 0x675   :  { %v4427_v4 = vadd.f32 %v4426_v52, %v42_v9  ;;  %v11978_v39 = vpop.f32.mrb[35].mxu0  ;;  %v5055_v9 = vrot.slane %v5053_v6, 1  ;;  %v17445_v6 = vld [vmem:[%s19451_s1 + $0x1b8] sm:$0xff]  }
 0x677   :  { %v4428_v11 = vmax.f32 %v4427_v4, 0.0  ;;  %v17334_v52 = vor.u32 %v5055_v9, %v5051_v8  ;;  %v17454_v8 = vld [vmem:[%s19451_s1 + $0x140] sm:$0xff]   ;;  %v17464_v9 = vld [vmem:[%s19451_s1 + $0x148] sm:$0xff]  }
 0x679   :  { %v4429_v25 = vpack.c.bf16 %v4428_v11, %v4428_v11 }
 0x67b   :  { %11996 = vmatmul.mubr.bf16.vlgmr.msra.gmra.mrb[32].mxu1 %v4429_v25 }
 0x67c   :  { %12020 = vmatpush3.bf16.msra.mxu1 %v16991_v12  ;;  %12035 = vmatprep.mubr.msk.bf16.mxu1 %vm14424_vm0, %v14423_v1 }
 0x67d   :  { %12021 = vmatprep.subr.bf16.mxu1 %v14423_v1 }
 0x680   :  { %12022 = vmatpush3.bf16.msra.mxu1 %v17001_v27 }
 0x681   :  { %12023 = vmatprep.subr.bf16.mxu1 %v14423_v1 }
 0x684   :  { %12024 = vmatpush3.bf16.msra.mxu1 %v17014_v29 }
 0x685   :  { %12025 = vmatprep.subr.bf16.mxu1 %v14423_v1 }
 0x688   :  { %12026 = vmatpush3.bf16.msra.mxu1 %v17025_v31 }
 0x689   :  { %12027 = vmatprep.subr.bf16.mxu1 %v14423_v1 }
 0x68c   :  { %12028 = vmatpush3.bf16.msra.mxu1 %v17036_v33 }
 0x68d   :  { %12029 = vmatprep.subr.bf16.mxu1 %v14423_v1 }
 0x690   :  { %12030 = vmatpush3.bf16.msra.mxu1 %v17047_v35 }
 0x691   :  { %12031 = vmatprep.subr.bf16.mxu1 %v14423_v1 }
 0x694   :  { %12032 = vmatpush3.bf16.msra.mxu1 %v17058_v63 }
 0x695   :  { %12033 = vmatprep.subr.bf16.mxu1 %v14423_v1 }
 0x698   :  { %12034 = vmatpush3.bf16.msra.mxu1 %v17069_v60 }
 0x699   :  { %12039 = vmatprep.subr.bf16.mxu1 %v14423_v1 }
 0x69b   :  { %12036 = vmatmul.mubr.bf16.vlgmr.msra.gmra.mrb[36].mxu1 %v17076_v61 }
 0x69c   :  { %12040 = vmatpush3.bf16.msra.mxu1 %v17081_v13  ;;  %12055 = vmatprep.mubr.msk.bf16.mxu1 %vm14424_vm0, %v14423_v1 }
 0x69d   :  { %12041 = vmatprep.subr.bf16.mxu1 %v14423_v1 }
 0x6a0   :  { %12042 = vmatpush3.bf16.msra.mxu1 %v17089_v14 }
 0x6a1   :  { %12043 = vmatprep.subr.bf16.mxu1 %v14423_v1 }
 0x6a4   :  { %12044 = vmatpush3.bf16.msra.mxu1 %v17098_v16 }
 0x6a5   :  { %12045 = vmatprep.subr.bf16.mxu1 %v14423_v1 }
 0x6a8   :  { %12046 = vmatpush3.bf16.msra.mxu1 %v17105_v17 }
 0x6a9   :  { %12047 = vmatprep.subr.bf16.mxu1 %v14423_v1 }
 0x6ac   :  { %12048 = vmatpush3.bf16.msra.mxu1 %v17112_v26 }
 0x6ad   :  { %12049 = vmatprep.subr.bf16.mxu1 %v14423_v1 }
 0x6b0   :  { %12050 = vmatpush3.bf16.msra.mxu1 %v17119_v40 }
 0x6b1   :  { %12051 = vmatprep.subr.bf16.mxu1 %v14423_v1 }
 0x6b4   :  { %12052 = vmatpush3.bf16.msra.mxu1 %v17126_v41 }
 0x6b5   :  { %12053 = vmatprep.subr.bf16.mxu1 %v14423_v1 }
 0x6b8   :  { %12054 = vmatpush3.bf16.msra.mxu1 %v17133_v59 }
 0x6b9   :  { %12059 = vmatprep.subr.bf16.mxu1 %v14423_v1 }
 0x6bb   :  { %12056 = vmatmul.mubr.bf16.vlgmr.msra.gmra.mrb[36].mxu1 %v17140_v47 }
 0x6bc   :  { %12060 = vmatpush3.bf16.msra.mxu1 %v17145_v49  ;;  %12075 = vmatprep.mubr.msk.bf16.mxu1 %vm14424_vm0, %v14423_v1 }
 0x6bd   :  { %12061 = vmatprep.subr.bf16.mxu1 %v14423_v1 }
 0x6c0   :  { %12062 = vmatpush3.bf16.msra.mxu1 %v17153_v50 }
 0x6c1   :  { %12063 = vmatprep.subr.bf16.mxu1 %v14423_v1 }
 0x6c4   :  { %12064 = vmatpush3.bf16.msra.mxu1 %v17162_v15 }
 0x6c5   :  { %12065 = vmatprep.subr.bf16.mxu1 %v14423_v1 }
 0x6c8   :  { %12066 = vmatpush3.bf16.msra.mxu1 %v17169_v51 }
 0x6c9   :  { %12067 = vmatprep.subr.bf16.mxu1 %v14423_v1 }
 0x6cc   :  { %12068 = vmatpush3.bf16.msra.mxu1 %v17176_v54 }
 0x6cd   :  { %12069 = vmatprep.subr.bf16.mxu1 %v14423_v1 }
 0x6d0   :  { %12070 = vmatpush3.bf16.msra.mxu1 %v17183_v57 }
 0x6d1   :  { %12071 = vmatprep.subr.bf16.mxu1 %v14423_v1 }
 0x6d4   :  { %12072 = vmatpush3.bf16.msra.mxu1 %v17193_v19 }
 0x6d5   :  { %12073 = vmatprep.subr.bf16.mxu1 %v14423_v1 }
 0x6d8   :  { %12074 = vmatpush3.bf16.msra.mxu1 %v17201_v53 }
 0x6d9   :  { %12079 = vmatprep.subr.bf16.mxu1 %v14423_v1 }
 0x6db   :  { %12076 = vmatmul.mubr.bf16.vlgmr.msra.gmra.mrb[36].mxu1 %v17208_v2 }
 0x6dc   :  { %12080 = vmatpush3.bf16.msra.mxu1 %v17213_v20  ;;  %12095 = vmatprep.mubr.msk.bf16.mxu1 %vm14424_vm0, %v14423_v1 }
 0x6dd   :  { %12081 = vmatprep.subr.bf16.mxu1 %v14423_v1 }
 0x6e0   :  { %12082 = vmatpush3.bf16.msra.mxu1 %v17221_v21 }
 0x6e1   :  { %12083 = vmatprep.subr.bf16.mxu1 %v14423_v1 }
 0x6e4   :  { %12084 = vmatpush3.bf16.msra.mxu1 %v17230_v22 }
 0x6e5   :  { %12085 = vmatprep.subr.bf16.mxu1 %v14423_v1 }
 0x6e8   :  { %12086 = vmatpush3.bf16.msra.mxu1 %v17237_v23 }
 0x6e9   :  { %12087 = vmatprep.subr.bf16.mxu1 %v14423_v1 }
 0x6ec   :  { %12088 = vmatpush3.bf16.msra.mxu1 %v17244_v37 }
 0x6ed   :  { %12089 = vmatprep.subr.bf16.mxu1 %v14423_v1 }
 0x6f0   :  { %12090 = vmatpush3.bf16.msra.mxu1 %v17251_v38 }
 0x6f1   :  { %12091 = vmatprep.subr.bf16.mxu1 %v14423_v1 }
 0x6f4   :  { %12092 = vmatpush3.bf16.msra.mxu1 %v17258_v43 }
 0x6f5   :  { %12093 = vmatprep.subr.bf16.mxu1 %v14423_v1 }
 0x6f8   :  { %12094 = vmatpush3.bf16.msra.mxu1 %v17265_v44 }
 0x6f9   :  { %12099 = vmatprep.subr.bf16.mxu1 %v14423_v1 }
 0x6fb   :  { %12096 = vmatmul.mubr.bf16.vlgmr.msra.gmra.mrb[36].mxu1 %v17272_v42 }
 0x6fc   :  { %12100 = vmatpush3.bf16.msra.mxu1 %v17277_v55  ;;  %12115 = vmatprep.mubr.msk.bf16.mxu1 %vm14424_vm0, %v14423_v1 }
 0x6fd   :  { %12101 = vmatprep.subr.bf16.mxu1 %v14423_v1 }
 0x700   :  { %12102 = vmatpush3.bf16.msra.mxu1 %v17285_v56 }
 0x701   :  { %12103 = vmatprep.subr.bf16.mxu1 %v14423_v1 }
 0x704   :  { %12104 = vmatpush3.bf16.msra.mxu1 %v17294_v58 }
 0x705   :  { %12105 = vmatprep.subr.bf16.mxu1 %v14423_v1 }
 0x708   :  { %12106 = vmatpush3.bf16.msra.mxu1 %v17301_v62 }
 0x709   :  { %12107 = vmatprep.subr.bf16.mxu1 %v14423_v1 }
 0x70c   :  { %12108 = vmatpush3.bf16.msra.mxu1 %v17308_v45 }
 0x70d   :  { %12109 = vmatprep.subr.bf16.mxu1 %v14423_v1 }
 0x710   :  { %12110 = vmatpush3.bf16.msra.mxu1 %v17317_v5 }
 0x711   :  { %12111 = vmatprep.subr.bf16.mxu1 %v14423_v1 }
 0x714   :  { %12112 = vmatpush3.bf16.msra.mxu1 %v17324_v7 }
 0x715   :  { %12113 = vmatprep.subr.bf16.mxu1 %v14423_v1 }
 0x718   :  { %12114 = vmatpush3.bf16.msra.mxu1 %v17331_v10 }
 0x719   :  { %12219 = vmatprep.subr.bf16.mxu1 %v14423_v1 }
 0x71b   :  { %12116 = vmatmul.mubr.bf16.vlgmr.msra.gmra.mrb[36].mxu1 %v17334_v52 }
 0x71c   :  { %12220 = vmatpush3.bf16.msra.mxu1 %v16991_v12  ;;  %12235 = vmatprep.mubr.msk.bf16.mxu1 %vm14424_vm0, %v14423_v1 }
 0x71d   :  { %12221 = vmatprep.subr.bf16.mxu1 %v14423_v1 }
 0x720   :  { %12222 = vmatpush3.bf16.msra.mxu1 %v17001_v27 }
 0x721   :  { %12223 = vmatprep.subr.bf16.mxu1 %v14423_v1 }
 0x724   :  { %12224 = vmatpush3.bf16.msra.mxu1 %v17014_v29 }
 0x725   :  { %12225 = vmatprep.subr.bf16.mxu1 %v14423_v1 }
 0x728   :  { %12226 = vmatpush3.bf16.msra.mxu1 %v17025_v31 }
 0x729   :  { %12227 = vmatprep.subr.bf16.mxu1 %v14423_v1 }
 0x72c   :  { %12228 = vmatpush3.bf16.msra.mxu1 %v17036_v33 }
 0x72d   :  { %12229 = vmatprep.subr.bf16.mxu1 %v14423_v1 }
 0x730   :  { %12230 = vmatpush3.bf16.msra.mxu1 %v17047_v35 }
 0x731   :  { %12231 = vmatprep.subr.bf16.mxu1 %v14423_v1 }
 0x734   :  { %12232 = vmatpush3.bf16.msra.mxu1 %v17058_v63 }
 0x735   :  { %12233 = vmatprep.subr.bf16.mxu1 %v14423_v1 }
 0x738   :  { %12234 = vmatpush3.bf16.msra.mxu1 %v17069_v60 }
 0x739   :  { %12239 = vmatprep.subr.bf16.mxu1 %v14423_v1 }
 0x73b   :  { %12236 = vmatmul.mubr.bf16.vlgmr.msra.gmra.mrb[40].mxu1 %v17208_v2 }
 0x73c   :  { %12240 = vmatpush3.bf16.msra.mxu1 %v17081_v13  ;;  %12255 = vmatprep.mubr.msk.bf16.mxu1 %vm14424_vm0, %v14423_v1 }
 0x73d   :  { %12241 = vmatprep.subr.bf16.mxu1 %v14423_v1 }
 0x740   :  { %12242 = vmatpush3.bf16.msra.mxu1 %v17089_v14 }
 0x741   :  { %12243 = vmatprep.subr.bf16.mxu1 %v14423_v1 }
 0x744   :  { %12244 = vmatpush3.bf16.msra.mxu1 %v17098_v16 }
 0x745   :  { %12245 = vmatprep.subr.bf16.mxu1 %v14423_v1 }
 0x748   :  { %12246 = vmatpush3.bf16.msra.mxu1 %v17105_v17 }
 0x749   :  { %12247 = vmatprep.subr.bf16.mxu1 %v14423_v1 }
 0x74c   :  { %12248 = vmatpush3.bf16.msra.mxu1 %v17112_v26 }
 0x74d   :  { %12249 = vmatprep.subr.bf16.mxu1 %v14423_v1 }
 0x74e   :  { %v4512_v48 = vpop.f32.mrb[32].mxu1 }
 0x74f   :  { %v4513_v4 = vadd.f32 %v4512_v48, %v43_v3  ;;  %v11997_v39 = vpop.f32.mrb[33].mxu1  ;;  %v17475_v3 = vld [vmem:[%s19451_s1 + $0x150] sm:$0xff]   ;;  %v17487_v48 = vld [vmem:[%s19451_s1 + $0x158] sm:$0xff]  }
 0x750   :  { %v4515_v11 = vpop.f32.mrb[34].mxu1  ;;  %12250 = vmatpush3.bf16.msra.mxu1 %v17119_v40  ;;  %v17505_v39 = vld [vmem:[%s19451_s1 + $0x168] sm:$0xff]  }
 0x751   :  { %v4518_v24 = vmax.f32 %v4513_v4, 0.0  ;;  %v11998_v25 = vpop.f32.mrb[35].mxu1  ;;  %12251 = vmatprep.subr.bf16.mxu1 %v14423_v1  ;;  %v17496_v4 = vld [vmem:[%s19451_s1 + $0x160] sm:$0xff]   ;;  %v17514_v11 = vld [vmem:[%s19451_s1 + $0x170] sm:$0xff]  }
 0x752   :  { %v17532_v25 = vld [vmem:[%s19451_s1 + $0x1c0] sm:$0xff]  }
 0x753   :  { %v4519_v30 = vpack.c.bf16 %v4518_v24, %v4518_v24  ;;  %v17523_v24 = vld [vmem:[%s19451_s1 + $0x178] sm:$0xff]  }
 0x754   :  { %12252 = vmatpush3.bf16.msra.mxu1 %v17126_v41 }
 0x755   :  { %12016 = vmatmul.mubr.bf16.vlgmr.msra.gmra.mrb[36].mxu0 %v4519_v30  ;;  %12253 = vmatprep.subr.bf16.mxu1 %v14423_v1  ;;  %v17542_v30 = vld [vmem:[%s19451_s1 + $0x1c8] sm:$0xff]  }
 0x756   :  { %12120 = vmatpush3.bf16.msra.mxu0 %v17378_v28  ;;  %12135 = vmatprep.mubr.msk.bf16.mxu0 %vm14424_vm0, %v14423_v1  ;;  %19645 = vst [vmem:[#allocation11_spill] sm:$0xff] %v17542_v30 }
 0x757   :  { %12121 = vmatprep.subr.bf16.mxu0 %v14423_v1 }
 0x758   :  { %12254 = vmatpush3.bf16.msra.mxu1 %v17133_v59 }
 0x759   :  { %12259 = vmatprep.subr.bf16.mxu1 %v14423_v1 }
 0x75a   :  { %12122 = vmatpush3.bf16.msra.mxu0 %v17386_v32 }
 0x75b   :  { %12123 = vmatprep.subr.bf16.mxu0 %v14423_v1  ;;  %12256 = vmatmul.mubr.bf16.vlgmr.msra.gmra.mrb[40].mxu1 %v17076_v61 }
 0x75c   :  { %12260 = vmatpush3.bf16.msra.mxu1 %v17145_v49  ;;  %12275 = vmatprep.mubr.msk.bf16.mxu1 %vm14424_vm0, %v14423_v1 }
 0x75d   :  { %12261 = vmatprep.subr.bf16.mxu1 %v14423_v1 }
 0x75e   :  { %12124 = vmatpush3.bf16.msra.mxu0 %v17397_v34 }
 0x75f   :  { %12125 = vmatprep.subr.bf16.mxu0 %v14423_v1 }
 0x760   :  { %12262 = vmatpush3.bf16.msra.mxu1 %v17153_v50 }
 0x761   :  { %12263 = vmatprep.subr.bf16.mxu1 %v14423_v1 }
 0x762   :  { %12126 = vmatpush3.bf16.msra.mxu0 %v17409_v36 }
 0x763   :  { %12127 = vmatprep.subr.bf16.mxu0 %v14423_v1 }
 0x764   :  { %12264 = vmatpush3.bf16.msra.mxu1 %v17162_v15 }
 0x765   :  { %12265 = vmatprep.subr.bf16.mxu1 %v14423_v1 }
 0x766   :  { %12128 = vmatpush3.bf16.msra.mxu0 %v17418_v0 }
 0x767   :  { %12129 = vmatprep.subr.bf16.mxu0 %v14423_v1 }
 0x768   :  { %12266 = vmatpush3.bf16.msra.mxu1 %v17169_v51 }
 0x769   :  { %12267 = vmatprep.subr.bf16.mxu1 %v14423_v1 }
 0x76a   :  { %12130 = vmatpush3.bf16.msra.mxu0 %v17427_v18 }
 0x76b   :  { %12131 = vmatprep.subr.bf16.mxu0 %v14423_v1 }
 0x76c   :  { %12268 = vmatpush3.bf16.msra.mxu1 %v17176_v54 }
 0x76d   :  { %12269 = vmatprep.subr.bf16.mxu1 %v14423_v1 }
 0x76e   :  { %12132 = vmatpush3.bf16.msra.mxu0 %v17436_v46 }
 0x76f   :  { %12133 = vmatprep.subr.bf16.mxu0 %v14423_v1 }
 0x770   :  { %12270 = vmatpush3.bf16.msra.mxu1 %v17183_v57 }
 0x771   :  { %12271 = vmatprep.subr.bf16.mxu1 %v14423_v1 }
 0x772   :  { %12134 = vmatpush3.bf16.msra.mxu0 %v17445_v6 }
 0x773   :  { %12139 = vmatprep.subr.bf16.mxu0 %v14423_v1 }
 0x774   :  { %12272 = vmatpush3.bf16.msra.mxu1 %v17193_v19 }
 0x775   :  { %12136 = vmatmul.mubr.bf16.vlgmr.msra.gmra.mrb[40].mxu0 %v17076_v61  ;;  %12273 = vmatprep.subr.bf16.mxu1 %v14423_v1 }
 0x776   :  { %12140 = vmatpush3.bf16.msra.mxu0 %v17454_v8  ;;  %12155 = vmatprep.mubr.msk.bf16.mxu0 %vm14424_vm0, %v14423_v1 }
 0x777   :  { %12141 = vmatprep.subr.bf16.mxu0 %v14423_v1 }
 0x778   :  { %12274 = vmatpush3.bf16.msra.mxu1 %v17201_v53 }
 0x779   :  { %12279 = vmatprep.subr.bf16.mxu1 %v14423_v1 }
 0x77a   :  { %12142 = vmatpush3.bf16.msra.mxu0 %v17464_v9 }
 0x77b   :  { %12143 = vmatprep.subr.bf16.mxu0 %v14423_v1  ;;  %12276 = vmatmul.mubr.bf16.vlgmr.msra.gmra.mrb[40].mxu1 %v17272_v42 }
 0x77c   :  { %12280 = vmatpush3.bf16.msra.mxu1 %v17213_v20  ;;  %12295 = vmatprep.mubr.msk.bf16.mxu1 %vm14424_vm0, %v14423_v1 }
 0x77d   :  { %12281 = vmatprep.subr.bf16.mxu1 %v14423_v1 }
 0x77e   :  { %12144 = vmatpush3.bf16.msra.mxu0 %v17475_v3 }
 0x77f   :  { %12145 = vmatprep.subr.bf16.mxu0 %v14423_v1 }
 0x780   :  { %12282 = vmatpush3.bf16.msra.mxu1 %v17221_v21 }
 0x781   :  { %12283 = vmatprep.subr.bf16.mxu1 %v14423_v1 }
 0x782   :  { %12146 = vmatpush3.bf16.msra.mxu0 %v17487_v48 }
 0x783   :  { %12147 = vmatprep.subr.bf16.mxu0 %v14423_v1 }
 0x784   :  { %12284 = vmatpush3.bf16.msra.mxu1 %v17230_v22 }
 0x785   :  { %12285 = vmatprep.subr.bf16.mxu1 %v14423_v1 }
 0x786   :  { %12148 = vmatpush3.bf16.msra.mxu0 %v17496_v4 }
 0x787   :  { %12149 = vmatprep.subr.bf16.mxu0 %v14423_v1 }
 0x788   :  { %12286 = vmatpush3.bf16.msra.mxu1 %v17237_v23 }
 0x789   :  { %12287 = vmatprep.subr.bf16.mxu1 %v14423_v1 }
 0x78a   :  { %12150 = vmatpush3.bf16.msra.mxu0 %v17505_v39 }
 0x78b   :  { %12151 = vmatprep.subr.bf16.mxu0 %v14423_v1 }
 0x78c   :  { %12288 = vmatpush3.bf16.msra.mxu1 %v17244_v37 }
 0x78d   :  { %12289 = vmatprep.subr.bf16.mxu1 %v14423_v1 }
 0x78e   :  { %12152 = vmatpush3.bf16.msra.mxu0 %v17514_v11 }
 0x78f   :  { %12153 = vmatprep.subr.bf16.mxu0 %v14423_v1 }
 0x790   :  { %12290 = vmatpush3.bf16.msra.mxu1 %v17251_v38 }
 0x791   :  { %12291 = vmatprep.subr.bf16.mxu1 %v14423_v1 }
 0x792   :  { %12154 = vmatpush3.bf16.msra.mxu0 %v17523_v24 }
 0x793   :  { %12159 = vmatprep.subr.bf16.mxu0 %v14423_v1 }
 0x794   :  { %12292 = vmatpush3.bf16.msra.mxu1 %v17258_v43 }
 0x795   :  { %12156 = vmatmul.mubr.bf16.vlgmr.msra.gmra.mrb[40].mxu0 %v17140_v47  ;;  %12293 = vmatprep.subr.bf16.mxu1 %v14423_v1  ;;  %v17553_v47 = vld [vmem:[%s19451_s1 + $0x1d0] sm:$0xff]  }
 0x796   :  { %12160 = vmatpush3.bf16.msra.mxu0 %v17532_v25  ;;  %12175 = vmatprep.mubr.msk.bf16.mxu0 %vm14424_vm0, %v14423_v1 }
 0x797   :  { %12161 = vmatprep.subr.bf16.mxu0 %v14423_v1 }
 0x798   :  { %12294 = vmatpush3.bf16.msra.mxu1 %v17265_v44 }
 0x799   :  { %12299 = vmatprep.subr.bf16.mxu1 %v14423_v1 }
 0x79a   :  { %12162 = vmatpush3.bf16.msra.mxu0 %v17542_v30  ;;  %v17565_v30 = vld [vmem:[%s19451_s1 + $0x1d8] sm:$0xff]  }
 0x79b   :  { %12163 = vmatprep.subr.bf16.mxu0 %v14423_v1  ;;  %12296 = vmatmul.mubr.bf16.vlgmr.msra.gmra.mrb[40].mxu1 %v17334_v52  ;;  %19646 = vst [vmem:[#allocation12_spill] sm:$0xff] %v17565_v30 }
 0x79c   :  { %12300 = vmatpush3.bf16.msra.mxu1 %v17277_v55  ;;  %12315 = vmatprep.mubr.msk.bf16.mxu1 %vm14424_vm0, %v14423_v1  ;;  %v17574_v55 = vld [vmem:[%s19451_s1 + $0x1e0] sm:$0xff]  }
 0x79d   :  { %12301 = vmatprep.subr.bf16.mxu1 %v14423_v1  ;;  %19647 = vst [vmem:[#allocation13_spill] sm:$0xff] %v17574_v55 }
 0x79e   :  { %12164 = vmatpush3.bf16.msra.mxu0 %v17553_v47 }
 0x79f   :  { %12165 = vmatprep.subr.bf16.mxu0 %v14423_v1 }
 0x7a0   :  { %12302 = vmatpush3.bf16.msra.mxu1 %v17285_v56  ;;  %v17583_v56 = vld [vmem:[%s19451_s1 + $0x1e8] sm:$0xff]  }
 0x7a1   :  { %12303 = vmatprep.subr.bf16.mxu1 %v14423_v1  ;;  %19648 = vst [vmem:[#allocation14_spill] sm:$0xff] %v17583_v56 }
 0x7a2   :  { %12166 = vmatpush3.bf16.msra.mxu0 %v17565_v30 }
 0x7a3   :  { %12167 = vmatprep.subr.bf16.mxu0 %v14423_v1 }
 0x7a4   :  { %12304 = vmatpush3.bf16.msra.mxu1 %v17294_v58  ;;  %v17592_v58 = vld [vmem:[%s19451_s1 + $0x1f0] sm:$0xff]  }
 0x7a5   :  { %12305 = vmatprep.subr.bf16.mxu1 %v14423_v1  ;;  %19649 = vst [vmem:[#allocation15_spill] sm:$0xff] %v17592_v58 }
 0x7a6   :  { %12168 = vmatpush3.bf16.msra.mxu0 %v17574_v55  ;;  %v9350_v55 = vcombine.low %v17076_v61, %v17076_v61 }
 0x7a7   :  { %12169 = vmatprep.subr.bf16.mxu0 %v14423_v1 }
 0x7a8   :  { %12306 = vmatpush3.bf16.msra.mxu1 %v17301_v62  ;;  %v5839_v62 = vshll.u32 %v9350_v55, 16 }
 0x7a9   :  { %12307 = vmatprep.subr.bf16.mxu1 %v14423_v1 }
 0x7aa   :  { %12170 = vmatpush3.bf16.msra.mxu0 %v17583_v56  ;;  %v17603_v56 = vld [vmem:[%s19451_s1 + $0x1f8] sm:$0xff]   ;;  %v5841_v30 = vrot.slane %v5839_v62, 1  ;;  %v17635_v62 = vld [vmem:[%s19451_s1 + $0x210] sm:$0xff]  }
 0x7ab   :  { %12171 = vmatprep.subr.bf16.mxu0 %v14423_v1  ;;  %19650 = vst [vmem:[#allocation16_spill] sm:$0xff] %v17603_v56 }
 0x7ac   :  { %12308 = vmatpush3.bf16.msra.mxu1 %v17308_v45  ;;  %v17612_v45 = vld [vmem:[%s19451_s1 + $0x200] sm:$0xff]  }
 0x7ad   :  { %12309 = vmatprep.subr.bf16.mxu1 %v14423_v1 }
 0x7ae   :  { %12172 = vmatpush3.bf16.msra.mxu0 %v17592_v58  ;;  %v5837_v58 = vshrl.u32 %v9350_v55, 16 }
 0x7af   :  { %12173 = vmatprep.subr.bf16.mxu0 %v14423_v1 }
 0x7b0   :  { %12310 = vmatpush3.bf16.msra.mxu1 %v17317_v5  ;;  %v17626_v55 = vor.u32 %v5841_v30, %v5837_v58  ;;  %v17647_v58 = vld [vmem:[%s19451_s1 + $0x218] sm:$0xff]  }
 0x7b1   :  { %12311 = vmatprep.subr.bf16.mxu1 %v14423_v1 }
 0x7b2   :  { %12174 = vmatpush3.bf16.msra.mxu0 %v17603_v56  ;;  %v17622_v56 = vld [vmem:[%s19451_s1 + $0x208] sm:$0xff]  }
 0x7b3   :  { %12179 = vmatprep.subr.bf16.mxu0 %v14423_v1 }
 0x7b4   :  { %12312 = vmatpush3.bf16.msra.mxu1 %v17324_v7 }
 0x7b5   :  { %12176 = vmatmul.mubr.bf16.vlgmr.msra.gmra.mrb[40].mxu0 %v17208_v2  ;;  %12313 = vmatprep.subr.bf16.mxu1 %v14423_v1 }
 0x7b6   :  { %12180 = vmatpush3.bf16.msra.mxu0 %v17612_v45  ;;  %12195 = vmatprep.mubr.msk.bf16.mxu0 %vm14424_vm0, %v14423_v1 }
 0x7b7   :  { %12181 = vmatprep.subr.bf16.mxu0 %v14423_v1 }
 0x7b8   :  { %12314 = vmatpush3.bf16.msra.mxu1 %v17331_v10 }
 0x7b9   :  { %12419 = vmatprep.subr.bf16.mxu1 %v14423_v1 }
 0x7ba   :  { %12182 = vmatpush3.bf16.msra.mxu0 %v17622_v56 }
 0x7bb   :  { %12183 = vmatprep.subr.bf16.mxu0 %v14423_v1  ;;  %12316 = vmatmul.mubr.bf16.vlgmr.msra.gmra.mrb[40].mxu1 %v17626_v55 }
 0x7bc   :  { %12420 = vmatpush3.bf16.msra.mxu1 %v16991_v12  ;;  %12435 = vmatprep.mubr.msk.bf16.mxu1 %vm14424_vm0, %v14423_v1  ;;  %v17656_v12 = vld [vmem:[%s19451_s1 + $0x220] sm:$0xff]  }
 0x7bd   :  { %12421 = vmatprep.subr.bf16.mxu1 %v14423_v1 }
 0x7be   :  { %12184 = vmatpush3.bf16.msra.mxu0 %v17635_v62 }
 0x7bf   :  { %12185 = vmatprep.subr.bf16.mxu0 %v14423_v1 }
 0x7c0   :  { %12422 = vmatpush3.bf16.msra.mxu1 %v17001_v27  ;;  %v17665_v27 = vld [vmem:[%s19451_s1 + $0x228] sm:$0xff]  }
 0x7c1   :  { %12423 = vmatprep.subr.bf16.mxu1 %v14423_v1 }
 0x7c2   :  { %12186 = vmatpush3.bf16.msra.mxu0 %v17647_v58 }
 0x7c3   :  { %12187 = vmatprep.subr.bf16.mxu0 %v14423_v1 }
 0x7c4   :  { %12424 = vmatpush3.bf16.msra.mxu1 %v17014_v29  ;;  %v17674_v29 = vld [vmem:[%s19451_s1 + $0x230] sm:$0xff]  }
 0x7c5   :  { %12425 = vmatprep.subr.bf16.mxu1 %v14423_v1 }
 0x7c6   :  { %12188 = vmatpush3.bf16.msra.mxu0 %v17656_v12 }
 0x7c7   :  { %12189 = vmatprep.subr.bf16.mxu0 %v14423_v1 }
 0x7c8   :  { %12426 = vmatpush3.bf16.msra.mxu1 %v17025_v31  ;;  %v17683_v31 = vld [vmem:[%s19451_s1 + $0x238] sm:$0xff]  }
 0x7c9   :  { %12427 = vmatprep.subr.bf16.mxu1 %v14423_v1 }
 0x7ca   :  { %12190 = vmatpush3.bf16.msra.mxu0 %v17665_v27 }
 0x7cb   :  { %12191 = vmatprep.subr.bf16.mxu0 %v14423_v1 }
 0x7cc   :  { %12428 = vmatpush3.bf16.msra.mxu1 %v17036_v33  ;;  %v17692_v33 = vld [vmem:[%s19451_s1 + $0x240] sm:$0xff]  }
 0x7cd   :  { %12429 = vmatprep.subr.bf16.mxu1 %v14423_v1 }
 0x7ce   :  { %12192 = vmatpush3.bf16.msra.mxu0 %v17674_v29 }
 0x7cf   :  { %12193 = vmatprep.subr.bf16.mxu0 %v14423_v1 }
 0x7d0   :  { %12430 = vmatpush3.bf16.msra.mxu1 %v17047_v35  ;;  %v17702_v35 = vld [vmem:[%s19451_s1 + $0x248] sm:$0xff]  }
 0x7d1   :  { %12431 = vmatprep.subr.bf16.mxu1 %v14423_v1 }
 0x7d2   :  { %12194 = vmatpush3.bf16.msra.mxu0 %v17683_v31 }
 0x7d3   :  { %12199 = vmatprep.subr.bf16.mxu0 %v14423_v1 }
 0x7d4   :  { %12432 = vmatpush3.bf16.msra.mxu1 %v17058_v63  ;;  %v17713_v63 = vld [vmem:[%s19451_s1 + $0x250] sm:$0xff]  }
 0x7d5   :  { %12196 = vmatmul.mubr.bf16.vlgmr.msra.gmra.mrb[40].mxu0 %v17272_v42  ;;  %12433 = vmatprep.subr.bf16.mxu1 %v14423_v1 }
 0x7d6   :  { %12200 = vmatpush3.bf16.msra.mxu0 %v17692_v33  ;;  %12215 = vmatprep.mubr.msk.bf16.mxu0 %vm14424_vm0, %v14423_v1 }
 0x7d7   :  { %12201 = vmatprep.subr.bf16.mxu0 %v14423_v1 }
 0x7d8   :  { %12434 = vmatpush3.bf16.msra.mxu1 %v17069_v60  ;;  %v17725_v60 = vld [vmem:[%s19451_s1 + $0x258] sm:$0xff]  }
 0x7d9   :  { %12439 = vmatprep.subr.bf16.mxu1 %v14423_v1 }
 0x7da   :  { %12202 = vmatpush3.bf16.msra.mxu0 %v17702_v35 }
 0x7db   :  { %12203 = vmatprep.subr.bf16.mxu0 %v14423_v1  ;;  %12436 = vmatmul.mubr.bf16.vlgmr.msra.gmra.mrb[44].mxu1 %v17272_v42 }
 0x7dc   :  { %12440 = vmatpush3.bf16.msra.mxu1 %v17081_v13  ;;  %12455 = vmatprep.mubr.msk.bf16.mxu1 %vm14424_vm0, %v14423_v1  ;;  %v17734_v13 = vld [vmem:[%s19451_s1 + $0x260] sm:$0xff]  }
 0x7dd   :  { %12441 = vmatprep.subr.bf16.mxu1 %v14423_v1  ;;  %19651 = vst [vmem:[#allocation17_spill] sm:$0xff] %v17734_v13 }
 0x7de   :  { %12204 = vmatpush3.bf16.msra.mxu0 %v17713_v63 }
 0x7df   :  { %12205 = vmatprep.subr.bf16.mxu0 %v14423_v1 }
 0x7e0   :  { %12442 = vmatpush3.bf16.msra.mxu1 %v17089_v14  ;;  %v17743_v14 = vld [vmem:[%s19451_s1 + $0x268] sm:$0xff]  }
 0x7e1   :  { %12443 = vmatprep.subr.bf16.mxu1 %v14423_v1  ;;  %19652 = vst [vmem:[#allocation18_spill] sm:$0xff] %v17743_v14 }
 0x7e2   :  { %12206 = vmatpush3.bf16.msra.mxu0 %v17725_v60 }
 0x7e3   :  { %12207 = vmatprep.subr.bf16.mxu0 %v14423_v1 }
 0x7e4   :  { %12444 = vmatpush3.bf16.msra.mxu1 %v17098_v16  ;;  %v17752_v16 = vld [vmem:[%s19451_s1 + $0x270] sm:$0xff]  }
 0x7e5   :  { %12445 = vmatprep.subr.bf16.mxu1 %v14423_v1 }
 0x7e6   :  { %12208 = vmatpush3.bf16.msra.mxu0 %v17734_v13 }
 0x7e7   :  { %12209 = vmatprep.subr.bf16.mxu0 %v14423_v1 }
 0x7e8   :  { %12446 = vmatpush3.bf16.msra.mxu1 %v17105_v17  ;;  %v17761_v17 = vld [vmem:[%s19451_s1 + $0x278] sm:$0xff]  }
 0x7e9   :  { %12447 = vmatprep.subr.bf16.mxu1 %v14423_v1 }
 0x7ea   :  { %12210 = vmatpush3.bf16.msra.mxu0 %v17743_v14 }
 0x7eb   :  { %12211 = vmatprep.subr.bf16.mxu0 %v14423_v1 }
 0x7ec   :  { %12448 = vmatpush3.bf16.msra.mxu1 %v17112_v26 }
 0x7ed   :  { %12449 = vmatprep.subr.bf16.mxu1 %v14423_v1 }
 0x7ee   :  { %12212 = vmatpush3.bf16.msra.mxu0 %v17752_v16  ;;  %v17763_v30 = vpop.f32.mrb[36].mxu1 }
 0x7ef   :  { %12213 = vmatprep.subr.bf16.mxu0 %v14423_v1  ;;  %v12117_v14 = vpop.f32.mrb[37].mxu1 }
 0x7f0   :  { %12450 = vmatpush3.bf16.msra.mxu1 %v17119_v40  ;;  %v5143_v13 = vpop.f32.mrb[38].mxu1  ;;  %v44_v40 = vld [vmem:[%s19460_s10] sm:$0x1]  ;;  %v14309_v14 = vld [vmem:[%s19451_s1 + $0x58] sm:$0xff]  }
 0x7f1   :  { %12451 = vmatprep.subr.bf16.mxu1 %v14423_v1  ;;  %v12118_v26 = vpop.f32.mrb[39].mxu1 }
 0x7f2   :  { %12214 = vmatpush3.bf16.msra.mxu0 %v17761_v17  ;;  %v14310_v26 = vld [vmem:[%s19451_s1 + $0x60] sm:$0xff]  }
 0x7f3   :  { %12319 = vmatprep.subr.bf16.mxu0 %v14423_v1 }
 0x7f4   :  { %12452 = vmatpush3.bf16.msra.mxu1 %v17126_v41 }
 0x7f5   :  { %12216 = vmatmul.mubr.bf16.vlgmr.msra.gmra.mrb[40].mxu0 %v17334_v52  ;;  %12453 = vmatprep.subr.bf16.mxu1 %v14423_v1 }
 0x7f6   :  { %12320 = vmatpush3.bf16.msra.mxu0 %v17378_v28  ;;  %12335 = vmatprep.mubr.msk.bf16.mxu0 %vm14424_vm0, %v14423_v1 }
 0x7f7   :  { %12321 = vmatprep.subr.bf16.mxu0 %v14423_v1 }
 0x7f8   :  { %12454 = vmatpush3.bf16.msra.mxu1 %v17133_v59 }
 0x7f9   :  { %12459 = vmatprep.subr.bf16.mxu1 %v14423_v1 }
 0x7fa   :  { %12322 = vmatpush3.bf16.msra.mxu0 %v17386_v32 }
 0x7fb   :  { %12323 = vmatprep.subr.bf16.mxu0 %v14423_v1  ;;  %12456 = vmatmul.mubr.bf16.vlgmr.msra.gmra.mrb[44].mxu1 %v17208_v2 }
 0x7fc   :  { %12460 = vmatpush3.bf16.msra.mxu1 %v17145_v49  ;;  %12475 = vmatprep.mubr.msk.bf16.mxu1 %vm14424_vm0, %v14423_v1 }
 0x7fd   :  { %12461 = vmatprep.subr.bf16.mxu1 %v14423_v1 }
 0x7fe   :  { %12324 = vmatpush3.bf16.msra.mxu0 %v17397_v34 }
 0x7ff   :  { %12325 = vmatprep.subr.bf16.mxu0 %v14423_v1 }
 0x800   :  { %12462 = vmatpush3.bf16.msra.mxu1 %v17153_v50 }
 0x801   :  { %12463 = vmatprep.subr.bf16.mxu1 %v14423_v1 }
 0x802   :  { %12326 = vmatpush3.bf16.msra.mxu0 %v17409_v36 }
 0x803   :  { %12327 = vmatprep.subr.bf16.mxu0 %v14423_v1 }
 0x804   :  { %12464 = vmatpush3.bf16.msra.mxu1 %v17162_v15 }
 0x805   :  { %12465 = vmatprep.subr.bf16.mxu1 %v14423_v1 }
 0x806   :  { %12328 = vmatpush3.bf16.msra.mxu0 %v17418_v0 }
 0x807   :  { %12329 = vmatprep.subr.bf16.mxu0 %v14423_v1 }
 0x808   :  { %12466 = vmatpush3.bf16.msra.mxu1 %v17169_v51  ;;  %v19653_v51 = vld [vmem:[#allocation11_spill] sm:$0xff] }
 0x809   :  { %12467 = vmatprep.subr.bf16.mxu1 %v14423_v1 }
 0x80a   :  { %12330 = vmatpush3.bf16.msra.mxu0 %v17427_v18 }
 0x80b   :  { %12331 = vmatprep.subr.bf16.mxu0 %v14423_v1 }
 0x80c   :  { %12468 = vmatpush3.bf16.msra.mxu1 %v17176_v54  ;;  %v19655_v54 = vld [vmem:[#allocation7_spill] sm:$0xff] }
 0x80d   :  { %12469 = vmatprep.subr.bf16.mxu1 %v14423_v1 }
 0x80e   :  { %12332 = vmatpush3.bf16.msra.mxu0 %v17436_v46 }
 0x80f   :  { %12333 = vmatprep.subr.bf16.mxu0 %v14423_v1 }
 0x810   :  { %12470 = vmatpush3.bf16.msra.mxu1 %v17183_v57  ;;  %v19656_v57 = vld [vmem:[#allocation12_spill] sm:$0xff] }
 0x811   :  { %12471 = vmatprep.subr.bf16.mxu1 %v14423_v1 }
 0x812   :  { %12334 = vmatpush3.bf16.msra.mxu0 %v17445_v6 }
 0x813   :  { %12339 = vmatprep.subr.bf16.mxu0 %v14423_v1 }
 0x814   :  { %12472 = vmatpush3.bf16.msra.mxu1 %v17193_v19  ;;  %v19657_v19 = vld [vmem:[#allocation8_spill] sm:$0xff] }
 0x815   :  { %12336 = vmatmul.mubr.bf16.vlgmr.msra.gmra.mrb[44].mxu0 %v17208_v2  ;;  %12473 = vmatprep.subr.bf16.mxu1 %v14423_v1 }
 0x816   :  { %12340 = vmatpush3.bf16.msra.mxu0 %v17454_v8  ;;  %12355 = vmatprep.mubr.msk.bf16.mxu0 %vm14424_vm0, %v14423_v1 }
 0x817   :  { %12341 = vmatprep.subr.bf16.mxu0 %v14423_v1 }
 0x818   :  { %12474 = vmatpush3.bf16.msra.mxu1 %v17201_v53  ;;  %v19658_v53 = vld [vmem:[#allocation13_spill] sm:$0xff] }
 0x819   :  { %12479 = vmatprep.subr.bf16.mxu1 %v14423_v1 }
 0x81a   :  { %12342 = vmatpush3.bf16.msra.mxu0 %v17464_v9 }
 0x81b   :  { %12343 = vmatprep.subr.bf16.mxu0 %v14423_v1  ;;  %12476 = vmatmul.mubr.bf16.vlgmr.msra.gmra.mrb[44].mxu1 %v17334_v52 }
 0x81c   :  { %12480 = vmatpush3.bf16.msra.mxu1 %v17213_v20  ;;  %12495 = vmatprep.mubr.msk.bf16.mxu1 %vm14424_vm0, %v14423_v1  ;;  %v19659_v20 = vld [vmem:[#allocation9_spill] sm:$0xff] }
 0x81d   :  { %12481 = vmatprep.subr.bf16.mxu1 %v14423_v1 }
 0x81e   :  { %12344 = vmatpush3.bf16.msra.mxu0 %v17475_v3 }
 0x81f   :  { %12345 = vmatprep.subr.bf16.mxu0 %v14423_v1 }
 0x820   :  { %12482 = vmatpush3.bf16.msra.mxu1 %v17221_v21  ;;  %v19660_v21 = vld [vmem:[#allocation14_spill] sm:$0xff] }
 0x821   :  { %12483 = vmatprep.subr.bf16.mxu1 %v14423_v1 }
 0x822   :  { %12346 = vmatpush3.bf16.msra.mxu0 %v17487_v48 }
 0x823   :  { %12347 = vmatprep.subr.bf16.mxu0 %v14423_v1 }
 0x824   :  { %12484 = vmatpush3.bf16.msra.mxu1 %v17230_v22  ;;  %v9351_v22 = vcombine.low %v17208_v2, %v17208_v2 }
 0x825   :  { %12485 = vmatprep.subr.bf16.mxu1 %v14423_v1 }
 0x826   :  { %12348 = vmatpush3.bf16.msra.mxu0 %v17496_v4 }
 0x827   :  { %12349 = vmatprep.subr.bf16.mxu0 %v14423_v1 }
 0x828   :  { %v4602_v41 = vpop.f32.mrb[36].mxu0  ;;  %12486 = vmatpush3.bf16.msra.mxu1 %v17237_v23  ;;  %v19661_v23 = vld [vmem:[#allocation10_spill] sm:$0xff] }
 0x829   :  { %v4603_v59 = vadd.f32 %v4602_v41, %v44_v40  ;;  %v12017_v49 = vpop.f32.mrb[37].mxu0  ;;  %12487 = vmatprep.subr.bf16.mxu1 %v14423_v1  ;;  %v14311_v40 = vld [vmem:[%s19451_s1 + $0x68] sm:$0xff]   ;;  %v14312_v41 = vld [vmem:[%s19451_s1 + $0x70] sm:$0xff]  }
 0x82a   :  { %12350 = vmatpush3.bf16.msra.mxu0 %v17505_v39  ;;  %v4605_v50 = vpop.f32.mrb[38].mxu0  ;;  %v14314_v49 = vld [vmem:[%s19451_s1] sm:$0xff]  }
 0x82b   :  { %4608 = vst [vmem:[#allocation2] sm:$0x1] %v4603_v59  ;;  %v12018_v15 = vpop.f32.mrb[39].mxu0  ;;  %12351 = vmatprep.subr.bf16.mxu0 %v14423_v1  ;;  %v14313_v59 = vld [vmem:[%s19451_s1 + $0x78] sm:$0xff]   ;;  %v14315_v50 = vld [vmem:[%s19451_s1 + $0x8] sm:$0xff]  }
 0x82c   :  { %12488 = vmatpush3.bf16.msra.mxu1 %v17244_v37  ;;  %v19662_v37 = vld [vmem:[#allocation15_spill] sm:$0xff] }
 0x82d   :  { %12489 = vmatprep.subr.bf16.mxu1 %v14423_v1  ;;  %v14316_v15 = vld [vmem:[%s19451_s1 + $0x10] sm:$0xff]  }
 0x82e   :  { %12352 = vmatpush3.bf16.msra.mxu0 %v17514_v11 }
 0x82f   :  { %12353 = vmatprep.subr.bf16.mxu0 %v14423_v1 }
 0x830   :  { %12490 = vmatpush3.bf16.msra.mxu1 %v17251_v38  ;;  %v6261_v38 = vshll.u32 %v9351_v22, 16 }
 0x831   :  { %12491 = vmatprep.subr.bf16.mxu1 %v14423_v1 }
 0x832   :  { %12354 = vmatpush3.bf16.msra.mxu0 %v17523_v24  ;;  %v6263_v13 = vrot.slane %v6261_v38, 1  ;;  %v14319_v38 = vld [vmem:[%s19451_s1 + $0x28] sm:$0xff]  }
 0x833   :  { %12359 = vmatprep.subr.bf16.mxu0 %v14423_v1 }
 0x834   :  { %12492 = vmatpush3.bf16.msra.mxu1 %v17258_v43  ;;  %v19663_v43 = vld [vmem:[#allocation16_spill] sm:$0xff] }
 0x835   :  { %12356 = vmatmul.mubr.bf16.vlgmr.msra.gmra.mrb[44].mxu0 %v17076_v61  ;;  %12493 = vmatprep.subr.bf16.mxu1 %v14423_v1  ;;  %v19654_v61 = vld [vmem:[#allocation6_spill] sm:$0xff] }
 0x836   :  { %12360 = vmatpush3.bf16.msra.mxu0 %v17532_v25  ;;  %12375 = vmatprep.mubr.msk.bf16.mxu0 %vm14424_vm0, %v14423_v1 }
 0x837   :  { %12361 = vmatprep.subr.bf16.mxu0 %v14423_v1 }
 0x838   :  { %12494 = vmatpush3.bf16.msra.mxu1 %v17265_v44  ;;  %v6259_v44 = vshrl.u32 %v9351_v22, 16 }
 0x839   :  { %12499 = vmatprep.subr.bf16.mxu1 %v14423_v1 }
 0x83a   :  { %12362 = vmatpush3.bf16.msra.mxu0 %v19653_v51  ;;  %v17896_v2 = vor.u32 %v6263_v13, %v6259_v44 }
 0x83b   :  { %12363 = vmatprep.subr.bf16.mxu0 %v14423_v1  ;;  %12496 = vmatmul.mubr.bf16.vlgmr.msra.gmra.mrb[44].mxu1 %v17626_v55 }
 0x83c   :  { %12500 = vmatpush3.bf16.msra.mxu1 %v19654_v61  ;;  %12515 = vmatprep.mubr.msk.bf16.mxu1 %vm14424_vm0, %v14423_v1  ;;  %v19664_v61 = vld [vmem:[#allocation17_spill] sm:$0xff] }
 0x83d   :  { %12501 = vmatprep.subr.bf16.mxu1 %v14423_v1 }
 0x83e   :  { %12364 = vmatpush3.bf16.msra.mxu0 %v17553_v47 }
 0x83f   :  { %12365 = vmatprep.subr.bf16.mxu0 %v14423_v1 }
 0x840   :  { %12502 = vmatpush3.bf16.msra.mxu1 %v19655_v54  ;;  %v14317_v54 = vld [vmem:[%s19451_s1 + $0x18] sm:$0xff]  }
 0x841   :  { %12503 = vmatprep.subr.bf16.mxu1 %v14423_v1 }
 0x842   :  { %12366 = vmatpush3.bf16.msra.mxu0 %v19656_v57 }
 0x843   :  { %12367 = vmatprep.subr.bf16.mxu0 %v14423_v1 }
 0x844   :  { %12504 = vmatpush3.bf16.msra.mxu1 %v19657_v19  ;;  %v19665_v19 = vld [vmem:[#allocation18_spill] sm:$0xff] }
 0x845   :  { %12505 = vmatprep.subr.bf16.mxu1 %v14423_v1 }
 0x846   :  { %12368 = vmatpush3.bf16.msra.mxu0 %v19658_v53 }
 0x847   :  { %12369 = vmatprep.subr.bf16.mxu0 %v14423_v1 }
 0x848   :  { %12506 = vmatpush3.bf16.msra.mxu1 %v19659_v20  ;;  %v14318_v20 = vld [vmem:[%s19451_s1 + $0x20] sm:$0xff]  }
 0x849   :  { %12507 = vmatprep.subr.bf16.mxu1 %v14423_v1 }
 0x84a   :  { %12370 = vmatpush3.bf16.msra.mxu0 %v19660_v21 }
 0x84b   :  { %12371 = vmatprep.subr.bf16.mxu0 %v14423_v1 }
 0x84c   :  { %12508 = vmatpush3.bf16.msra.mxu1 %v19661_v23 }
 0x84d   :  { %12509 = vmatprep.subr.bf16.mxu1 %v14423_v1 }
 0x84e   :  { %12372 = vmatpush3.bf16.msra.mxu0 %v19662_v37 }
 0x84f   :  { %12373 = vmatprep.subr.bf16.mxu0 %v14423_v1 }
 0x850   :  { %12510 = vmatpush3.bf16.msra.mxu1 %v17317_v5  ;;  %v14306_v5 = vld [vmem:[%s19451_s1 + $0x40] sm:$0xff]  }
 0x851   :  { %12511 = vmatprep.subr.bf16.mxu1 %v14423_v1 }
 0x852   :  { %12374 = vmatpush3.bf16.msra.mxu0 %v19663_v43 }
 0x853   :  { %12379 = vmatprep.subr.bf16.mxu0 %v14423_v1 }
 0x854   :  { %12512 = vmatpush3.bf16.msra.mxu1 %v17324_v7  ;;  %v14307_v7 = vld [vmem:[%s19451_s1 + $0x48] sm:$0xff]  }
 0x855   :  { %12376 = vmatmul.mubr.bf16.vlgmr.msra.gmra.mrb[44].mxu0 %v17272_v42  ;;  %12513 = vmatprep.subr.bf16.mxu1 %v14423_v1 }
 0x856   :  { %12380 = vmatpush3.bf16.msra.mxu0 %v17612_v45  ;;  %12395 = vmatprep.mubr.msk.bf16.mxu0 %vm14424_vm0, %v14423_v1 }
 0x857   :  { %12381 = vmatprep.subr.bf16.mxu0 %v14423_v1 }
 0x858   :  { %12514 = vmatpush3.bf16.msra.mxu1 %v17331_v10  ;;  %v14308_v10 = vld [vmem:[%s19451_s1 + $0x50] sm:$0xff]  }
 0x859   :  { %12619 = vmatprep.subr.bf16.mxu1 %v14423_v1 }
 0x85a   :  { %12382 = vmatpush3.bf16.msra.mxu0 %v17622_v56 }
 0x85b   :  { %12383 = vmatprep.subr.bf16.mxu0 %v14423_v1  ;;  %12516 = vmatmul.mubr.bf16.vlgmr.msra.gmra.mrb[44].mxu1 %v17896_v2 }
 0x85c   :  { %12620 = vmatpush3.bf16.msra.mxu1 %v14306_v5  ;;  %12635 = vmatprep.mubr.msk.bf16.mxu1 %vm14424_vm0, %v14423_v1  ;;  %v14320_v5 = vld [vmem:[%s19451_s1 + $0x30] sm:$0xff]  }
 0x85d   :  { %12621 = vmatprep.subr.bf16.mxu1 %v14423_v1 }
 0x85e   :  { %12384 = vmatpush3.bf16.msra.mxu0 %v17635_v62 }
 0x85f   :  { %12385 = vmatprep.subr.bf16.mxu0 %v14423_v1 }
 0x860   :  { %12622 = vmatpush3.bf16.msra.mxu1 %v14307_v7  ;;  %v14321_v7 = vld [vmem:[%s19451_s1 + $0x38] sm:$0xff]  }
 0x861   :  { %12623 = vmatprep.subr.bf16.mxu1 %v14423_v1 }
 0x862   :  { %12386 = vmatpush3.bf16.msra.mxu0 %v17647_v58 }
 0x863   :  { %12387 = vmatprep.subr.bf16.mxu0 %v14423_v1 }
 0x864   :  { %12624 = vmatpush3.bf16.msra.mxu1 %v14308_v10  ;;  %v14333_v10 = vld [vmem:[%s19451_s1 + $0xd0] sm:$0xff]  }
 0x865   :  { %12625 = vmatprep.subr.bf16.mxu1 %v14423_v1 }
 0x866   :  { %12388 = vmatpush3.bf16.msra.mxu0 %v17656_v12 }
 0x867   :  { %12389 = vmatprep.subr.bf16.mxu0 %v14423_v1 }
 0x868   :  { %12626 = vmatpush3.bf16.msra.mxu1 %v14309_v14  ;;  %v14334_v14 = vld [vmem:[%s19451_s1 + $0xd8] sm:$0xff]  }
 0x869   :  { %12627 = vmatprep.subr.bf16.mxu1 %v14423_v1 }
 0x86a   :  { %12390 = vmatpush3.bf16.msra.mxu0 %v17665_v27 }
 0x86b   :  { %12391 = vmatprep.subr.bf16.mxu0 %v14423_v1 }
 0x86c   :  { %12628 = vmatpush3.bf16.msra.mxu1 %v14310_v26 }
 0x86d   :  { %12629 = vmatprep.subr.bf16.mxu1 %v14423_v1 }
 0x86e   :  { %12392 = vmatpush3.bf16.msra.mxu0 %v17674_v29 }
 0x86f   :  { %12393 = vmatprep.subr.bf16.mxu0 %v14423_v1 }
 0x870   :  { %12630 = vmatpush3.bf16.msra.mxu1 %v14311_v40 }
 0x871   :  { %12631 = vmatprep.subr.bf16.mxu1 %v14423_v1 }
 0x872   :  { %12394 = vmatpush3.bf16.msra.mxu0 %v17683_v31 }
 0x873   :  { %12399 = vmatprep.subr.bf16.mxu0 %v14423_v1 }
 0x874   :  { %12632 = vmatpush3.bf16.msra.mxu1 %v14312_v41 }
 0x875   :  { %12396 = vmatmul.mubr.bf16.vlgmr.msra.gmra.mrb[44].mxu0 %v17334_v52  ;;  %12633 = vmatprep.subr.bf16.mxu1 %v14423_v1 }
 0x876   :  { %12400 = vmatpush3.bf16.msra.mxu0 %v17692_v33  ;;  %12415 = vmatprep.mubr.msk.bf16.mxu0 %vm14424_vm0, %v14423_v1 }
 0x877   :  { %12401 = vmatprep.subr.bf16.mxu0 %v14423_v1 }
 0x878   :  { %12634 = vmatpush3.bf16.msra.mxu1 %v14313_v59  ;;  %v14335_v59 = vld [vmem:[%s19451_s1 + $0xe0] sm:$0xff]  }
 0x879   :  { %12639 = vmatprep.subr.bf16.mxu1 %v14423_v1 }
 0x87a   :  { %12402 = vmatpush3.bf16.msra.mxu0 %v17702_v35 }
 0x87b   :  { %12403 = vmatprep.subr.bf16.mxu0 %v14423_v1  ;;  %12636 = vmatmul.mubr.bf16.vlgmr.msra.gmra.mrb[48].mxu1 %v17334_v52 }
 0x87c   :  { %12640 = vmatpush3.bf16.msra.mxu1 %v14314_v49  ;;  %12655 = vmatprep.mubr.msk.bf16.mxu1 %vm14424_vm0, %v14423_v1  ;;  %v14342_v49 = vld [vmem:[%s19451_s1 + $0x110] sm:$0xff]  }
 0x87d   :  { %12641 = vmatprep.subr.bf16.mxu1 %v14423_v1 }
 0x87e   :  { %12404 = vmatpush3.bf16.msra.mxu0 %v17713_v63 }
 0x87f   :  { %12405 = vmatprep.subr.bf16.mxu0 %v14423_v1 }
 0x880   :  { %12642 = vmatpush3.bf16.msra.mxu1 %v14315_v50 }
 0x881   :  { %12643 = vmatprep.subr.bf16.mxu1 %v14423_v1 }
 0x882   :  { %12406 = vmatpush3.bf16.msra.mxu0 %v17725_v60 }
 0x883   :  { %12407 = vmatprep.subr.bf16.mxu0 %v14423_v1 }
 0x884   :  { %12644 = vmatpush3.bf16.msra.mxu1 %v14316_v15 }
 0x885   :  { %12645 = vmatprep.subr.bf16.mxu1 %v14423_v1 }
 0x886   :  { %12408 = vmatpush3.bf16.msra.mxu0 %v19664_v61 }
 0x887   :  { %12409 = vmatprep.subr.bf16.mxu0 %v14423_v1 }
 0x888   :  { %12646 = vmatpush3.bf16.msra.mxu1 %v14317_v54 }
 0x889   :  { %12647 = vmatprep.subr.bf16.mxu1 %v14423_v1 }
 0x88a   :  { %12410 = vmatpush3.bf16.msra.mxu0 %v19665_v19 }
 0x88b   :  { %12411 = vmatprep.subr.bf16.mxu0 %v14423_v1 }
 0x88c   :  { %12648 = vmatpush3.bf16.msra.mxu1 %v14318_v20  ;;  %v14347_v20 = vld [vmem:[%s19451_s1 + $0x138] sm:$0xff]  }
 0x88d   :  { %12649 = vmatprep.subr.bf16.mxu1 %v14423_v1 }
 0x88e   :  { %12412 = vmatpush3.bf16.msra.mxu0 %v17752_v16  ;;  %v17988_v22 = vpop.f32.mrb[40].mxu1 }
 0x88f   :  { %12413 = vmatprep.subr.bf16.mxu0 %v14423_v1  ;;  %v12317_v23 = vpop.f32.mrb[41].mxu1 }
 0x890   :  { %12650 = vmatpush3.bf16.msra.mxu1 %v14319_v38  ;;  %v5881_v44 = vpop.f32.mrb[42].mxu1  ;;  %v14351_v23 = vld [vmem:[%s19451_s1 + $0x198] sm:$0xff]   ;;  %v14352_v38 = vld [vmem:[%s19451_s1 + $0x1a0] sm:$0xff]  }
 0x891   :  { %12651 = vmatprep.subr.bf16.mxu1 %v14423_v1  ;;  %v12318_v13 = vpop.f32.mrb[43].mxu1  ;;  %v14353_v44 = vld [vmem:[%s19451_s1 + $0x1a8] sm:$0xff]  }
 0x892   :  { %12414 = vmatpush3.bf16.msra.mxu0 %v17761_v17  ;;  %v14354_v13 = vld [vmem:[%s19451_s1 + $0x1b0] sm:$0xff]  }
 0x893   :  { %12519 = vmatprep.subr.bf16.mxu0 %v14423_v1 }
 0x894   :  { %12652 = vmatpush3.bf16.msra.mxu1 %v14320_v5  ;;  %v14355_v5 = vld [vmem:[%s19451_s1 + $0x1b8] sm:$0xff]  }
 0x895   :  { %12416 = vmatmul.mubr.bf16.vlgmr.msra.gmra.mrb[44].mxu0 %v17626_v55  ;;  %12653 = vmatprep.subr.bf16.mxu1 %v14423_v1 }
 0x896   :  { %12520 = vmatpush3.bf16.msra.mxu0 %v17378_v28  ;;  %12535 = vmatprep.mubr.msk.bf16.mxu0 %vm14424_vm0, %v14423_v1  ;;  %v14322_v28 = vld [vmem:[%s19451_s1 + $0x80] sm:$0xff]  }
 0x897   :  { %12521 = vmatprep.subr.bf16.mxu0 %v14423_v1 }
 0x898   :  { %12654 = vmatpush3.bf16.msra.mxu1 %v14321_v7  ;;  %v14356_v7 = vld [vmem:[%s19451_s1 + $0x140] sm:$0xff]  }
 0x899   :  { %12659 = vmatprep.subr.bf16.mxu1 %v14423_v1 }
 0x89a   :  { %12522 = vmatpush3.bf16.msra.mxu0 %v17386_v32  ;;  %v14323_v32 = vld [vmem:[%s19451_s1 + $0x88] sm:$0xff]  }
 0x89b   :  { %12523 = vmatprep.subr.bf16.mxu0 %v14423_v1  ;;  %12656 = vmatmul.mubr.bf16.vlgmr.msra.gmra.mrb[48].mxu1 %v17272_v42  ;;  %v14324_v42 = vld [vmem:[%s19451_s1 + $0x90] sm:$0xff]  }
 0x89c   :  { %12660 = vmatpush3.bf16.msra.mxu1 %v14322_v28  ;;  %12675 = vmatprep.mubr.msk.bf16.mxu1 %vm14424_vm0, %v14423_v1  ;;  %v14357_v28 = vld [vmem:[%s19451_s1 + $0x148] sm:$0xff]  }
 0x89d   :  { %12661 = vmatprep.subr.bf16.mxu1 %v14423_v1 }
 0x89e   :  { %12524 = vmatpush3.bf16.msra.mxu0 %v17397_v34  ;;  %v14325_v34 = vld [vmem:[%s19451_s1 + $0x98] sm:$0xff]  }
 0x89f   :  { %12525 = vmatprep.subr.bf16.mxu0 %v14423_v1 }
 0x8a0   :  { %12662 = vmatpush3.bf16.msra.mxu1 %v14323_v32  ;;  %v14359_v32 = vld [vmem:[%s19451_s1 + $0x158] sm:$0xff]  }
 0x8a1   :  { %12663 = vmatprep.subr.bf16.mxu1 %v14423_v1 }
 0x8a2   :  { %12526 = vmatpush3.bf16.msra.mxu0 %v17409_v36  ;;  %v14326_v36 = vld [vmem:[%s19451_s1 + $0xa0] sm:$0xff]  }
 0x8a3   :  { %12527 = vmatprep.subr.bf16.mxu0 %v14423_v1 }
 0x8a4   :  { %12664 = vmatpush3.bf16.msra.mxu1 %v14324_v42  ;;  %v14360_v42 = vld [vmem:[%s19451_s1 + $0x160] sm:$0xff]  }
 0x8a5   :  { %12665 = vmatprep.subr.bf16.mxu1 %v14423_v1 }
 0x8a6   :  { %12528 = vmatpush3.bf16.msra.mxu0 %v17418_v0  ;;  %v14327_v0 = vld [vmem:[%s19451_s1 + $0xa8] sm:$0xff]  }
 0x8a7   :  { %12529 = vmatprep.subr.bf16.mxu0 %v14423_v1 }
 0x8a8   :  { %12666 = vmatpush3.bf16.msra.mxu1 %v14325_v34 }
 0x8a9   :  { %12667 = vmatprep.subr.bf16.mxu1 %v14423_v1 }
 0x8aa   :  { %12530 = vmatpush3.bf16.msra.mxu0 %v17427_v18  ;;  %v14328_v18 = vld [vmem:[%s19451_s1 + $0xb0] sm:$0xff]  }
 0x8ab   :  { %12531 = vmatprep.subr.bf16.mxu0 %v14423_v1 }
 0x8ac   :  { %12668 = vmatpush3.bf16.msra.mxu1 %v14326_v36 }
 0x8ad   :  { %12669 = vmatprep.subr.bf16.mxu1 %v14423_v1 }
 0x8ae   :  { %12532 = vmatpush3.bf16.msra.mxu0 %v17436_v46  ;;  %v18057_v46 = vld [vmem:[%s19450_s0 + $0x1c] sm:$0xf] }
 0x8af   :  { %12533 = vmatprep.subr.bf16.mxu0 %v14423_v1 }
 0x8b0   :  { %12670 = vmatpush3.bf16.msra.mxu1 %v14327_v0 }
 0x8b1   :  { %12671 = vmatprep.subr.bf16.mxu1 %v14423_v1 }
 0x8b2   :  { %12534 = vmatpush3.bf16.msra.mxu0 %v17445_v6  ;;  %v14330_v6 = vld [vmem:[%s19451_s1 + $0xb8] sm:$0xff]  }
 0x8b3   :  { %12539 = vmatprep.subr.bf16.mxu0 %v14423_v1 }
 0x8b4   :  { %12672 = vmatpush3.bf16.msra.mxu1 %v14328_v18 }
 0x8b5   :  { %12536 = vmatmul.mubr.bf16.vlgmr.msra.gmra.mrb[48].mxu0 %v18057_v46  ;;  %12673 = vmatprep.subr.bf16.mxu1 %v14423_v1 }
 0x8b6   :  { %12540 = vmatpush3.bf16.msra.mxu0 %v17454_v8  ;;  %12555 = vmatprep.mubr.msk.bf16.mxu0 %vm14424_vm0, %v14423_v1  ;;  %v14331_v8 = vld [vmem:[%s19451_s1 + $0xc0] sm:$0xff]  }
 0x8b7   :  { %12541 = vmatprep.subr.bf16.mxu0 %v14423_v1 }
 0x8b8   :  { %12674 = vmatpush3.bf16.msra.mxu1 %v14330_v6  ;;  %v14361_v6 = vld [vmem:[%s19451_s1 + $0x168] sm:$0xff]  }
 0x8b9   :  { %12679 = vmatprep.subr.bf16.mxu1 %v14423_v1 }
 0x8ba   :  { %12542 = vmatpush3.bf16.msra.mxu0 %v17464_v9  ;;  %v14332_v9 = vld [vmem:[%s19451_s1 + $0xc8] sm:$0xff]  }
 0x8bb   :  { %12543 = vmatprep.subr.bf16.mxu0 %v14423_v1  ;;  %12676 = vmatmul.mubr.bf16.vlgmr.msra.gmra.mrb[48].mxu1 %v17626_v55 }
 0x8bc   :  { %12680 = vmatpush3.bf16.msra.mxu1 %v14331_v8  ;;  %12695 = vmatprep.mubr.msk.bf16.mxu1 %vm14424_vm0, %v14423_v1 }
 0x8bd   :  { %12681 = vmatprep.subr.bf16.mxu1 %v14423_v1 }
 0x8be   :  { %12544 = vmatpush3.bf16.msra.mxu0 %v17475_v3 }
 0x8bf   :  { %12545 = vmatprep.subr.bf16.mxu0 %v14423_v1 }
 0x8c0   :  { %12682 = vmatpush3.bf16.msra.mxu1 %v14332_v9  ;;  %v14362_v9 = vld [vmem:[%s19451_s1 + $0x170] sm:$0xff]  }
 0x8c1   :  { %12683 = vmatprep.subr.bf16.mxu1 %v14423_v1 }
 0x8c2   :  { %12546 = vmatpush3.bf16.msra.mxu0 %v17487_v48 }
 0x8c3   :  { %12547 = vmatprep.subr.bf16.mxu0 %v14423_v1 }
 0x8c4   :  { %12684 = vmatpush3.bf16.msra.mxu1 %v14333_v10  ;;  %v14363_v10 = vld [vmem:[%s19451_s1 + $0x178] sm:$0xff]  }
 0x8c5   :  { %12685 = vmatprep.subr.bf16.mxu1 %v14423_v1 }
 0x8c6   :  { %12548 = vmatpush3.bf16.msra.mxu0 %v17496_v4 }
 0x8c7   :  { %12549 = vmatprep.subr.bf16.mxu0 %v14423_v1 }
 0x8c8   :  { %v5663_v3 = vpop.f32.mrb[40].mxu0  ;;  %12686 = vmatpush3.bf16.msra.mxu1 %v14334_v14  ;;  %v14365_v14 = vld [vmem:[%s19451_s1 + $0x1c8] sm:$0xff]  }
 0x8c9   :  { %v5670_v48 = vmax.f32 %v17763_v30, %v5663_v3  ;;  %v12217_v26 = vpop.f32.mrb[41].mxu0  ;;  %12687 = vmatprep.subr.bf16.mxu1 %v14423_v1  ;;  %v14337_v30 = vld [vmem:[%s19451_s1 + $0xf0] sm:$0xff]   ;;  %v14364_v3 = vld [vmem:[%s19451_s1 + $0x1c0] sm:$0xff]  }
 0x8ca   :  { %v5666_v40 = vpop.f32.mrb[42].mxu0  ;;  %12550 = vmatpush3.bf16.msra.mxu0 %v17505_v39  ;;  %v14336_v39 = vld [vmem:[%s19451_s1 + $0xe8] sm:$0xff]   ;;  %v14368_v26 = vld [vmem:[%s19451_s1 + $0x1e0] sm:$0xff]  }
 0x8cb   :  { %v18099_v41 = vmax.f32 %v5670_v48, %v17988_v22  ;;  %v12218_v4 = vpop.f32.mrb[43].mxu0  ;;  %12551 = vmatprep.subr.bf16.mxu0 %v14423_v1  ;;  %v14350_v22 = vld [vmem:[%s19451_s1 + $0x190] sm:$0xff]   ;;  %v14367_v48 = vld [vmem:[%s19451_s1 + $0x1d8] sm:$0xff]   ;;  %v14369_v40 = vld [vmem:[%s19451_s1 + $0x1e8] sm:$0xff]  }
 0x8cc   :  { %12688 = vmatpush3.bf16.msra.mxu1 %v14335_v59  ;;  %v18329_v4 = vld [vmem:[%s19453_s3 + $0x40] sm:$0xff]   ;;  %v18335_v59 = vld [vmem:[%s19453_s3 + $0x48] sm:$0xff]  }
 0x8cd   :  { %12689 = vmatprep.subr.bf16.mxu1 %v14423_v1 }
 0x8ce   :  { %12552 = vmatpush3.bf16.msra.mxu0 %v17514_v11  ;;  %v14338_v11 = vld [vmem:[%s19450_s0 + $0x14] sm:$0xf] }
 0x8cf   :  { %12553 = vmatprep.subr.bf16.mxu0 %v14423_v1 }
 0x8d0   :  { %12690 = vmatpush3.bf16.msra.mxu1 %v14336_v39  ;;  %v14370_v39 = vld [vmem:[%s19451_s1 + $0x1f0] sm:$0xff]  }
 0x8d1   :  { %12691 = vmatprep.subr.bf16.mxu1 %v14423_v1 }
 0x8d2   :  { %12554 = vmatpush3.bf16.msra.mxu0 %v17523_v24  ;;  %v14339_v24 = vld [vmem:[%s19451_s1 + $0xf8] sm:$0xff]  }
 0x8d3   :  { %12559 = vmatprep.subr.bf16.mxu0 %v14423_v1 }
 0x8d4   :  { %12692 = vmatpush3.bf16.msra.mxu1 %v14337_v30  ;;  %v18346_v30 = vld [vmem:[%s19453_s3 + $0x50] sm:$0xff]  }
 0x8d5   :  { %12556 = vmatmul.mubr.bf16.vlgmr.msra.gmra.mrb[48].mxu0 %v14338_v11  ;;  %12693 = vmatprep.subr.bf16.mxu1 %v14423_v1  ;;  %v14371_v11 = vld [vmem:[%s19451_s1 + $0x1f8] sm:$0xff]  }
 0x8d6   :  { %12560 = vmatpush3.bf16.msra.mxu0 %v17532_v25  ;;  %12575 = vmatprep.mubr.msk.bf16.mxu0 %vm14424_vm0, %v14423_v1  ;;  %v14340_v25 = vld [vmem:[%s19451_s1 + $0x100] sm:$0xff]  }
 0x8d7   :  { %12561 = vmatprep.subr.bf16.mxu0 %v14423_v1 }
 0x8d8   :  { %12694 = vmatpush3.bf16.msra.mxu1 %v14339_v24  ;;  %v18358_v24 = vld [vmem:[%s19453_s3 + $0x58] sm:$0xff]  }
 0x8d9   :  { %12699 = vmatprep.subr.bf16.mxu1 %v14423_v1 }
 0x8da   :  { %12562 = vmatpush3.bf16.msra.mxu0 %v19653_v51  ;;  %v14341_v51 = vld [vmem:[%s19451_s1 + $0x108] sm:$0xff]  }
 0x8db   :  { %12563 = vmatprep.subr.bf16.mxu0 %v14423_v1  ;;  %12696 = vmatmul.mubr.bf16.vlgmr.msra.gmra.mrb[48].mxu1 %v17896_v2 }
 0x8dc   :  { %12700 = vmatpush3.bf16.msra.mxu1 %v14340_v25  ;;  %12715 = vmatprep.mubr.msk.bf16.mxu1 %vm14424_vm0, %v14423_v1  ;;  %v14372_v25 = vld [vmem:[%s19451_s1 + $0x200] sm:$0xff]  }
 0x8dd   :  { %12701 = vmatprep.subr.bf16.mxu1 %v14423_v1 }
 0x8de   :  { %12564 = vmatpush3.bf16.msra.mxu0 %v17553_v47  ;;  %v14343_v47 = vld [vmem:[%s19451_s1 + $0x118] sm:$0xff]  }
 0x8df   :  { %12565 = vmatprep.subr.bf16.mxu0 %v14423_v1 }
 0x8e0   :  { %12702 = vmatpush3.bf16.msra.mxu1 %v14341_v51  ;;  %v14373_v51 = vld [vmem:[%s19451_s1 + $0x208] sm:$0xff]  }
 0x8e1   :  { %12703 = vmatprep.subr.bf16.mxu1 %v14423_v1 }
 0x8e2   :  { %12566 = vmatpush3.bf16.msra.mxu0 %v19656_v57  ;;  %v9352_v57 = vcombine.low %v18057_v46, %v18057_v46 }
 0x8e3   :  { %12567 = vmatprep.subr.bf16.mxu0 %v14423_v1 }
 0x8e4   :  { %12704 = vmatpush3.bf16.msra.mxu1 %v14342_v49  ;;  %v6679_v50 = vshll.u32 %v9352_v57, 16  ;;  %v6677_v15 = vshrl.u32 %v9352_v57, 16  ;;  %v18382_v49 = vld [vmem:[%s19453_s3 + $0x68] sm:$0xff]   ;;  %v14375_v57 = vld [vmem:[%s19451_s1 + $0x218] sm:$0xff]  }
 0x8e5   :  { %12705 = vmatprep.subr.bf16.mxu1 %v14423_v1 }
 0x8e6   :  { %12568 = vmatpush3.bf16.msra.mxu0 %v19658_v53  ;;  %v14344_v53 = vld [vmem:[%s19451_s1 + $0x120] sm:$0xff]   ;;  %v6681_v54 = vrot.slane %v6679_v50, 1  ;;  %v14377_v50 = vld [vmem:[%s19451_s1 + $0x228] sm:$0xff]  }
 0x8e7   :  { %12569 = vmatprep.subr.bf16.mxu0 %v14423_v1 }
 0x8e8   :  { %12706 = vmatpush3.bf16.msra.mxu1 %v14343_v47  ;;  %v14374_v47 = vld [vmem:[%s19451_s1 + $0x210] sm:$0xff]  }
 0x8e9   :  { %12707 = vmatprep.subr.bf16.mxu1 %v14423_v1 }
 0x8ea   :  { %12570 = vmatpush3.bf16.msra.mxu0 %v19660_v21  ;;  %v14345_v21 = vld [vmem:[%s19451_s1 + $0x128] sm:$0xff]  }
 0x8eb   :  { %12571 = vmatprep.subr.bf16.mxu0 %v14423_v1 }
 0x8ec   :  { %12708 = vmatpush3.bf16.msra.mxu1 %v14344_v53  ;;  %v14376_v53 = vld [vmem:[%s19451_s1 + $0x220] sm:$0xff]  }
 0x8ed   :  { %12709 = vmatprep.subr.bf16.mxu1 %v14423_v1 }
 0x8ee   :  { %12572 = vmatpush3.bf16.msra.mxu0 %v19662_v37  ;;  %v14346_v37 = vld [vmem:[%s19451_s1 + $0x130] sm:$0xff]  }
 0x8ef   :  { %12573 = vmatprep.subr.bf16.mxu0 %v14423_v1 }
 0x8f0   :  { %12710 = vmatpush3.bf16.msra.mxu1 %v14345_v21 }
 0x8f1   :  { %12711 = vmatprep.subr.bf16.mxu1 %v14423_v1 }
 0x8f2   :  { %12574 = vmatpush3.bf16.msra.mxu0 %v19663_v43  ;;  %v18181_v43 = vor.u32 %v6681_v54, %v6677_v15 }
 0x8f3   :  { %12579 = vmatprep.subr.bf16.mxu0 %v14423_v1 }
 0x8f4   :  { %12712 = vmatpush3.bf16.msra.mxu1 %v14346_v37 }
 0x8f5   :  { %12576 = vmatmul.mubr.bf16.vlgmr.msra.gmra.mrb[48].mxu0 %v17334_v52  ;;  %12713 = vmatprep.subr.bf16.mxu1 %v14423_v1 }
 0x8f6   :  { %12580 = vmatpush3.bf16.msra.mxu0 %v17612_v45  ;;  %12595 = vmatprep.mubr.msk.bf16.mxu0 %vm14424_vm0, %v14423_v1 }
 0x8f7   :  { %12581 = vmatprep.subr.bf16.mxu0 %v14423_v1 }
 0x8f8   :  { %12714 = vmatpush3.bf16.msra.mxu1 %v14347_v20  ;;  %v18475_v20 = vld [vmem:[%s19453_s3 + $0x70] sm:$0xff]  }
 0x8f9   :  { %12819 = vmatprep.subr.bf16.mxu1 %v14423_v1 }
 0x8fa   :  { %12582 = vmatpush3.bf16.msra.mxu0 %v17622_v56 }
 0x8fb   :  { %12583 = vmatprep.subr.bf16.mxu0 %v14423_v1  ;;  %12716 = vmatmul.mubr.bf16.vlgmr.msra.gmra.mrb[48].mxu1 %v18181_v43 }
 0x8fc   :  { %12835 = vmatprep.mubr.msk.bf16.mxu1 %vm14424_vm0, %v14423_v1  ;;  %12820 = vmatpush3.bf16.msra.mxu1 %v18329_v4 }
 0x8fd   :  { %12821 = vmatprep.subr.bf16.mxu1 %v14423_v1 }
 0x8fe   :  { %12584 = vmatpush3.bf16.msra.mxu0 %v17635_v62 }
 0x8ff   :  { %12585 = vmatprep.subr.bf16.mxu0 %v14423_v1 }
 0x900   :  { %12822 = vmatpush3.bf16.msra.mxu1 %v18335_v59 }
 0x901   :  { %12823 = vmatprep.subr.bf16.mxu1 %v14423_v1 }
 0x902   :  { %12586 = vmatpush3.bf16.msra.mxu0 %v17647_v58 }
 0x903   :  { %12587 = vmatprep.subr.bf16.mxu0 %v14423_v1 }
 0x904   :  { %12824 = vmatpush3.bf16.msra.mxu1 %v18346_v30 }
 0x905   :  { %12825 = vmatprep.subr.bf16.mxu1 %v14423_v1 }
 0x906   :  { %12588 = vmatpush3.bf16.msra.mxu0 %v17656_v12  ;;  %v14348_v12 = vld [vmem:[%s19451_s1 + $0x180] sm:$0xff]  }
 0x907   :  { %12589 = vmatprep.subr.bf16.mxu0 %v14423_v1 }
 0x908   :  { %12826 = vmatpush3.bf16.msra.mxu1 %v18358_v24 }
 0x909   :  { %12827 = vmatprep.subr.bf16.mxu1 %v14423_v1 }
 0x90a   :  { %12590 = vmatpush3.bf16.msra.mxu0 %v17665_v27  ;;  %v14349_v27 = vld [vmem:[%s19451_s1 + $0x188] sm:$0xff]  }
 0x90b   :  { %12591 = vmatprep.subr.bf16.mxu0 %v14423_v1 }
 0x90e   :  { %12592 = vmatpush3.bf16.msra.mxu0 %v17674_v29 }
 0x90f   :  { %12593 = vmatprep.subr.bf16.mxu0 %v14423_v1 }
 0x912   :  { %12594 = vmatpush3.bf16.msra.mxu0 %v17683_v31 }
 0x913   :  { %12599 = vmatprep.subr.bf16.mxu0 %v14423_v1 }
 0x915   :  { %12596 = vmatmul.mubr.bf16.vlgmr.msra.gmra.mrb[48].mxu0 %v17626_v55 }
 0x916   :  { %12600 = vmatpush3.bf16.msra.mxu0 %v17692_v33  ;;  %12615 = vmatprep.mubr.msk.bf16.mxu0 %vm14424_vm0, %v14423_v1 }
 0x917   :  { %12601 = vmatprep.subr.bf16.mxu0 %v14423_v1 }
 0x91a   :  { %12602 = vmatpush3.bf16.msra.mxu0 %v17702_v35 }
 0x91b   :  { %12603 = vmatprep.subr.bf16.mxu0 %v14423_v1 }
 0x91e   :  { %12604 = vmatpush3.bf16.msra.mxu0 %v17713_v63 }
 0x91f   :  { %12605 = vmatprep.subr.bf16.mxu0 %v14423_v1 }
 0x922   :  { %12606 = vmatpush3.bf16.msra.mxu0 %v17725_v60 }
 0x923   :  { %12607 = vmatprep.subr.bf16.mxu0 %v14423_v1 }
 0x926   :  { %12608 = vmatpush3.bf16.msra.mxu0 %v19664_v61 }
 0x927   :  { %12609 = vmatprep.subr.bf16.mxu0 %v14423_v1 }
 0x92a   :  { %12610 = vmatpush3.bf16.msra.mxu0 %v19665_v19 }
 0x92b   :  { %12611 = vmatprep.subr.bf16.mxu0 %v14423_v1 }
 0x92e   :  { %12612 = vmatpush3.bf16.msra.mxu0 %v17752_v16  ;;  %v18220_v56 = vpop.f32.mrb[44].mxu1 }
 0x92f   :  { %12613 = vmatprep.subr.bf16.mxu0 %v14423_v1  ;;  %v12517_v45 = vpop.f32.mrb[45].mxu1 }
 0x930   :  { %v6303_v62 = vpop.f32.mrb[46].mxu1  ;;  %v18480_v45 = vld [vmem:[%s19453_s3 + $0x1b0] sm:$0xff]  }
 0x931   :  { %v12518_v58 = vpop.f32.mrb[47].mxu1  ;;  %v18494_v62 = vld [vmem:[%s19453_s3 + $0x1b8] sm:$0xff]  }
 0x932   :  { %12614 = vmatpush3.bf16.msra.mxu0 %v17761_v17 }
 0x933   :  { %12719 = vmatprep.subr.bf16.mxu0 %v14423_v1 }
 0x935   :  { %12616 = vmatmul.mubr.bf16.vlgmr.msra.gmra.mrb[48].mxu0 %v17896_v2 }
 0x936   :  { %12720 = vmatpush3.bf16.msra.mxu0 %v14348_v12  ;;  %12735 = vmatprep.mubr.msk.bf16.mxu0 %vm14424_vm0, %v14423_v1 }
 0x937   :  { %12721 = vmatprep.subr.bf16.mxu0 %v14423_v1 }
 0x93a   :  { %12722 = vmatpush3.bf16.msra.mxu0 %v14349_v27 }
 0x93b   :  { %12723 = vmatprep.subr.bf16.mxu0 %v14423_v1 }
 0x93e   :  { %12724 = vmatpush3.bf16.msra.mxu0 %v14350_v22 }
 0x93f   :  { %12725 = vmatprep.subr.bf16.mxu0 %v14423_v1 }
 0x942   :  { %12726 = vmatpush3.bf16.msra.mxu0 %v14351_v23  ;;  %v14378_v23 = vld [vmem:[%s19452_s2] ss:$0 sm:$0xff] }
 0x943   :  { %12727 = vmatprep.subr.bf16.mxu0 %v14423_v1 }
 0x946   :  { %12728 = vmatpush3.bf16.msra.mxu0 %v14352_v38 }
 0x947   :  { %12729 = vmatprep.subr.bf16.mxu0 %v14423_v1 }
 0x94a   :  { %12730 = vmatpush3.bf16.msra.mxu0 %v14353_v44 }
 0x94b   :  { %12731 = vmatprep.subr.bf16.mxu0 %v14423_v1 }
 0x94e   :  { %12732 = vmatpush3.bf16.msra.mxu0 %v14354_v13 }
 0x94f   :  { %12733 = vmatprep.subr.bf16.mxu0 %v14423_v1 }
 0x952   :  { %12734 = vmatpush3.bf16.msra.mxu0 %v14355_v5  ;;  %v18506_v5 = vld [vmem:[%s19453_s3] sm:$0xff]  }
 0x953   :  { %12739 = vmatprep.subr.bf16.mxu0 %v14423_v1 }
 0x955   :  { %12736 = vmatmul.mubr.bf16.vlgmr.msra.gmra.mrb[52].mxu0 %v17334_v52  ;;  %v14358_v52 = vld [vmem:[%s19451_s1 + $0x150] sm:$0xff]  }
 0x956   :  { %12740 = vmatpush3.bf16.msra.mxu0 %v14356_v7  ;;  %12755 = vmatprep.mubr.msk.bf16.mxu0 %vm14424_vm0, %v14423_v1  ;;  %v18511_v7 = vld [vmem:[%s19453_s3 + $0x140] sm:$0xff]  }
 0x957   :  { %12741 = vmatprep.subr.bf16.mxu0 %v14423_v1 }
 0x95a   :  { %12742 = vmatpush3.bf16.msra.mxu0 %v14357_v28 }
 0x95b   :  { %12743 = vmatprep.subr.bf16.mxu0 %v14423_v1 }
 0x95e   :  { %12744 = vmatpush3.bf16.msra.mxu0 %v14358_v52  ;;  %v18522_v52 = vld [vmem:[%s19453_s3 + $0x8] sm:$0xff]  }
 0x95f   :  { %12745 = vmatprep.subr.bf16.mxu0 %v14423_v1 }
 0x962   :  { %12746 = vmatpush3.bf16.msra.mxu0 %v14359_v32  ;;  %v18527_v32 = vld [vmem:[%s19453_s3 + $0x148] sm:$0xff]  }
 0x963   :  { %12747 = vmatprep.subr.bf16.mxu0 %v14423_v1 }
 0x966   :  { %12748 = vmatpush3.bf16.msra.mxu0 %v14360_v42  ;;  %v18540_v42 = vld [vmem:[%s19453_s3 + $0x10] sm:$0xff]  }
 0x967   :  { %12749 = vmatprep.subr.bf16.mxu0 %v14423_v1 }
 0x968   :  { %v18283_v34 = vpop.f32.mrb[44].mxu0 }
 0x969   :  { %v6089_v36 = vmax.f32 %v18099_v41, %v18283_v34  ;;  %v12417_v0 = vpop.f32.mrb[45].mxu0  ;;  %v18627_v34 = vld [vmem:[%s19453_s3 + $0x80] sm:$0xff]  }
 0x96a   :  { %v6085_v18 = vpop.f32.mrb[46].mxu0  ;;  %12750 = vmatpush3.bf16.msra.mxu0 %v14361_v6  ;;  %v18545_v0 = vld [vmem:[%s19453_s3 + $0x150] sm:$0xff]   ;;  %v18559_v6 = vld [vmem:[%s19453_s3 + $0x158] sm:$0xff]  }
 0x96b   :  { %v12418_v8 = vpop.f32.mrb[47].mxu0  ;;  %12751 = vmatprep.subr.bf16.mxu0 %v14423_v1  ;;  %v18554_v18 = vld [vmem:[%s19453_s3 + $0x18] sm:$0xff]  }
 0x96c   :  { %v18568_v8 = vld [vmem:[%s19453_s3 + $0x20] sm:$0xff]  }
 0x96e   :  { %12752 = vmatpush3.bf16.msra.mxu0 %v14362_v9  ;;  %v18573_v9 = vld [vmem:[%s19453_s3 + $0x160] sm:$0xff]  }
 0x96f   :  { %12753 = vmatprep.subr.bf16.mxu0 %v14423_v1 }
 0x972   :  { %12754 = vmatpush3.bf16.msra.mxu0 %v14363_v10  ;;  %v18582_v10 = vld [vmem:[%s19453_s3 + $0x28] sm:$0xff]  }
 0x973   :  { %12759 = vmatprep.subr.bf16.mxu0 %v14423_v1 }
 0x975   :  { %12756 = vmatmul.mubr.bf16.vlgmr.msra.gmra.mrb[52].mxu0 %v18057_v46  ;;  %v14366_v46 = vld [vmem:[%s19451_s1 + $0x1d0] sm:$0xff]  }
 0x976   :  { %12760 = vmatpush3.bf16.msra.mxu0 %v14364_v3  ;;  %12775 = vmatprep.mubr.msk.bf16.mxu0 %vm14424_vm0, %v14423_v1  ;;  %v18587_v3 = vld [vmem:[%s19453_s3 + $0x168] sm:$0xff]  }
 0x977   :  { %12761 = vmatprep.subr.bf16.mxu0 %v14423_v1 }
 0x97a   :  { %12762 = vmatpush3.bf16.msra.mxu0 %v14365_v14  ;;  %v18596_v14 = vld [vmem:[%s19453_s3 + $0x30] sm:$0xff]  }
 0x97b   :  { %12763 = vmatprep.subr.bf16.mxu0 %v14423_v1 }
 0x97e   :  { %12764 = vmatpush3.bf16.msra.mxu0 %v14366_v46  ;;  %v18601_v46 = vld [vmem:[%s19453_s3 + $0x170] sm:$0xff]  }
 0x97f   :  { %12765 = vmatprep.subr.bf16.mxu0 %v14423_v1 }
 0x982   :  { %12766 = vmatpush3.bf16.msra.mxu0 %v14367_v48  ;;  %v6090_v48 = vadd.f32 %v14378_v23, %v6089_v36  ;;  %v18632_v36 = vld [vmem:[%s19453_s3 + $0x1c0] sm:$0xff]  }
 0x983   :  { %12767 = vmatprep.subr.bf16.mxu0 %v14423_v1 }
 0x984   :  { %v6091_v41 = vmax.f32 %v6090_v48, 0.0  ;;  %v18804_v48 = vld [vmem:[%s19453_s3 + $0x218] sm:$0xff]  }
 0x985   :  { %19669 = vst [vmem:[#allocation22_spill] sm:$0xff] %v18804_v48 }
 0x986   :  { %12768 = vmatpush3.bf16.msra.mxu0 %v14368_v26  ;;  %v18613_v26 = vld [vmem:[%s19453_s3 + $0x38] sm:$0xff]  }
 0x987   :  { %12769 = vmatprep.subr.bf16.mxu0 %v14423_v1 }
 0x98a   :  { %12770 = vmatpush3.bf16.msra.mxu0 %v14369_v40  ;;  %v18618_v40 = vld [vmem:[%s19453_s3 + $0x178] sm:$0xff]  }
 0x98b   :  { %12771 = vmatprep.subr.bf16.mxu0 %v14423_v1 }
 0x98e   :  { %12772 = vmatpush3.bf16.msra.mxu0 %v14370_v39  ;;  %v18634_v39 = vpack.c.bf16 %v6091_v41, %v6091_v41  ;;  %v18813_v41 = vld [vmem:[%s19453_s3 + $0xe0] sm:$0xff]  }
 0x98f   :  { %12773 = vmatprep.subr.bf16.mxu0 %v14423_v1  ;;  %19670 = vst [vmem:[#allocation23_spill] sm:$0xff] %v18813_v41 }
 0x992   :  { %12774 = vmatpush3.bf16.msra.mxu0 %v14371_v11  ;;  %v18645_v11 = vld [vmem:[%s19453_s3 + $0x88] sm:$0xff]  }
 0x993   :  { %12779 = vmatprep.subr.bf16.mxu0 %v14423_v1 }
 0x995   :  { %12776 = vmatmul.mubr.bf16.vlgmr.msra.gmra.mrb[52].mxu0 %v17626_v55  ;;  %v18371_v55 = vld [vmem:[%s19453_s3 + $0x60] sm:$0xff]  }
 0x996   :  { %12780 = vmatpush3.bf16.msra.mxu0 %v14372_v25  ;;  %12795 = vmatprep.mubr.msk.bf16.mxu0 %vm14424_vm0, %v14423_v1  ;;  %v18650_v25 = vld [vmem:[%s19453_s3 + $0x1c8] sm:$0xff]  }
 0x997   :  { %12781 = vmatprep.subr.bf16.mxu0 %v14423_v1  ;;  %12828 = vmatpush3.bf16.msra.mxu1 %v18371_v55 }
 0x998   :  { %12829 = vmatprep.subr.bf16.mxu1 %v14423_v1 }
 0x99a   :  { %12782 = vmatpush3.bf16.msra.mxu0 %v14373_v51  ;;  %v18663_v51 = vld [vmem:[%s19453_s3 + $0x90] sm:$0xff]  }
 0x99b   :  { %12783 = vmatprep.subr.bf16.mxu0 %v14423_v1  ;;  %12830 = vmatpush3.bf16.msra.mxu1 %v18382_v49 }
 0x99c   :  { %12831 = vmatprep.subr.bf16.mxu1 %v14423_v1 }
 0x99e   :  { %12784 = vmatpush3.bf16.msra.mxu0 %v14374_v47  ;;  %v18668_v47 = vld [vmem:[%s19453_s3 + $0x1d0] sm:$0xff]  }
 0x99f   :  { %12785 = vmatprep.subr.bf16.mxu0 %v14423_v1  ;;  %12832 = vmatpush3.bf16.msra.mxu1 %v18475_v20 }
 0x9a0   :  { %12833 = vmatprep.subr.bf16.mxu1 %v14423_v1 }
 0x9a2   :  { %12786 = vmatpush3.bf16.msra.mxu0 %v14375_v57  ;;  %v18677_v57 = vld [vmem:[%s19453_s3 + $0x98] sm:$0xff]  }
 0x9a3   :  { %12787 = vmatprep.subr.bf16.mxu0 %v14423_v1 }
 0x9a6   :  { %12788 = vmatpush3.bf16.msra.mxu0 %v14376_v53  ;;  %v18682_v53 = vld [vmem:[%s19453_s3 + $0x1d8] sm:$0xff]  }
 0x9a7   :  { %12789 = vmatprep.subr.bf16.mxu0 %v14423_v1 }
 0x9aa   :  { %12790 = vmatpush3.bf16.msra.mxu0 %v14377_v50  ;;  %v18691_v50 = vld [vmem:[%s19453_s3 + $0xa0] sm:$0xff]  }
 0x9ab   :  { %12791 = vmatprep.subr.bf16.mxu0 %v14423_v1 }
 0x9ae   :  { %12792 = vmatpush3.bf16.msra.mxu0 %v17674_v29 }
 0x9af   :  { %12793 = vmatprep.subr.bf16.mxu0 %v14423_v1 }
 0x9b2   :  { %12794 = vmatpush3.bf16.msra.mxu0 %v17683_v31 }
 0x9b3   :  { %12799 = vmatprep.subr.bf16.mxu0 %v14423_v1 }
 0x9b5   :  { %12796 = vmatmul.mubr.bf16.vlgmr.msra.gmra.mrb[52].mxu0 %v17896_v2  ;;  %v18459_v2 = vld [vmem:[%s19453_s3 + $0x1a0] sm:$0xff]  }
 0x9b6   :  { %12800 = vmatpush3.bf16.msra.mxu0 %v17692_v33  ;;  %12815 = vmatprep.mubr.msk.bf16.mxu0 %vm14424_vm0, %v14423_v1 }
 0x9b7   :  { %12801 = vmatprep.subr.bf16.mxu0 %v14423_v1 }
 0x9ba   :  { %12802 = vmatpush3.bf16.msra.mxu0 %v17702_v35 }
 0x9bb   :  { %12803 = vmatprep.subr.bf16.mxu0 %v14423_v1 }
 0x9be   :  { %12804 = vmatpush3.bf16.msra.mxu0 %v17713_v63  ;;  %v18428_v63 = vld [vmem:[%s19453_s3 + $0x180] sm:$0xff]  }
 0x9bf   :  { %12805 = vmatprep.subr.bf16.mxu0 %v14423_v1 }
 0x9c2   :  { %12806 = vmatpush3.bf16.msra.mxu0 %v17725_v60  ;;  %v18436_v60 = vld [vmem:[%s19453_s3 + $0x188] sm:$0xff]  }
 0x9c3   :  { %12807 = vmatprep.subr.bf16.mxu0 %v14423_v1 }
 0x9c6   :  { %12808 = vmatpush3.bf16.msra.mxu0 %v19664_v61  ;;  %v18466_v61 = vld [vmem:[%s19453_s3 + $0x1a8] sm:$0xff]  }
 0x9c7   :  { %12809 = vmatprep.subr.bf16.mxu0 %v14423_v1 }
 0x9ca   :  { %12810 = vmatpush3.bf16.msra.mxu0 %v19665_v19 }
 0x9cb   :  { %12811 = vmatprep.subr.bf16.mxu0 %v14423_v1 }
 0x9ce   :  { %12812 = vmatpush3.bf16.msra.mxu0 %v17752_v16  ;;  %v6718_v29 = vpop.f32.mrb[48].mxu1  ;;  %v18445_v16 = vld [vmem:[%s19453_s3 + $0x190] sm:$0xff]  }
 0x9cf   :  { %12813 = vmatprep.subr.bf16.mxu0 %v14423_v1  ;;  %v12717_v31 = vpop.f32.mrb[49].mxu1 }
 0x9d0   :  { %v6721_v33 = vpop.f32.mrb[50].mxu1  ;;  %v18705_v31 = vld [vmem:[%s19453_s3 + $0xa8] sm:$0xff]  }
 0x9d1   :  { %v12718_v35 = vpop.f32.mrb[51].mxu1  ;;  %v18710_v33 = vld [vmem:[%s19453_s3 + $0x1e8] sm:$0xff]  }
 0x9d2   :  { %12814 = vmatpush3.bf16.msra.mxu0 %v17761_v17  ;;  %v18452_v17 = vld [vmem:[%s19453_s3 + $0x198] sm:$0xff]   ;;  %v18719_v35 = vld [vmem:[%s19453_s3 + $0xb0] sm:$0xff]  }
 0x9d3   :  { %12919 = vmatprep.subr.bf16.mxu0 %v14423_v1 }
 0x9d5   :  { %12816 = vmatmul.mubr.bf16.vlgmr.msra.gmra.mrb[52].mxu0 %v18181_v43 }
 0x9d6   :  { %12920 = vmatpush3.bf16.msra.mxu0 %v18428_v63  ;;  %12935 = vmatprep.mubr.msk.bf16.mxu0 %vm14424_vm0, %v14423_v1 }
 0x9d7   :  { %12921 = vmatprep.subr.bf16.mxu0 %v14423_v1 }
 0x9da   :  { %12922 = vmatpush3.bf16.msra.mxu0 %v18436_v60 }
 0x9db   :  { %12923 = vmatprep.subr.bf16.mxu0 %v14423_v1 }
 0x9de   :  { %12924 = vmatpush3.bf16.msra.mxu0 %v18445_v16 }
 0x9df   :  { %12925 = vmatprep.subr.bf16.mxu0 %v14423_v1 }
 0x9e2   :  { %12926 = vmatpush3.bf16.msra.mxu0 %v18452_v17 }
 0x9e3   :  { %12927 = vmatprep.subr.bf16.mxu0 %v14423_v1 }
 0x9e6   :  { %12928 = vmatpush3.bf16.msra.mxu0 %v18459_v2 }
 0x9e7   :  { %12929 = vmatprep.subr.bf16.mxu0 %v14423_v1 }
 0x9ea   :  { %12930 = vmatpush3.bf16.msra.mxu0 %v18466_v61 }
 0x9eb   :  { %12931 = vmatprep.subr.bf16.mxu0 %v14423_v1 }
 0x9ee   :  { %12932 = vmatpush3.bf16.msra.mxu0 %v18480_v45 }
 0x9ef   :  { %12933 = vmatprep.subr.bf16.mxu0 %v14423_v1 }
 0x9f2   :  { %12934 = vmatpush3.bf16.msra.mxu0 %v18494_v62 }
 0x9f3   :  { %12939 = vmatprep.subr.bf16.mxu0 %v14423_v1 }
 0xa08   :  { %v6503_v19 = vpop.f32.mrb[48].mxu0 }
 0xa09   :  { %v6510_v21 = vmax.f32 %v18220_v56, %v6503_v19  ;;  %v12617_v15 = vpop.f32.mrb[49].mxu0  ;;  %v18489_v56 = vld [vmem:[%s19453_s3 + $0x78] sm:$0xff]   ;;  %v18724_v19 = vld [vmem:[%s19453_s3 + $0x1f0] sm:$0xff]  }
 0xa0a   :  { %v6506_v54 = vpop.f32.mrb[50].mxu0  ;;  %12834 = vmatpush3.bf16.msra.mxu1 %v18489_v56  ;;  %v18734_v15 = vld [vmem:[%s19453_s3 + $0xb8] sm:$0xff]  }
 0xa0b   :  { %v6725_v37 = vmax.f32 %v6510_v21, %v6718_v29  ;;  %v12618_v43 = vpop.f32.mrb[51].mxu0  ;;  %12839 = vmatprep.subr.bf16.mxu1 %v14423_v1  ;;  %v18696_v29 = vld [vmem:[%s19453_s3 + $0x1e0] sm:$0xff]   ;;  %v7160_v21 = vshll.u32 %v18634_v39, 16  ;;  %v18739_v54 = vld [vmem:[%s19453_s3 + $0x1f8] sm:$0xff]  }
 0xa0c   :  { %v7158_v43 = vshrl.u32 %v18634_v39, 16 }
 0xaa8   :  { %v6922_v58 = vpop.f32.mrb[52].mxu0 }
 0xaa9   :  { %v6929_v12 = vmax.f32 %v6725_v37, %v6922_v58  ;;  %v12817_v27 = vpop.f32.mrb[53].mxu0  ;;  %v7162_v37 = vrot.slane %v7160_v21, 1  ;;  %v18749_v58 = vld [vmem:[%s19453_s3 + $0xc0] sm:$0xff]  }
 0xaaa   :  { %v6925_v22 = vpop.f32.mrb[54].mxu0  ;;  %v18818_v21 = vld [vmem:[%s19453_s3 + $0x220] sm:$0xff]  }
 0xaab   :  { %v6930_v38 = vadd.f32 %v14378_v23, %v6929_v12  ;;  %v12818_v44 = vpop.f32.mrb[55].mxu0  ;;  %v18754_v12 = vld [vmem:[%s19453_s3 + $0x200] sm:$0xff]   ;;  %v18756_v27 = vor.u32 %v7162_v37, %v7158_v43  ;;  %v18767_v22 = vld [vmem:[%s19453_s3 + $0xc8] sm:$0xff]   ;;  %19671 = vst [vmem:[#allocation24_spill] sm:$0xff] %v18818_v21 }
 0xaac   :  { %v18772_v23 = vld [vmem:[%s19453_s3 + $0x208] sm:$0xff]   ;;  %v18790_v44 = vld [vmem:[%s19453_s3 + $0x210] sm:$0xff]  }
 0xaad   :  { %v6931_v13 = vmax.f32 %v6930_v38, 0.0  ;;  %v18785_v38 = vld [vmem:[%s19453_s3 + $0xd0] sm:$0xff]   ;;  %19667 = vst [vmem:[#allocation20_spill] sm:$0xff] %v18790_v44  ;;  %v18827_v37 = vld [vmem:[%s19453_s3 + $0xe8] sm:$0xff]  }
 0xaae   :  { %19666 = vst [vmem:[#allocation19_spill] sm:$0xff] %v18785_v38  ;;  %19672 = vst [vmem:[#allocation25_spill] sm:$0xff] %v18827_v37  ;;  %v18832_v43 = vld [vmem:[%s19453_s3 + $0x228] sm:$0xff]  }
 0xaaf   :  { %v18513_v28 = vpack.c.bf16 %v6931_v13, %v6931_v13  ;;  %v18799_v13 = vld [vmem:[%s19453_s3 + $0xd8] sm:$0xff]   ;;  %19673 = vst [vmem:[#allocation5_spill] sm:$0xff] %v18832_v43 }
 0xab0   :  { %19668 = vst [vmem:[#allocation21_spill] sm:$0xff] %v18799_v13 }
 0xab1   :  { %12836 = vmatmul.mubr.bf16.vlgmr.msra.gmra.mrb[52].mxu1 %v18513_v28  ;;  %12936 = vmatmul.mubr.bf16.vlgmr.msra.gmra.mrb[56].mxu0 %v18513_v28 }
 0xab2   :  { %12840 = vmatpush3.bf16.msra.mxu1 %v18506_v5  ;;  %12940 = vmatpush3.bf16.msra.mxu0 %v18511_v7 }
 0xab3   :  { %12841 = vmatprep.subr.bf16.mxu1 %v14423_v1  ;;  %12941 = vmatprep.subr.bf16.mxu0 %v14423_v1 }
 0xab4   :  { %12855 = vmatprep.mubr.msk.bf16.mxu1 %vm14424_vm0, %v14423_v1  ;;  %12955 = vmatprep.mubr.msk.bf16.mxu0 %vm14424_vm0, %v14423_v1 }
 0xab6   :  { %12842 = vmatpush3.bf16.msra.mxu1 %v18522_v52  ;;  %12942 = vmatpush3.bf16.msra.mxu0 %v18527_v32 }
 0xab7   :  { %12843 = vmatprep.subr.bf16.mxu1 %v14423_v1  ;;  %12943 = vmatprep.subr.bf16.mxu0 %v14423_v1 }
 0xaba   :  { %12844 = vmatpush3.bf16.msra.mxu1 %v18540_v42  ;;  %12944 = vmatpush3.bf16.msra.mxu0 %v18545_v0 }
 0xabb   :  { %12845 = vmatprep.subr.bf16.mxu1 %v14423_v1  ;;  %12945 = vmatprep.subr.bf16.mxu0 %v14423_v1 }
 0xabe   :  { %12846 = vmatpush3.bf16.msra.mxu1 %v18554_v18  ;;  %12946 = vmatpush3.bf16.msra.mxu0 %v18559_v6 }
 0xabf   :  { %12847 = vmatprep.subr.bf16.mxu1 %v14423_v1  ;;  %12947 = vmatprep.subr.bf16.mxu0 %v14423_v1 }
 0xac2   :  { %12848 = vmatpush3.bf16.msra.mxu1 %v18568_v8  ;;  %12948 = vmatpush3.bf16.msra.mxu0 %v18573_v9 }
 0xac3   :  { %12849 = vmatprep.subr.bf16.mxu1 %v14423_v1  ;;  %12949 = vmatprep.subr.bf16.mxu0 %v14423_v1 }
 0xac6   :  { %12850 = vmatpush3.bf16.msra.mxu1 %v18582_v10  ;;  %12950 = vmatpush3.bf16.msra.mxu0 %v18587_v3 }
 0xac7   :  { %12851 = vmatprep.subr.bf16.mxu1 %v14423_v1  ;;  %12951 = vmatprep.subr.bf16.mxu0 %v14423_v1 }
 0xaca   :  { %12852 = vmatpush3.bf16.msra.mxu1 %v18596_v14  ;;  %12952 = vmatpush3.bf16.msra.mxu0 %v18601_v46 }
 0xacb   :  { %12853 = vmatprep.subr.bf16.mxu1 %v14423_v1  ;;  %12953 = vmatprep.subr.bf16.mxu0 %v14423_v1 }
 0xace   :  { %12854 = vmatpush3.bf16.msra.mxu1 %v18613_v26  ;;  %12954 = vmatpush3.bf16.msra.mxu0 %v18618_v40 }
 0xacf   :  { %12859 = vmatprep.subr.bf16.mxu1 %v14423_v1  ;;  %12959 = vmatprep.subr.bf16.mxu0 %v14423_v1 }
 0xad1   :  { %12856 = vmatmul.mubr.bf16.vlgmr.msra.gmra.mrb[52].mxu1 %v18634_v39  ;;  %12956 = vmatmul.mubr.bf16.vlgmr.msra.gmra.mrb[56].mxu0 %v18634_v39 }
 0xad2   :  { %12860 = vmatpush3.bf16.msra.mxu1 %v18627_v34  ;;  %12960 = vmatpush3.bf16.msra.mxu0 %v18632_v36 }
 0xad3   :  { %12861 = vmatprep.subr.bf16.mxu1 %v14423_v1  ;;  %12961 = vmatprep.subr.bf16.mxu0 %v14423_v1 }
 0xad4   :  { %12875 = vmatprep.mubr.msk.bf16.mxu1 %vm14424_vm0, %v14423_v1  ;;  %12975 = vmatprep.mubr.msk.bf16.mxu0 %vm14424_vm0, %v14423_v1 }
 0xad6   :  { %12862 = vmatpush3.bf16.msra.mxu1 %v18645_v11  ;;  %12962 = vmatpush3.bf16.msra.mxu0 %v18650_v25 }
 0xad7   :  { %12863 = vmatprep.subr.bf16.mxu1 %v14423_v1  ;;  %12963 = vmatprep.subr.bf16.mxu0 %v14423_v1 }
 0xada   :  { %12864 = vmatpush3.bf16.msra.mxu1 %v18663_v51  ;;  %12964 = vmatpush3.bf16.msra.mxu0 %v18668_v47 }
 0xadb   :  { %12865 = vmatprep.subr.bf16.mxu1 %v14423_v1  ;;  %12965 = vmatprep.subr.bf16.mxu0 %v14423_v1 }
 0xade   :  { %12866 = vmatpush3.bf16.msra.mxu1 %v18677_v57  ;;  %12966 = vmatpush3.bf16.msra.mxu0 %v18682_v53 }
 0xadf   :  { %12867 = vmatprep.subr.bf16.mxu1 %v14423_v1  ;;  %12967 = vmatprep.subr.bf16.mxu0 %v14423_v1 }
 0xae2   :  { %12868 = vmatpush3.bf16.msra.mxu1 %v18691_v50  ;;  %12968 = vmatpush3.bf16.msra.mxu0 %v18696_v29 }
 0xae3   :  { %12869 = vmatprep.subr.bf16.mxu1 %v14423_v1  ;;  %12969 = vmatprep.subr.bf16.mxu0 %v14423_v1 }
 0xae6   :  { %12870 = vmatpush3.bf16.msra.mxu1 %v18705_v31  ;;  %12970 = vmatpush3.bf16.msra.mxu0 %v18710_v33 }
 0xae7   :  { %12871 = vmatprep.subr.bf16.mxu1 %v14423_v1  ;;  %12971 = vmatprep.subr.bf16.mxu0 %v14423_v1 }
 0xaea   :  { %12872 = vmatpush3.bf16.msra.mxu1 %v18719_v35  ;;  %12972 = vmatpush3.bf16.msra.mxu0 %v18724_v19 }
 0xaeb   :  { %12873 = vmatprep.subr.bf16.mxu1 %v14423_v1  ;;  %12973 = vmatprep.subr.bf16.mxu0 %v14423_v1 }
 0xaee   :  { %12874 = vmatpush3.bf16.msra.mxu1 %v18734_v15  ;;  %12974 = vmatpush3.bf16.msra.mxu0 %v18739_v54 }
 0xaef   :  { %12879 = vmatprep.subr.bf16.mxu1 %v14423_v1  ;;  %12979 = vmatprep.subr.bf16.mxu0 %v14423_v1 }
 0xaf1   :  { %12876 = vmatmul.mubr.bf16.vlgmr.msra.gmra.mrb[52].mxu1 %v18756_v27  ;;  %12976 = vmatmul.mubr.bf16.vlgmr.msra.gmra.mrb[56].mxu0 %v18756_v27 }
 0xaf2   :  { %12880 = vmatpush3.bf16.msra.mxu1 %v18749_v58  ;;  %12980 = vmatpush3.bf16.msra.mxu0 %v18754_v12 }
 0xaf3   :  { %12881 = vmatprep.subr.bf16.mxu1 %v14423_v1  ;;  %12981 = vmatprep.subr.bf16.mxu0 %v14423_v1 }
 0xaf4   :  { %12895 = vmatprep.mubr.msk.bf16.mxu1 %vm14424_vm0, %v14423_v1  ;;  %12995 = vmatprep.mubr.msk.bf16.mxu0 %vm14424_vm0, %v14423_v1 }
 0xaf6   :  { %12882 = vmatpush3.bf16.msra.mxu1 %v18767_v22  ;;  %12982 = vmatpush3.bf16.msra.mxu0 %v18772_v23 }
 0xaf7   :  { %12883 = vmatprep.subr.bf16.mxu1 %v14423_v1  ;;  %12983 = vmatprep.subr.bf16.mxu0 %v14423_v1 }
 0xafa   :  { %12884 = vmatpush3.bf16.msra.mxu1 %v18785_v38  ;;  %12984 = vmatpush3.bf16.msra.mxu0 %v18790_v44  ;;  %v7271_v44 = vshrl.u32 %v18513_v28, 16 }
 0xafb   :  { %12885 = vmatprep.subr.bf16.mxu1 %v14423_v1  ;;  %12985 = vmatprep.subr.bf16.mxu0 %v14423_v1 }
 0xafe   :  { %12886 = vmatpush3.bf16.msra.mxu1 %v18799_v13  ;;  %12986 = vmatpush3.bf16.msra.mxu0 %v18804_v48  ;;  %v7273_v48 = vshll.u32 %v18513_v28, 16 }
 0xaff   :  { %12887 = vmatprep.subr.bf16.mxu1 %v14423_v1  ;;  %12987 = vmatprep.subr.bf16.mxu0 %v14423_v1 }
 0xb00   :  { %v7275_v13 = vrot.slane %v7273_v48, 1  ;;  %v18889_v48 = vld [vmem:[%s19453_s3 + $0x108] sm:$0xff]  }
 0xb01   :  { %19677 = vst [vmem:[#allocation7_spill] sm:$0xff] %v18889_v48 }
 0xb02   :  { %12888 = vmatpush3.bf16.msra.mxu1 %v18813_v41  ;;  %12988 = vmatpush3.bf16.msra.mxu0 %v18818_v21  ;;  %v18841_v21 = vld [vmem:[%s19453_s3 + $0xf0] sm:$0xff]   ;;  %v18878_v38 = vor.u32 %v7275_v13, %v7271_v44  ;;  %v18894_v44 = vld [vmem:[%s19453_s3 + $0x248] sm:$0xff]  }
 0xb03   :  { %12889 = vmatprep.subr.bf16.mxu1 %v14423_v1  ;;  %12989 = vmatprep.subr.bf16.mxu0 %v14423_v1  ;;  %19674 = vst [vmem:[#allocation26_spill] sm:$0xff] %v18841_v21  ;;  %v18846_v41 = vld [vmem:[%s19453_s3 + $0x230] sm:$0xff]   ;;  %19678 = vst [vmem:[#allocation12_spill] sm:$0xff] %v18894_v44 }
 0xb04   :  { %19675 = vst [vmem:[#allocation11_spill] sm:$0xff] %v18846_v41  ;;  %v18907_v13 = vld [vmem:[%s19453_s3 + $0x110] sm:$0xff]  }
 0xb05   :  { %19679 = vst [vmem:[#allocation8_spill] sm:$0xff] %v18907_v13 }
 0xb06   :  { %12890 = vmatpush3.bf16.msra.mxu1 %v18827_v37  ;;  %12990 = vmatpush3.bf16.msra.mxu0 %v18832_v43  ;;  %v18856_v43 = vld [vmem:[%s19453_s3 + $0xf8] sm:$0xff]  }
 0xb07   :  { %12891 = vmatprep.subr.bf16.mxu1 %v14423_v1  ;;  %12991 = vmatprep.subr.bf16.mxu0 %v14423_v1  ;;  %v18861_v37 = vld [vmem:[%s19453_s3 + $0x238] sm:$0xff]  }
 0xb0a   :  { %12892 = vmatpush3.bf16.msra.mxu1 %v18841_v21  ;;  %12992 = vmatpush3.bf16.msra.mxu0 %v18846_v41  ;;  %v18871_v41 = vld [vmem:[%s19453_s3 + $0x100] sm:$0xff]  }
 0xb0b   :  { %12893 = vmatprep.subr.bf16.mxu1 %v14423_v1  ;;  %12993 = vmatprep.subr.bf16.mxu0 %v14423_v1  ;;  %v18876_v21 = vld [vmem:[%s19453_s3 + $0x240] sm:$0xff]  }
 0xb0c   :  { %19676 = vst [vmem:[#allocation6_spill] sm:$0xff] %v18876_v21 }
 0xb0e   :  { %12894 = vmatpush3.bf16.msra.mxu1 %v18856_v43  ;;  %12994 = vmatpush3.bf16.msra.mxu0 %v18861_v37 }
 0xb0f   :  { %12899 = vmatprep.subr.bf16.mxu1 %v14423_v1  ;;  %12999 = vmatprep.subr.bf16.mxu0 %v14423_v1 }
 0xb11   :  { %12896 = vmatmul.mubr.bf16.vlgmr.msra.gmra.mrb[52].mxu1 %v18878_v38  ;;  %12996 = vmatmul.mubr.bf16.vlgmr.msra.gmra.mrb[56].mxu0 %v18878_v38 }
 0xb12   :  { %12900 = vmatpush3.bf16.msra.mxu1 %v18871_v41  ;;  %13000 = vmatpush3.bf16.msra.mxu0 %v18876_v21  ;;  %v18912_v21 = vld [vmem:[%s19453_s3 + $0x250] sm:$0xff]  }
 0xb13   :  { %12901 = vmatprep.subr.bf16.mxu1 %v14423_v1  ;;  %13001 = vmatprep.subr.bf16.mxu0 %v14423_v1  ;;  %19680 = vst [vmem:[#allocation13_spill] sm:$0xff] %v18912_v21 }
 0xb14   :  { %12915 = vmatprep.mubr.msk.bf16.mxu1 %vm14424_vm0, %v14423_v1  ;;  %13015 = vmatprep.mubr.msk.bf16.mxu0 %vm14424_vm0, %v14423_v1 }
 0xb16   :  { %12902 = vmatpush3.bf16.msra.mxu1 %v18889_v48  ;;  %13002 = vmatpush3.bf16.msra.mxu0 %v18894_v44  ;;  %v18921_v44 = vld [vmem:[%s19453_s3 + $0x118] sm:$0xff]  }
 0xb17   :  { %12903 = vmatprep.subr.bf16.mxu1 %v14423_v1  ;;  %13003 = vmatprep.subr.bf16.mxu0 %v14423_v1  ;;  %19681 = vst [vmem:[#allocation9_spill] sm:$0xff] %v18921_v44  ;;  %v18926_v48 = vld [vmem:[%s19453_s3 + $0x258] sm:$0xff]  }
 0xb18   :  { %19682 = vst [vmem:[#allocation14_spill] sm:$0xff] %v18926_v48 }
 0xb1a   :  { %12904 = vmatpush3.bf16.msra.mxu1 %v18907_v13  ;;  %13004 = vmatpush3.bf16.msra.mxu0 %v18912_v21  ;;  %v18935_v21 = vld [vmem:[%s19453_s3 + $0x120] sm:$0xff]  }
 0xb1b   :  { %12905 = vmatprep.subr.bf16.mxu1 %v14423_v1  ;;  %13005 = vmatprep.subr.bf16.mxu0 %v14423_v1  ;;  %19683 = vst [vmem:[#allocation10_spill] sm:$0xff] %v18935_v21  ;;  %v18940_v13 = vld [vmem:[%s19453_s3 + $0x260] sm:$0xff]  }
 0xb1c   :  { %19684 = vst [vmem:[#allocation15_spill] sm:$0xff] %v18940_v13 }
 0xb1e   :  { %12906 = vmatpush3.bf16.msra.mxu1 %v18921_v44  ;;  %13006 = vmatpush3.bf16.msra.mxu0 %v18926_v48  ;;  %v18949_v48 = vld [vmem:[%s19453_s3 + $0x128] sm:$0xff]  }
 0xb1f   :  { %12907 = vmatprep.subr.bf16.mxu1 %v14423_v1  ;;  %13007 = vmatprep.subr.bf16.mxu0 %v14423_v1  ;;  %19685 = vst [vmem:[#allocation16_spill] sm:$0xff] %v18949_v48  ;;  %v18954_v44 = vld [vmem:[%s19453_s3 + $0x268] sm:$0xff]  }
 0xb20   :  { %19686 = vst [vmem:[#allocation17_spill] sm:$0xff] %v18954_v44 }
 0xb22   :  { %12908 = vmatpush3.bf16.msra.mxu1 %v18935_v21  ;;  %13008 = vmatpush3.bf16.msra.mxu0 %v18940_v13  ;;  %v18963_v13 = vld [vmem:[%s19453_s3 + $0x130] sm:$0xff]  }
 0xb23   :  { %12909 = vmatprep.subr.bf16.mxu1 %v14423_v1  ;;  %13009 = vmatprep.subr.bf16.mxu0 %v14423_v1  ;;  %v18968_v21 = vld [vmem:[%s19453_s3 + $0x270] sm:$0xff]  }
 0xb24   :  { %19687 = vst [vmem:[#allocation18_spill] sm:$0xff] %v18968_v21 }
 0xb26   :  { %12910 = vmatpush3.bf16.msra.mxu1 %v18949_v48  ;;  %13010 = vmatpush3.bf16.msra.mxu0 %v18954_v44  ;;  %v18977_v44 = vld [vmem:[%s19453_s3 + $0x138] sm:$0xff]  }
 0xb27   :  { %12911 = vmatprep.subr.bf16.mxu1 %v14423_v1  ;;  %13011 = vmatprep.subr.bf16.mxu0 %v14423_v1  ;;  %v18982_v48 = vld [vmem:[%s19453_s3 + $0x278] sm:$0xff]  }
 0xb2a   :  { %12912 = vmatpush3.bf16.msra.mxu1 %v18963_v13  ;;  %13012 = vmatpush3.bf16.msra.mxu0 %v18968_v21  ;;  %v18989_v21 = vrot.slane %v18634_v39, 1 }
 0xb2b   :  { %12913 = vmatprep.subr.bf16.mxu1 %v14423_v1  ;;  %13013 = vmatprep.subr.bf16.mxu0 %v14423_v1 }
 0xb2e   :  { %12914 = vmatpush3.bf16.msra.mxu1 %v18977_v44  ;;  %13014 = vmatpush3.bf16.msra.mxu0 %v18982_v48 }
 0xb2f   :  { %13019 = vmatprep.subr.bf16.mxu1 %v14423_v1  ;;  %13119 = vmatprep.subr.bf16.mxu0 %v14423_v1 }
 0xb31   :  { %12916 = vmatmul.mubr.bf16.vlgmr.msra.gmra.mrb[52].mxu1 %v18989_v21  ;;  %13016 = vmatmul.mubr.bf16.vlgmr.msra.gmra.mrb[56].mxu0 %v18989_v21 }
 0xb32   :  { %13020 = vmatpush3.bf16.msra.mxu1 %v18329_v4  ;;  %13120 = vmatpush3.bf16.msra.mxu0 %v18428_v63  ;;  %v19688_v4 = vld [vmem:[#allocation19_spill] sm:$0xff]  ;;  %v19694_v63 = vld [vmem:[#allocation25_spill] sm:$0xff] }
 0xb33   :  { %13021 = vmatprep.subr.bf16.mxu1 %v14423_v1  ;;  %13121 = vmatprep.subr.bf16.mxu0 %v14423_v1 }
 0xb34   :  { %13035 = vmatprep.mubr.msk.bf16.mxu1 %vm14424_vm0, %v14423_v1  ;;  %13135 = vmatprep.mubr.msk.bf16.mxu0 %vm14424_vm0, %v14423_v1 }
 0xb36   :  { %13022 = vmatpush3.bf16.msra.mxu1 %v18335_v59  ;;  %13122 = vmatpush3.bf16.msra.mxu0 %v18436_v60  ;;  %v19689_v59 = vld [vmem:[#allocation20_spill] sm:$0xff]  ;;  %v19695_v60 = vld [vmem:[#allocation5_spill] sm:$0xff] }
 0xb37   :  { %13023 = vmatprep.subr.bf16.mxu1 %v14423_v1  ;;  %13123 = vmatprep.subr.bf16.mxu0 %v14423_v1 }
 0xb3a   :  { %13024 = vmatpush3.bf16.msra.mxu1 %v18346_v30  ;;  %13124 = vmatpush3.bf16.msra.mxu0 %v18445_v16  ;;  %v19690_v30 = vld [vmem:[#allocation21_spill] sm:$0xff]  ;;  %v19696_v16 = vld [vmem:[#allocation26_spill] sm:$0xff] }
 0xb3b   :  { %13025 = vmatprep.subr.bf16.mxu1 %v14423_v1  ;;  %13125 = vmatprep.subr.bf16.mxu0 %v14423_v1 }
 0xb3e   :  { %13026 = vmatpush3.bf16.msra.mxu1 %v18358_v24  ;;  %13126 = vmatpush3.bf16.msra.mxu0 %v18452_v17  ;;  %v19691_v24 = vld [vmem:[#allocation22_spill] sm:$0xff]  ;;  %v19697_v17 = vld [vmem:[#allocation11_spill] sm:$0xff] }
 0xb3f   :  { %13027 = vmatprep.subr.bf16.mxu1 %v14423_v1  ;;  %13127 = vmatprep.subr.bf16.mxu0 %v14423_v1 }
 0xb42   :  { %13028 = vmatpush3.bf16.msra.mxu1 %v18371_v55  ;;  %13128 = vmatpush3.bf16.msra.mxu0 %v18459_v2  ;;  %v19692_v55 = vld [vmem:[#allocation23_spill] sm:$0xff]  ;;  %v19698_v2 = vld [vmem:[#allocation6_spill] sm:$0xff] }
 0xb43   :  { %13029 = vmatprep.subr.bf16.mxu1 %v14423_v1  ;;  %13129 = vmatprep.subr.bf16.mxu0 %v14423_v1 }
 0xb46   :  { %13030 = vmatpush3.bf16.msra.mxu1 %v18382_v49  ;;  %13130 = vmatpush3.bf16.msra.mxu0 %v18466_v61  ;;  %v19693_v49 = vld [vmem:[#allocation24_spill] sm:$0xff]  ;;  %v19699_v61 = vld [vmem:[#allocation7_spill] sm:$0xff] }
 0xb47   :  { %13031 = vmatprep.subr.bf16.mxu1 %v14423_v1  ;;  %13131 = vmatprep.subr.bf16.mxu0 %v14423_v1 }
 0xb4a   :  { %13032 = vmatpush3.bf16.msra.mxu1 %v18475_v20  ;;  %13132 = vmatpush3.bf16.msra.mxu0 %v18480_v45  ;;  %v19700_v20 = vld [vmem:[#allocation12_spill] sm:$0xff] }
 0xb4b   :  { %13033 = vmatprep.subr.bf16.mxu1 %v14423_v1  ;;  %13133 = vmatprep.subr.bf16.mxu0 %v14423_v1  ;;  %v19701_v45 = vld [vmem:[#allocation8_spill] sm:$0xff] }
 0xb4e   :  { %13034 = vmatpush3.bf16.msra.mxu1 %v18489_v56  ;;  %13134 = vmatpush3.bf16.msra.mxu0 %v18494_v62  ;;  %v19702_v56 = vld [vmem:[#allocation13_spill] sm:$0xff] }
 0xb4f   :  { %13039 = vmatprep.subr.bf16.mxu1 %v14423_v1  ;;  %13139 = vmatprep.subr.bf16.mxu0 %v14423_v1  ;;  %v19703_v62 = vld [vmem:[#allocation9_spill] sm:$0xff] }
 0xb51   :  { %13036 = vmatmul.mubr.bf16.vlgmr.msra.gmra.mrb[56].mxu1 %v18756_v27  ;;  %13136 = vmatmul.mubr.bf16.vlgmr.msra.gmra.mrb[60].mxu0 %v18756_v27 }
 0xb52   :  { %13040 = vmatpush3.bf16.msra.mxu1 %v18506_v5  ;;  %13140 = vmatpush3.bf16.msra.mxu0 %v18511_v7  ;;  %v19704_v5 = vld [vmem:[#allocation14_spill] sm:$0xff] }
 0xb53   :  { %13041 = vmatprep.subr.bf16.mxu1 %v14423_v1  ;;  %13141 = vmatprep.subr.bf16.mxu0 %v14423_v1  ;;  %v19705_v7 = vld [vmem:[#allocation10_spill] sm:$0xff] }
 0xb54   :  { %13055 = vmatprep.mubr.msk.bf16.mxu1 %vm14424_vm0, %v14423_v1  ;;  %13155 = vmatprep.mubr.msk.bf16.mxu0 %vm14424_vm0, %v14423_v1 }
 0xb56   :  { %13042 = vmatpush3.bf16.msra.mxu1 %v18522_v52  ;;  %13142 = vmatpush3.bf16.msra.mxu0 %v18527_v32  ;;  %v19706_v52 = vld [vmem:[#allocation15_spill] sm:$0xff]  ;;  %v19707_v32 = vld [vmem:[#allocation16_spill] sm:$0xff] }
 0xb57   :  { %13043 = vmatprep.subr.bf16.mxu1 %v14423_v1  ;;  %13143 = vmatprep.subr.bf16.mxu0 %v14423_v1 }
 0xb5a   :  { %13044 = vmatpush3.bf16.msra.mxu1 %v18540_v42  ;;  %13144 = vmatpush3.bf16.msra.mxu0 %v18545_v0  ;;  %v19708_v42 = vld [vmem:[#allocation17_spill] sm:$0xff]  ;;  %v19709_v0 = vld [vmem:[#allocation18_spill] sm:$0xff] }
 0xb5b   :  { %13045 = vmatprep.subr.bf16.mxu1 %v14423_v1  ;;  %13145 = vmatprep.subr.bf16.mxu0 %v14423_v1 }
 0xb5e   :  { %13046 = vmatpush3.bf16.msra.mxu1 %v18554_v18  ;;  %13146 = vmatpush3.bf16.msra.mxu0 %v18559_v6  ;;  %v14130_v18 = vld [vmem:[%s19455_s5] sm:$0xff]  }
 0xb5f   :  { %13047 = vmatprep.subr.bf16.mxu1 %v14423_v1  ;;  %13147 = vmatprep.subr.bf16.mxu0 %v14423_v1  ;;  %v14131_v6 = vld [vmem:[%s19455_s5 + $0x40] sm:$0xff]  }
 0xb62   :  { %13048 = vmatpush3.bf16.msra.mxu1 %v18568_v8  ;;  %13148 = vmatpush3.bf16.msra.mxu0 %v18573_v9  ;;  %v8162_v8 = vrot.slane %v18513_v28, 1  ;;  %v14132_v9 = vld [vmem:[%s19455_s5 + $0x8] sm:$0xff]  }
 0xb63   :  { %13049 = vmatprep.subr.bf16.mxu1 %v14423_v1  ;;  %13149 = vmatprep.subr.bf16.mxu0 %v14423_v1 }
 0xb66   :  { %13050 = vmatpush3.bf16.msra.mxu1 %v18582_v10  ;;  %13150 = vmatpush3.bf16.msra.mxu0 %v18587_v3  ;;  %v14133_v10 = vld [vmem:[%s19455_s5 + $0x48] sm:$0xff]   ;;  %v14135_v3 = vld [vmem:[%s19455_s5 + $0x50] sm:$0xff]  }
 0xb67   :  { %13051 = vmatprep.subr.bf16.mxu1 %v14423_v1  ;;  %13151 = vmatprep.subr.bf16.mxu0 %v14423_v1 }
 0xb6a   :  { %13052 = vmatpush3.bf16.msra.mxu1 %v18596_v14  ;;  %13152 = vmatpush3.bf16.msra.mxu0 %v18601_v46  ;;  %v14136_v14 = vld [vmem:[%s19455_s5 + $0x18] sm:$0xff]  }
 0xb6b   :  { %13053 = vmatprep.subr.bf16.mxu1 %v14423_v1  ;;  %13153 = vmatprep.subr.bf16.mxu0 %v14423_v1  ;;  %v14137_v46 = vld [vmem:[%s19455_s5 + $0x58] sm:$0xff]  }
 0xb6e   :  { %13054 = vmatpush3.bf16.msra.mxu1 %v18613_v26  ;;  %13154 = vmatpush3.bf16.msra.mxu0 %v18618_v40  ;;  %v14138_v26 = vld [vmem:[%s19455_s5 + $0x20] sm:$0xff]  }
 0xb6f   :  { %13059 = vmatprep.subr.bf16.mxu1 %v14423_v1  ;;  %13159 = vmatprep.subr.bf16.mxu0 %v14423_v1  ;;  %v14139_v40 = vld [vmem:[%s19455_s5 + $0x60] sm:$0xff]  }
 0xb71   :  { %13056 = vmatmul.mubr.bf16.vlgmr.msra.gmra.mrb[56].mxu1 %v18513_v28  ;;  %13156 = vmatmul.mubr.bf16.vlgmr.msra.gmra.mrb[60].mxu0 %v18513_v28  ;;  %v14134_v28 = vld [vmem:[%s19455_s5 + $0x10] sm:$0xff]  }
 0xb72   :  { %13060 = vmatpush3.bf16.msra.mxu1 %v18627_v34  ;;  %13160 = vmatpush3.bf16.msra.mxu0 %v18632_v36  ;;  %v14140_v34 = vld [vmem:[%s19455_s5 + $0x28] sm:$0xff]  }
 0xb73   :  { %13061 = vmatprep.subr.bf16.mxu1 %v14423_v1  ;;  %13161 = vmatprep.subr.bf16.mxu0 %v14423_v1 }
 0xb74   :  { %13075 = vmatprep.mubr.msk.bf16.mxu1 %vm14424_vm0, %v14423_v1  ;;  %13175 = vmatprep.mubr.msk.bf16.mxu0 %vm14424_vm0, %v14423_v1 }
 0xb76   :  { %13062 = vmatpush3.bf16.msra.mxu1 %v18645_v11  ;;  %13162 = vmatpush3.bf16.msra.mxu0 %v18650_v25 }
 0xb77   :  { %13063 = vmatprep.subr.bf16.mxu1 %v14423_v1  ;;  %13163 = vmatprep.subr.bf16.mxu0 %v14423_v1 }
 0xb7a   :  { %13064 = vmatpush3.bf16.msra.mxu1 %v18663_v51  ;;  %13164 = vmatpush3.bf16.msra.mxu0 %v18668_v47 }
 0xb7b   :  { %13065 = vmatprep.subr.bf16.mxu1 %v14423_v1  ;;  %13165 = vmatprep.subr.bf16.mxu0 %v14423_v1 }
 0xb7e   :  { %13066 = vmatpush3.bf16.msra.mxu1 %v18677_v57  ;;  %13166 = vmatpush3.bf16.msra.mxu0 %v18682_v53 }
 0xb7f   :  { %13067 = vmatprep.subr.bf16.mxu1 %v14423_v1  ;;  %13167 = vmatprep.subr.bf16.mxu0 %v14423_v1 }
 0xb82   :  { %13068 = vmatpush3.bf16.msra.mxu1 %v18691_v50  ;;  %13168 = vmatpush3.bf16.msra.mxu0 %v18696_v29  ;;  %v14141_v29 = vld [vmem:[%s19455_s5 + $0x68] sm:$0xff]  }
 0xb83   :  { %13069 = vmatprep.subr.bf16.mxu1 %v14423_v1  ;;  %13169 = vmatprep.subr.bf16.mxu0 %v14423_v1 }
 0xb86   :  { %13070 = vmatpush3.bf16.msra.mxu1 %v18705_v31  ;;  %13170 = vmatpush3.bf16.msra.mxu0 %v18710_v33  ;;  %v14142_v31 = vld [vmem:[%s19455_s5 + $0x30] sm:$0xff]  }
 0xb87   :  { %13071 = vmatprep.subr.bf16.mxu1 %v14423_v1  ;;  %13171 = vmatprep.subr.bf16.mxu0 %v14423_v1  ;;  %v14143_v33 = vld [vmem:[%s19455_s5 + $0x70] sm:$0xff]  }
 0xb8a   :  { %13072 = vmatpush3.bf16.msra.mxu1 %v18719_v35  ;;  %13172 = vmatpush3.bf16.msra.mxu0 %v18724_v19  ;;  %v14144_v35 = vld [vmem:[%s19455_s5 + $0x38] sm:$0xff]  }
 0xb8b   :  { %13073 = vmatprep.subr.bf16.mxu1 %v14423_v1  ;;  %13173 = vmatprep.subr.bf16.mxu0 %v14423_v1  ;;  %v14145_v19 = vld [vmem:[%s19455_s5 + $0x78] sm:$0xff]  }
 0xb8e   :  { %13074 = vmatpush3.bf16.msra.mxu1 %v18734_v15  ;;  %13174 = vmatpush3.bf16.msra.mxu0 %v18739_v54 }
 0xb8f   :  { %13079 = vmatprep.subr.bf16.mxu1 %v14423_v1  ;;  %13179 = vmatprep.subr.bf16.mxu0 %v14423_v1 }
 0xb91   :  { %13076 = vmatmul.mubr.bf16.vlgmr.msra.gmra.mrb[56].mxu1 %v18878_v38  ;;  %13176 = vmatmul.mubr.bf16.vlgmr.msra.gmra.mrb[60].mxu0 %v18878_v38 }
 0xb92   :  { %13080 = vmatpush3.bf16.msra.mxu1 %v18749_v58  ;;  %13180 = vmatpush3.bf16.msra.mxu0 %v18754_v12 }
 0xb93   :  { %13081 = vmatprep.subr.bf16.mxu1 %v14423_v1  ;;  %13181 = vmatprep.subr.bf16.mxu0 %v14423_v1 }
 0xb94   :  { %13095 = vmatprep.mubr.msk.bf16.mxu1 %vm14424_vm0, %v14423_v1  ;;  %13195 = vmatprep.mubr.msk.bf16.mxu0 %vm14424_vm0, %v14423_v1 }
 0xb96   :  { %13082 = vmatpush3.bf16.msra.mxu1 %v18767_v22  ;;  %13182 = vmatpush3.bf16.msra.mxu0 %v18772_v23 }
 0xb97   :  { %13083 = vmatprep.subr.bf16.mxu1 %v14423_v1  ;;  %13183 = vmatprep.subr.bf16.mxu0 %v14423_v1 }
 0xb9a   :  { %13084 = vmatpush3.bf16.msra.mxu1 %v19688_v4  ;;  %13184 = vmatpush3.bf16.msra.mxu0 %v19689_v59  ;;  %v14147_v4 = vld [vmem:[%s19455_s5 + $0x80] sm:$0xff]  }
 0xb9b   :  { %13085 = vmatprep.subr.bf16.mxu1 %v14423_v1  ;;  %13185 = vmatprep.subr.bf16.mxu0 %v14423_v1 }
 0xb9e   :  { %13086 = vmatpush3.bf16.msra.mxu1 %v19690_v30  ;;  %13186 = vmatpush3.bf16.msra.mxu0 %v19691_v24  ;;  %v14148_v30 = vld [vmem:[%s19455_s5 + $0xc8] sm:$0xff]  }
 0xb9f   :  { %13087 = vmatprep.subr.bf16.mxu1 %v14423_v1  ;;  %13187 = vmatprep.subr.bf16.mxu0 %v14423_v1  ;;  %v14149_v24 = vld [vmem:[%s19455_s5 + $0x88] sm:$0xff]  }
 0xba2   :  { %13088 = vmatpush3.bf16.msra.mxu1 %v19692_v55  ;;  %13188 = vmatpush3.bf16.msra.mxu0 %v19693_v49  ;;  %v14150_v55 = vld [vmem:[%s19455_s5 + $0xd0] sm:$0xff]  }
 0xba3   :  { %13089 = vmatprep.subr.bf16.mxu1 %v14423_v1  ;;  %13189 = vmatprep.subr.bf16.mxu0 %v14423_v1  ;;  %v14151_v49 = vld [vmem:[%s19455_s5 + $0x90] sm:$0xff]  }
 0xba6   :  { %13090 = vmatpush3.bf16.msra.mxu1 %v19694_v63  ;;  %13190 = vmatpush3.bf16.msra.mxu0 %v19695_v60  ;;  %v14152_v63 = vld [vmem:[%s19455_s5 + $0xd8] sm:$0xff]  }
 0xba7   :  { %13091 = vmatprep.subr.bf16.mxu1 %v14423_v1  ;;  %13191 = vmatprep.subr.bf16.mxu0 %v14423_v1  ;;  %v14153_v60 = vld [vmem:[%s19455_s5 + $0x98] sm:$0xff]  }
 0xbaa   :  { %13092 = vmatpush3.bf16.msra.mxu1 %v19696_v16  ;;  %13192 = vmatpush3.bf16.msra.mxu0 %v19697_v17  ;;  %v14154_v16 = vld [vmem:[%s19455_s5 + $0xe0] sm:$0xff]  }
 0xbab   :  { %13093 = vmatprep.subr.bf16.mxu1 %v14423_v1  ;;  %13193 = vmatprep.subr.bf16.mxu0 %v14423_v1  ;;  %v14155_v17 = vld [vmem:[%s19455_s5 + $0xa0] sm:$0xff]  }
 0xbae   :  { %13094 = vmatpush3.bf16.msra.mxu1 %v18856_v43  ;;  %13194 = vmatpush3.bf16.msra.mxu0 %v18861_v37  ;;  %v14379_v37 = vld [vmem:[%s19454_s4] ss:$0 sm:$0xff] }
 0xbaf   :  { %13099 = vmatprep.subr.bf16.mxu1 %v14423_v1  ;;  %13199 = vmatprep.subr.bf16.mxu0 %v14423_v1 }
 0xbb1   :  { %13096 = vmatmul.mubr.bf16.vlgmr.msra.gmra.mrb[56].mxu1 %v18989_v21  ;;  %13196 = vmatmul.mubr.bf16.vlgmr.msra.gmra.mrb[60].mxu0 %v18989_v21 }
 0xbb2   :  { %13100 = vmatpush3.bf16.msra.mxu1 %v18871_v41  ;;  %13200 = vmatpush3.bf16.msra.mxu0 %v19698_v2  ;;  %v14156_v2 = vld [vmem:[%s19455_s5 + $0xe8] sm:$0xff]  }
 0xbb3   :  { %13101 = vmatprep.subr.bf16.mxu1 %v14423_v1  ;;  %13201 = vmatprep.subr.bf16.mxu0 %v14423_v1 }
 0xbb4   :  { %13115 = vmatprep.mubr.msk.bf16.mxu1 %vm14424_vm0, %v14423_v1  ;;  %13215 = vmatprep.mubr.msk.bf16.mxu0 %vm14424_vm0, %v14423_v1 }
 0xbb6   :  { %13102 = vmatpush3.bf16.msra.mxu1 %v19699_v61  ;;  %13202 = vmatpush3.bf16.msra.mxu0 %v19700_v20  ;;  %v14157_v61 = vld [vmem:[%s19455_s5 + $0xa8] sm:$0xff]   ;;  %v14158_v20 = vld [vmem:[%s19455_s5 + $0xf0] sm:$0xff]  }
 0xbb7   :  { %13103 = vmatprep.subr.bf16.mxu1 %v14423_v1  ;;  %13203 = vmatprep.subr.bf16.mxu0 %v14423_v1 }
 0xbba   :  { %13104 = vmatpush3.bf16.msra.mxu1 %v19701_v45  ;;  %13204 = vmatpush3.bf16.msra.mxu0 %v19702_v56  ;;  %v14159_v45 = vld [vmem:[%s19455_s5 + $0xb0] sm:$0xff]   ;;  %v14160_v56 = vld [vmem:[%s19455_s5 + $0xf8] sm:$0xff]  }
 0xbbb   :  { %13105 = vmatprep.subr.bf16.mxu1 %v14423_v1  ;;  %13205 = vmatprep.subr.bf16.mxu0 %v14423_v1 }
 0xbbe   :  { %13106 = vmatpush3.bf16.msra.mxu1 %v19703_v62  ;;  %13206 = vmatpush3.bf16.msra.mxu0 %v19704_v5  ;;  %v14161_v62 = vld [vmem:[%s19455_s5 + $0xb8] sm:$0xff]  }
 0xbbf   :  { %13107 = vmatprep.subr.bf16.mxu1 %v14423_v1  ;;  %13207 = vmatprep.subr.bf16.mxu0 %v14423_v1 }
 0xbc2   :  { %13108 = vmatpush3.bf16.msra.mxu1 %v19705_v7  ;;  %13208 = vmatpush3.bf16.msra.mxu0 %v19706_v52  ;;  %v14162_v7 = vld [vmem:[%s19455_s5 + $0x100] sm:$0xff]  }
 0xbc3   :  { %13109 = vmatprep.subr.bf16.mxu1 %v14423_v1  ;;  %13209 = vmatprep.subr.bf16.mxu0 %v14423_v1 }
 0xbc6   :  { %13110 = vmatpush3.bf16.msra.mxu1 %v19707_v32  ;;  %13210 = vmatpush3.bf16.msra.mxu0 %v19708_v42  ;;  %v14380_v32 = vld [vmem:[%s19457_s7] sm:$0xff]   ;;  %v14163_v42 = vld [vmem:[%s19455_s5 + $0x108] sm:$0xff]  }
 0xbc7   :  { %13111 = vmatprep.subr.bf16.mxu1 %v14423_v1  ;;  %13211 = vmatprep.subr.bf16.mxu0 %v14423_v1 }
 0xbca   :  { %13112 = vmatpush3.bf16.msra.mxu1 %v18963_v13  ;;  %13212 = vmatpush3.bf16.msra.mxu0 %v19709_v0  ;;  %v14381_v0 = vld [vmem:[%s19457_s7 + $0x8] sm:$0xff]  }
 0xbcb   :  { %13113 = vmatprep.subr.bf16.mxu1 %v14423_v1  ;;  %13213 = vmatprep.subr.bf16.mxu0 %v14423_v1 }
 0xbce   :  { %13114 = vmatpush3.bf16.msra.mxu1 %v18977_v44  ;;  %13214 = vmatpush3.bf16.msra.mxu0 %v18982_v48  ;;  %v14146_v44 = vld [vmem:[%s19455_s5 + $0xc0] sm:$0xff]  }
 0xbcf   :  { %13239 = vmatprep.subr.bf16.mxu0 %v14423_v1  ;;  %13219 = vmatprep.subr.bf16.mxu1 %v14423_v1 }
 0xbd1   :  { %13116 = vmatmul.mubr.bf16.vlgmr.msra.gmra.mrb[56].mxu1 %v8162_v8  ;;  %13216 = vmatmul.mubr.bf16.vlgmr.msra.gmra.mrb[60].mxu0 %v8162_v8  ;;  %v14165_v8 = vld [vmem:[%s19455_s5 + $0x118] sm:$0xff]  }
 0xbd2   :  { %13240 = vmatpush3.bf16.msra.mxu0 %v14130_v18  ;;  %13220 = vmatpush3.bf16.msra.mxu1 %v14131_v6  ;;  %v14164_v18 = vld [vmem:[%s19455_s5 + $0x110] sm:$0xff]  }
 0xbd3   :  { %13241 = vmatprep.subr.bf16.mxu0 %v14423_v1  ;;  %13221 = vmatprep.subr.bf16.mxu1 %v14423_v1  ;;  %v14382_v6 = vld [vmem:[%s19457_s7 + $0x10] sm:$0xff]  }
 0xbd4   :  { %13255 = vmatprep.mubr.msk.bf16.mxu0 %vm14424_vm0, %v14423_v1  ;;  %13235 = vmatprep.mubr.msk.bf16.mxu1 %vm14424_vm0, %v14423_v1 }
 0xbd6   :  { %13242 = vmatpush3.bf16.msra.mxu0 %v14132_v9  ;;  %13222 = vmatpush3.bf16.msra.mxu1 %v14133_v10  ;;  %v14383_v9 = vld [vmem:[%s19457_s7 + $0x18] sm:$0xff]   ;;  %v14166_v10 = vld [vmem:[%s19455_s5 + $0x120] sm:$0xff]  }
 0xbd7   :  { %13243 = vmatprep.subr.bf16.mxu0 %v14423_v1  ;;  %13223 = vmatprep.subr.bf16.mxu1 %v14423_v1 }
 0xbda   :  { %13244 = vmatpush3.bf16.msra.mxu0 %v14134_v28  ;;  %13224 = vmatpush3.bf16.msra.mxu1 %v14135_v3  ;;  %v14384_v28 = vld [vmem:[%s19457_s7 + $0x20] sm:$0xff]   ;;  %v14167_v3 = vld [vmem:[%s19455_s5 + $0x128] sm:$0xff]  }
 0xbdb   :  { %13245 = vmatprep.subr.bf16.mxu0 %v14423_v1  ;;  %13225 = vmatprep.subr.bf16.mxu1 %v14423_v1 }
 0xbde   :  { %13246 = vmatpush3.bf16.msra.mxu0 %v14136_v14  ;;  %13226 = vmatpush3.bf16.msra.mxu1 %v14137_v46  ;;  %v14385_v14 = vld [vmem:[%s19457_s7 + $0x28] sm:$0xff]   ;;  %v14168_v46 = vld [vmem:[%s19455_s5 + $0x130] sm:$0xff]  }
 0xbdf   :  { %13247 = vmatprep.subr.bf16.mxu0 %v14423_v1  ;;  %13227 = vmatprep.subr.bf16.mxu1 %v14423_v1 }
 0xbe2   :  { %13248 = vmatpush3.bf16.msra.mxu0 %v14138_v26  ;;  %13228 = vmatpush3.bf16.msra.mxu1 %v14139_v40  ;;  %v14386_v26 = vld [vmem:[%s19457_s7 + $0x30] sm:$0xff]   ;;  %v14169_v40 = vld [vmem:[%s19455_s5 + $0x138] sm:$0xff]  }
 0xbe3   :  { %13249 = vmatprep.subr.bf16.mxu0 %v14423_v1  ;;  %13229 = vmatprep.subr.bf16.mxu1 %v14423_v1 }
 0xbe6   :  { %13250 = vmatpush3.bf16.msra.mxu0 %v14140_v34  ;;  %13230 = vmatpush3.bf16.msra.mxu1 %v14141_v29  ;;  %v14387_v34 = vld [vmem:[%s19457_s7 + $0x38] sm:$0xff]  }
 0xbe7   :  { %13251 = vmatprep.subr.bf16.mxu0 %v14423_v1  ;;  %13231 = vmatprep.subr.bf16.mxu1 %v14423_v1 }
 0xbea   :  { %13252 = vmatpush3.bf16.msra.mxu0 %v14142_v31  ;;  %13232 = vmatpush3.bf16.msra.mxu1 %v14143_v33 }
 0xbeb   :  { %13253 = vmatprep.subr.bf16.mxu0 %v14423_v1  ;;  %13233 = vmatprep.subr.bf16.mxu1 %v14423_v1 }
 0xbee   :  { %13254 = vmatpush3.bf16.msra.mxu0 %v14144_v35  ;;  %13234 = vmatpush3.bf16.msra.mxu1 %v14145_v19 }
 0xbef   :  { %13279 = vmatprep.subr.bf16.mxu0 %v14423_v1  ;;  %13259 = vmatprep.subr.bf16.mxu1 %v14423_v1 }
 0xc04   :  { %v7468_v36 = vpop.f32.mrb[52].mxu1  ;;  %v7991_v39 = vpop.f32.mrb[56].mxu0 }
 0xc05   :  { %v7998_v11 = vmax.f32 %v7468_v36, %v7991_v39  ;;  %v12917_v25 = vpop.f32.mrb[53].mxu1  ;;  %v13017_v51 = vpop.f32.mrb[57].mxu0  ;;  %v14388_v39 = vld [vmem:[%s19459_s9] sm:$0xff]  }
 0xc06   :  { %v7471_v47 = vpop.f32.mrb[54].mxu1  ;;  %v7994_v57 = vpop.f32.mrb[58].mxu0  ;;  %v14390_v25 = vld [vmem:[%s19459_s9 + $0x10] sm:$0xff]   ;;  %v14391_v51 = vld [vmem:[%s19459_s9 + $0x18] sm:$0xff]  }
 0xc07   :  { %v12918_v53 = vpop.f32.mrb[55].mxu1  ;;  %v13018_v50 = vpop.f32.mrb[59].mxu0  ;;  %v14392_v47 = vld [vmem:[%s19459_s9 + $0x20] sm:$0xff]   ;;  %v14393_v57 = vld [vmem:[%s19459_s9 + $0x28] sm:$0xff]  }
 0xc08   :  { %v14394_v53 = vld [vmem:[%s19459_s9 + $0x30] sm:$0xff]   ;;  %v14395_v50 = vld [vmem:[%s19459_s9 + $0x38] sm:$0xff]  }
 0xca4   :  { %v8198_v15 = vpop.f32.mrb[56].mxu1  ;;  %v8402_v54 = vpop.f32.mrb[60].mxu0 }
 0xca5   :  { %v8205_v58 = vmax.f32 %v7998_v11, %v8198_v15  ;;  %v13117_v12 = vpop.f32.mrb[57].mxu1  ;;  %v13217_v27 = vpop.f32.mrb[61].mxu0  ;;  %v14389_v11 = vld [vmem:[%s19459_s9 + $0x8] sm:$0xff]  }
 0xca6   :  { %v8201_v22 = vpop.f32.mrb[58].mxu1  ;;  %v8405_v23 = vpop.f32.mrb[62].mxu0 }
 0xca7   :  { %v8409_v38 = vmax.f32 %v8205_v58, %v8402_v54  ;;  %v13118_v41 = vpop.f32.mrb[59].mxu1  ;;  %v13218_v21 = vpop.f32.mrb[63].mxu0 }
 0xca9   :  { %v8410_v43 = vadd.f32 %v14379_v37, %v8409_v38 }
 0xcab   :  { %v8411_v48 = vmax.f32 %v8410_v43, 0.0 }
 0xcad   :  { %v19258_v13 = vpack.c.bf16 %v8411_v48, %v8411_v48 }
 0xcaf   :  { %13256 = vmatmul.mubr.bf16.vlgmr.msra.gmra.mrb[64].mxu0 %v19258_v13  ;;  %v8446_v59 = vshrl.u32 %v19258_v13, 16  ;;  %v8642_v52 = vrot.slane %v19258_v13, 1  ;;  %v8856_v36 = vrot.slane %v19258_v13, 2 }
 0xcb0   :  { %13280 = vmatpush3.bf16.msra.mxu0 %v14146_v44  ;;  %13295 = vmatprep.mubr.msk.bf16.mxu0 %vm14424_vm0, %v14423_v1 }
 0xcb1   :  { %13236 = vmatmul.mubr.bf16.vlgmr.msra.gmra.mrb[60].mxu1 %v8446_v59  ;;  %13281 = vmatprep.subr.bf16.mxu0 %v14423_v1  ;;  %v8749_v5 = vrot.slane %v8446_v59, 1 }
 0xcb2   :  { %13260 = vmatpush3.bf16.msra.mxu1 %v14147_v4  ;;  %13275 = vmatprep.mubr.msk.bf16.mxu1 %vm14424_vm0, %v14423_v1 }
 0xcb3   :  { %13261 = vmatprep.subr.bf16.mxu1 %v14423_v1 }
 0xcb4   :  { %13282 = vmatpush3.bf16.msra.mxu0 %v14148_v30  ;;  %v14396_v30 = vld [vmem:[%s19456_s6] sm:$0x1] }
 0xcb5   :  { %13283 = vmatprep.subr.bf16.mxu0 %v14423_v1 }
 0xcb6   :  { %13262 = vmatpush3.bf16.msra.mxu1 %v14149_v24 }
 0xcb7   :  { %13263 = vmatprep.subr.bf16.mxu1 %v14423_v1 }
 0xcb8   :  { %13284 = vmatpush3.bf16.msra.mxu0 %v14150_v55 }
 0xcb9   :  { %13285 = vmatprep.subr.bf16.mxu0 %v14423_v1 }
 0xcba   :  { %13264 = vmatpush3.bf16.msra.mxu1 %v14151_v49 }
 0xcbb   :  { %13265 = vmatprep.subr.bf16.mxu1 %v14423_v1 }
 0xcbc   :  { %13286 = vmatpush3.bf16.msra.mxu0 %v14152_v63 }
 0xcbd   :  { %13287 = vmatprep.subr.bf16.mxu0 %v14423_v1 }
 0xcbe   :  { %13266 = vmatpush3.bf16.msra.mxu1 %v14153_v60 }
 0xcbf   :  { %13267 = vmatprep.subr.bf16.mxu1 %v14423_v1 }
 0xcc0   :  { %13288 = vmatpush3.bf16.msra.mxu0 %v14154_v16  ;;  %v14397_v16 = vld [vmem:[%s19458_s8] sm:$0x1]  ;;  %s14399_s8 = scalar_lea.vmem %s9040_s26, 32 }
 0xcc1   :  { %13289 = vmatprep.subr.bf16.mxu0 %v14423_v1  ;;  %p14400_p0 = scmp.ne.s32.totalorder %s9040_s26, %s14399_s8  ;;  %p14405_p2 = scmp.lt.s32.totalorder %s14399_s8, %s14399_s8 }
 0xcc2   :  { %13268 = vmatpush3.bf16.msra.mxu1 %v14155_v17 }
 0xcc3   :  { %13269 = vmatprep.subr.bf16.mxu1 %v14423_v1  ;;  %p14406_p3 = por %p14405_p2, %p14404_p1 }
 0xcc4   :  { %13290 = vmatpush3.bf16.msra.mxu0 %v14156_v2 }
 0xcc5   :  { %13291 = vmatprep.subr.bf16.mxu0 %v14423_v1  ;;  %p14407_p4 = pnand %p14406_p3, %p14400_p0 }
 0xcc6   :  { %13270 = vmatpush3.bf16.msra.mxu1 %v14157_v61 }
 0xcc7   :  { %13271 = vmatprep.subr.bf16.mxu1 %v14423_v1 }
 0xcc8   :  { %13292 = vmatpush3.bf16.msra.mxu0 %v14158_v20 }
 0xcc9   :  { %13293 = vmatprep.subr.bf16.mxu0 %v14423_v1 }
 0xcca   :  { %13272 = vmatpush3.bf16.msra.mxu1 %v14159_v45 }
 0xccb   :  { %13273 = vmatprep.subr.bf16.mxu1 %v14423_v1 }
 0xccc   :  { %13294 = vmatpush3.bf16.msra.mxu0 %v14160_v56 }
 0xccd   :  { %13319 = vmatprep.subr.bf16.mxu0 %v14423_v1 }
 0xcce   :  { %13274 = vmatpush3.bf16.msra.mxu1 %v14161_v62 }
 0xccf   :  { %13296 = vmatmul.mubr.bf16.vlgmr.msra.gmra.mrb[68].mxu0 %v8749_v5  ;;  %13299 = vmatprep.subr.bf16.mxu1 %v14423_v1  ;;  %v14398_v5 = vld [vmem:[%s19460_s10] sm:$0x1] }
 0xcd0   :  { %13320 = vmatpush3.bf16.msra.mxu0 %v14380_v32  ;;  %13335 = vmatprep.mubr.msk.bf16.mxu0 %vm14424_vm0, %v14423_v1 }
 0xcd1   :  { %13276 = vmatmul.mubr.bf16.vlgmr.msra.gmra.mrb[64].mxu1 %v8642_v52  ;;  %13321 = vmatprep.subr.bf16.mxu0 %v14423_v1 }
 0xcd2   :  { %13300 = vmatpush3.bf16.msra.mxu1 %v14162_v7  ;;  %13315 = vmatprep.mubr.msk.bf16.mxu1 %vm14424_vm0, %v14423_v1 }
 0xcd3   :  { %13301 = vmatprep.subr.bf16.mxu1 %v14423_v1 }
 0xcd4   :  { %13322 = vmatpush3.bf16.msra.mxu0 %v14381_v0 }
 0xcd5   :  { %13323 = vmatprep.subr.bf16.mxu0 %v14423_v1 }
 0xcd6   :  { %13302 = vmatpush3.bf16.msra.mxu1 %v14163_v42 }
 0xcd7   :  { %13303 = vmatprep.subr.bf16.mxu1 %v14423_v1 }
 0xcd8   :  { %13324 = vmatpush3.bf16.msra.mxu0 %v14382_v6 }
 0xcd9   :  { %13325 = vmatprep.subr.bf16.mxu0 %v14423_v1 }
 0xcda   :  { %13304 = vmatpush3.bf16.msra.mxu1 %v14164_v18 }
 0xcdb   :  { %13305 = vmatprep.subr.bf16.mxu1 %v14423_v1 }
 0xcdc   :  { %13326 = vmatpush3.bf16.msra.mxu0 %v14383_v9 }
 0xcdd   :  { %13327 = vmatprep.subr.bf16.mxu0 %v14423_v1 }
 0xcde   :  { %13306 = vmatpush3.bf16.msra.mxu1 %v14165_v8 }
 0xcdf   :  { %13307 = vmatprep.subr.bf16.mxu1 %v14423_v1 }
 0xce0   :  { %13328 = vmatpush3.bf16.msra.mxu0 %v14384_v28 }
 0xce1   :  { %13329 = vmatprep.subr.bf16.mxu0 %v14423_v1 }
 0xce2   :  { %13308 = vmatpush3.bf16.msra.mxu1 %v14166_v10 }
 0xce3   :  { %13309 = vmatprep.subr.bf16.mxu1 %v14423_v1 }
 0xce4   :  { %13330 = vmatpush3.bf16.msra.mxu0 %v14385_v14 }
 0xce5   :  { %13331 = vmatprep.subr.bf16.mxu0 %v14423_v1 }
 0xce6   :  { %13310 = vmatpush3.bf16.msra.mxu1 %v14167_v3 }
 0xce7   :  { %13311 = vmatprep.subr.bf16.mxu1 %v14423_v1 }
 0xce8   :  { %13332 = vmatpush3.bf16.msra.mxu0 %v14386_v26 }
 0xce9   :  { %13333 = vmatprep.subr.bf16.mxu0 %v14423_v1 }
 0xcea   :  { %13312 = vmatpush3.bf16.msra.mxu1 %v14168_v46 }
 0xceb   :  { %13313 = vmatprep.subr.bf16.mxu1 %v14423_v1 }
 0xcec   :  { %13334 = vmatpush3.bf16.msra.mxu0 %v14387_v34 }
 0xcee   :  { %13314 = vmatpush3.bf16.msra.mxu1 %v14169_v40 }
 0xcef   :  { %13339 = vmatprep.subr.bf16.mxu1 %v14423_v1 }
 0xcf1   :  { %13316 = vmatmul.mubr.bf16.vlgmr.msra.gmra.mrb[68].mxu1 %v8856_v36 }
 0xcf2   :  { %13340 = vmatpush3.bf16.msra.mxu1 %v14388_v39  ;;  %13355 = vmatprep.mubr.msk.bf16.mxu1 %vm14424_vm0, %v14423_v1 }
 0xcf3   :  { %13341 = vmatprep.subr.bf16.mxu1 %v14423_v1 }
 0xcf6   :  { %13342 = vmatpush3.bf16.msra.mxu1 %v14389_v11 }
 0xcf7   :  { %13343 = vmatprep.subr.bf16.mxu1 %v14423_v1 }
 0xcfa   :  { %13344 = vmatpush3.bf16.msra.mxu1 %v14390_v25 }
 0xcfb   :  { %13345 = vmatprep.subr.bf16.mxu1 %v14423_v1 }
 0xcfe   :  { %13346 = vmatpush3.bf16.msra.mxu1 %v14391_v51 }
 0xcff   :  { %13347 = vmatprep.subr.bf16.mxu1 %v14423_v1 }
 0xd02   :  { %13348 = vmatpush3.bf16.msra.mxu1 %v14392_v47 }
 0xd03   :  { %13349 = vmatprep.subr.bf16.mxu1 %v14423_v1 }
 0xd06   :  { %13350 = vmatpush3.bf16.msra.mxu1 %v14393_v57 }
 0xd07   :  { %13351 = vmatprep.subr.bf16.mxu1 %v14423_v1 }
 0xd0a   :  { %13352 = vmatpush3.bf16.msra.mxu1 %v14394_v53 }
 0xd0b   :  { %13353 = vmatprep.subr.bf16.mxu1 %v14423_v1 }
 0xd0e   :  { %13354 = vmatpush3.bf16.msra.mxu1 %v14395_v50 }
 0xd82   :  { %v8619_v29 = vpop.f32.mrb[64].mxu0 }
 0xd83   :  { %v13257_v31 = vpop.f32.mrb[65].mxu0 }
 0xd84   :  { %v8531_v33 = vpop.f32.mrb[60].mxu1  ;;  %v8622_v35 = vpop.f32.mrb[66].mxu0 }
 0xd85   :  { %v8620_v19 = vadd.f32 %v8619_v29, %v8531_v33  ;;  %v13237_v15 = vpop.f32.mrb[61].mxu1  ;;  %v13258_v54 = vpop.f32.mrb[67].mxu0 }
 0xd86   :  { %v8534_v58 = vpop.f32.mrb[62].mxu1 }
 0xd87   :  { %v13238_v12 = vpop.f32.mrb[63].mxu1 }
 0xda2   :  { %v8833_v27 = vpop.f32.mrb[68].mxu0 }
 0xda3   :  { %v13297_v22 = vpop.f32.mrb[69].mxu0 }
 0xda4   :  { %v8726_v23 = vpop.f32.mrb[64].mxu1  ;;  %v8836_v38 = vpop.f32.mrb[70].mxu0 }
 0xda5   :  { %v8732_v41 = vadd.f32 %v8726_v23, %v8620_v19  ;;  %v13277_v1 = vpop.f32.mrb[65].mxu1  ;;  %v13298_v21 = vpop.f32.mrb[71].mxu0 }
 0xda6   :  { %v8729_v37 = vpop.f32.mrb[66].mxu1 }
 0xda7   :  { %v13278_v43 = vpop.f32.mrb[67].mxu1  ;;  %v8839_v48 = vadd.f32 %v8833_v27, %v8732_v41 }
 0xdc4   :  { %v8940_v44 = vpop.f32.mrb[68].mxu1 }
 0xdc5   :  { %v8946_v13 = vadd.f32 %v8940_v44, %v8839_v48  ;;  %v13317_v4 = vpop.f32.mrb[69].mxu1 }
 0xdc6   :  { %v8943_v59 = vpop.f32.mrb[70].mxu1 }
 0xdc7   :  { %v8947_v24 = vadd.f32 %v14396_v30, %v8946_v13  ;;  %v13318_v55 = vpop.f32.mrb[71].mxu1 }
 0xdc9   :  { %v8948_v49 = vmax.f32 %v8947_v24, 0.0 }
 0xdcb   :  { %v8949_v63 = vpack.c.bf16 %v8948_v49, %v8948_v49 }
 0xdcd   :  { %13336 = vmatmul.mubr.bf16.vlgmr.msra.gmra.mrb[72].mxu0 %v8949_v63 }
 0xea0   :  { %v8984_v60 = vpop.f32.mrb[72].mxu0 }
 0xea1   :  { %v8985_v17 = vadd.f32 %v14397_v16, %v8984_v60  ;;  %v13337_v2 = vpop.f32.mrb[73].mxu0 }
 0xea2   :  { %v8987_v61 = vpop.f32.mrb[74].mxu0 }
 0xea3   :  { %v8990_v20 = vmax.f32 %v8985_v17, 0.0  ;;  %v13338_v45 = vpop.f32.mrb[75].mxu0 }
 0xea5   :  { %v8991_v56 = vpack.c.bf16 %v8990_v20, %v8990_v20 }
 0xea7   :  { %13356 = vmatmul.mubr.bf16.vlgmr.msra.gmra.mrb[72].mxu1 %v8991_v56 }
 0xf7a   :  { %v9026_v62 = vpop.f32.mrb[72].mxu1 }
 0xf7b   :  { %v9027_v7 = vadd.f32 %v14398_v5, %v9026_v62  ;;  %v13357_v52 = vpop.f32.mrb[73].mxu1 }
 0xf7c   :  { %v9029_v32 = vpop.f32.mrb[74].mxu1 }
 0xf7d   :  { %9032 = vst [vmem:[#allocation2 + $0x1] sm:$0x1] %v9027_v7  ;;  %v13358_v42 = vpop.f32.mrb[75].mxu1 }
 0xf7e   :  { %14410 = shalt.err (!%p14407_p4)
}
 0xf7f   :  { %s14411_s29 = scalar_lea.hbm %s19461_s11, 32 }
 0xf80   :  { %p14412_p5 = scmp.ne.s32.totalorder %s19461_s11, %s14411_s29  ;;  %p14415_p6 = scmp.lt.u32.totalorder %s14411_s29, %s19461_s11 }
 0xf82   :  { %p14417_p7 = pnand %p14415_p6, %p14412_p5 }
 0xf84   :  { %14420 = shalt.err (!%p14417_p7)
}
 0xf85   :  { %9042 = dma.vmem_to_hbm [thread:$0]  %s9040_s26, 32, %s19461_s11, [#allocation3]  }
 0xf86   :  { %14421 = dma.done.wait [#allocation3], 32  }
 0xf87   :  { %14422 = vsyncadd [#allocation3], 4294967264 }
 0xf88   :  { %9046 = vsyncpa [#allocation3], 1 }

</bundles_post_ra>
